<compile_context>
chip_gen: v7x
topology: tpu7x:2x2x1
jax: 0.10.0
libtpu: 0.0.40
codegen_flags: <defaults>
</compile_context>

<pallas_src>
import jax
import jax.numpy as jnp
from jax import lax
from jax.experimental import pallas as pl
from jax.experimental.pallas import tpu as pltpu

_BN_EPS = 1e-5
# Interior column offset inside the padded VMEM scratch.  8 = one f32 sublane
# tile, so the per-step interior store is tile-aligned; column _PAD-1 is the
# left zero halo and column _PAD+W the right zero halo.
_PAD = 8


def _celu(x):
    # CELU with alpha = 1 (nn.CELU default); clamp so the discarded branch of
    # the where() never produces inf.
    return jnp.where(x > 0, x, jnp.exp(jnp.minimum(x, 0.0)) - 1.0)


# ----------------------------------------------------------------------------
# Fused WideBasic kernel factory
# ----------------------------------------------------------------------------
def _make_wide_basic_kernel(H, W, Cin, P, stride, has_shortcut):
    Ho = (H - 1) // stride + 1
    Wo = (W - 1) // stride + 1
    Hp = H + 2                # rows: [1, H+1) interior, rows 0 / H+1 zero halo
    Wp = W + _PAD + 8         # cols: [_PAD, _PAD+W) interior, _PAD-1/_PAD+W halo

    def _zero_halo(pad_ref, C):
        # Only the halo actually read by the 3x3 windows needs to be zero:
        # rows 0 and H+1, and columns _PAD-1 / _PAD+W.  We zero aligned 8-wide
        # column strips (cheap masked stores) and the two full halo rows.
        dt = pad_ref.dtype
        zrow = jnp.zeros((1, Wp, C), dt)
        pad_ref[0:1, :, :] = zrow
        pad_ref[H + 1:H + 2, :, :] = zrow
        zcol = jnp.zeros((Hp, 8, C), dt)
        pad_ref[:, _PAD - 8:_PAD, :] = zcol               # covers column _PAD-1
        pad_ref[:, _PAD + W:_PAD + W + 8, :] = zcol       # covers column _PAD+W

    def _conv3x3(pad_ref, w_ref, C, s, ho, wo):
        """3x3 'same' conv as 9 accumulated K=C dots (f32 accumulator).

        Each tap's (ho*wo, C) window is read directly from the zero-haloed
        scratch (no im2col concatenate / no large cast temporary)."""
        acc = jnp.zeros((ho * wo, P), jnp.float32)
        for kh in range(3):
            for kw in range(3):
                c0 = _PAD - 1 + kw
                if s == 1:
                    win = pad_ref[kh:kh + ho, c0:c0 + wo, :]
                else:
                    # strided window read straight from VMEM
                    win = pad_ref[pl.ds(kh, ho, s), pl.ds(c0, wo, s), :]
                acc = acc + jnp.dot(
                    win.reshape(ho * wo, C).astype(w_ref.dtype),
                    w_ref[kh * 3 + kw],
                    preferred_element_type=jnp.float32)
        return acc

    def kernel(x_ref, s1_ref, t1_ref, w1_ref, b1_ref,
               s2_ref, t2_ref, w2_ref, b2_ref, *rest):
        if has_shortcut:
            scw_ref, scb_ref, o_ref, pad1_ref, pad2_ref = rest
        else:
            o_ref, pad1_ref, pad2_ref = rest

        # Halo-only zeroing every step: correct regardless of how the
        # "parallel" batch axis is sharded across TensorCores, and the
        # interior is fully overwritten below.
        _zero_halo(pad1_ref, Cin)
        _zero_halo(pad2_ref, P)

        # ---- BN1 (folded scale/shift) + CELU (f32), store interior ---------
        a1 = _celu(x_ref[0].astype(jnp.float32) * s1_ref[...] + t1_ref[...])
        pad1_ref[1:H + 1, _PAD:_PAD + W, :] = a1.astype(pad1_ref.dtype)

        # ---- conv1: 3x3, stride 1, padding 1 (9 accumulated K=Cin dots) ----
        h = _conv3x3(pad1_ref, w1_ref, Cin, 1, H, W) + b1_ref[...]   # (H*W, P)
        # TODO(synk): nn.Dropout is identity in eval mode; training-mode RNG
        #             dropout mask and batch-stat BN are not implemented.

        # ---- BN2 (folded) + CELU (f32), store interior ----------------------
        a2 = _celu(h * s2_ref[...] + t2_ref[...])
        pad2_ref[1:H + 1, _PAD:_PAD + W, :] = (
            a2.reshape(H, W, P).astype(pad2_ref.dtype))

        # ---- conv2: 3x3, stride s, padding 1 (9 accumulated K=P dots) -------
        out = _conv3x3(pad2_ref, w2_ref, P, stride, Ho, Wo) + b2_ref[...]

        # ---- shortcut + residual add (x re-read here, not kept live) --------
        if has_shortcut:
            if stride == 1:
                xs = x_ref[0]
            else:
                xs = x_ref[0, pl.ds(0, Ho, stride), pl.ds(0, Wo, stride), :]
            sc = jnp.dot(xs.reshape(Ho * Wo, Cin).astype(scw_ref.dtype),
                         scw_ref[...], preferred_element_type=jnp.float32)
            out = out + sc + scb_ref[...]
        else:
            out = out + x_ref[0].astype(jnp.float32).reshape(H * W, Cin)

        # NOTE: at real WRN widths (P >= 128) this store is lane-dense; at the
        # tiny demo width (P = 8) it is a masked partial store.
        o_ref[0] = out.reshape(Ho, Wo, P).astype(o_ref.dtype)

    return kernel, Ho, Wo, Hp, Wp


def _vmem_limit_bytes(H, W, Cin, P, Ho, Wo, Hp, Wp, has_shortcut, mxu_dtype):
    """Generation-aware VMEM limit: >= estimated per-step footprint, capped at
    ~85% of the physical per-core VMEM."""
    f32 = 4
    mxu = jnp.finfo(mxu_dtype).bits // 8
    io = (H * W * Cin + Ho * Wo * P) * f32 * 2            # double-buffered I/O
    wgt = (9 * Cin * P + 9 * P * P
           + (Cin * P if has_shortcut else 0)) * mxu * 2  # worst case 2 buffers
    bn = (2 * Cin + 6 * P) * f32 * 2
    scr = Hp * Wp * (Cin + P) * f32                       # padded scratches
    tmp = (2 * H * W * Cin + 3 * H * W * P + Ho * Wo * P) * f32  # live temps
    est = io + wgt + bn + scr + tmp + (8 << 20)           # + headroom
    try:
        cap = int(getattr(pltpu.get_tpu_info(), "vmem_capacity_bytes",
                          64 << 20))
    except Exception:
        cap = 64 << 20                                     # v7x per-TC floor
    return int(min(max(est, 32 << 20), int(cap * 0.85)))


def _bn_affine(bnp):
    scale = bnp["gamma"] * lax.rsqrt(bnp["var"] + _BN_EPS)
    shift = bnp["beta"] - bnp["mean"] * scale
    return scale, shift


def wide_basic_forward_nhwc(params, x_nhwc, *, stride, mxu_dtype=jnp.bfloat16):
    """WideBasic.forward (eval mode) on NHWC activations (no layout transposes).

    Keep whole networks in NHWC and call this entry point per block so
    activations are never transposed through HBM.  mxu_dtype is the dtype of
    the matmul operands (bf16 is MXU-native on v5e/v6e/v7x); BN/CELU math and
    all accumulation stay float32."""
    N, H, W, Cin = x_nhwc.shape
    P = params["conv1_w"].shape[-1]
    has_shortcut = "sc_w" in params
    if not has_shortcut:
        assert stride == 1 and Cin == P

    s1, t1 = _bn_affine(params["bn1"])
    s2, t2 = _bn_affine(params["bn2"])
    w1 = params["conv1_w"].reshape(9, Cin, P).astype(mxu_dtype)   # tap-major
    w2 = params["conv2_w"].reshape(9, P, P).astype(mxu_dtype)

    kernel, Ho, Wo, Hp, Wp = _make_wide_basic_kernel(
        H, W, Cin, P, stride, has_shortcut)

    args = [x_nhwc,
            s1.reshape(1, Cin), t1.reshape(1, Cin), w1,
            params["conv1_b"].reshape(1, P),
            s2.reshape(1, P), t2.reshape(1, P), w2,
            params["conv2_b"].reshape(1, P)]
    const_shapes = [(1, Cin), (1, Cin), (9, Cin, P), (1, P),
                    (1, P), (1, P), (9, P, P), (1, P)]
    if has_shortcut:
        args += [params["sc_w"].astype(mxu_dtype), params["sc_b"].reshape(1, P)]
        const_shapes += [(Cin, P), (1, P)]

    vmem_limit = _vmem_limit_bytes(H, W, Cin, P, Ho, Wo, Hp, Wp,
                                   has_shortcut, mxu_dtype)

    def _call(const_pipeline_mode):
        def const_spec(shape):
            zeros = (0,) * len(shape)
            index_map = lambda n, _z=zeros: _z
            if const_pipeline_mode is None:
                return pl.BlockSpec(shape, index_map)
            return pl.BlockSpec(shape, index_map,
                                pipeline_mode=const_pipeline_mode)

        in_specs = ([pl.BlockSpec((1, H, W, Cin), lambda n: (n, 0, 0, 0))]
                    + [const_spec(s) for s in const_shapes])
        return pl.pallas_call(
            kernel,
            out_shape=jax.ShapeDtypeStruct((N, Ho, Wo, P), x_nhwc.dtype),
            grid=(N,),
            in_specs=in_specs,
            out_specs=pl.BlockSpec((1, Ho, Wo, P), lambda n: (n, 0, 0, 0)),
            scratch_shapes=[pltpu.VMEM((Hp, Wp, Cin), jnp.float32),
                            pltpu.VMEM((Hp, Wp, P), jnp.float32)],
            compiler_params=pltpu.CompilerParams(
                dimension_semantics=("parallel",),
                vmem_limit_bytes=vmem_limit),
        )(*args)

    # Grid-invariant operands (weights / BN affine / biases) never change block
    # index, so they do not need double-buffering.  Fall back to the default
    # pipeline mode if single-buffering is rejected by this jax version.
    try:
        return _call(pl.Buffered(1))
    except Exception:
        return _call(None)


def wide_basic_forward(params, x_nchw, *, stride, mxu_dtype=jnp.bfloat16):
    """Drop-in equivalent of the PyTorch module (NCHW in / NCHW out).
    For chains of blocks prefer wide_basic_forward_nhwc to avoid per-block
    NCHW<->NHWC transposes through HBM."""
    x = jnp.transpose(x_nchw, (0, 2, 3, 1))
    out = wide_basic_forward_nhwc(params, x, stride=stride, mxu_dtype=mxu_dtype)
    return jnp.transpose(out, (0, 3, 1, 2))


# ----------------------------------------------------------------------------
# Parameter init (deterministic) and a pure-JAX reference for correctness
# ----------------------------------------------------------------------------
def init_wide_basic_params(key, in_planes, planes, stride):
    ks = jax.random.split(key, 14)

    def bn(kg, kb, km, kv, c):
        return dict(
            gamma=jax.random.uniform(kg, (c,), jnp.float32, 0.5, 1.5),
            beta=0.1 * jax.random.normal(kb, (c,), jnp.float32),
            mean=0.1 * jax.random.normal(km, (c,), jnp.float32),
            var=jax.random.uniform(kv, (c,), jnp.float32, 0.5, 1.5),
        )

    params = dict(
        bn1=bn(ks[0], ks[1], ks[2], ks[3], in_planes),
        conv1_w=(jax.random.normal(ks[4], (3, 3, in_planes, planes), jnp.float32)
                 / jnp.sqrt(9.0 * in_planes)),
        conv1_b=0.05 * jax.random.normal(ks[5], (planes,), jnp.float32),
        bn2=bn(ks[6], ks[7], ks[8], ks[9], planes),
        conv2_w=(jax.random.normal(ks[10], (3, 3, planes, planes), jnp.float32)
                 / jnp.sqrt(9.0 * planes)),
        conv2_b=0.05 * jax.random.normal(ks[11], (planes,), jnp.float32),
    )
    if stride != 1 or in_planes != planes:
        params["sc_w"] = (jax.random.normal(ks[12], (in_planes, planes), jnp.float32)
                          / jnp.sqrt(float(in_planes)))
        params["sc_b"] = 0.05 * jax.random.normal(ks[13], (planes,), jnp.float32)
    return params


def _ref_forward(params, x_nchw, *, stride):
    x = jnp.transpose(x_nchw, (0, 2, 3, 1))
    dn = ("NHWC", "HWIO", "NHWC")

    def bn(a, p):
        return (a - p["mean"]) * lax.rsqrt(p["var"] + _BN_EPS) * p["gamma"] + p["beta"]

    h = _celu(bn(x, params["bn1"]))
    h = lax.conv_general_dilated(h, params["conv1_w"], (1, 1),
                                 padding=((1, 1), (1, 1)),
                                 dimension_numbers=dn) + params["conv1_b"]
    h2 = _celu(bn(h, params["bn2"]))
    out = lax.conv_general_dilated(h2, params["conv2_w"], (stride, stride),
                                   padding=((1, 1), (1, 1)),
                                   dimension_numbers=dn) + params["conv2_b"]
    if "sc_w" in params:
        sc_w = params["sc_w"].reshape(1, 1, *params["sc_w"].shape)
        sc = lax.conv_general_dilated(x, sc_w, (stride, stride),
                                      padding=((0, 0), (0, 0)),
                                      dimension_numbers=dn) + params["sc_b"]
    else:
        sc = x
    return jnp.transpose(out + sc, (0, 3, 1, 2))


if __name__ == "__main__":
    key = jax.random.PRNGKey(0)
    N, H, W = 2, 16, 16

    cases = [
        # (name, in_planes, planes, stride, mxu_dtype, abs tolerance)
        ("conv-shortcut / bf16 MXU (default)", 4, 8, 1, jnp.bfloat16, 1e-1),
        ("identity-shortcut / bf16 MXU", 8, 8, 1, jnp.bfloat16, 1e-1),
        ("conv-shortcut / f32 MXU", 4, 8, 1, jnp.float32, 1e-3),
    ]

    for i, (name, cin, planes, stride, mdt, tol) in enumerate(cases):
        kx, kp = jax.random.split(jax.random.fold_in(key, i))
        x = jax.random.normal(kx, (N, cin, H, W), jnp.float32)
        params = init_wide_basic_params(kp, cin, planes, stride)

        out = jax.block_until_ready(
            wide_basic_forward(params, x, stride=stride, mxu_dtype=mdt))
        ref = jax.block_until_ready(_ref_forward(params, x, stride=stride))

        Ho = (H - 1) // stride + 1
        assert out.shape == (N, planes, Ho, Ho), (name, out.shape)
        err = float(jnp.max(jnp.abs(out.astype(jnp.float32) - ref)))
        assert err < tol, f"{name}: max abs err {err} >= {tol}"

    print("KERNEL_OK")
</pallas_src>

<mosaic_0001>
module attributes {stable_mosaic.version = 11 : i64} {
  func.func @kernel(%arg0: i32, %arg1: memref<1x16x16x4xf32, #tpu.memory_space<vmem>>, %arg2: memref<1x4xf32, #tpu.memory_space<vmem>>, %arg3: memref<1x4xf32, #tpu.memory_space<vmem>>, %arg4: memref<9x4x8xbf16, #tpu.memory_space<vmem>>, %arg5: memref<1x8xf32, #tpu.memory_space<vmem>>, %arg6: memref<1x8xf32, #tpu.memory_space<vmem>>, %arg7: memref<1x8xf32, #tpu.memory_space<vmem>>, %arg8: memref<9x8x8xbf16, #tpu.memory_space<vmem>>, %arg9: memref<1x8xf32, #tpu.memory_space<vmem>>, %arg10: memref<4x8xbf16, #tpu.memory_space<vmem>>, %arg11: memref<1x8xf32, #tpu.memory_space<vmem>>, %arg12: memref<1x16x16x8xf32, #tpu.memory_space<vmem>>, %arg13: memref<18x32x4xf32, #tpu.memory_space<vmem>>, %arg14: memref<18x32x8xf32, #tpu.memory_space<vmem>>) attributes {dimension_semantics = [#tpu.dimension_semantics<parallel>], iteration_bounds = array<i64: 2>, scalar_prefetch = 0 : i64, scratch_operands = 2 : i64, tpu.core_type = #tpu.core_type<tc>, window_params = [{transform_indices = @transform_0, window_bounds = array<i64: 1, 16, 16, 4>}, {pipeline_mode = #tpu.pipeline_mode<synchronous>, transform_indices = @transform_1, window_bounds = array<i64: 1, 4>}, {pipeline_mode = #tpu.pipeline_mode<synchronous>, transform_indices = @transform_2, window_bounds = array<i64: 1, 4>}, {pipeline_mode = #tpu.pipeline_mode<synchronous>, transform_indices = @transform_3, window_bounds = array<i64: 9, 4, 8>}, {pipeline_mode = #tpu.pipeline_mode<synchronous>, transform_indices = @transform_4, window_bounds = array<i64: 1, 8>}, {pipeline_mode = #tpu.pipeline_mode<synchronous>, transform_indices = @transform_5, window_bounds = array<i64: 1, 8>}, {pipeline_mode = #tpu.pipeline_mode<synchronous>, transform_indices = @transform_6, window_bounds = array<i64: 1, 8>}, {pipeline_mode = #tpu.pipeline_mode<synchronous>, transform_indices = @transform_7, window_bounds = array<i64: 9, 8, 8>}, {pipeline_mode = #tpu.pipeline_mode<synchronous>, transform_indices = @transform_8, window_bounds = array<i64: 1, 8>}, {pipeline_mode = #tpu.pipeline_mode<synchronous>, transform_indices = @transform_9, window_bounds = array<i64: 4, 8>}, {pipeline_mode = #tpu.pipeline_mode<synchronous>, transform_indices = @transform_10, window_bounds = array<i64: 1, 8>}, {transform_indices = @transform_11, window_bounds = array<i64: 1, 16, 16, 8>}]} {
    %cst = arith.constant 0.000000e+00 : f32
    %0 = vector.broadcast %cst : f32 to vector<1x32x4xf32>
    %c0 = arith.constant 0 : index
    %c0_0 = arith.constant 0 : index
    %c0_1 = arith.constant 0 : index
    %1 = vector.load %arg13[%c0, %c0_0, %c0_1] : memref<18x32x4xf32, #tpu.memory_space<vmem>>, vector<1x32x4xf32>
    tpu.vector_store %arg13[%c0, %c0_0, %c0_1], %0 {strides = array<i32>} : memref<18x32x4xf32, #tpu.memory_space<vmem>>, vector<1x32x4xf32>,
    %c17 = arith.constant 17 : index
    %c0_2 = arith.constant 0 : index
    %c0_3 = arith.constant 0 : index
    %2 = vector.load %arg13[%c17, %c0_2, %c0_3] : memref<18x32x4xf32, #tpu.memory_space<vmem>>, vector<1x32x4xf32>
    tpu.vector_store %arg13[%c17, %c0_2, %c0_3], %0 {strides = array<i32>} : memref<18x32x4xf32, #tpu.memory_space<vmem>>, vector<1x32x4xf32>,
    %cst_4 = arith.constant 0.000000e+00 : f32
    %3 = vector.broadcast %cst_4 : f32 to vector<18x8x4xf32>
    %c0_5 = arith.constant 0 : index
    %c0_6 = arith.constant 0 : index
    %c0_7 = arith.constant 0 : index
    %4 = vector.load %arg13[%c0_5, %c0_6, %c0_7] : memref<18x32x4xf32, #tpu.memory_space<vmem>>, vector<18x8x4xf32>
    tpu.vector_store %arg13[%c0_5, %c0_6, %c0_7], %3 {strides = array<i32>} : memref<18x32x4xf32, #tpu.memory_space<vmem>>, vector<18x8x4xf32>,
    %c0_8 = arith.constant 0 : index
    %c24 = arith.constant 24 : index
    %c0_9 = arith.constant 0 : index
    %5 = vector.load %arg13[%c0_8, %c24, %c0_9] : memref<18x32x4xf32, #tpu.memory_space<vmem>>, vector<18x8x4xf32>
    tpu.vector_store %arg13[%c0_8, %c24, %c0_9], %3 {strides = array<i32>} : memref<18x32x4xf32, #tpu.memory_space<vmem>>, vector<18x8x4xf32>,
    %cst_10 = arith.constant 0.000000e+00 : f32
    %6 = vector.broadcast %cst_10 : f32 to vector<1x32x8xf32>
    %c0_11 = arith.constant 0 : index
    %c0_12 = arith.constant 0 : index
    %c0_13 = arith.constant 0 : index
    %7 = vector.load %arg14[%c0_11, %c0_12, %c0_13] : memref<18x32x8xf32, #tpu.memory_space<vmem>>, vector<1x32x8xf32>
    tpu.vector_store %arg14[%c0_11, %c0_12, %c0_13], %6 {strides = array<i32>} : memref<18x32x8xf32, #tpu.memory_space<vmem>>, vector<1x32x8xf32>,
    %c17_14 = arith.constant 17 : index
    %c0_15 = arith.constant 0 : index
    %c0_16 = arith.constant 0 : index
    %8 = vector.load %arg14[%c17_14, %c0_15, %c0_16] : memref<18x32x8xf32, #tpu.memory_space<vmem>>, vector<1x32x8xf32>
    tpu.vector_store %arg14[%c17_14, %c0_15, %c0_16], %6 {strides = array<i32>} : memref<18x32x8xf32, #tpu.memory_space<vmem>>, vector<1x32x8xf32>,
    %cst_17 = arith.constant 0.000000e+00 : f32
    %9 = vector.broadcast %cst_17 : f32 to vector<18x8x8xf32>
    %c0_18 = arith.constant 0 : index
    %c0_19 = arith.constant 0 : index
    %c0_20 = arith.constant 0 : index
    %10 = vector.load %arg14[%c0_18, %c0_19, %c0_20] : memref<18x32x8xf32, #tpu.memory_space<vmem>>, vector<18x8x8xf32>
    tpu.vector_store %arg14[%c0_18, %c0_19, %c0_20], %9 {strides = array<i32>} : memref<18x32x8xf32, #tpu.memory_space<vmem>>, vector<18x8x8xf32>,
    %c0_21 = arith.constant 0 : index
    %c24_22 = arith.constant 24 : index
    %c0_23 = arith.constant 0 : index
    %11 = vector.load %arg14[%c0_21, %c24_22, %c0_23] : memref<18x32x8xf32, #tpu.memory_space<vmem>>, vector<18x8x8xf32>
    tpu.vector_store %arg14[%c0_21, %c24_22, %c0_23], %9 {strides = array<i32>} : memref<18x32x8xf32, #tpu.memory_space<vmem>>, vector<18x8x8xf32>,
    %c0_24 = arith.constant 0 : index
    %c0_25 = arith.constant 0 : index
    %c0_26 = arith.constant 0 : index
    %c0_27 = arith.constant 0 : index
    %12 = vector.load %arg1[%c0_24, %c0_25, %c0_26, %c0_27] : memref<1x16x16x4xf32, #tpu.memory_space<vmem>>, vector<1x16x16x4xf32>
    %13 = vector.shape_cast %12 : vector<1x16x16x4xf32> to vector<16x16x4xf32>
    %c0_28 = arith.constant 0 : index
    %c0_29 = arith.constant 0 : index
    %14 = vector.load %arg2[%c0_28, %c0_29] : memref<1x4xf32, #tpu.memory_space<vmem>>, vector<1x4xf32>
    %15 = vector.shape_cast %14 : vector<1x4xf32> to vector<1x1x4xf32>
    %16 = vector.broadcast %15 : vector<1x1x4xf32> to vector<16x16x4xf32>
    %17 = arith.mulf %13, %16 : vector<16x16x4xf32>
    %c0_30 = arith.constant 0 : index
    %c0_31 = arith.constant 0 : index
    %18 = vector.load %arg3[%c0_30, %c0_31] : memref<1x4xf32, #tpu.memory_space<vmem>>, vector<1x4xf32>
    %19 = vector.shape_cast %18 : vector<1x4xf32> to vector<1x1x4xf32>
    %20 = vector.broadcast %19 : vector<1x1x4xf32> to vector<16x16x4xf32>
    %21 = arith.addf %17, %20 : vector<16x16x4xf32>
    %cst_32 = arith.constant 0.000000e+00 : f32
    %22 = vector.broadcast %cst_32 : f32 to vector<16x16x4xf32>
    %23 = arith.cmpf ogt, %21, %22 : vector<16x16x4xf32>
    %cst_33 = arith.constant 0.000000e+00 : f32
    %24 = vector.broadcast %cst_33 : f32 to vector<16x16x4xf32>
    %25 = arith.minimumf %21, %24 : vector<16x16x4xf32>
    %26 = math.exp %25 : vector<16x16x4xf32>
    %cst_34 = arith.constant 1.000000e+00 : f32
    %27 = vector.broadcast %cst_34 : f32 to vector<16x16x4xf32>
    %28 = arith.subf %26, %27 : vector<16x16x4xf32>
    %29 = arith.select %23, %21, %28 : vector<16x16x4xi1>, vector<16x16x4xf32>
    %c1 = arith.constant 1 : index
    %c8 = arith.constant 8 : index
    %c0_35 = arith.constant 0 : index
    %30 = vector.load %arg13[%c1, %c8, %c0_35] : memref<18x32x4xf32, #tpu.memory_space<vmem>>, vector<16x16x4xf32>
    tpu.vector_store %arg13[%c1, %c8, %c0_35], %29 {strides = array<i32>} : memref<18x32x4xf32, #tpu.memory_space<vmem>>, vector<16x16x4xf32>,
    %cst_36 = arith.constant 0.000000e+00 : f32
    %31 = vector.broadcast %cst_36 : f32 to vector<256x8xf32>
    %c0_37 = arith.constant 0 : index
    %c7 = arith.constant 7 : index
    %c0_38 = arith.constant 0 : index
    %32 = vector.load %arg13[%c0_37, %c7, %c0_38] : memref<18x32x4xf32, #tpu.memory_space<vmem>>, vector<16x16x4xf32>
    %33 = vector.shape_cast %32 : vector<16x16x4xf32> to vector<256x4xf32>
    %34 = arith.truncf %33 : vector<256x4xf32> to vector<256x4xbf16>
    %c0_39 = arith.constant 0 : index
    %c0_40 = arith.constant 0 : index
    %c0_41 = arith.constant 0 : index
    %35 = vector.load %arg4[%c0_39, %c0_40, %c0_41] : memref<9x4x8xbf16, #tpu.memory_space<vmem>>, vector<1x4x8xbf16>
    %36 = vector.shape_cast %35 : vector<1x4x8xbf16> to vector<4x8xbf16>
    %cst_42 = arith.constant dense<0.000000e+00> : vector<256x8xf32>
    %37 = tpu.matmul %34, %36, %cst_42 {dimension_numbers = #tpu.dot_dimension_numbers<[1], [0], [0], [1], [0, 0, 1, 1], [], []>} : vector<256x4xbf16>, vector<4x8xbf16>, vector<256x8xf32> -> vector<256x8xf32>
    %38 = arith.addf %31, %37 : vector<256x8xf32>
    %c0_43 = arith.constant 0 : index
    %c8_44 = arith.constant 8 : index
    %c0_45 = arith.constant 0 : index
    %39 = vector.load %arg13[%c0_43, %c8_44, %c0_45] : memref<18x32x4xf32, #tpu.memory_space<vmem>>, vector<16x16x4xf32>
    %40 = vector.shape_cast %39 : vector<16x16x4xf32> to vector<256x4xf32>
    %41 = arith.truncf %40 : vector<256x4xf32> to vector<256x4xbf16>
    %c1_46 = arith.constant 1 : index
    %c0_47 = arith.constant 0 : index
    %c0_48 = arith.constant 0 : index
    %42 = vector.load %arg4[%c1_46, %c0_47, %c0_48] : memref<9x4x8xbf16, #tpu.memory_space<vmem>>, vector<1x4x8xbf16>
    %43 = vector.shape_cast %42 : vector<1x4x8xbf16> to vector<4x8xbf16>
    %cst_49 = arith.constant dense<0.000000e+00> : vector<256x8xf32>
    %44 = tpu.matmul %41, %43, %cst_49 {dimension_numbers = #tpu.dot_dimension_numbers<[1], [0], [0], [1], [0, 0, 1, 1], [], []>} : vector<256x4xbf16>, vector<4x8xbf16>, vector<256x8xf32> -> vector<256x8xf32>
    %45 = arith.addf %38, %44 : vector<256x8xf32>
    %c0_50 = arith.constant 0 : index
    %c9 = arith.constant 9 : index
    %c0_51 = arith.constant 0 : index
    %46 = vector.load %arg13[%c0_50, %c9, %c0_51] : memref<18x32x4xf32, #tpu.memory_space<vmem>>, vector<16x16x4xf32>
    %47 = vector.shape_cast %46 : vector<16x16x4xf32> to vector<256x4xf32>
    %48 = arith.truncf %47 : vector<256x4xf32> to vector<256x4xbf16>
    %c2 = arith.constant 2 : index
    %c0_52 = arith.constant 0 : index
    %c0_53 = arith.constant 0 : index
    %49 = vector.load %arg4[%c2, %c0_52, %c0_53] : memref<9x4x8xbf16, #tpu.memory_space<vmem>>, vector<1x4x8xbf16>
    %50 = vector.shape_cast %49 : vector<1x4x8xbf16> to vector<4x8xbf16>
    %cst_54 = arith.constant dense<0.000000e+00> : vector<256x8xf32>
    %51 = tpu.matmul %48, %50, %cst_54 {dimension_numbers = #tpu.dot_dimension_numbers<[1], [0], [0], [1], [0, 0, 1, 1], [], []>} : vector<256x4xbf16>, vector<4x8xbf16>, vector<256x8xf32> -> vector<256x8xf32>
    %52 = arith.addf %45, %51 : vector<256x8xf32>
    %c1_55 = arith.constant 1 : index
    %c7_56 = arith.constant 7 : index
    %c0_57 = arith.constant 0 : index
    %53 = vector.load %arg13[%c1_55, %c7_56, %c0_57] : memref<18x32x4xf32, #tpu.memory_space<vmem>>, vector<16x16x4xf32>
    %54 = vector.shape_cast %53 : vector<16x16x4xf32> to vector<256x4xf32>
    %55 = arith.truncf %54 : vector<256x4xf32> to vector<256x4xbf16>
    %c3 = arith.constant 3 : index
    %c0_58 = arith.constant 0 : index
    %c0_59 = arith.constant 0 : index
    %56 = vector.load %arg4[%c3, %c0_58, %c0_59] : memref<9x4x8xbf16, #tpu.memory_space<vmem>>, vector<1x4x8xbf16>
    %57 = vector.shape_cast %56 : vector<1x4x8xbf16> to vector<4x8xbf16>
    %cst_60 = arith.constant dense<0.000000e+00> : vector<256x8xf32>
    %58 = tpu.matmul %55, %57, %cst_60 {dimension_numbers = #tpu.dot_dimension_numbers<[1], [0], [0], [1], [0, 0, 1, 1], [], []>} : vector<256x4xbf16>, vector<4x8xbf16>, vector<256x8xf32> -> vector<256x8xf32>
    %59 = arith.addf %52, %58 : vector<256x8xf32>
    %c1_61 = arith.constant 1 : index
    %c8_62 = arith.constant 8 : index
    %c0_63 = arith.constant 0 : index
    %60 = vector.load %arg13[%c1_61, %c8_62, %c0_63] : memref<18x32x4xf32, #tpu.memory_space<vmem>>, vector<16x16x4xf32>
    %61 = vector.shape_cast %60 : vector<16x16x4xf32> to vector<256x4xf32>
    %62 = arith.truncf %61 : vector<256x4xf32> to vector<256x4xbf16>
    %c4 = arith.constant 4 : index
    %c0_64 = arith.constant 0 : index
    %c0_65 = arith.constant 0 : index
    %63 = vector.load %arg4[%c4, %c0_64, %c0_65] : memref<9x4x8xbf16, #tpu.memory_space<vmem>>, vector<1x4x8xbf16>
    %64 = vector.shape_cast %63 : vector<1x4x8xbf16> to vector<4x8xbf16>
    %cst_66 = arith.constant dense<0.000000e+00> : vector<256x8xf32>
    %65 = tpu.matmul %62, %64, %cst_66 {dimension_numbers = #tpu.dot_dimension_numbers<[1], [0], [0], [1], [0, 0, 1, 1], [], []>} : vector<256x4xbf16>, vector<4x8xbf16>, vector<256x8xf32> -> vector<256x8xf32>
    %66 = arith.addf %59, %65 : vector<256x8xf32>
    %c1_67 = arith.constant 1 : index
    %c9_68 = arith.constant 9 : index
    %c0_69 = arith.constant 0 : index
    %67 = vector.load %arg13[%c1_67, %c9_68, %c0_69] : memref<18x32x4xf32, #tpu.memory_space<vmem>>, vector<16x16x4xf32>
    %68 = vector.shape_cast %67 : vector<16x16x4xf32> to vector<256x4xf32>
    %69 = arith.truncf %68 : vector<256x4xf32> to vector<256x4xbf16>
    %c5 = arith.constant 5 : index
    %c0_70 = arith.constant 0 : index
    %c0_71 = arith.constant 0 : index
    %70 = vector.load %arg4[%c5, %c0_70, %c0_71] : memref<9x4x8xbf16, #tpu.memory_space<vmem>>, vector<1x4x8xbf16>
    %71 = vector.shape_cast %70 : vector<1x4x8xbf16> to vector<4x8xbf16>
    %cst_72 = arith.constant dense<0.000000e+00> : vector<256x8xf32>
    %72 = tpu.matmul %69, %71, %cst_72 {dimension_numbers = #tpu.dot_dimension_numbers<[1], [0], [0], [1], [0, 0, 1, 1], [], []>} : vector<256x4xbf16>, vector<4x8xbf16>, vector<256x8xf32> -> vector<256x8xf32>
    %73 = arith.addf %66, %72 : vector<256x8xf32>
    %c2_73 = arith.constant 2 : index
    %c7_74 = arith.constant 7 : index
    %c0_75 = arith.constant 0 : index
    %74 = vector.load %arg13[%c2_73, %c7_74, %c0_75] : memref<18x32x4xf32, #tpu.memory_space<vmem>>, vector<16x16x4xf32>
    %75 = vector.shape_cast %74 : vector<16x16x4xf32> to vector<256x4xf32>
    %76 = arith.truncf %75 : vector<256x4xf32> to vector<256x4xbf16>
    %c6 = arith.constant 6 : index
    %c0_76 = arith.constant 0 : index
    %c0_77 = arith.constant 0 : index
    %77 = vector.load %arg4[%c6, %c0_76, %c0_77] : memref<9x4x8xbf16, #tpu.memory_space<vmem>>, vector<1x4x8xbf16>
    %78 = vector.shape_cast %77 : vector<1x4x8xbf16> to vector<4x8xbf16>
    %cst_78 = arith.constant dense<0.000000e+00> : vector<256x8xf32>
    %79 = tpu.matmul %76, %78, %cst_78 {dimension_numbers = #tpu.dot_dimension_numbers<[1], [0], [0], [1], [0, 0, 1, 1], [], []>} : vector<256x4xbf16>, vector<4x8xbf16>, vector<256x8xf32> -> vector<256x8xf32>
    %80 = arith.addf %73, %79 : vector<256x8xf32>
    %c2_79 = arith.constant 2 : index
    %c8_80 = arith.constant 8 : index
    %c0_81 = arith.constant 0 : index
    %81 = vector.load %arg13[%c2_79, %c8_80, %c0_81] : memref<18x32x4xf32, #tpu.memory_space<vmem>>, vector<16x16x4xf32>
    %82 = vector.shape_cast %81 : vector<16x16x4xf32> to vector<256x4xf32>
    %83 = arith.truncf %82 : vector<256x4xf32> to vector<256x4xbf16>
    %c7_82 = arith.constant 7 : index
    %c0_83 = arith.constant 0 : index
    %c0_84 = arith.constant 0 : index
    %84 = vector.load %arg4[%c7_82, %c0_83, %c0_84] : memref<9x4x8xbf16, #tpu.memory_space<vmem>>, vector<1x4x8xbf16>
    %85 = vector.shape_cast %84 : vector<1x4x8xbf16> to vector<4x8xbf16>
    %cst_85 = arith.constant dense<0.000000e+00> : vector<256x8xf32>
    %86 = tpu.matmul %83, %85, %cst_85 {dimension_numbers = #tpu.dot_dimension_numbers<[1], [0], [0], [1], [0, 0, 1, 1], [], []>} : vector<256x4xbf16>, vector<4x8xbf16>, vector<256x8xf32> -> vector<256x8xf32>
    %87 = arith.addf %80, %86 : vector<256x8xf32>
    %c2_86 = arith.constant 2 : index
    %c9_87 = arith.constant 9 : index
    %c0_88 = arith.constant 0 : index
    %88 = vector.load %arg13[%c2_86, %c9_87, %c0_88] : memref<18x32x4xf32, #tpu.memory_space<vmem>>, vector<16x16x4xf32>
    %89 = vector.shape_cast %88 : vector<16x16x4xf32> to vector<256x4xf32>
    %90 = arith.truncf %89 : vector<256x4xf32> to vector<256x4xbf16>
    %c8_89 = arith.constant 8 : index
    %c0_90 = arith.constant 0 : index
    %c0_91 = arith.constant 0 : index
    %91 = vector.load %arg4[%c8_89, %c0_90, %c0_91] : memref<9x4x8xbf16, #tpu.memory_space<vmem>>, vector<1x4x8xbf16>
    %92 = vector.shape_cast %91 : vector<1x4x8xbf16> to vector<4x8xbf16>
    %cst_92 = arith.constant dense<0.000000e+00> : vector<256x8xf32>
    %93 = tpu.matmul %90, %92, %cst_92 {dimension_numbers = #tpu.dot_dimension_numbers<[1], [0], [0], [1], [0, 0, 1, 1], [], []>} : vector<256x4xbf16>, vector<4x8xbf16>, vector<256x8xf32> -> vector<256x8xf32>
    %94 = arith.addf %87, %93 : vector<256x8xf32>
    %c0_93 = arith.constant 0 : index
    %c0_94 = arith.constant 0 : index
    %95 = vector.load %arg5[%c0_93, %c0_94] : memref<1x8xf32, #tpu.memory_space<vmem>>, vector<1x8xf32>
    %96 = vector.broadcast %95 : vector<1x8xf32> to vector<256x8xf32>
    %97 = arith.addf %94, %96 : vector<256x8xf32>
    %c0_95 = arith.constant 0 : index
    %c0_96 = arith.constant 0 : index
    %98 = vector.load %arg6[%c0_95, %c0_96] : memref<1x8xf32, #tpu.memory_space<vmem>>, vector<1x8xf32>
    %99 = vector.broadcast %98 : vector<1x8xf32> to vector<256x8xf32>
    %100 = arith.mulf %97, %99 : vector<256x8xf32>
    %c0_97 = arith.constant 0 : index
    %c0_98 = arith.constant 0 : index
    %101 = vector.load %arg7[%c0_97, %c0_98] : memref<1x8xf32, #tpu.memory_space<vmem>>, vector<1x8xf32>
    %102 = vector.broadcast %101 : vector<1x8xf32> to vector<256x8xf32>
    %103 = arith.addf %100, %102 : vector<256x8xf32>
    %cst_99 = arith.constant 0.000000e+00 : f32
    %104 = vector.broadcast %cst_99 : f32 to vector<256x8xf32>
    %105 = arith.cmpf ogt, %103, %104 : vector<256x8xf32>
    %cst_100 = arith.constant 0.000000e+00 : f32
    %106 = vector.broadcast %cst_100 : f32 to vector<256x8xf32>
    %107 = arith.minimumf %103, %106 : vector<256x8xf32>
    %108 = math.exp %107 : vector<256x8xf32>
    %cst_101 = arith.constant 1.000000e+00 : f32
    %109 = vector.broadcast %cst_101 : f32 to vector<256x8xf32>
    %110 = arith.subf %108, %109 : vector<256x8xf32>
    %111 = arith.select %105, %103, %110 : vector<256x8xi1>, vector<256x8xf32>
    %112 = vector.shape_cast %111 : vector<256x8xf32> to vector<16x16x8xf32>
    %c1_102 = arith.constant 1 : index
    %c8_103 = arith.constant 8 : index
    %c0_104 = arith.constant 0 : index
    %113 = vector.load %arg14[%c1_102, %c8_103, %c0_104] : memref<18x32x8xf32, #tpu.memory_space<vmem>>, vector<16x16x8xf32>
    tpu.vector_store %arg14[%c1_102, %c8_103, %c0_104], %112 {strides = array<i32>} : memref<18x32x8xf32, #tpu.memory_space<vmem>>, vector<16x16x8xf32>,
    %cst_105 = arith.constant 0.000000e+00 : f32
    %114 = vector.broadcast %cst_105 : f32 to vector<256x8xf32>
    %c0_106 = arith.constant 0 : index
    %c7_107 = arith.constant 7 : index
    %c0_108 = arith.constant 0 : index
    %115 = vector.load %arg14[%c0_106, %c7_107, %c0_108] : memref<18x32x8xf32, #tpu.memory_space<vmem>>, vector<16x16x8xf32>
    %116 = vector.shape_cast %115 : vector<16x16x8xf32> to vector<256x8xf32>
    %117 = arith.truncf %116 : vector<256x8xf32> to vector<256x8xbf16>
    %c0_109 = arith.constant 0 : index
    %c0_110 = arith.constant 0 : index
    %c0_111 = arith.constant 0 : index
    %118 = vector.load %arg8[%c0_109, %c0_110, %c0_111] : memref<9x8x8xbf16, #tpu.memory_space<vmem>>, vector<1x8x8xbf16>
    %119 = vector.shape_cast %118 : vector<1x8x8xbf16> to vector<8x8xbf16>
    %cst_112 = arith.constant dense<0.000000e+00> : vector<256x8xf32>
    %120 = tpu.matmul %117, %119, %cst_112 {dimension_numbers = #tpu.dot_dimension_numbers<[1], [0], [0], [1], [0, 0, 1, 1], [], []>} : vector<256x8xbf16>, vector<8x8xbf16>, vector<256x8xf32> -> vector<256x8xf32>
    %121 = arith.addf %114, %120 : vector<256x8xf32>
    %c0_113 = arith.constant 0 : index
    %c8_114 = arith.constant 8 : index
    %c0_115 = arith.constant 0 : index
    %122 = vector.load %arg14[%c0_113, %c8_114, %c0_115] : memref<18x32x8xf32, #tpu.memory_space<vmem>>, vector<16x16x8xf32>
    %123 = vector.shape_cast %122 : vector<16x16x8xf32> to vector<256x8xf32>
    %124 = arith.truncf %123 : vector<256x8xf32> to vector<256x8xbf16>
    %c1_116 = arith.constant 1 : index
    %c0_117 = arith.constant 0 : index
    %c0_118 = arith.constant 0 : index
    %125 = vector.load %arg8[%c1_116, %c0_117, %c0_118] : memref<9x8x8xbf16, #tpu.memory_space<vmem>>, vector<1x8x8xbf16>
    %126 = vector.shape_cast %125 : vector<1x8x8xbf16> to vector<8x8xbf16>
    %cst_119 = arith.constant dense<0.000000e+00> : vector<256x8xf32>
    %127 = tpu.matmul %124, %126, %cst_119 {dimension_numbers = #tpu.dot_dimension_numbers<[1], [0], [0], [1], [0, 0, 1, 1], [], []>} : vector<256x8xbf16>, vector<8x8xbf16>, vector<256x8xf32> -> vector<256x8xf32>
    %128 = arith.addf %121, %127 : vector<256x8xf32>
    %c0_120 = arith.constant 0 : index
    %c9_121 = arith.constant 9 : index
    %c0_122 = arith.constant 0 : index
    %129 = vector.load %arg14[%c0_120, %c9_121, %c0_122] : memref<18x32x8xf32, #tpu.memory_space<vmem>>, vector<16x16x8xf32>
    %130 = vector.shape_cast %129 : vector<16x16x8xf32> to vector<256x8xf32>
    %131 = arith.truncf %130 : vector<256x8xf32> to vector<256x8xbf16>
    %c2_123 = arith.constant 2 : index
    %c0_124 = arith.constant 0 : index
    %c0_125 = arith.constant 0 : index
    %132 = vector.load %arg8[%c2_123, %c0_124, %c0_125] : memref<9x8x8xbf16, #tpu.memory_space<vmem>>, vector<1x8x8xbf16>
    %133 = vector.shape_cast %132 : vector<1x8x8xbf16> to vector<8x8xbf16>
    %cst_126 = arith.constant dense<0.000000e+00> : vector<256x8xf32>
    %134 = tpu.matmul %131, %133, %cst_126 {dimension_numbers = #tpu.dot_dimension_numbers<[1], [0], [0], [1], [0, 0, 1, 1], [], []>} : vector<256x8xbf16>, vector<8x8xbf16>, vector<256x8xf32> -> vector<256x8xf32>
    %135 = arith.addf %128, %134 : vector<256x8xf32>
    %c1_127 = arith.constant 1 : index
    %c7_128 = arith.constant 7 : index
    %c0_129 = arith.constant 0 : index
    %136 = vector.load %arg14[%c1_127, %c7_128, %c0_129] : memref<18x32x8xf32, #tpu.memory_space<vmem>>, vector<16x16x8xf32>
    %137 = vector.shape_cast %136 : vector<16x16x8xf32> to vector<256x8xf32>
    %138 = arith.truncf %137 : vector<256x8xf32> to vector<256x8xbf16>
    %c3_130 = arith.constant 3 : index
    %c0_131 = arith.constant 0 : index
    %c0_132 = arith.constant 0 : index
    %139 = vector.load %arg8[%c3_130, %c0_131, %c0_132] : memref<9x8x8xbf16, #tpu.memory_space<vmem>>, vector<1x8x8xbf16>
    %140 = vector.shape_cast %139 : vector<1x8x8xbf16> to vector<8x8xbf16>
    %cst_133 = arith.constant dense<0.000000e+00> : vector<256x8xf32>
    %141 = tpu.matmul %138, %140, %cst_133 {dimension_numbers = #tpu.dot_dimension_numbers<[1], [0], [0], [1], [0, 0, 1, 1], [], []>} : vector<256x8xbf16>, vector<8x8xbf16>, vector<256x8xf32> -> vector<256x8xf32>
    %142 = arith.addf %135, %141 : vector<256x8xf32>
    %c1_134 = arith.constant 1 : index
    %c8_135 = arith.constant 8 : index
    %c0_136 = arith.constant 0 : index
    %143 = vector.load %arg14[%c1_134, %c8_135, %c0_136] : memref<18x32x8xf32, #tpu.memory_space<vmem>>, vector<16x16x8xf32>
    %144 = vector.shape_cast %143 : vector<16x16x8xf32> to vector<256x8xf32>
    %145 = arith.truncf %144 : vector<256x8xf32> to vector<256x8xbf16>
    %c4_137 = arith.constant 4 : index
    %c0_138 = arith.constant 0 : index
    %c0_139 = arith.constant 0 : index
    %146 = vector.load %arg8[%c4_137, %c0_138, %c0_139] : memref<9x8x8xbf16, #tpu.memory_space<vmem>>, vector<1x8x8xbf16>
    %147 = vector.shape_cast %146 : vector<1x8x8xbf16> to vector<8x8xbf16>
    %cst_140 = arith.constant dense<0.000000e+00> : vector<256x8xf32>
    %148 = tpu.matmul %145, %147, %cst_140 {dimension_numbers = #tpu.dot_dimension_numbers<[1], [0], [0], [1], [0, 0, 1, 1], [], []>} : vector<256x8xbf16>, vector<8x8xbf16>, vector<256x8xf32> -> vector<256x8xf32>
    %149 = arith.addf %142, %148 : vector<256x8xf32>
    %c1_141 = arith.constant 1 : index
    %c9_142 = arith.constant 9 : index
    %c0_143 = arith.constant 0 : index
    %150 = vector.load %arg14[%c1_141, %c9_142, %c0_143] : memref<18x32x8xf32, #tpu.memory_space<vmem>>, vector<16x16x8xf32>
    %151 = vector.shape_cast %150 : vector<16x16x8xf32> to vector<256x8xf32>
    %152 = arith.truncf %151 : vector<256x8xf32> to vector<256x8xbf16>
    %c5_144 = arith.constant 5 : index
    %c0_145 = arith.constant 0 : index
    %c0_146 = arith.constant 0 : index
    %153 = vector.load %arg8[%c5_144, %c0_145, %c0_146] : memref<9x8x8xbf16, #tpu.memory_space<vmem>>, vector<1x8x8xbf16>
    %154 = vector.shape_cast %153 : vector<1x8x8xbf16> to vector<8x8xbf16>
    %cst_147 = arith.constant dense<0.000000e+00> : vector<256x8xf32>
    %155 = tpu.matmul %152, %154, %cst_147 {dimension_numbers = #tpu.dot_dimension_numbers<[1], [0], [0], [1], [0, 0, 1, 1], [], []>} : vector<256x8xbf16>, vector<8x8xbf16>, vector<256x8xf32> -> vector<256x8xf32>
    %156 = arith.addf %149, %155 : vector<256x8xf32>
    %c2_148 = arith.constant 2 : index
    %c7_149 = arith.constant 7 : index
    %c0_150 = arith.constant 0 : index
    %157 = vector.load %arg14[%c2_148, %c7_149, %c0_150] : memref<18x32x8xf32, #tpu.memory_space<vmem>>, vector<16x16x8xf32>
    %158 = vector.shape_cast %157 : vector<16x16x8xf32> to vector<256x8xf32>
    %159 = arith.truncf %158 : vector<256x8xf32> to vector<256x8xbf16>
    %c6_151 = arith.constant 6 : index
    %c0_152 = arith.constant 0 : index
    %c0_153 = arith.constant 0 : index
    %160 = vector.load %arg8[%c6_151, %c0_152, %c0_153] : memref<9x8x8xbf16, #tpu.memory_space<vmem>>, vector<1x8x8xbf16>
    %161 = vector.shape_cast %160 : vector<1x8x8xbf16> to vector<8x8xbf16>
    %cst_154 = arith.constant dense<0.000000e+00> : vector<256x8xf32>
    %162 = tpu.matmul %159, %161, %cst_154 {dimension_numbers = #tpu.dot_dimension_numbers<[1], [0], [0], [1], [0, 0, 1, 1], [], []>} : vector<256x8xbf16>, vector<8x8xbf16>, vector<256x8xf32> -> vector<256x8xf32>
    %163 = arith.addf %156, %162 : vector<256x8xf32>
    %c2_155 = arith.constant 2 : index
    %c8_156 = arith.constant 8 : index
    %c0_157 = arith.constant 0 : index
    %164 = vector.load %arg14[%c2_155, %c8_156, %c0_157] : memref<18x32x8xf32, #tpu.memory_space<vmem>>, vector<16x16x8xf32>
    %165 = vector.shape_cast %164 : vector<16x16x8xf32> to vector<256x8xf32>
    %166 = arith.truncf %165 : vector<256x8xf32> to vector<256x8xbf16>
    %c7_158 = arith.constant 7 : index
    %c0_159 = arith.constant 0 : index
    %c0_160 = arith.constant 0 : index
    %167 = vector.load %arg8[%c7_158, %c0_159, %c0_160] : memref<9x8x8xbf16, #tpu.memory_space<vmem>>, vector<1x8x8xbf16>
    %168 = vector.shape_cast %167 : vector<1x8x8xbf16> to vector<8x8xbf16>
    %cst_161 = arith.constant dense<0.000000e+00> : vector<256x8xf32>
    %169 = tpu.matmul %166, %168, %cst_161 {dimension_numbers = #tpu.dot_dimension_numbers<[1], [0], [0], [1], [0, 0, 1, 1], [], []>} : vector<256x8xbf16>, vector<8x8xbf16>, vector<256x8xf32> -> vector<256x8xf32>
    %170 = arith.addf %163, %169 : vector<256x8xf32>
    %c2_162 = arith.constant 2 : index
    %c9_163 = arith.constant 9 : index
    %c0_164 = arith.constant 0 : index
    %171 = vector.load %arg14[%c2_162, %c9_163, %c0_164] : memref<18x32x8xf32, #tpu.memory_space<vmem>>, vector<16x16x8xf32>
    %172 = vector.shape_cast %171 : vector<16x16x8xf32> to vector<256x8xf32>
    %173 = arith.truncf %172 : vector<256x8xf32> to vector<256x8xbf16>
    %c8_165 = arith.constant 8 : index
    %c0_166 = arith.constant 0 : index
    %c0_167 = arith.constant 0 : index
    %174 = vector.load %arg8[%c8_165, %c0_166, %c0_167] : memref<9x8x8xbf16, #tpu.memory_space<vmem>>, vector<1x8x8xbf16>
    %175 = vector.shape_cast %174 : vector<1x8x8xbf16> to vector<8x8xbf16>
    %cst_168 = arith.constant dense<0.000000e+00> : vector<256x8xf32>
    %176 = tpu.matmul %173, %175, %cst_168 {dimension_numbers = #tpu.dot_dimension_numbers<[1], [0], [0], [1], [0, 0, 1, 1], [], []>} : vector<256x8xbf16>, vector<8x8xbf16>, vector<256x8xf32> -> vector<256x8xf32>
    %177 = arith.addf %170, %176 : vector<256x8xf32>
    %c0_169 = arith.constant 0 : index
    %c0_170 = arith.constant 0 : index
    %178 = vector.load %arg9[%c0_169, %c0_170] : memref<1x8xf32, #tpu.memory_space<vmem>>, vector<1x8xf32>
    %179 = vector.broadcast %178 : vector<1x8xf32> to vector<256x8xf32>
    %180 = arith.addf %177, %179 : vector<256x8xf32>
    %c0_171 = arith.constant 0 : index
    %c0_172 = arith.constant 0 : index
    %c0_173 = arith.constant 0 : index
    %c0_174 = arith.constant 0 : index
    %181 = vector.load %arg1[%c0_171, %c0_172, %c0_173, %c0_174] : memref<1x16x16x4xf32, #tpu.memory_space<vmem>>, vector<1x16x16x4xf32>
    %182 = vector.shape_cast %181 : vector<1x16x16x4xf32> to vector<16x16x4xf32>
    %183 = vector.shape_cast %182 : vector<16x16x4xf32> to vector<256x4xf32>
    %184 = arith.truncf %183 : vector<256x4xf32> to vector<256x4xbf16>
    %c0_175 = arith.constant 0 : index
    %c0_176 = arith.constant 0 : index
    %185 = vector.load %arg10[%c0_175, %c0_176] : memref<4x8xbf16, #tpu.memory_space<vmem>>, vector<4x8xbf16>
    %cst_177 = arith.constant dense<0.000000e+00> : vector<256x8xf32>
    %186 = tpu.matmul %184, %185, %cst_177 {dimension_numbers = #tpu.dot_dimension_numbers<[1], [0], [0], [1], [0, 0, 1, 1], [], []>} : vector<256x4xbf16>, vector<4x8xbf16>, vector<256x8xf32> -> vector<256x8xf32>
    %187 = arith.addf %180, %186 : vector<256x8xf32>
    %c0_178 = arith.constant 0 : index
    %c0_179 = arith.constant 0 : index
    %188 = vector.load %arg11[%c0_178, %c0_179] : memref<1x8xf32, #tpu.memory_space<vmem>>, vector<1x8xf32>
    %189 = vector.broadcast %188 : vector<1x8xf32> to vector<256x8xf32>
    %190 = arith.addf %187, %189 : vector<256x8xf32>
    %191 = vector.shape_cast %190 : vector<256x8xf32> to vector<16x16x8xf32>
    %c0_180 = arith.constant 0 : index
    %c0_181 = arith.constant 0 : index
    %c0_182 = arith.constant 0 : index
    %c0_183 = arith.constant 0 : index
    %192 = vector.load %arg12[%c0_180, %c0_181, %c0_182, %c0_183] : memref<1x16x16x8xf32, #tpu.memory_space<vmem>>, vector<1x16x16x8xf32>
    %193 = vector.shape_cast %192 : vector<1x16x16x8xf32> to vector<16x16x8xf32>
    %194 = vector.shape_cast %191 : vector<16x16x8xf32> to vector<1x16x16x8xf32>
    tpu.vector_store %arg12[%c0_180, %c0_181, %c0_182, %c0_183], %194 {strides = array<i32>} : memref<1x16x16x8xf32, #tpu.memory_space<vmem>>, vector<1x16x16x8xf32>,
    return
  }
  func.func @transform_0(%arg0: i32) -> (i32, i32, i32, i32) {
    %c0_i32 = arith.constant 0 : i32
    %c0_i32_0 = arith.constant 0 : i32
    %c0_i32_1 = arith.constant 0 : i32
    %c0_i32_2 = arith.constant 0 : i32
    return %arg0, %c0_i32, %c0_i32_0, %c0_i32_1 : i32, i32, i32, i32
  }
  func.func @transform_1(%arg0: i32) -> (i32, i32) {
    %c0_i32 = arith.constant 0 : i32
    %c0_i32_0 = arith.constant 0 : i32
    %c0_i32_1 = arith.constant 0 : i32
    return %c0_i32, %c0_i32_0 : i32, i32
  }
  func.func @transform_2(%arg0: i32) -> (i32, i32) {
    %c0_i32 = arith.constant 0 : i32
    %c0_i32_0 = arith.constant 0 : i32
    %c0_i32_1 = arith.constant 0 : i32
    return %c0_i32, %c0_i32_0 : i32, i32
  }
  func.func @transform_3(%arg0: i32) -> (i32, i32, i32) {
    %c0_i32 = arith.constant 0 : i32
    %c0_i32_0 = arith.constant 0 : i32
    %c0_i32_1 = arith.constant 0 : i32
    %c0_i32_2 = arith.constant 0 : i32
    return %c0_i32, %c0_i32_0, %c0_i32_1 : i32, i32, i32
  }
  func.func @transform_4(%arg0: i32) -> (i32, i32) {
    %c0_i32 = arith.constant 0 : i32
    %c0_i32_0 = arith.constant 0 : i32
    %c0_i32_1 = arith.constant 0 : i32
    return %c0_i32, %c0_i32_0 : i32, i32
  }
  func.func @transform_5(%arg0: i32) -> (i32, i32) {
    %c0_i32 = arith.constant 0 : i32
    %c0_i32_0 = arith.constant 0 : i32
    %c0_i32_1 = arith.constant 0 : i32
    return %c0_i32, %c0_i32_0 : i32, i32
  }
  func.func @transform_6(%arg0: i32) -> (i32, i32) {
    %c0_i32 = arith.constant 0 : i32
    %c0_i32_0 = arith.constant 0 : i32
    %c0_i32_1 = arith.constant 0 : i32
    return %c0_i32, %c0_i32_0 : i32, i32
  }
  func.func @transform_7(%arg0: i32) -> (i32, i32, i32) {
    %c0_i32 = arith.constant 0 : i32
    %c0_i32_0 = arith.constant 0 : i32
    %c0_i32_1 = arith.constant 0 : i32
    %c0_i32_2 = arith.constant 0 : i32
    return %c0_i32, %c0_i32_0, %c0_i32_1 : i32, i32, i32
  }
  func.func @transform_8(%arg0: i32) -> (i32, i32) {
    %c0_i32 = arith.constant 0 : i32
    %c0_i32_0 = arith.constant 0 : i32
    %c0_i32_1 = arith.constant 0 : i32
    return %c0_i32, %c0_i32_0 : i32, i32
  }
  func.func @transform_9(%arg0: i32) -> (i32, i32) {
    %c0_i32 = arith.constant 0 : i32
    %c0_i32_0 = arith.constant 0 : i32
    %c0_i32_1 = arith.constant 0 : i32
    return %c0_i32, %c0_i32_0 : i32, i32
  }
  func.func @transform_10(%arg0: i32) -> (i32, i32) {
    %c0_i32 = arith.constant 0 : i32
    %c0_i32_0 = arith.constant 0 : i32
    %c0_i32_1 = arith.constant 0 : i32
    return %c0_i32, %c0_i32_0 : i32, i32
  }
  func.func @transform_11(%arg0: i32) -> (i32, i32, i32, i32) {
    %c0_i32 = arith.constant 0 : i32
    %c0_i32_0 = arith.constant 0 : i32
    %c0_i32_1 = arith.constant 0 : i32
    %c0_i32_2 = arith.constant 0 : i32
    return %arg0, %c0_i32, %c0_i32_0, %c0_i32_1 : i32, i32, i32, i32
  }
}

module attributes {stable_mosaic.version = 11 : i64} {
  func.func @kernel(%arg0: i32, %arg1: memref<1x16x16x4xf32, #tpu.memory_space<vmem>>, %arg2: memref<1x4xf32, #tpu.memory_space<vmem>>, %arg3: memref<1x4xf32, #tpu.memory_space<vmem>>, %arg4: memref<9x4x8xbf16, #tpu.memory_space<vmem>>, %arg5: memref<1x8xf32, #tpu.memory_space<vmem>>, %arg6: memref<1x8xf32, #tpu.memory_space<vmem>>, %arg7: memref<1x8xf32, #tpu.memory_space<vmem>>, %arg8: memref<9x8x8xbf16, #tpu.memory_space<vmem>>, %arg9: memref<1x8xf32, #tpu.memory_space<vmem>>, %arg10: memref<4x8xbf16, #tpu.memory_space<vmem>>, %arg11: memref<1x8xf32, #tpu.memory_space<vmem>>, %arg12: memref<1x16x16x8xf32, #tpu.memory_space<vmem>>, %arg13: memref<18x32x4xf32, #tpu.memory_space<vmem>>, %arg14: memref<18x32x8xf32, #tpu.memory_space<vmem>>) attributes {dimension_semantics = [#tpu.dimension_semantics<parallel>], iteration_bounds = array<i64: 2>, scalar_prefetch = 0 : i64, scratch_operands = 2 : i64, tpu.core_type = #tpu.core_type<tc>, window_params = [{transform_indices = @transform_0, window_bounds = array<i64: 1, 16, 16, 4>}, {pipeline_mode = #tpu.pipeline_mode<synchronous>, transform_indices = @transform_1, window_bounds = array<i64: 1, 4>}, {pipeline_mode = #tpu.pipeline_mode<synchronous>, transform_indices = @transform_2, window_bounds = array<i64: 1, 4>}, {pipeline_mode = #tpu.pipeline_mode<synchronous>, transform_indices = @transform_3, window_bounds = array<i64: 9, 4, 8>}, {pipeline_mode = #tpu.pipeline_mode<synchronous>, transform_indices = @transform_4, window_bounds = array<i64: 1, 8>}, {pipeline_mode = #tpu.pipeline_mode<synchronous>, transform_indices = @transform_5, window_bounds = array<i64: 1, 8>}, {pipeline_mode = #tpu.pipeline_mode<synchronous>, transform_indices = @transform_6, window_bounds = array<i64: 1, 8>}, {pipeline_mode = #tpu.pipeline_mode<synchronous>, transform_indices = @transform_7, window_bounds = array<i64: 9, 8, 8>}, {pipeline_mode = #tpu.pipeline_mode<synchronous>, transform_indices = @transform_8, window_bounds = array<i64: 1, 8>}, {pipeline_mode = #tpu.pipeline_mode<synchronous>, transform_indices = @transform_9, window_bounds = array<i64: 4, 8>}, {pipeline_mode = #tpu.pipeline_mode<synchronous>, transform_indices = @transform_10, window_bounds = array<i64: 1, 8>}, {transform_indices = @transform_11, window_bounds = array<i64: 1, 16, 16, 8>}]} {
    %cst = arith.constant 0.000000e+00 : f32
    %0 = vector.broadcast %cst : f32 to vector<1x32x4xf32>
    %c0 = arith.constant 0 : index
    %c0_0 = arith.constant 0 : index
    %c0_1 = arith.constant 0 : index
    %1 = vector.load %arg13[%c0, %c0_0, %c0_1] : memref<18x32x4xf32, #tpu.memory_space<vmem>>, vector<1x32x4xf32>
    tpu.vector_store %arg13[%c0, %c0_0, %c0_1], %0 {strides = array<i32>} : memref<18x32x4xf32, #tpu.memory_space<vmem>>, vector<1x32x4xf32>,
    %c17 = arith.constant 17 : index
    %c0_2 = arith.constant 0 : index
    %c0_3 = arith.constant 0 : index
    %2 = vector.load %arg13[%c17, %c0_2, %c0_3] : memref<18x32x4xf32, #tpu.memory_space<vmem>>, vector<1x32x4xf32>
    tpu.vector_store %arg13[%c17, %c0_2, %c0_3], %0 {strides = array<i32>} : memref<18x32x4xf32, #tpu.memory_space<vmem>>, vector<1x32x4xf32>,
    %cst_4 = arith.constant 0.000000e+00 : f32
    %3 = vector.broadcast %cst_4 : f32 to vector<18x8x4xf32>
    %c0_5 = arith.constant 0 : index
    %c0_6 = arith.constant 0 : index
    %c0_7 = arith.constant 0 : index
    %4 = vector.load %arg13[%c0_5, %c0_6, %c0_7] : memref<18x32x4xf32, #tpu.memory_space<vmem>>, vector<18x8x4xf32>
    tpu.vector_store %arg13[%c0_5, %c0_6, %c0_7], %3 {strides = array<i32>} : memref<18x32x4xf32, #tpu.memory_space<vmem>>, vector<18x8x4xf32>,
    %c0_8 = arith.constant 0 : index
    %c24 = arith.constant 24 : index
    %c0_9 = arith.constant 0 : index
    %5 = vector.load %arg13[%c0_8, %c24, %c0_9] : memref<18x32x4xf32, #tpu.memory_space<vmem>>, vector<18x8x4xf32>
    tpu.vector_store %arg13[%c0_8, %c24, %c0_9], %3 {strides = array<i32>} : memref<18x32x4xf32, #tpu.memory_space<vmem>>, vector<18x8x4xf32>,
    %cst_10 = arith.constant 0.000000e+00 : f32
    %6 = vector.broadcast %cst_10 : f32 to vector<1x32x8xf32>
    %c0_11 = arith.constant 0 : index
    %c0_12 = arith.constant 0 : index
    %c0_13 = arith.constant 0 : index
    %7 = vector.load %arg14[%c0_11, %c0_12, %c0_13] : memref<18x32x8xf32, #tpu.memory_space<vmem>>, vector<1x32x8xf32>
    tpu.vector_store %arg14[%c0_11, %c0_12, %c0_13], %6 {strides = array<i32>} : memref<18x32x8xf32, #tpu.memory_space<vmem>>, vector<1x32x8xf32>,
    %c17_14 = arith.constant 17 : index
    %c0_15 = arith.constant 0 : index
    %c0_16 = arith.constant 0 : index
    %8 = vector.load %arg14[%c17_14, %c0_15, %c0_16] : memref<18x32x8xf32, #tpu.memory_space<vmem>>, vector<1x32x8xf32>
    tpu.vector_store %arg14[%c17_14, %c0_15, %c0_16], %6 {strides = array<i32>} : memref<18x32x8xf32, #tpu.memory_space<vmem>>, vector<1x32x8xf32>,
    %cst_17 = arith.constant 0.000000e+00 : f32
    %9 = vector.broadcast %cst_17 : f32 to vector<18x8x8xf32>
    %c0_18 = arith.constant 0 : index
    %c0_19 = arith.constant 0 : index
    %c0_20 = arith.constant 0 : index
    %10 = vector.load %arg14[%c0_18, %c0_19, %c0_20] : memref<18x32x8xf32, #tpu.memory_space<vmem>>, vector<18x8x8xf32>
    tpu.vector_store %arg14[%c0_18, %c0_19, %c0_20], %9 {strides = array<i32>} : memref<18x32x8xf32, #tpu.memory_space<vmem>>, vector<18x8x8xf32>,
    %c0_21 = arith.constant 0 : index
    %c24_22 = arith.constant 24 : index
    %c0_23 = arith.constant 0 : index
    %11 = vector.load %arg14[%c0_21, %c24_22, %c0_23] : memref<18x32x8xf32, #tpu.memory_space<vmem>>, vector<18x8x8xf32>
    tpu.vector_store %arg14[%c0_21, %c24_22, %c0_23], %9 {strides = array<i32>} : memref<18x32x8xf32, #tpu.memory_space<vmem>>, vector<18x8x8xf32>,
    %c0_24 = arith.constant 0 : index
    %c0_25 = arith.constant 0 : index
    %c0_26 = arith.constant 0 : index
    %c0_27 = arith.constant 0 : index
    %12 = vector.load %arg1[%c0_24, %c0_25, %c0_26, %c0_27] : memref<1x16x16x4xf32, #tpu.memory_space<vmem>>, vector<1x16x16x4xf32>
    %13 = vector.shape_cast %12 : vector<1x16x16x4xf32> to vector<16x16x4xf32>
    %c0_28 = arith.constant 0 : index
    %c0_29 = arith.constant 0 : index
    %14 = vector.load %arg2[%c0_28, %c0_29] : memref<1x4xf32, #tpu.memory_space<vmem>>, vector<1x4xf32>
    %15 = vector.shape_cast %14 : vector<1x4xf32> to vector<1x1x4xf32>
    %16 = vector.broadcast %15 : vector<1x1x4xf32> to vector<16x16x4xf32>
    %17 = arith.mulf %13, %16 : vector<16x16x4xf32>
    %c0_30 = arith.constant 0 : index
    %c0_31 = arith.constant 0 : index
    %18 = vector.load %arg3[%c0_30, %c0_31] : memref<1x4xf32, #tpu.memory_space<vmem>>, vector<1x4xf32>
    %19 = vector.shape_cast %18 : vector<1x4xf32> to vector<1x1x4xf32>
    %20 = vector.broadcast %19 : vector<1x1x4xf32> to vector<16x16x4xf32>
    %21 = arith.addf %17, %20 : vector<16x16x4xf32>
    %cst_32 = arith.constant 0.000000e+00 : f32
    %22 = vector.broadcast %cst_32 : f32 to vector<16x16x4xf32>
    %23 = arith.cmpf ogt, %21, %22 : vector<16x16x4xf32>
    %cst_33 = arith.constant 0.000000e+00 : f32
    %24 = vector.broadcast %cst_33 : f32 to vector<16x16x4xf32>
    %25 = arith.minimumf %21, %24 : vector<16x16x4xf32>
    %26 = math.exp %25 : vector<16x16x4xf32>
    %cst_34 = arith.constant 1.000000e+00 : f32
    %27 = vector.broadcast %cst_34 : f32 to vector<16x16x4xf32>
    %28 = arith.subf %26, %27 : vector<16x16x4xf32>
    %29 = arith.select %23, %21, %28 : vector<16x16x4xi1>, vector<16x16x4xf32>
    %c1 = arith.constant 1 : index
    %c8 = arith.constant 8 : index
    %c0_35 = arith.constant 0 : index
    %30 = vector.load %arg13[%c1, %c8, %c0_35] : memref<18x32x4xf32, #tpu.memory_space<vmem>>, vector<16x16x4xf32>
    tpu.vector_store %arg13[%c1, %c8, %c0_35], %29 {strides = array<i32>} : memref<18x32x4xf32, #tpu.memory_space<vmem>>, vector<16x16x4xf32>,
    %cst_36 = arith.constant 0.000000e+00 : f32
    %31 = vector.broadcast %cst_36 : f32 to vector<256x8xf32>
    %c0_37 = arith.constant 0 : index
    %c7 = arith.constant 7 : index
    %c0_38 = arith.constant 0 : index
    %32 = vector.load %arg13[%c0_37, %c7, %c0_38] : memref<18x32x4xf32, #tpu.memory_space<vmem>>, vector<16x16x4xf32>
    %33 = vector.shape_cast %32 : vector<16x16x4xf32> to vector<256x4xf32>
    %34 = arith.truncf %33 : vector<256x4xf32> to vector<256x4xbf16>
    %c0_39 = arith.constant 0 : index
    %c0_40 = arith.constant 0 : index
    %c0_41 = arith.constant 0 : index
    %35 = vector.load %arg4[%c0_39, %c0_40, %c0_41] : memref<9x4x8xbf16, #tpu.memory_space<vmem>>, vector<1x4x8xbf16>
    %36 = vector.shape_cast %35 : vector<1x4x8xbf16> to vector<4x8xbf16>
    %cst_42 = arith.constant dense<0.000000e+00> : vector<256x8xf32>
    %37 = tpu.matmul %34, %36, %cst_42 {dimension_numbers = #tpu.dot_dimension_numbers<[1], [0], [0], [1], [0, 0, 1, 1], [], []>} : vector<256x4xbf16>, vector<4x8xbf16>, vector<256x8xf32> -> vector<256x8xf32>
    %38 = arith.addf %31, %37 : vector<256x8xf32>
    %c0_43 = arith.constant 0 : index
    %c8_44 = arith.constant 8 : index
    %c0_45 = arith.constant 0 : index
    %39 = vector.load %arg13[%c0_43, %c8_44, %c0_45] : memref<18x32x4xf32, #tpu.memory_space<vmem>>, vector<16x16x4xf32>
    %40 = vector.shape_cast %39 : vector<16x16x4xf32> to vector<256x4xf32>
    %41 = arith.truncf %40 : vector<256x4xf32> to vector<256x4xbf16>
    %c1_46 = arith.constant 1 : index
    %c0_47 = arith.constant 0 : index
    %c0_48 = arith.constant 0 : index
    %42 = vector.load %arg4[%c1_46, %c0_47, %c0_48] : memref<9x4x8xbf16, #tpu.memory_space<vmem>>, vector<1x4x8xbf16>
    %43 = vector.shape_cast %42 : vector<1x4x8xbf16> to vector<4x8xbf16>
    %cst_49 = arith.constant dense<0.000000e+00> : vector<256x8xf32>
    %44 = tpu.matmul %41, %43, %cst_49 {dimension_numbers = #tpu.dot_dimension_numbers<[1], [0], [0], [1], [0, 0, 1, 1], [], []>} : vector<256x4xbf16>, vector<4x8xbf16>, vector<256x8xf32> -> vector<256x8xf32>
    %45 = arith.addf %38, %44 : vector<256x8xf32>
    %c0_50 = arith.constant 0 : index
    %c9 = arith.constant 9 : index
    %c0_51 = arith.constant 0 : index
    %46 = vector.load %arg13[%c0_50, %c9, %c0_51] : memref<18x32x4xf32, #tpu.memory_space<vmem>>, vector<16x16x4xf32>
    %47 = vector.shape_cast %46 : vector<16x16x4xf32> to vector<256x4xf32>
    %48 = arith.truncf %47 : vector<256x4xf32> to vector<256x4xbf16>
    %c2 = arith.constant 2 : index
    %c0_52 = arith.constant 0 : index
    %c0_53 = arith.constant 0 : index
    %49 = vector.load %arg4[%c2, %c0_52, %c0_53] : memref<9x4x8xbf16, #tpu.memory_space<vmem>>, vector<1x4x8xbf16>
    %50 = vector.shape_cast %49 : vector<1x4x8xbf16> to vector<4x8xbf16>
    %cst_54 = arith.constant dense<0.000000e+00> : vector<256x8xf32>
    %51 = tpu.matmul %48, %50, %cst_54 {dimension_numbers = #tpu.dot_dimension_numbers<[1], [0], [0], [1], [0, 0, 1, 1], [], []>} : vector<256x4xbf16>, vector<4x8xbf16>, vector<256x8xf32> -> vector<256x8xf32>
    %52 = arith.addf %45, %51 : vector<256x8xf32>
    %c1_55 = arith.constant 1 : index
    %c7_56 = arith.constant 7 : index
    %c0_57 = arith.constant 0 : index
    %53 = vector.load %arg13[%c1_55, %c7_56, %c0_57] : memref<18x32x4xf32, #tpu.memory_space<vmem>>, vector<16x16x4xf32>
    %54 = vector.shape_cast %53 : vector<16x16x4xf32> to vector<256x4xf32>
    %55 = arith.truncf %54 : vector<256x4xf32> to vector<256x4xbf16>
    %c3 = arith.constant 3 : index
    %c0_58 = arith.constant 0 : index
    %c0_59 = arith.constant 0 : index
    %56 = vector.load %arg4[%c3, %c0_58, %c0_59] : memref<9x4x8xbf16, #tpu.memory_space<vmem>>, vector<1x4x8xbf16>
    %57 = vector.shape_cast %56 : vector<1x4x8xbf16> to vector<4x8xbf16>
    %cst_60 = arith.constant dense<0.000000e+00> : vector<256x8xf32>
    %58 = tpu.matmul %55, %57, %cst_60 {dimension_numbers = #tpu.dot_dimension_numbers<[1], [0], [0], [1], [0, 0, 1, 1], [], []>} : vector<256x4xbf16>, vector<4x8xbf16>, vector<256x8xf32> -> vector<256x8xf32>
    %59 = arith.addf %52, %58 : vector<256x8xf32>
    %c1_61 = arith.constant 1 : index
    %c8_62 = arith.constant 8 : index
    %c0_63 = arith.constant 0 : index
    %60 = vector.load %arg13[%c1_61, %c8_62, %c0_63] : memref<18x32x4xf32, #tpu.memory_space<vmem>>, vector<16x16x4xf32>
    %61 = vector.shape_cast %60 : vector<16x16x4xf32> to vector<256x4xf32>
    %62 = arith.truncf %61 : vector<256x4xf32> to vector<256x4xbf16>
    %c4 = arith.constant 4 : index
    %c0_64 = arith.constant 0 : index
    %c0_65 = arith.constant 0 : index
    %63 = vector.load %arg4[%c4, %c0_64, %c0_65] : memref<9x4x8xbf16, #tpu.memory_space<vmem>>, vector<1x4x8xbf16>
    %64 = vector.shape_cast %63 : vector<1x4x8xbf16> to vector<4x8xbf16>
    %cst_66 = arith.constant dense<0.000000e+00> : vector<256x8xf32>
    %65 = tpu.matmul %62, %64, %cst_66 {dimension_numbers = #tpu.dot_dimension_numbers<[1], [0], [0], [1], [0, 0, 1, 1], [], []>} : vector<256x4xbf16>, vector<4x8xbf16>, vector<256x8xf32> -> vector<256x8xf32>
    %66 = arith.addf %59, %65 : vector<256x8xf32>
    %c1_67 = arith.constant 1 : index
    %c9_68 = arith.constant 9 : index
    %c0_69 = arith.constant 0 : index
    %67 = vector.load %arg13[%c1_67, %c9_68, %c0_69] : memref<18x32x4xf32, #tpu.memory_space<vmem>>, vector<16x16x4xf32>
    %68 = vector.shape_cast %67 : vector<16x16x4xf32> to vector<256x4xf32>
    %69 = arith.truncf %68 : vector<256x4xf32> to vector<256x4xbf16>
    %c5 = arith.constant 5 : index
    %c0_70 = arith.constant 0 : index
    %c0_71 = arith.constant 0 : index
    %70 = vector.load %arg4[%c5, %c0_70, %c0_71] : memref<9x4x8xbf16, #tpu.memory_space<vmem>>, vector<1x4x8xbf16>
    %71 = vector.shape_cast %70 : vector<1x4x8xbf16> to vector<4x8xbf16>
    %cst_72 = arith.constant dense<0.000000e+00> : vector<256x8xf32>
    %72 = tpu.matmul %69, %71, %cst_72 {dimension_numbers = #tpu.dot_dimension_numbers<[1], [0], [0], [1], [0, 0, 1, 1], [], []>} : vector<256x4xbf16>, vector<4x8xbf16>, vector<256x8xf32> -> vector<256x8xf32>
    %73 = arith.addf %66, %72 : vector<256x8xf32>
    %c2_73 = arith.constant 2 : index
    %c7_74 = arith.constant 7 : index
    %c0_75 = arith.constant 0 : index
    %74 = vector.load %arg13[%c2_73, %c7_74, %c0_75] : memref<18x32x4xf32, #tpu.memory_space<vmem>>, vector<16x16x4xf32>
    %75 = vector.shape_cast %74 : vector<16x16x4xf32> to vector<256x4xf32>
    %76 = arith.truncf %75 : vector<256x4xf32> to vector<256x4xbf16>
    %c6 = arith.constant 6 : index
    %c0_76 = arith.constant 0 : index
    %c0_77 = arith.constant 0 : index
    %77 = vector.load %arg4[%c6, %c0_76, %c0_77] : memref<9x4x8xbf16, #tpu.memory_space<vmem>>, vector<1x4x8xbf16>
    %78 = vector.shape_cast %77 : vector<1x4x8xbf16> to vector<4x8xbf16>
    %cst_78 = arith.constant dense<0.000000e+00> : vector<256x8xf32>
    %79 = tpu.matmul %76, %78, %cst_78 {dimension_numbers = #tpu.dot_dimension_numbers<[1], [0], [0], [1], [0, 0, 1, 1], [], []>} : vector<256x4xbf16>, vector<4x8xbf16>, vector<256x8xf32> -> vector<256x8xf32>
    %80 = arith.addf %73, %79 : vector<256x8xf32>
    %c2_79 = arith.constant 2 : index
    %c8_80 = arith.constant 8 : index
    %c0_81 = arith.constant 0 : index
    %81 = vector.load %arg13[%c2_79, %c8_80, %c0_81] : memref<18x32x4xf32, #tpu.memory_space<vmem>>, vector<16x16x4xf32>
    %82 = vector.shape_cast %81 : vector<16x16x4xf32> to vector<256x4xf32>
    %83 = arith.truncf %82 : vector<256x4xf32> to vector<256x4xbf16>
    %c7_82 = arith.constant 7 : index
    %c0_83 = arith.constant 0 : index
    %c0_84 = arith.constant 0 : index
    %84 = vector.load %arg4[%c7_82, %c0_83, %c0_84] : memref<9x4x8xbf16, #tpu.memory_space<vmem>>, vector<1x4x8xbf16>
    %85 = vector.shape_cast %84 : vector<1x4x8xbf16> to vector<4x8xbf16>
    %cst_85 = arith.constant dense<0.000000e+00> : vector<256x8xf32>
    %86 = tpu.matmul %83, %85, %cst_85 {dimension_numbers = #tpu.dot_dimension_numbers<[1], [0], [0], [1], [0, 0, 1, 1], [], []>} : vector<256x4xbf16>, vector<4x8xbf16>, vector<256x8xf32> -> vector<256x8xf32>
    %87 = arith.addf %80, %86 : vector<256x8xf32>
    %c2_86 = arith.constant 2 : index
    %c9_87 = arith.constant 9 : index
    %c0_88 = arith.constant 0 : index
    %88 = vector.load %arg13[%c2_86, %c9_87, %c0_88] : memref<18x32x4xf32, #tpu.memory_space<vmem>>, vector<16x16x4xf32>
    %89 = vector.shape_cast %88 : vector<16x16x4xf32> to vector<256x4xf32>
    %90 = arith.truncf %89 : vector<256x4xf32> to vector<256x4xbf16>
    %c8_89 = arith.constant 8 : index
    %c0_90 = arith.constant 0 : index
    %c0_91 = arith.constant 0 : index
    %91 = vector.load %arg4[%c8_89, %c0_90, %c0_91] : memref<9x4x8xbf16, #tpu.memory_space<vmem>>, vector<1x4x8xbf16>
    %92 = vector.shape_cast %91 : vector<1x4x8xbf16> to vector<4x8xbf16>
    %cst_92 = arith.constant dense<0.000000e+00> : vector<256x8xf32>
    %93 = tpu.matmul %90, %92, %cst_92 {dimension_numbers = #tpu.dot_dimension_numbers<[1], [0], [0], [1], [0, 0, 1, 1], [], []>} : vector<256x4xbf16>, vector<4x8xbf16>, vector<256x8xf32> -> vector<256x8xf32>
    %94 = arith.addf %87, %93 : vector<256x8xf32>
    %c0_93 = arith.constant 0 : index
    %c0_94 = arith.constant 0 : index
    %95 = vector.load %arg5[%c0_93, %c0_94] : memref<1x8xf32, #tpu.memory_space<vmem>>, vector<1x8xf32>
    %96 = vector.broadcast %95 : vector<1x8xf32> to vector<256x8xf32>
    %97 = arith.addf %94, %96 : vector<256x8xf32>
    %c0_95 = arith.constant 0 : index
    %c0_96 = arith.constant 0 : index
    %98 = vector.load %arg6[%c0_95, %c0_96] : memref<1x8xf32, #tpu.memory_space<vmem>>, vector<1x8xf32>
    %99 = vector.broadcast %98 : vector<1x8xf32> to vector<256x8xf32>
    %100 = arith.mulf %97, %99 : vector<256x8xf32>
    %c0_97 = arith.constant 0 : index
    %c0_98 = arith.constant 0 : index
    %101 = vector.load %arg7[%c0_97, %c0_98] : memref<1x8xf32, #tpu.memory_space<vmem>>, vector<1x8xf32>
    %102 = vector.broadcast %101 : vector<1x8xf32> to vector<256x8xf32>
    %103 = arith.addf %100, %102 : vector<256x8xf32>
    %cst_99 = arith.constant 0.000000e+00 : f32
    %104 = vector.broadcast %cst_99 : f32 to vector<256x8xf32>
    %105 = arith.cmpf ogt, %103, %104 : vector<256x8xf32>
    %cst_100 = arith.constant 0.000000e+00 : f32
    %106 = vector.broadcast %cst_100 : f32 to vector<256x8xf32>
    %107 = arith.minimumf %103, %106 : vector<256x8xf32>
    %108 = math.exp %107 : vector<256x8xf32>
    %cst_101 = arith.constant 1.000000e+00 : f32
    %109 = vector.broadcast %cst_101 : f32 to vector<256x8xf32>
    %110 = arith.subf %108, %109 : vector<256x8xf32>
    %111 = arith.select %105, %103, %110 : vector<256x8xi1>, vector<256x8xf32>
    %112 = vector.shape_cast %111 : vector<256x8xf32> to vector<16x16x8xf32>
    %c1_102 = arith.constant 1 : index
    %c8_103 = arith.constant 8 : index
    %c0_104 = arith.constant 0 : index
    %113 = vector.load %arg14[%c1_102, %c8_103, %c0_104] : memref<18x32x8xf32, #tpu.memory_space<vmem>>, vector<16x16x8xf32>
    tpu.vector_store %arg14[%c1_102, %c8_103, %c0_104], %112 {strides = array<i32>} : memref<18x32x8xf32, #tpu.memory_space<vmem>>, vector<16x16x8xf32>,
    %cst_105 = arith.constant 0.000000e+00 : f32
    %114 = vector.broadcast %cst_105 : f32 to vector<256x8xf32>
    %c0_106 = arith.constant 0 : index
    %c7_107 = arith.constant 7 : index
    %c0_108 = arith.constant 0 : index
    %115 = vector.load %arg14[%c0_106, %c7_107, %c0_108] : memref<18x32x8xf32, #tpu.memory_space<vmem>>, vector<16x16x8xf32>
    %116 = vector.shape_cast %115 : vector<16x16x8xf32> to vector<256x8xf32>
    %117 = arith.truncf %116 : vector<256x8xf32> to vector<256x8xbf16>
    %c0_109 = arith.constant 0 : index
    %c0_110 = arith.constant 0 : index
    %c0_111 = arith.constant 0 : index
    %118 = vector.load %arg8[%c0_109, %c0_110, %c0_111] : memref<9x8x8xbf16, #tpu.memory_space<vmem>>, vector<1x8x8xbf16>
    %119 = vector.shape_cast %118 : vector<1x8x8xbf16> to vector<8x8xbf16>
    %cst_112 = arith.constant dense<0.000000e+00> : vector<256x8xf32>
    %120 = tpu.matmul %117, %119, %cst_112 {dimension_numbers = #tpu.dot_dimension_numbers<[1], [0], [0], [1], [0, 0, 1, 1], [], []>} : vector<256x8xbf16>, vector<8x8xbf16>, vector<256x8xf32> -> vector<256x8xf32>
    %121 = arith.addf %114, %120 : vector<256x8xf32>
    %c0_113 = arith.constant 0 : index
    %c8_114 = arith.constant 8 : index
    %c0_115 = arith.constant 0 : index
    %122 = vector.load %arg14[%c0_113, %c8_114, %c0_115] : memref<18x32x8xf32, #tpu.memory_space<vmem>>, vector<16x16x8xf32>
    %123 = vector.shape_cast %122 : vector<16x16x8xf32> to vector<256x8xf32>
    %124 = arith.truncf %123 : vector<256x8xf32> to vector<256x8xbf16>
    %c1_116 = arith.constant 1 : index
    %c0_117 = arith.constant 0 : index
    %c0_118 = arith.constant 0 : index
    %125 = vector.load %arg8[%c1_116, %c0_117, %c0_118] : memref<9x8x8xbf16, #tpu.memory_space<vmem>>, vector<1x8x8xbf16>
    %126 = vector.shape_cast %125 : vector<1x8x8xbf16> to vector<8x8xbf16>
    %cst_119 = arith.constant dense<0.000000e+00> : vector<256x8xf32>
    %127 = tpu.matmul %124, %126, %cst_119 {dimension_numbers = #tpu.dot_dimension_numbers<[1], [0], [0], [1], [0, 0, 1, 1], [], []>} : vector<256x8xbf16>, vector<8x8xbf16>, vector<256x8xf32> -> vector<256x8xf32>
    %128 = arith.addf %121, %127 : vector<256x8xf32>
    %c0_120 = arith.constant 0 : index
    %c9_121 = arith.constant 9 : index
    %c0_122 = arith.constant 0 : index
    %129 = vector.load %arg14[%c0_120, %c9_121, %c0_122] : memref<18x32x8xf32, #tpu.memory_space<vmem>>, vector<16x16x8xf32>
    %130 = vector.shape_cast %129 : vector<16x16x8xf32> to vector<256x8xf32>
    %131 = arith.truncf %130 : vector<256x8xf32> to vector<256x8xbf16>
    %c2_123 = arith.constant 2 : index
    %c0_124 = arith.constant 0 : index
    %c0_125 = arith.constant 0 : index
    %132 = vector.load %arg8[%c2_123, %c0_124, %c0_125] : memref<9x8x8xbf16, #tpu.memory_space<vmem>>, vector<1x8x8xbf16>
    %133 = vector.shape_cast %132 : vector<1x8x8xbf16> to vector<8x8xbf16>
    %cst_126 = arith.constant dense<0.000000e+00> : vector<256x8xf32>
    %134 = tpu.matmul %131, %133, %cst_126 {dimension_numbers = #tpu.dot_dimension_numbers<[1], [0], [0], [1], [0, 0, 1, 1], [], []>} : vector<256x8xbf16>, vector<8x8xbf16>, vector<256x8xf32> -> vector<256x8xf32>
    %135 = arith.addf %128, %134 : vector<256x8xf32>
    %c1_127 = arith.constant 1 : index
    %c7_128 = arith.constant 7 : index
    %c0_129 = arith.constant 0 : index
    %136 = vector.load %arg14[%c1_127, %c7_128, %c0_129] : memref<18x32x8xf32, #tpu.memory_space<vmem>>, vector<16x16x8xf32>
    %137 = vector.shape_cast %136 : vector<16x16x8xf32> to vector<256x8xf32>
    %138 = arith.truncf %137 : vector<256x8xf32> to vector<256x8xbf16>
    %c3_130 = arith.constant 3 : index
    %c0_131 = arith.constant 0 : index
    %c0_132 = arith.constant 0 : index
    %139 = vector.load %arg8[%c3_130, %c0_131, %c0_132] : memref<9x8x8xbf16, #tpu.memory_space<vmem>>, vector<1x8x8xbf16>
    %140 = vector.shape_cast %139 : vector<1x8x8xbf16> to vector<8x8xbf16>
    %cst_133 = arith.constant dense<0.000000e+00> : vector<256x8xf32>
    %141 = tpu.matmul %138, %140, %cst_133 {dimension_numbers = #tpu.dot_dimension_numbers<[1], [0], [0], [1], [0, 0, 1, 1], [], []>} : vector<256x8xbf16>, vector<8x8xbf16>, vector<256x8xf32> -> vector<256x8xf32>
    %142 = arith.addf %135, %141 : vector<256x8xf32>
    %c1_134 = arith.constant 1 : index
    %c8_135 = arith.constant 8 : index
    %c0_136 = arith.constant 0 : index
    %143 = vector.load %arg14[%c1_134, %c8_135, %c0_136] : memref<18x32x8xf32, #tpu.memory_space<vmem>>, vector<16x16x8xf32>
    %144 = vector.shape_cast %143 : vector<16x16x8xf32> to vector<256x8xf32>
    %145 = arith.truncf %144 : vector<256x8xf32> to vector<256x8xbf16>
    %c4_137 = arith.constant 4 : index
    %c0_138 = arith.constant 0 : index
    %c0_139 = arith.constant 0 : index
    %146 = vector.load %arg8[%c4_137, %c0_138, %c0_139] : memref<9x8x8xbf16, #tpu.memory_space<vmem>>, vector<1x8x8xbf16>
    %147 = vector.shape_cast %146 : vector<1x8x8xbf16> to vector<8x8xbf16>
    %cst_140 = arith.constant dense<0.000000e+00> : vector<256x8xf32>
    %148 = tpu.matmul %145, %147, %cst_140 {dimension_numbers = #tpu.dot_dimension_numbers<[1], [0], [0], [1], [0, 0, 1, 1], [], []>} : vector<256x8xbf16>, vector<8x8xbf16>, vector<256x8xf32> -> vector<256x8xf32>
    %149 = arith.addf %142, %148 : vector<256x8xf32>
    %c1_141 = arith.constant 1 : index
    %c9_142 = arith.constant 9 : index
    %c0_143 = arith.constant 0 : index
    %150 = vector.load %arg14[%c1_141, %c9_142, %c0_143] : memref<18x32x8xf32, #tpu.memory_space<vmem>>, vector<16x16x8xf32>
    %151 = vector.shape_cast %150 : vector<16x16x8xf32> to vector<256x8xf32>
    %152 = arith.truncf %151 : vector<256x8xf32> to vector<256x8xbf16>
    %c5_144 = arith.constant 5 : index
    %c0_145 = arith.constant 0 : index
    %c0_146 = arith.constant 0 : index
    %153 = vector.load %arg8[%c5_144, %c0_145, %c0_146] : memref<9x8x8xbf16, #tpu.memory_space<vmem>>, vector<1x8x8xbf16>
    %154 = vector.shape_cast %153 : vector<1x8x8xbf16> to vector<8x8xbf16>
    %cst_147 = arith.constant dense<0.000000e+00> : vector<256x8xf32>
    %155 = tpu.matmul %152, %154, %cst_147 {dimension_numbers = #tpu.dot_dimension_numbers<[1], [0], [0], [1], [0, 0, 1, 1], [], []>} : vector<256x8xbf16>, vector<8x8xbf16>, vector<256x8xf32> -> vector<256x8xf32>
    %156 = arith.addf %149, %155 : vector<256x8xf32>
    %c2_148 = arith.constant 2 : index
    %c7_149 = arith.constant 7 : index
    %c0_150 = arith.constant 0 : index
    %157 = vector.load %arg14[%c2_148, %c7_149, %c0_150] : memref<18x32x8xf32, #tpu.memory_space<vmem>>, vector<16x16x8xf32>
    %158 = vector.shape_cast %157 : vector<16x16x8xf32> to vector<256x8xf32>
    %159 = arith.truncf %158 : vector<256x8xf32> to vector<256x8xbf16>
    %c6_151 = arith.constant 6 : index
    %c0_152 = arith.constant 0 : index
    %c0_153 = arith.constant 0 : index
    %160 = vector.load %arg8[%c6_151, %c0_152, %c0_153] : memref<9x8x8xbf16, #tpu.memory_space<vmem>>, vector<1x8x8xbf16>
    %161 = vector.shape_cast %160 : vector<1x8x8xbf16> to vector<8x8xbf16>
    %cst_154 = arith.constant dense<0.000000e+00> : vector<256x8xf32>
    %162 = tpu.matmul %159, %161, %cst_154 {dimension_numbers = #tpu.dot_dimension_numbers<[1], [0], [0], [1], [0, 0, 1, 1], [], []>} : vector<256x8xbf16>, vector<8x8xbf16>, vector<256x8xf32> -> vector<256x8xf32>
    %163 = arith.addf %156, %162 : vector<256x8xf32>
    %c2_155 = arith.constant 2 : index
    %c8_156 = arith.constant 8 : index
    %c0_157 = arith.constant 0 : index
    %164 = vector.load %arg14[%c2_155, %c8_156, %c0_157] : memref<18x32x8xf32, #tpu.memory_space<vmem>>, vector<16x16x8xf32>
    %165 = vector.shape_cast %164 : vector<16x16x8xf32> to vector<256x8xf32>
    %166 = arith.truncf %165 : vector<256x8xf32> to vector<256x8xbf16>
    %c7_158 = arith.constant 7 : index
    %c0_159 = arith.constant 0 : index
    %c0_160 = arith.constant 0 : index
    %167 = vector.load %arg8[%c7_158, %c0_159, %c0_160] : memref<9x8x8xbf16, #tpu.memory_space<vmem>>, vector<1x8x8xbf16>
    %168 = vector.shape_cast %167 : vector<1x8x8xbf16> to vector<8x8xbf16>
    %cst_161 = arith.constant dense<0.000000e+00> : vector<256x8xf32>
    %169 = tpu.matmul %166, %168, %cst_161 {dimension_numbers = #tpu.dot_dimension_numbers<[1], [0], [0], [1], [0, 0, 1, 1], [], []>} : vector<256x8xbf16>, vector<8x8xbf16>, vector<256x8xf32> -> vector<256x8xf32>
    %170 = arith.addf %163, %169 : vector<256x8xf32>
    %c2_162 = arith.constant 2 : index
    %c9_163 = arith.constant 9 : index
    %c0_164 = arith.constant 0 : index
    %171 = vector.load %arg14[%c2_162, %c9_163, %c0_164] : memref<18x32x8xf32, #tpu.memory_space<vmem>>, vector<16x16x8xf32>
    %172 = vector.shape_cast %171 : vector<16x16x8xf32> to vector<256x8xf32>
    %173 = arith.truncf %172 : vector<256x8xf32> to vector<256x8xbf16>
    %c8_165 = arith.constant 8 : index
    %c0_166 = arith.constant 0 : index
    %c0_167 = arith.constant 0 : index
    %174 = vector.load %arg8[%c8_165, %c0_166, %c0_167] : memref<9x8x8xbf16, #tpu.memory_space<vmem>>, vector<1x8x8xbf16>
    %175 = vector.shape_cast %174 : vector<1x8x8xbf16> to vector<8x8xbf16>
    %cst_168 = arith.constant dense<0.000000e+00> : vector<256x8xf32>
    %176 = tpu.matmul %173, %175, %cst_168 {dimension_numbers = #tpu.dot_dimension_numbers<[1], [0], [0], [1], [0, 0, 1, 1], [], []>} : vector<256x8xbf16>, vector<8x8xbf16>, vector<256x8xf32> -> vector<256x8xf32>
    %177 = arith.addf %170, %176 : vector<256x8xf32>
    %c0_169 = arith.constant 0 : index
    %c0_170 = arith.constant 0 : index
    %178 = vector.load %arg9[%c0_169, %c0_170] : memref<1x8xf32, #tpu.memory_space<vmem>>, vector<1x8xf32>
    %179 = vector.broadcast %178 : vector<1x8xf32> to vector<256x8xf32>
    %180 = arith.addf %177, %179 : vector<256x8xf32>
    %c0_171 = arith.constant 0 : index
    %c0_172 = arith.constant 0 : index
    %c0_173 = arith.constant 0 : index
    %c0_174 = arith.constant 0 : index
    %181 = vector.load %arg1[%c0_171, %c0_172, %c0_173, %c0_174] : memref<1x16x16x4xf32, #tpu.memory_space<vmem>>, vector<1x16x16x4xf32>
    %182 = vector.shape_cast %181 : vector<1x16x16x4xf32> to vector<16x16x4xf32>
    %183 = vector.shape_cast %182 : vector<16x16x4xf32> to vector<256x4xf32>
    %184 = arith.truncf %183 : vector<256x4xf32> to vector<256x4xbf16>
    %c0_175 = arith.constant 0 : index
    %c0_176 = arith.constant 0 : index
    %185 = vector.load %arg10[%c0_175, %c0_176] : memref<4x8xbf16, #tpu.memory_space<vmem>>, vector<4x8xbf16>
    %cst_177 = arith.constant dense<0.000000e+00> : vector<256x8xf32>
    %186 = tpu.matmul %184, %185, %cst_177 {dimension_numbers = #tpu.dot_dimension_numbers<[1], [0], [0], [1], [0, 0, 1, 1], [], []>} : vector<256x4xbf16>, vector<4x8xbf16>, vector<256x8xf32> -> vector<256x8xf32>
    %187 = arith.addf %180, %186 : vector<256x8xf32>
    %c0_178 = arith.constant 0 : index
    %c0_179 = arith.constant 0 : index
    %188 = vector.load %arg11[%c0_178, %c0_179] : memref<1x8xf32, #tpu.memory_space<vmem>>, vector<1x8xf32>
    %189 = vector.broadcast %188 : vector<1x8xf32> to vector<256x8xf32>
    %190 = arith.addf %187, %189 : vector<256x8xf32>
    %191 = vector.shape_cast %190 : vector<256x8xf32> to vector<16x16x8xf32>
    %c0_180 = arith.constant 0 : index
    %c0_181 = arith.constant 0 : index
    %c0_182 = arith.constant 0 : index
    %c0_183 = arith.constant 0 : index
    %192 = vector.load %arg12[%c0_180, %c0_181, %c0_182, %c0_183] : memref<1x16x16x8xf32, #tpu.memory_space<vmem>>, vector<1x16x16x8xf32>
    %193 = vector.shape_cast %192 : vector<1x16x16x8xf32> to vector<16x16x8xf32>
    %194 = vector.shape_cast %191 : vector<16x16x8xf32> to vector<1x16x16x8xf32>
    tpu.vector_store %arg12[%c0_180, %c0_181, %c0_182, %c0_183], %194 {strides = array<i32>} : memref<1x16x16x8xf32, #tpu.memory_space<vmem>>, vector<1x16x16x8xf32>,
    return
  }
  func.func @transform_0(%arg0: i32) -> (i32, i32, i32, i32) {
    %c0_i32 = arith.constant 0 : i32
    %c0_i32_0 = arith.constant 0 : i32
    %c0_i32_1 = arith.constant 0 : i32
    %c0_i32_2 = arith.constant 0 : i32
    return %arg0, %c0_i32, %c0_i32_0, %c0_i32_1 : i32, i32, i32, i32
  }
  func.func @transform_1(%arg0: i32) -> (i32, i32) {
    %c0_i32 = arith.constant 0 : i32
    %c0_i32_0 = arith.constant 0 : i32
    %c0_i32_1 = arith.constant 0 : i32
    return %c0_i32, %c0_i32_0 : i32, i32
  }
  func.func @transform_2(%arg0: i32) -> (i32, i32) {
    %c0_i32 = arith.constant 0 : i32
    %c0_i32_0 = arith.constant 0 : i32
    %c0_i32_1 = arith.constant 0 : i32
    return %c0_i32, %c0_i32_0 : i32, i32
  }
  func.func @transform_3(%arg0: i32) -> (i32, i32, i32) {
    %c0_i32 = arith.constant 0 : i32
    %c0_i32_0 = arith.constant 0 : i32
    %c0_i32_1 = arith.constant 0 : i32
    %c0_i32_2 = arith.constant 0 : i32
    return %c0_i32, %c0_i32_0, %c0_i32_1 : i32, i32, i32
  }
  func.func @transform_4(%arg0: i32) -> (i32, i32) {
    %c0_i32 = arith.constant 0 : i32
    %c0_i32_0 = arith.constant 0 : i32
    %c0_i32_1 = arith.constant 0 : i32
    return %c0_i32, %c0_i32_0 : i32, i32
  }
  func.func @transform_5(%arg0: i32) -> (i32, i32) {
    %c0_i32 = arith.constant 0 : i32
    %c0_i32_0 = arith.constant 0 : i32
    %c0_i32_1 = arith.constant 0 : i32
    return %c0_i32, %c0_i32_0 : i32, i32
  }
  func.func @transform_6(%arg0: i32) -> (i32, i32) {
    %c0_i32 = arith.constant 0 : i32
    %c0_i32_0 = arith.constant 0 : i32
    %c0_i32_1 = arith.constant 0 : i32
    return %c0_i32, %c0_i32_0 : i32, i32
  }
  func.func @transform_7(%arg0: i32) -> (i32, i32, i32) {
    %c0_i32 = arith.constant 0 : i32
    %c0_i32_0 = arith.constant 0 : i32
    %c0_i32_1 = arith.constant 0 : i32
    %c0_i32_2 = arith.constant 0 : i32
    return %c0_i32, %c0_i32_0, %c0_i32_1 : i32, i32, i32
  }
  func.func @transform_8(%arg0: i32) -> (i32, i32) {
    %c0_i32 = arith.constant 0 : i32
    %c0_i32_0 = arith.constant 0 : i32
    %c0_i32_1 = arith.constant 0 : i32
    return %c0_i32, %c0_i32_0 : i32, i32
  }
  func.func @transform_9(%arg0: i32) -> (i32, i32) {
    %c0_i32 = arith.constant 0 : i32
    %c0_i32_0 = arith.constant 0 : i32
    %c0_i32_1 = arith.constant 0 : i32
    return %c0_i32, %c0_i32_0 : i32, i32
  }
  func.func @transform_10(%arg0: i32) -> (i32, i32) {
    %c0_i32 = arith.constant 0 : i32
    %c0_i32_0 = arith.constant 0 : i32
    %c0_i32_1 = arith.constant 0 : i32
    return %c0_i32, %c0_i32_0 : i32, i32
  }
  func.func @transform_11(%arg0: i32) -> (i32, i32, i32, i32) {
    %c0_i32 = arith.constant 0 : i32
    %c0_i32_0 = arith.constant 0 : i32
    %c0_i32_1 = arith.constant 0 : i32
    %c0_i32_2 = arith.constant 0 : i32
    return %arg0, %c0_i32, %c0_i32_0, %c0_i32_1 : i32, i32, i32, i32
  }
}

</mosaic_0001>

<bundles_post_ra>
// kernel: tpu_custom_call.1
= control target key start
LH: loop header
LB: loop body
LE: loop exit
PB: predicated region body
PF: predicated region fallthrough
CT: control target
= control target key end

     0   :  { %s8958_s17 = smov 0   ;;  %s10941_s0 = inlined_call_operand.vmem [shape: f32[2,16,16,4], index: 0, kind: input, shape index: {}]   ;;  %s10942_s1 = inlined_call_operand.vmem [shape: f32[1,4], index: 1, kind: input, shape index: {}]   ;;  %s10943_s2 = inlined_call_operand.vmem [shape: f32[1,4], index: 2, kind: input, shape index: {}]   ;;  %s10944_s3 = inlined_call_operand.vmem [shape: bf16[9,4,8], index: 3, kind: input, shape index: {}]   ;;  %s10945_s4 = inlined_call_operand.vmem [shape: f32[1,8], index: 4, kind: input, shape index: {}]   ;;  %s10946_s5 = inlined_call_operand.vmem [shape: f32[1,8], index: 5, kind: input, shape index: {}]   ;;  %s10947_s6 = inlined_call_operand.vmem [shape: f32[1,8], index: 6, kind: input, shape index: {}]   ;;  %s10948_s7 = inlined_call_operand.vmem [shape: bf16[9,8,8], index: 7, kind: input, shape index: {}]   ;;  %s10949_s8 = inlined_call_operand.vmem [shape: f32[1,8], index: 8, kind: input, shape index: {}]   ;;  %s10950_s9 = inlined_call_operand.vmem [shape: bf16[4,8], index: 9, kind: input, shape index: {}]   ;;  %s10951_s10 = inlined_call_operand.vmem [shape: f32[1,8], index: 10, kind: input, shape index: {}]   ;;  %s10952_s11 = inlined_call_operand.vmem [shape: f32[2,16,16,8], index: 11, kind: output, shape index: {}]  }
   0x1 LB: > { %s6781_s18 = sadd.s32 4294967295, %s8895_s17   ;;  %p6785_p0 = scmp.ge.s32.totalorder %s8895_s17, 1  ;;  %s8895_s17 = sphi %s8958_s17, %s21_s17  }
   0x2   : > { %p337_p1 = scmp.lt.s32.totalorder %s8895_s17, 3 }
   0x4   : > { %p338_p2 = pnand %p6785_p0, %p337_p1 }
   0x6   : > { %341 = sbr.rel (%p338_p2) target bundleno = 1672 (0x688), region = 64 }
   0xd   : > { %v6824_v0 = vld [vmem:[%s10944_s3 + $0x2] sm:$0x3]  ;;  %vm962_vm0 = vcmask 1041408   ;;  %vm388_vm1 = vcmask 31744   ;;  %p8971_p3 = scmp.lt.s32.totalorder %s6781_s18, 1  ;;  %v8897_v2 = vmov 0.0  }
   0xe   : > { %8732 = vmatprep.subr.msk.bf16.mxu0 %vm962_vm0, %v6824_v0  ;;  %v964_v1 = vsel %vm962_vm0, %v6824_v0, 0  ;;  %390 = vst.msk [vmem:[#allocation2 + $0x8] sm:$0xff] %vm388_vm1, %v8897_v2  ;;  %391 = vst.msk [vmem:[#allocation2 + $0x10] sm:$0xff] %vm388_vm1, %v8897_v2  ;;  %v863_v3 = vld [vmem:[%s10944_s3] sm:$0x3] }
   0xf   : > { %389 = vst.msk [vmem:[#allocation2] sm:$0xff] %vm388_vm1, %v8897_v2  ;;  %392 = vst.msk [vmem:[#allocation2 + $0x18] sm:$0xff] %vm388_vm1, %v8897_v2  ;;  %7509 = vmatpush3.bf16.msra.mxu0 %v964_v1  ;;  %s10959_s18 = smov (!%p8971_p3, %s6781_s18), 1  ;;  %v9079_v4 = vld [vmem:[%s10942_s1] ss:$0 sm:$0xff]  ;;  %v9133_v37 = vsel %vm962_vm0, %v863_v3, 0 }
  0x10   : > { %394 = vst.msk [vmem:[#allocation2 + $0x220] sm:$0xff] %vm388_vm1, %v8897_v2  ;;  %395 = vst.msk [vmem:[#allocation2 + $0x228] sm:$0xff] %vm388_vm1, %v8897_v2  ;;  %8733 = vmatprep.subr.msk.bf16.mxu0 %vm962_vm0, %v863_v3  ;;  %s7183_s24 = sshll.u32 %s10959_s18, 8  ;;  %v9091_v5 = vld [vmem:[%s10943_s2] ss:$0 sm:$0xff] }
  0x11   : > { %396 = vst.msk [vmem:[#allocation2 + $0x230] sm:$0xff] %vm388_vm1, %v8897_v2  ;;  %397 = vst.msk [vmem:[#allocation2 + $0x238] sm:$0xff] %vm388_vm1, %v8897_v2  ;;  %s9086_s29 = scalar_lea.vmem %s10941_s0, %s7183_s24  ;;  %s10800_s13 = scalar_lea.vmem %s10952_s11, %s7183_s24 }
  0x12   : > { %399 = vst.msk [vmem:[#allocation2 + $0x20] sm:$0xff] %vm388_vm1, %v8897_v2  ;;  %400 = vst.msk [vmem:[#allocation2 + $0x40] sm:$0xff] %vm388_vm1, %v8897_v2  ;;  %v480_v6 = vld [vmem:[%s9086_s29] sm:$0xff]  ;;  %v481_v7 = vld [vmem:[%s9086_s29 + $0x8] sm:$0xff] }
  0x13   : > { %401 = vst.msk [vmem:[#allocation2 + $0x60] sm:$0xff] %vm388_vm1, %v8897_v2  ;;  %402 = vst.msk [vmem:[#allocation2 + $0x80] sm:$0xff] %vm388_vm1, %v8897_v2  ;;  %v482_v8 = vld [vmem:[%s9086_s29 + $0x10] sm:$0xff]  ;;  %v519_v9 = vmul.f32 %v9079_v4, %v480_v6  ;;  %v520_v10 = vmul.f32 %v9079_v4, %v481_v7  ;;  %v483_v11 = vld [vmem:[%s9086_s29 + $0x18] sm:$0xff] }
  0x14   : > { %403 = vst.msk [vmem:[#allocation2 + $0xa0] sm:$0xff] %vm388_vm1, %v8897_v2  ;;  %404 = vst.msk [vmem:[#allocation2 + $0xc0] sm:$0xff] %vm388_vm1, %v8897_v2  ;;  %v521_v12 = vmul.f32 %v9079_v4, %v482_v8  ;;  %v484_v13 = vld [vmem:[%s9086_s29 + $0x20] sm:$0xff]  ;;  %v485_v14 = vld [vmem:[%s9086_s29 + $0x28] sm:$0xff]  ;;  %v522_v17 = vmul.f32 %v9079_v4, %v483_v11 }
  0x15   : > { %405 = vst.msk [vmem:[#allocation2 + $0xe0] sm:$0xff] %vm388_vm1, %v8897_v2  ;;  %406 = vst.msk [vmem:[#allocation2 + $0x100] sm:$0xff] %vm388_vm1, %v8897_v2  ;;  %v864_v15 = vld [vmem:[#allocation2 + $0x8] sm:$0xff]  ;;  %v865_v16 = vld [vmem:[#allocation2 + $0x10] sm:$0xff]  ;;  %v523_v18 = vmul.f32 %v9079_v4, %v484_v13  ;;  %v524_v19 = vmul.f32 %v9079_v4, %v485_v14  ;;  %v9107_v22 = vadd.f32 %v9091_v5, %v519_v9 }
  0x16   : > { %407 = vst.msk [vmem:[#allocation2 + $0x120] sm:$0xff] %vm388_vm1, %v8897_v2  ;;  %408 = vst.msk [vmem:[#allocation2 + $0x140] sm:$0xff] %vm388_vm1, %v8897_v2  ;;  %v486_v20 = vld [vmem:[%s9086_s29 + $0x30] sm:$0xff]  ;;  %v896_v21 = vpack.c.bf16 %v865_v16, %v864_v15  ;;  %v9110_v23 = vadd.f32 %v9091_v5, %v520_v10  ;;  %v9113_v24 = vadd.f32 %v9091_v5, %v521_v12  ;;  %v487_v33 = vld [vmem:[%s9086_s29 + $0x38] sm:$0xff] }
  0x17   : > { %409 = vst.msk [vmem:[#allocation2 + $0x160] sm:$0xff] %vm388_vm1, %v8897_v2  ;;  %410 = vst.msk [vmem:[#allocation2 + $0x180] sm:$0xff] %vm388_vm1, %v8897_v2  ;;  %v9116_v25 = vadd.f32 %v9091_v5, %v522_v17  ;;  %v9119_v26 = vadd.f32 %v9091_v5, %v523_v18  ;;  %v9122_v27 = vadd.f32 %v9091_v5, %v524_v19  ;;  %v622_v28 = vmin.f32 %v9107_v22, 0.0  ;;  %v488_v34 = vld [vmem:[%s9086_s29 + $0x40] sm:$0xff]  ;;  %v489_v38 = vld [vmem:[%s9086_s29 + $0x48] sm:$0xff] }
  0x18   : > { %411 = vst.msk [vmem:[#allocation2 + $0x1a0] sm:$0xff] %vm388_vm1, %v8897_v2  ;;  %412 = vst.msk [vmem:[#allocation2 + $0x1c0] sm:$0xff] %vm388_vm1, %v8897_v2  ;;  %7510 = vmatprep.mubr.msk.bf16.mxu0 %vm388_vm1, %v896_v21  ;;  %v623_v29 = vmin.f32 %v9110_v23, 0.0  ;;  %v525_v30 = vmul.f32 %v9079_v4, %v486_v20  ;;  %v624_v31 = vmin.f32 %v9113_v24, 0.0  ;;  %v526_v43 = vmul.f32 %v9079_v4, %v487_v33  ;;  %v490_v46 = vld [vmem:[%s9086_s29 + $0x50] sm:$0xff]  ;;  %v491_v54 = vld [vmem:[%s9086_s29 + $0x58] sm:$0xff] }
  0x19   : > { %413 = vst.msk [vmem:[#allocation2 + $0x1e0] sm:$0xff] %vm388_vm1, %v8897_v2  ;;  %414 = vst.msk [vmem:[#allocation2 + $0x200] sm:$0xff] %vm388_vm1, %v8897_v2  ;;  %v625_v32 = vmin.f32 %v9116_v25, 0.0  ;;  %v654_v35 = vmul.f32 1.442695, %v622_v28  ;;  %v626_v41 = vmin.f32 %v9119_v26, 0.0  ;;  %v527_v45 = vmul.f32 %v9079_v4, %v488_v34 }
  0x1a   : > { %417 = vst.msk [vmem:[#allocation2 + $0x38] sm:$0xff] %vm388_vm1, %v8897_v2  ;;  %418 = vst.msk [vmem:[#allocation2 + $0x58] sm:$0xff] %vm388_vm1, %v8897_v2  ;;  %v656_v36 = vmul.f32 1.442695, %v623_v29  ;;  %v658_v39 = vmul.f32 1.442695, %v624_v31  ;;  %v9140_v44 = vadd.f32 %v9091_v5, %v525_v30  ;;  %v528_v49 = vmul.f32 %v9079_v4, %v489_v38 }
  0x1b   : > { %419 = vst.msk [vmem:[#allocation2 + $0x78] sm:$0xff] %vm388_vm1, %v8897_v2  ;;  %420 = vst.msk [vmem:[#allocation2 + $0x98] sm:$0xff] %vm388_vm1, %v8897_v2  ;;  %v660_v40 = vmul.f32 1.442695, %v625_v32  ;;  %v627_v42 = vmin.f32 %v9122_v27, 0.0  ;;  %8761 = vpow2.f32 %v654_v35  ;;  %vm590_vm2 = vcmp.gt.f32.partialorder %v9107_v22, 0.0 }
  0x1c   : > { %421 = vst.msk [vmem:[#allocation2 + $0xb8] sm:$0xff] %vm388_vm1, %v8897_v2  ;;  %422 = vst.msk [vmem:[#allocation2 + $0xd8] sm:$0xff] %vm388_vm1, %v8897_v2  ;;  %8763 = vpow2.f32 %v656_v36  ;;  %v662_v47 = vmul.f32 1.442695, %v626_v41  ;;  %v9147_v50 = vadd.f32 %v9091_v5, %v526_v43  ;;  %v628_v51 = vmin.f32 %v9140_v44, 0.0  ;;  %v492_v58 = vld [vmem:[%s9086_s29 + $0x60] sm:$0xff] }
  0x1d   : > { %423 = vst.msk [vmem:[#allocation2 + $0xf8] sm:$0xff] %vm388_vm1, %v8897_v2  ;;  %424 = vst.msk [vmem:[#allocation2 + $0x118] sm:$0xff] %vm388_vm1, %v8897_v2  ;;  %v664_v48 = vmul.f32 1.442695, %v627_v42  ;;  %8765 = vpow2.f32 %v658_v39  ;;  %v9151_v52 = vadd.f32 %v9091_v5, %v527_v45  ;;  %v9154_v53 = vadd.f32 %v9091_v5, %v528_v49  ;;  %v493_v59 = vld [vmem:[%s9086_s29 + $0x68] sm:$0xff]  ;;  %v494_v11 = vld [vmem:[%s9086_s29 + $0x70] sm:$0xff] }
  0x1e   : > { %425 = vst.msk [vmem:[#allocation2 + $0x138] sm:$0xff] %vm388_vm1, %v8897_v2  ;;  %426 = vst.msk [vmem:[#allocation2 + $0x158] sm:$0xff] %vm388_vm1, %v8897_v2  ;;  %8767 = vpow2.f32 %v660_v40  ;;  %v529_v55 = vmul.f32 %v9079_v4, %v490_v46  ;;  %vm591_vm3 = vcmp.gt.f32.partialorder %v9110_v23, 0.0  ;;  %v629_v56 = vmin.f32 %v9147_v50, 0.0  ;;  %v495_v29 = vld [vmem:[%s9086_s29 + $0x78] sm:$0xff]  ;;  %v496_v40 = vld [vmem:[%s9086_s29 + $0x80] sm:$0xff] }
  0x1f   : > { %427 = vst.msk [vmem:[#allocation2 + $0x178] sm:$0xff] %vm388_vm1, %v8897_v2  ;;  %428 = vst.msk [vmem:[#allocation2 + $0x198] sm:$0xff] %vm388_vm1, %v8897_v2  ;;  %8769 = vpow2.f32 %v662_v47  ;;  %v666_v57 = vmul.f32 1.442695, %v628_v51  ;;  %vm592_vm4 = vcmp.gt.f32.partialorder %v9113_v24, 0.0  ;;  %vm593_vm5 = vcmp.gt.f32.partialorder %v9116_v25, 0.0 }
  0x20   : > { %429 = vst.msk [vmem:[#allocation2 + $0x1b8] sm:$0xff] %vm388_vm1, %v8897_v2  ;;  %430 = vst.msk [vmem:[#allocation2 + $0x1d8] sm:$0xff] %vm388_vm1, %v8897_v2  ;;  %8771 = vpow2.f32 %v664_v48  ;;  %v630_v60 = vmin.f32 %v9151_v52, 0.0  ;;  %vm594_vm6 = vcmp.gt.f32.partialorder %v9119_v26, 0.0  ;;  %v668_v61 = vmul.f32 1.442695, %v629_v56 }
  0x21   : > { %431 = vst.msk [vmem:[#allocation2 + $0x1f8] sm:$0xff] %vm388_vm1, %v8897_v2  ;;  %432 = vst.msk [vmem:[#allocation2 + $0x218] sm:$0xff] %vm388_vm1, %v8897_v2  ;;  %8773 = vpow2.f32 %v666_v57  ;;  %v631_v62 = vmin.f32 %v9154_v53, 0.0  ;;  %v530_v63 = vmul.f32 %v9079_v4, %v491_v54  ;;  %v9169_v1 = vadd.f32 %v9091_v5, %v529_v55  ;;  %v497_v45 = vld [vmem:[%s9086_s29 + $0x88] sm:$0xff] }
  0x22   : > { %398 = vst.msk [vmem:[#allocation2] sm:$0xff] %vm388_vm1, %v8897_v2  ;;  %415 = vst.msk [vmem:[#allocation2 + $0x220] sm:$0xff] %vm388_vm1, %v8897_v2  ;;  %v670_v0 = vmul.f32 1.442695, %v630_v60  ;;  %v531_v3 = vmul.f32 %v9079_v4, %v492_v58  ;;  %v532_v6 = vmul.f32 %v9079_v4, %v493_v59  ;;  %vm595_vm7 = vcmp.gt.f32.partialorder %v9122_v27, 0.0 }
  0x23   : > { %416 = vst.msk [vmem:[#allocation2 + $0x18] sm:$0xff] %vm388_vm1, %v8897_v2  ;;  %433 = vst.msk [vmem:[#allocation2 + $0x238] sm:$0xff] %vm388_vm1, %v8897_v2  ;;  %8775 = vpow2.f32 %v668_v61  ;;  %v672_v7 = vmul.f32 1.442695, %v631_v62  ;;  %v9175_v8 = vadd.f32 %v9091_v5, %v530_v63  ;;  %vm596_vm8 = vcmp.gt.f32.partialorder %v9140_v44, 0.0 }
  0x24   : > { %8777 = vpow2.f32 %v670_v0  ;;  %v632_v9 = vmin.f32 %v9169_v1, 0.0  ;;  %v9180_v10 = vadd.f32 %v9091_v5, %v531_v3  ;;  %vm597_vm9 = vcmp.gt.f32.partialorder %v9147_v50, 0.0 }
  0x25   : > { %v8762_v12 = vpop.eup %8761  ;;  %8779 = vpow2.f32 %v672_v7  ;;  %v633_v13 = vmin.f32 %v9175_v8, 0.0  ;;  %v9186_v14 = vadd.f32 %v9091_v5, %v532_v6  ;;  %vm598_vm10 = vcmp.gt.f32.partialorder %v9151_v52, 0.0 }
  0x26   : > { %v8764_v15 = vpop.eup %8763  ;;  %v6792_v16 = vadd.f32 -1.0, %v8762_v12  ;;  %v674_v17 = vmul.f32 1.442695, %v632_v9  ;;  %v634_v18 = vmin.f32 %v9180_v10, 0.0  ;;  %vm599_vm11 = vcmp.gt.f32.partialorder %v9154_v53, 0.0 }
  0x27   : > { %v8766_v19 = vpop.eup %8765  ;;  %v6793_v20 = vadd.f32 -1.0, %v8764_v15  ;;  %v676_v21 = vmul.f32 1.442695, %v633_v13  ;;  %v635_v28 = vmin.f32 %v9186_v14, 0.0  ;;  %v533_v30 = vmul.f32 %v9079_v4, %v494_v11  ;;  %v499_v11 = vld [vmem:[%s9086_s29 + $0x98] sm:$0xff] }
  0x28   : > { %v8768_v31 = vpop.eup %8767  ;;  %v750_v32 = vsel %vm590_vm2, %v9107_v22, %v6792_v16  ;;  %v6794_v33 = vadd.f32 -1.0, %v8766_v19  ;;  %8781 = vpow2.f32 %v674_v17  ;;  %v678_v34 = vmul.f32 1.442695, %v634_v18  ;;  %v500_v16 = vld [vmem:[%s9086_s29 + $0xa0] sm:$0xff] }
  0x29   : > { %v8770_v35 = vpop.eup %8769  ;;  %v751_v36 = vsel %vm591_vm3, %v9110_v23, %v6793_v20  ;;  %783 = vst.msk [vmem:[#allocation2 + $0x28] sm:$0xff] %vm388_vm1, %v750_v32  ;;  %v6795_v38 = vadd.f32 -1.0, %v8768_v31  ;;  %8783 = vpow2.f32 %v676_v21  ;;  %v680_v39 = vmul.f32 1.442695, %v635_v28 }
  0x2a   : > { %v8772_v41 = vpop.eup %8771  ;;  %784 = vst.msk [vmem:[#allocation2 + $0x30] sm:$0xff] %vm388_vm1, %v751_v36  ;;  %v752_v22 = vsel %vm592_vm4, %v9113_v24, %v6794_v33  ;;  %v6796_v42 = vadd.f32 -1.0, %v8770_v35  ;;  %8785 = vpow2.f32 %v678_v34  ;;  %v534_v43 = vmul.f32 %v9079_v4, %v495_v29 }
  0x2b   : > { %v8774_v46 = vpop.eup %8773  ;;  %v753_v23 = vsel %vm593_vm5, %v9116_v25, %v6795_v38  ;;  %785 = vst.msk [vmem:[#allocation2 + $0x48] sm:$0xff] %vm388_vm1, %v752_v22  ;;  %v6797_v47 = vadd.f32 -1.0, %v8772_v41  ;;  %8787 = vpow2.f32 %v680_v39  ;;  %v9213_v48 = vadd.f32 %v9091_v5, %v533_v30 }
  0x2c   : > { %786 = vst.msk [vmem:[#allocation2 + $0x50] sm:$0xff] %vm388_vm1, %v753_v23  ;;  %v754_v24 = vsel %vm594_vm6, %v9119_v26, %v6796_v42  ;;  %v6798_v49 = vadd.f32 -1.0, %v8774_v46  ;;  %v9220_v51 = vadd.f32 %v9091_v5, %v534_v43  ;;  %v535_v25 = vmul.f32 %v9079_v4, %v496_v40  ;;  %v498_v26 = vld [vmem:[%s9086_s29 + $0x90] sm:$0xff] }
  0x2d   : > { %v8776_v54 = vpop.eup %8775  ;;  %v755_v55 = vsel %vm595_vm7, %v9122_v27, %v6797_v47  ;;  %787 = vst.msk [vmem:[#allocation2 + $0x68] sm:$0xff] %vm388_vm1, %v754_v24  ;;  %vm600_vm12 = vcmp.gt.f32.partialorder %v9169_v1, 0.0  ;;  %v636_v56 = vmin.f32 %v9213_v48, 0.0  ;;  %v536_v57 = vmul.f32 %v9079_v4, %v497_v45  ;;  %v501_v45 = vld [vmem:[%s9086_s29 + $0xa8] sm:$0xff]  ;;  %v502_v47 = vld [vmem:[%s9086_s29 + $0xb0] sm:$0xff]  ;;  %v503_v24 = vld [vmem:[%s9086_s29 + $0xb8] sm:$0xff] }
  0x2e   : > { %v8778_v58 = vpop.eup %8777  ;;  %788 = vst.msk [vmem:[#allocation2 + $0x70] sm:$0xff] %vm388_vm1, %v755_v55  ;;  %v6799_v59 = vadd.f32 -1.0, %v8776_v54  ;;  %v756_v60 = vsel %vm596_vm8, %v9140_v44, %v6798_v49  ;;  %vm601_vm13 = vcmp.gt.f32.partialorder %v9175_v8, 0.0  ;;  %v637_v27 = vmin.f32 %v9220_v51, 0.0 }
  0x2f   : > { %v8780_v61 = vpop.eup %8779  ;;  %789 = vst.msk [vmem:[#allocation2 + $0x88] sm:$0xff] %vm388_vm1, %v756_v60  ;;  %v6800_v62 = vadd.f32 -1.0, %v8778_v58  ;;  %v682_v63 = vmul.f32 1.442695, %v636_v56  ;;  %v9239_v0 = vadd.f32 %v9091_v5, %v535_v25  ;;  %v9242_v3 = vadd.f32 %v9091_v5, %v536_v57 }
  0x30   : > { %v866_v6 = vld [vmem:[#allocation2 + $0x28] sm:$0xff]  ;;  %v757_v44 = vsel %vm597_vm9, %v9147_v50, %v6799_v59  ;;  %v6801_v7 = vadd.f32 -1.0, %v8780_v61  ;;  %v684_v9 = vmul.f32 1.442695, %v637_v27  ;;  %v537_v12 = vmul.f32 %v9079_v4, %v498_v26 }
  0x31   : > { %v867_v13 = vld [vmem:[#allocation2 + $0x30] sm:$0xff]  ;;  %790 = vst.msk [vmem:[#allocation2 + $0x90] sm:$0xff] %vm388_vm1, %v757_v44  ;;  %v758_v15 = vsel %vm598_vm10, %v9151_v52, %v6800_v62  ;;  %vm602_vm14 = vcmp.gt.f32.partialorder %v9180_v10, 0.0  ;;  %vm603_vm15 = vcmp.gt.f32.partialorder %v9186_v14, 0.0  ;;  %8789 = vpow2.f32 %v682_v63 }
  0x32   : > { %v8782_v17 = vpop.eup %8781  ;;  %v897_v50 = vpack.c.bf16 %v867_v13, %v866_v6  ;;  %v868_v18 = vld [vmem:[#allocation2 + $0x48] sm:$0xff]  ;;  %v759_v19 = vsel %vm599_vm11, %v9154_v53, %v6801_v7  ;;  %791 = vst.msk [vmem:[#allocation2 + $0xa8] sm:$0xff] %vm388_vm1, %v758_v15  ;;  %8791 = vpow2.f32 %v684_v9  ;;  %v638_v20 = vmin.f32 %v9239_v0, 0.0  ;;  %v9270_v53 = vld [vmem:[%s10944_s3 + $0x4] sm:$0x3] }
  0x33   : > { %v8784_v21 = vpop.eup %8783  ;;  %v869_v52 = vld [vmem:[#allocation2 + $0x50] sm:$0xff]  ;;  %792 = vst.msk [vmem:[#allocation2 + $0xb0] sm:$0xff] %vm388_vm1, %v759_v19  ;;  %v6802_v28 = vadd.f32 -1.0, %v8782_v17  ;;  %v639_v29 = vmin.f32 %v9242_v3, 0.0  ;;  %v538_v30 = vmul.f32 %v9079_v4, %v499_v11  ;;  %v9265_v31 = vadd.f32 %v9091_v5, %v537_v12  ;;  %v505_v17 = vld [vmem:[%s9086_s29 + $0xc8] sm:$0xff] }
  0x34   : > { %v8786_v32 = vpop.eup %8785  ;;  %7511 = vmatmul.mubr.msk.bf16.vlgmr.msra.gmra.mrb[0].mxu0 %vm388_vm1, %v897_v50  ;;  %v898_v33 = vpack.c.bf16 %v869_v52, %v868_v18  ;;  %v870_v34 = vld [vmem:[#allocation2 + $0x68] sm:$0xff]  ;;  %v6803_v35 = vadd.f32 -1.0, %v8784_v21  ;;  %v686_v36 = vmul.f32 1.442695, %v638_v20  ;;  %v539_v38 = vmul.f32 %v9079_v4, %v500_v16  ;;  %v506_v50 = vld [vmem:[%s9086_s29 + $0xd0] sm:$0xff] }
  0x35   : > { %v8788_v39 = vpop.eup %8787  ;;  %7543 = vmatpush3.bf16.msra.mxu0 %v9133_v37  ;;  %v871_v40 = vld [vmem:[#allocation2 + $0x70] sm:$0xff]  ;;  %v760_v41 = vsel %vm600_vm12, %v9169_v1, %v6802_v28  ;;  %v6804_v22 = vadd.f32 -1.0, %v8786_v32  ;;  %v688_v42 = vmul.f32 1.442695, %v639_v29  ;;  %v9279_v43 = vadd.f32 %v9091_v5, %v538_v30 }
  0x36   : > { %7514 = vmatprep.mubr.msk.bf16.mxu0 %vm388_vm1, %v898_v33  ;;  %v872_v46 = vld [vmem:[#allocation2 + $0x88] sm:$0xff]  ;;  %v761_v23 = vsel %vm601_vm13, %v9175_v8, %v6803_v35  ;;  %793 = vst.msk [vmem:[#allocation2 + $0xc8] sm:$0xff] %vm388_vm1, %v760_v41  ;;  %v6805_v37 = vadd.f32 -1.0, %v8788_v39  ;;  %8793 = vpow2.f32 %v686_v36  ;;  %8734 = vmatprep.subr.msk.bf16.mxu0 %vm962_vm0, %v9270_v53  ;;  %v899_v1 = vpack.c.bf16 %v871_v40, %v870_v34  ;;  %v507_v34 = vld [vmem:[%s9086_s29 + $0xd8] sm:$0xff] }
  0x37   : > { %794 = vst.msk [vmem:[#allocation2 + $0xd0] sm:$0xff] %vm388_vm1, %v761_v23  ;;  %v762_v49 = vsel %vm602_vm14, %v9180_v10, %v6804_v22  ;;  %8795 = vpow2.f32 %v688_v42  ;;  %v640_v54 = vmin.f32 %v9265_v31, 0.0  ;;  %v641_v55 = vmin.f32 %v9279_v43, 0.0  ;;  %v508_v42 = vld [vmem:[%s9086_s29 + $0xe0] sm:$0xff] }
  0x38   : > { %v873_v25 = vld [vmem:[#allocation2 + $0x90] sm:$0xff]  ;;  %v763_v8 = vsel %vm603_vm15, %v9186_v14, %v6805_v37  ;;  %795 = vst.msk [vmem:[#allocation2 + $0xe8] sm:$0xff] %vm388_vm1, %v762_v49  ;;  %v540_v56 = vmul.f32 %v9079_v4, %v501_v45  ;;  %v9306_v10 = vadd.f32 %v9091_v5, %v539_v38  ;;  %v541_v26 = vmul.f32 %v9079_v4, %v502_v47  ;;  %v504_v14 = vld [vmem:[%s9086_s29 + $0xc0] sm:$0xff]  ;;  %v509_v37 = vld [vmem:[%s9086_s29 + $0xe8] sm:$0xff] }
  0x39   : > { %v9302_v57 = vpack.c.bf16 %v873_v25, %v872_v46  ;;  %796 = vst.msk [vmem:[#allocation2 + $0xf0] sm:$0xff] %vm388_vm1, %v763_v8  ;;  %v542_v58 = vmul.f32 %v9079_v4, %v503_v24  ;;  %v690_v59 = vmul.f32 1.442695, %v640_v54  ;;  %v692_v60 = vmul.f32 1.442695, %v641_v55  ;;  %v874_v44 = vld [vmem:[#allocation2 + $0xa8] sm:$0xff] }
  0x3a   : > { %v9312_v27 = vadd.f32 %v9091_v5, %v540_v56  ;;  %vm604_vm2 = vcmp.gt.f32.partialorder %v9213_v48, 0.0  ;;  %vm605_vm3 = vcmp.gt.f32.partialorder %v9220_v51, 0.0  ;;  %v642_v62 = vmin.f32 %v9306_v10, 0.0  ;;  %v875_v7 = vld [vmem:[#allocation2 + $0xb0] sm:$0xff] }
  0x3b   : > { %v8790_v61 = vpop.eup %8789  ;;  %v9318_v63 = vadd.f32 %v9091_v5, %v541_v26  ;;  %8797 = vpow2.f32 %v690_v59  ;;  %v543_v12 = vmul.f32 %v9079_v4, %v504_v14  ;;  %v9326_v16 = vadd.f32 %v9091_v5, %v542_v58 }
  0x3c   : > { %v8792_v6 = vpop.eup %8791  ;;  %7515 = vmatmul.mubr.msk.bf16.gmra.mrb[4].mxu0 %vm388_vm1, %v899_v1  ;;  %v6806_v9 = vadd.f32 -1.0, %v8790_v61  ;;  %v643_v11 = vmin.f32 %v9312_v27, 0.0  ;;  %8799 = vpow2.f32 %v692_v60  ;;  %v694_v15 = vmul.f32 1.442695, %v642_v62 }
  0x3d   : > { %7518 = vmatprep.mubr.msk.bf16.mxu0 %vm388_vm1, %v9302_v57  ;;  %v6807_v13 = vadd.f32 -1.0, %v8792_v6  ;;  %v876_v18 = vld [vmem:[#allocation2 + $0xc8] sm:$0xff]  ;;  %vm606_vm4 = vcmp.gt.f32.partialorder %v9239_v0, 0.0  ;;  %v644_v52 = vmin.f32 %v9318_v63, 0.0  ;;  %v9335_v28 = vpack.c.bf16 %v875_v7, %v874_v44 }
  0x3e   : > { %v877_v19 = vld [vmem:[#allocation2 + $0xd0] sm:$0xff]  ;;  %v764_v20 = vsel %vm604_vm2, %v9213_v48, %v6806_v9  ;;  %v696_v21 = vmul.f32 1.442695, %v643_v11  ;;  %vm607_vm5 = vcmp.gt.f32.partialorder %v9242_v3, 0.0  ;;  %8801 = vpow2.f32 %v694_v15 }
  0x3f   : > { %v765_v29 = vsel %vm605_vm3, %v9220_v51, %v6807_v13  ;;  %797 = vst.msk [vmem:[#allocation2 + $0x108] sm:$0xff] %vm388_vm1, %v764_v20  ;;  %v645_v48 = vmin.f32 %v9326_v16, 0.0  ;;  %v698_v32 = vmul.f32 1.442695, %v644_v52  ;;  %v544_v33 = vmul.f32 %v9079_v4, %v505_v17  ;;  %v878_v47 = vld [vmem:[#allocation2 + $0xe8] sm:$0xff] }
  0x40   : > { %v8794_v30 = vpop.eup %8793  ;;  %798 = vst.msk [vmem:[#allocation2 + $0x110] sm:$0xff] %vm388_vm1, %v765_v29  ;;  %8803 = vpow2.f32 %v696_v21  ;;  %v9346_v36 = vpack.c.bf16 %v877_v19, %v876_v18  ;;  %v9349_v38 = vadd.f32 %v9091_v5, %v543_v12  ;;  %v545_v39 = vmul.f32 %v9079_v4, %v506_v50  ;;  %v879_v24 = vld [vmem:[#allocation2 + $0xf0] sm:$0xff] }
  0x41   : > { %v8796_v35 = vpop.eup %8795  ;;  %v6808_v51 = vadd.f32 -1.0, %v8794_v30  ;;  %8805 = vpow2.f32 %v698_v32  ;;  %v700_v41 = vmul.f32 1.442695, %v645_v48  ;;  %v9353_v22 = vadd.f32 %v9091_v5, %v544_v33 }
  0x42   : > { %v6809_v40 = vadd.f32 -1.0, %v8796_v35  ;;  %v646_v46 = vmin.f32 %v9349_v38, 0.0  ;;  %v546_v23 = vmul.f32 %v9079_v4, %v507_v34  ;;  %v9373_v25 = vadd.f32 %v9091_v5, %v545_v39 }
  0x43   : > { %v766_v45 = vsel %vm606_vm4, %v9239_v0, %v6808_v51  ;;  %8807 = vpow2.f32 %v700_v41  ;;  %v647_v49 = vmin.f32 %v9353_v22, 0.0  ;;  %v547_v54 = vmul.f32 %v9079_v4, %v508_v42 }
  0x44   : > { %7519 = vmatmul.mubr.msk.bf16.gmra.mrb[8].mxu0 %vm388_vm1, %v9335_v28  ;;  %v767_v1 = vsel %vm607_vm5, %v9242_v3, %v6809_v40  ;;  %799 = vst.msk [vmem:[#allocation2 + $0x128] sm:$0xff] %vm388_vm1, %v766_v45  ;;  %v702_v0 = vmul.f32 1.442695, %v646_v46  ;;  %v9376_v8 = vadd.f32 %v9091_v5, %v546_v23  ;;  %vm608_vm6 = vcmp.gt.f32.partialorder %v9265_v31, 0.0 }
  0x45   : > { %7522 = vmatprep.mubr.msk.bf16.mxu0 %vm388_vm1, %v9346_v36  ;;  %800 = vst.msk [vmem:[#allocation2 + $0x130] sm:$0xff] %vm388_vm1, %v767_v1  ;;  %v8798_v3 = vpop.eup %8797  ;;  %vm609_vm7 = vcmp.gt.f32.partialorder %v9279_v43, 0.0  ;;  %v704_v56 = vmul.f32 1.442695, %v647_v49  ;;  %v548_v26 = vmul.f32 %v9079_v4, %v509_v37  ;;  %v9382_v14 = vpack.c.bf16 %v879_v24, %v878_v47 }
  0x46   : > { %v880_v55 = vld [vmem:[#allocation2 + $0x108] sm:$0xff]  ;;  %v8800_v58 = vpop.eup %8799  ;;  %v6810_v60 = vadd.f32 -1.0, %v8798_v3  ;;  %vm610_vm8 = vcmp.gt.f32.partialorder %v9306_v10, 0.0  ;;  %8809 = vpow2.f32 %v702_v0  ;;  %v648_v6 = vmin.f32 %v9373_v25, 0.0 }
  0x47   : > { %v881_v59 = vld [vmem:[#allocation2 + $0x110] sm:$0xff]  ;;  %v6811_v62 = vadd.f32 -1.0, %v8800_v58  ;;  %8811 = vpow2.f32 %v704_v56  ;;  %v649_v9 = vmin.f32 %v9376_v8, 0.0  ;;  %v9391_v11 = vadd.f32 %v9091_v5, %v547_v54 }
  0x48   : > { %v9385_v61 = vpack.c.bf16 %v881_v59, %v880_v55  ;;  %v8802_v44 = vpop.eup %8801  ;;  %v768_v7 = vsel %vm608_vm6, %v9265_v31, %v6810_v60  ;;  %v9394_v12 = vadd.f32 %v9091_v5, %v548_v26  ;;  %vm611_vm9 = vcmp.gt.f32.partialorder %v9312_v27, 0.0 }
  0x49   : > { %v769_v15 = vsel %vm609_vm7, %v9279_v43, %v6811_v62  ;;  %801 = vst.msk [vmem:[#allocation2 + $0x148] sm:$0xff] %vm388_vm1, %v768_v7  ;;  %v6812_v17 = vadd.f32 -1.0, %v8802_v44  ;;  %v706_v50 = vmul.f32 1.442695, %v648_v6  ;;  %vm612_vm10 = vcmp.gt.f32.partialorder %v9318_v63, 0.0 }
  0x4a   : > { %v8804_v13 = vpop.eup %8803  ;;  %802 = vst.msk [vmem:[#allocation2 + $0x150] sm:$0xff] %vm388_vm1, %v769_v15  ;;  %v708_v18 = vmul.f32 1.442695, %v649_v9  ;;  %v650_v20 = vmin.f32 %v9391_v11, 0.0  ;;  %v651_v21 = vmin.f32 %v9394_v12, 0.0  ;;  %vm613_vm11 = vcmp.gt.f32.partialorder %v9326_v16, 0.0 }
  0x4b   : > { %v6813_v31 = vadd.f32 -1.0, %v8804_v13  ;;  %v8806_v19 = vpop.eup %8805  ;;  %v770_v43 = vsel %vm610_vm8, %v9306_v10, %v6812_v17  ;;  %8813 = vpow2.f32 %v706_v50  ;;  %v882_v52 = vld [vmem:[#allocation2 + $0x128] sm:$0xff]  ;;  %vm614_vm12 = vcmp.gt.f32.partialorder %v9349_v38, 0.0 }
  0x4c   : > { %7523 = vmatmul.mubr.msk.bf16.gmra.mrb[12].mxu0 %vm388_vm1, %v9382_v14  ;;  %v883_v29 = vld [vmem:[#allocation2 + $0x130] sm:$0xff]  ;;  %803 = vst.msk [vmem:[#allocation2 + $0x168] sm:$0xff] %vm388_vm1, %v770_v43  ;;  %v6814_v48 = vadd.f32 -1.0, %v8806_v19  ;;  %8815 = vpow2.f32 %v708_v18  ;;  %v710_v10 = vmul.f32 1.442695, %v650_v20  ;;  %vm615_vm13 = vcmp.gt.f32.partialorder %v9353_v22, 0.0 }
  0x4d   : > { %7526 = vmatprep.mubr.msk.bf16.mxu0 %vm388_vm1, %v9385_v61  ;;  %v771_v30 = vsel %vm611_vm9, %v9312_v27, %v6813_v31  ;;  %v8808_v32 = vpop.eup %8807  ;;  %v712_v33 = vmul.f32 1.442695, %v651_v21  ;;  %v9421_v51 = vpack.c.bf16 %v883_v29, %v882_v52  ;;  %vm616_vm14 = vcmp.gt.f32.partialorder %v9373_v25, 0.0  ;;  %v815_v17 = vld [vmem:[#allocation2 + $0x7] sm:$0xff]  ;;  %v818_v19 = vld [vmem:[#allocation2 + $0x2f] sm:$0xff] }
  0x4e   : > { %804 = vst.msk [vmem:[#allocation2 + $0x170] sm:$0xff] %vm388_vm1, %v771_v30  ;;  %v6815_v34 = vadd.f32 -1.0, %v8808_v32  ;;  %v772_v35 = vsel %vm612_vm10, %v9318_v63, %v6814_v48  ;;  %8817 = vpow2.f32 %v710_v10  ;;  %vm617_vm15 = vcmp.gt.f32.partialorder %v9376_v8, 0.0  ;;  %v817_v18 = vld [vmem:[#allocation2 + $0x27] sm:$0xff]  ;;  %v820_v20 = vld [vmem:[#allocation2 + $0x4f] sm:$0xff] }
  0x4f   : > { %805 = vst.msk [vmem:[#allocation2 + $0x188] sm:$0xff] %vm388_vm1, %v772_v35  ;;  %8819 = vpow2.f32 %v712_v33  ;;  %vm618_vm2 = vcmp.gt.f32.partialorder %v9391_v11, 0.0  ;;  %vm619_vm3 = vcmp.gt.f32.partialorder %v9394_v12, 0.0  ;;  %v819_v43 = vld [vmem:[#allocation2 + $0x47] sm:$0xff]  ;;  %v9471_v21 = vpack.c.bf16 %v818_v19, %v817_v18  ;;  %v822_v32 = vld [vmem:[#allocation2 + $0x6f] sm:$0xff] }
  0x50   : > { %v8810_v27 = vpop.eup %8809  ;;  %v884_v39 = vld [vmem:[#allocation2 + $0x148] sm:$0xff]  ;;  %v773_v40 = vsel %vm613_vm11, %v9326_v16, %v6815_v34  ;;  %v9473_v52 = vpack.c.bf16 %v820_v20, %v819_v43  ;;  %v1438_v29 = vsel %vm962_vm0, %v9270_v53, 0  ;;  %v9480_v30 = vld [vmem:[%s10944_s3 + $0x6] sm:$0x3]  ;;  %vm434_vm6 = vcmask 64512  }
  0x51   : > { %v8812_v41 = vpop.eup %8811  ;;  %v885_v42 = vld [vmem:[#allocation2 + $0x150] sm:$0xff]  ;;  %806 = vst.msk [vmem:[#allocation2 + $0x190] sm:$0xff] %vm388_vm1, %v773_v40  ;;  %v6816_v45 = vadd.f32 -1.0, %v8810_v27  ;;  %v821_v48 = vld [vmem:[#allocation2 + $0x67] sm:$0xff]  ;;  %vm3887_vm7 = vcmask 1043456  }
  0x52   : > { %v9428_v63 = vpack.c.bf16 %v885_v42, %v884_v39  ;;  %v6817_v46 = vadd.f32 -1.0, %v8812_v41  ;;  %v823_v10 = vld [vmem:[#allocation2 + $0x87] sm:$0xff]  ;;  %v824_v33 = vld [vmem:[#allocation2 + $0x8f] sm:$0xff]  ;;  %v9488_v53 = vpack.c.bf16 %v822_v32, %v821_v48  ;;  %435 = vst.msk [vmem:[#allocation3] sm:$0xff] %vm434_vm6, %v8897_v2  ;;  %436 = vst.msk [vmem:[#allocation3 + $0x8] sm:$0xff] %vm434_vm6, %v8897_v2 }
  0x53   : > { %v774_v23 = vsel %vm614_vm12, %v9349_v38, %v6816_v45  ;;  %v886_v16 = vld [vmem:[#allocation2 + $0x168] sm:$0xff]  ;;  %v9490_v34 = vpack.c.bf16 %v824_v33, %v823_v10  ;;  %437 = vst.msk [vmem:[#allocation3 + $0x10] sm:$0xff] %vm434_vm6, %v8897_v2  ;;  %438 = vst.msk [vmem:[#allocation3 + $0x18] sm:$0xff] %vm434_vm6, %v8897_v2 }
  0x54   : > { %7527 = vmatmul.mubr.msk.bf16.gmra.mrb[16].mxu0 %vm388_vm1, %v9421_v51  ;;  %v775_v47 = vsel %vm615_vm13, %v9353_v22, %v6817_v46  ;;  %807 = vst.msk [vmem:[#allocation2 + $0x1a8] sm:$0xff] %vm388_vm1, %v774_v23  ;;  %v825_v35 = vld [vmem:[#allocation2 + $0xa7] sm:$0xff]  ;;  %v826_v27 = vld [vmem:[#allocation2 + $0xaf] sm:$0xff] }
  0x55   : > { %7530 = vmatprep.mubr.msk.bf16.mxu0 %vm388_vm1, %v9428_v63  ;;  %v887_v37 = vld [vmem:[#allocation2 + $0x170] sm:$0xff]  ;;  %v8814_v24 = vpop.eup %8813  ;;  %808 = vst.msk [vmem:[#allocation2 + $0x1b0] sm:$0xff] %vm388_vm1, %v775_v47  ;;  %v827_v39 = vld [vmem:[#allocation2 + $0xc7] sm:$0xff]  ;;  %v9496_v41 = vpack.c.bf16 %v826_v27, %v825_v35 }
  0x56   : > { %v8816_v1 = vpop.eup %8815  ;;  %v888_v49 = vld [vmem:[#allocation2 + $0x188] sm:$0xff]  ;;  %v6818_v0 = vadd.f32 -1.0, %v8814_v24  ;;  %v9440_v38 = vpack.c.bf16 %v887_v37, %v886_v16  ;;  %v510_v24 = vld [vmem:[%s9086_s29 + $0xf0] sm:$0xff]  ;;  %440 = vst.msk [vmem:[#allocation3 + $0x220] sm:$0xff] %vm434_vm6, %v8897_v2  ;;  %441 = vst.msk [vmem:[#allocation3 + $0x228] sm:$0xff] %vm434_vm6, %v8897_v2 }
  0x57   : > { %v6819_v54 = vadd.f32 -1.0, %v8816_v1  ;;  %v828_v40 = vld [vmem:[#allocation2 + $0xcf] sm:$0xff]  ;;  %v829_v45 = vld [vmem:[#allocation2 + $0xe7] sm:$0xff]  ;;  %v511_v1 = vld [vmem:[%s9086_s29 + $0xf8] sm:$0xff]  ;;  %442 = vst.msk [vmem:[#allocation3 + $0x230] sm:$0xff] %vm434_vm6, %v8897_v2 }
  0x58   : > { %v889_v3 = vld [vmem:[#allocation2 + $0x190] sm:$0xff]  ;;  %v776_v55 = vsel %vm616_vm14, %v9373_v25, %v6818_v0  ;;  %v8818_v56 = vpop.eup %8817  ;;  %v9498_v42 = vpack.c.bf16 %v828_v40, %v827_v39  ;;  %v831_v23 = vld [vmem:[#allocation2 + $0x107] sm:$0xff]  ;;  %v550_v0 = vmul.f32 %v9079_v4, %v511_v1  ;;  %443 = vst.msk [vmem:[#allocation3 + $0x238] sm:$0xff] %vm434_vm6, %v8897_v2  ;;  %445 = vst.msk [vmem:[#allocation3 + $0x20] sm:$0xff] %vm434_vm6, %v8897_v2 }
  0x59   : > { %v9443_v22 = vpack.c.bf16 %v889_v3, %v888_v49  ;;  %v777_v26 = vsel %vm617_vm15, %v9376_v8, %v6819_v54  ;;  %809 = vst.msk [vmem:[#allocation2 + $0x1c8] sm:$0xff] %vm388_vm1, %v776_v55  ;;  %v8820_v58 = vpop.eup %8819  ;;  %v6820_v59 = vadd.f32 -1.0, %v8818_v56  ;;  %v830_v46 = vld [vmem:[#allocation2 + $0xef] sm:$0xff]  ;;  %v549_v49 = vmul.f32 %v9079_v4, %v510_v24  ;;  %v833_v54 = vld [vmem:[#allocation2 + $0x127] sm:$0xff] }
  0x5a   : > { %810 = vst.msk [vmem:[#allocation2 + $0x1d0] sm:$0xff] %vm388_vm1, %v777_v26  ;;  %v6821_v60 = vadd.f32 -1.0, %v8820_v58  ;;  %v832_v16 = vld [vmem:[#allocation2 + $0x10f] sm:$0xff]  ;;  %v9504_v37 = vpack.c.bf16 %v830_v46, %v829_v45  ;;  %v835_v55 = vld [vmem:[#allocation2 + $0x147] sm:$0xff]  ;;  %v589_v58 = vadd.f32 %v9091_v5, %v550_v0 }
  0x5b   : > { %v890_v25 = vld [vmem:[#allocation2 + $0x1a8] sm:$0xff]  ;;  %v778_v8 = vsel %vm618_vm2, %v9391_v11, %v6820_v59  ;;  %v9506_v47 = vpack.c.bf16 %v832_v16, %v831_v23  ;;  %v588_v26 = vadd.f32 %v9091_v5, %v549_v49  ;;  %v1340_v40 = vld [vmem:[#allocation2 + $0x11] sm:$0xff]  ;;  %446 = vst.msk [vmem:[#allocation3 + $0x40] sm:$0xff] %vm434_vm6, %v8897_v2  ;;  %447 = vst.msk [vmem:[#allocation3 + $0x60] sm:$0xff] %vm434_vm6, %v8897_v2 }
  0x5c   : > { %7531 = vmatmul.mubr.msk.bf16.gmra.mrb[20].mxu0 %vm388_vm1, %v9440_v38  ;;  %v891_v62 = vld [vmem:[#allocation2 + $0x1b0] sm:$0xff]  ;;  %v779_v6 = vsel %vm619_vm3, %v9394_v12, %v6821_v60  ;;  %811 = vst.msk [vmem:[#allocation2 + $0x1e8] sm:$0xff] %vm388_vm1, %v778_v8  ;;  %v837_v4 = vld [vmem:[#allocation2 + $0x167] sm:$0xff]  ;;  %vm621_vm5 = vcmp.gt.f32.partialorder %v589_v58, 0.0 }
  0x5d   : > { %7534 = vmatprep.mubr.msk.bf16.mxu0 %vm388_vm1, %v9443_v22  ;;  %812 = vst.msk [vmem:[#allocation2 + $0x1f0] sm:$0xff] %vm388_vm1, %v779_v6  ;;  %v9458_v44 = vpack.c.bf16 %v891_v62, %v890_v25  ;;  %v816_v12 = vld [vmem:[#allocation2 + $0xf] sm:$0xff]  ;;  %v652_v60 = vmin.f32 %v588_v26, 0.0  ;;  %v653_v25 = vmin.f32 %v589_v58, 0.0  ;;  %vm620_vm4 = vcmp.gt.f32.partialorder %v588_v26, 0.0 }
  0x5e   : > { %v847_v31 = vpack.c.bf16 %v816_v12, %v815_v17  ;;  %v834_v3 = vld [vmem:[#allocation2 + $0x12f] sm:$0xff]  ;;  %v841_v17 = vld [vmem:[#allocation2 + $0x1a7] sm:$0xff]  ;;  %448 = vst.msk [vmem:[#allocation3 + $0x80] sm:$0xff] %vm434_vm6, %v8897_v2  ;;  %449 = vst.msk [vmem:[#allocation3 + $0xa0] sm:$0xff] %vm434_vm6, %v8897_v2 }
  0x5f   : > { %v836_v56 = vld [vmem:[#allocation2 + $0x14f] sm:$0xff]  ;;  %v9518_v59 = vpack.c.bf16 %v834_v3, %v833_v54  ;;  %v714_v8 = vmul.f32 1.442695, %v652_v60  ;;  %v716_v6 = vmul.f32 1.442695, %v653_v25  ;;  %v1732_v54 = vsel %vm962_vm0, %v9480_v30, 0 }
  0x60   : > { %v892_v7 = vld [vmem:[#allocation2 + $0x1c8] sm:$0xff]  ;;  %v9520_v62 = vpack.c.bf16 %v836_v56, %v835_v55  ;;  %v1342_v16 = vld [vmem:[#allocation2 + $0x31] sm:$0xff]  ;;  %450 = vst.msk [vmem:[#allocation3 + $0xc0] sm:$0xff] %vm434_vm6, %v8897_v2  ;;  %451 = vst.msk [vmem:[#allocation3 + $0xe0] sm:$0xff] %vm434_vm6, %v8897_v2 }
  0x61   : > { %v893_v9 = vld [vmem:[#allocation2 + $0x1d0] sm:$0xff]  ;;  %8821 = vpow2.f32 %v714_v8  ;;  %v843_v18 = vld [vmem:[#allocation2 + $0x1c7] sm:$0xff]  ;;  %452 = vst.msk [vmem:[#allocation3 + $0x100] sm:$0xff] %vm434_vm6, %v8897_v2  ;;  %453 = vst.msk [vmem:[#allocation3 + $0x120] sm:$0xff] %vm434_vm6, %v8897_v2 }
  0x62   : > { %v9460_v13 = vpack.c.bf16 %v893_v9, %v892_v7  ;;  %v838_v7 = vld [vmem:[#allocation2 + $0x16f] sm:$0xff]  ;;  %8823 = vpow2.f32 %v716_v6  ;;  %v839_v9 = vld [vmem:[#allocation2 + $0x187] sm:$0xff]  ;;  %454 = vst.msk [vmem:[#allocation3 + $0x140] sm:$0xff] %vm434_vm6, %v8897_v2  ;;  %455 = vst.msk [vmem:[#allocation3 + $0x160] sm:$0xff] %vm434_vm6, %v8897_v2 }
  0x63   : > { %v894_v15 = vld [vmem:[#allocation2 + $0x1e8] sm:$0xff]  ;;  %v1344_v1 = vld [vmem:[#allocation2 + $0x51] sm:$0xff]  ;;  %456 = vst.msk [vmem:[#allocation3 + $0x180] sm:$0xff] %vm434_vm6, %v8897_v2  ;;  %457 = vst.msk [vmem:[#allocation3 + $0x1a0] sm:$0xff] %vm434_vm6, %v8897_v2 }
  0x64   : > { %7535 = vmatmul.mubr.msk.bf16.gmra.mrb[24].mxu0 %vm388_vm1, %v9458_v44  ;;  %v895_v11 = vld [vmem:[#allocation2 + $0x1f0] sm:$0xff]  ;;  %v845_v35 = vld [vmem:[#allocation2 + $0x1e7] sm:$0xff]  ;;  %458 = vst.msk [vmem:[#allocation3 + $0x1c0] sm:$0xff] %vm434_vm6, %v8897_v2  ;;  %459 = vst.msk [vmem:[#allocation3 + $0x1e0] sm:$0xff] %vm434_vm6, %v8897_v2 }
  0x65   : > { %7538 = vmatprep.mubr.msk.bf16.mxu0 %vm388_vm1, %v9460_v13  ;;  %v9466_v50 = vpack.c.bf16 %v895_v11, %v894_v15  ;;  %v840_v5 = vld [vmem:[#allocation2 + $0x18f] sm:$0xff]  ;;  %v9526_v15 = vpack.c.bf16 %v838_v7, %v837_v4  ;;  %v6891_v3 = vld [vmem:[%s10944_s3 + $0x8] sm:$0x3]  ;;  %460 = vst.msk [vmem:[#allocation3 + $0x200] sm:$0xff] %vm434_vm6, %v8897_v2  ;;  %463 = vst.msk [vmem:[#allocation3 + $0x38] sm:$0xff] %vm434_vm6, %v8897_v2 }
  0x66   : > { %v9528_v11 = vpack.c.bf16 %v840_v5, %v839_v9  ;;  %v842_v12 = vld [vmem:[#allocation2 + $0x1af] sm:$0xff]  ;;  %464 = vst.msk [vmem:[#allocation3 + $0x58] sm:$0xff] %vm434_vm6, %v8897_v2  ;;  %465 = vst.msk [vmem:[#allocation3 + $0x78] sm:$0xff] %vm434_vm6, %v8897_v2 }
  0x67   : > { %v844_v19 = vld [vmem:[#allocation2 + $0x1cf] sm:$0xff]  ;;  %466 = vst.msk [vmem:[#allocation3 + $0x98] sm:$0xff] %vm434_vm6, %v8897_v2  ;;  %467 = vst.msk [vmem:[#allocation3 + $0xb8] sm:$0xff] %vm434_vm6, %v8897_v2 }
  0x68   : > { %v9536_v32 = vpack.c.bf16 %v844_v19, %v843_v18  ;;  %v846_v27 = vld [vmem:[#allocation2 + $0x1ef] sm:$0xff]  ;;  %468 = vst.msk [vmem:[#allocation3 + $0xd8] sm:$0xff] %vm434_vm6, %v8897_v2  ;;  %469 = vst.msk [vmem:[#allocation3 + $0xf8] sm:$0xff] %vm434_vm6, %v8897_v2 }
  0x69   : > { %v1339_v39 = vld [vmem:[#allocation2 + $0x9] sm:$0xff]  ;;  %v9544_v45 = vpack.c.bf16 %v846_v27, %v845_v35  ;;  %v1346_v56 = vld [vmem:[#allocation2 + $0x71] sm:$0xff]  ;;  %470 = vst.msk [vmem:[#allocation3 + $0x118] sm:$0xff] %vm434_vm6, %v8897_v2  ;;  %471 = vst.msk [vmem:[#allocation3 + $0x138] sm:$0xff] %vm434_vm6, %v8897_v2 }
  0x6a   : > { %v1371_v46 = vpack.c.bf16 %v1340_v40, %v1339_v39  ;;  %v1341_v23 = vld [vmem:[#allocation2 + $0x29] sm:$0xff]  ;;  %v1350_v8 = vld [vmem:[#allocation2 + $0xb1] sm:$0xff]  ;;  %472 = vst.msk [vmem:[#allocation3 + $0x158] sm:$0xff] %vm434_vm6, %v8897_v2  ;;  %473 = vst.msk [vmem:[#allocation3 + $0x178] sm:$0xff] %vm434_vm6, %v8897_v2 }
  0x6b   : > { %v1343_v24 = vld [vmem:[#allocation2 + $0x49] sm:$0xff]  ;;  %v9549_v49 = vpack.c.bf16 %v1342_v16, %v1341_v23  ;;  %v1352_v4 = vld [vmem:[#allocation2 + $0xd1] sm:$0xff]  ;;  %474 = vst.msk [vmem:[#allocation3 + $0x198] sm:$0xff] %vm434_vm6, %v8897_v2  ;;  %475 = vst.msk [vmem:[#allocation3 + $0x1b8] sm:$0xff] %vm434_vm6, %v8897_v2 }
  0x6c   : > { %7539 = vmatmul.mubr.msk.bf16.gmra.mrb[28].mxu0 %vm388_vm1, %v9466_v50  ;;  %v9551_v0 = vpack.c.bf16 %v1344_v1, %v1343_v24  ;;  %v1345_v55 = vld [vmem:[#allocation2 + $0x69] sm:$0xff]  ;;  %v1362_v39 = vld [vmem:[#allocation2 + $0x171] sm:$0xff]  ;;  %476 = vst.msk [vmem:[#allocation3 + $0x1d8] sm:$0xff] %vm434_vm6, %v8897_v2  ;;  %477 = vst.msk [vmem:[#allocation3 + $0x1f8] sm:$0xff] %vm434_vm6, %v8897_v2 }
  0x6d   : > { %7544 = vmatprep.mubr.msk.bf16.mxu0 %vm388_vm1, %v847_v31  ;;  %v8822_v31 = vpop.eup %8821  ;;  %v9563_v60 = vpack.c.bf16 %v1346_v56, %v1345_v55  ;;  %v1349_v25 = vld [vmem:[#allocation2 + $0xa9] sm:$0xff]  ;;  %v1366_v1 = vld [vmem:[#allocation2 + $0x1b1] sm:$0xff]  ;;  %478 = vst.msk [vmem:[#allocation3 + $0x218] sm:$0xff] %vm434_vm6, %v8897_v2  ;;  %444 = vst.msk [vmem:[#allocation3] sm:$0xff] %vm434_vm6, %v8897_v2 }
  0x6e   : > { %v8824_v43 = vpop.eup %8823  ;;  %v6822_v20 = vadd.f32 -1.0, %v8822_v31  ;;  %v1351_v6 = vld [vmem:[#allocation2 + $0xc9] sm:$0xff]  ;;  %v9571_v7 = vpack.c.bf16 %v1350_v8, %v1349_v25  ;;  %v1356_v31 = vld [vmem:[#allocation2 + $0x111] sm:$0xff]  ;;  %461 = vst.msk [vmem:[#allocation3 + $0x220] sm:$0xff] %vm434_vm6, %v8897_v2  ;;  %462 = vst.msk [vmem:[#allocation3 + $0x18] sm:$0xff] %vm434_vm6, %v8897_v2 }
  0x6f   : > { %v6823_v48 = vadd.f32 -1.0, %v8824_v43  ;;  %v9573_v9 = vpack.c.bf16 %v1352_v4, %v1351_v6  ;;  %v1353_v5 = vld [vmem:[#allocation2 + $0xe9] sm:$0xff]  ;;  %v1368_v55 = vld [vmem:[#allocation2 + $0x1d1] sm:$0xff]  ;;  %v2026_v6 = vsel %vm962_vm0, %v6891_v3, 0  ;;  %479 = vst.msk [vmem:[#allocation3 + $0x238] sm:$0xff] %vm434_vm6, %v8897_v2 }
  0x70   : > { %v780_v10 = vsel %vm620_vm4, %v588_v26, %v6822_v20  ;;  %v1347_v26 = vld [vmem:[#allocation2 + $0x89] sm:$0xff]  ;;  %v1358_v20 = vld [vmem:[#allocation2 + $0x131] sm:$0xff] }
  0x71   : > { %v781_v33 = vsel %vm621_vm5, %v589_v58, %v6823_v48  ;;  %813 = vst.msk [vmem:[#allocation2 + $0x208] sm:$0xff] %vm388_vm1, %v780_v10  ;;  %v1348_v58 = vld [vmem:[#allocation2 + $0x91] sm:$0xff]  ;;  %v1357_v43 = vld [vmem:[#allocation2 + $0x129] sm:$0xff] }
  0x72   : > { %814 = vst.msk [vmem:[#allocation2 + $0x210] sm:$0xff] %vm388_vm1, %v781_v33  ;;  %v1359_v48 = vld [vmem:[#allocation2 + $0x149] sm:$0xff]  ;;  %v1360_v10 = vld [vmem:[#allocation2 + $0x151] sm:$0xff]  ;;  %v9587_v33 = vpack.c.bf16 %v1358_v20, %v1357_v43 }
  0x73   : > { %v9589_v35 = vpack.c.bf16 %v1360_v10, %v1359_v48  ;;  %v1361_v27 = vld [vmem:[#allocation2 + $0x169] sm:$0xff]  ;;  %v1370_v25 = vld [vmem:[#allocation2 + $0x1f1] sm:$0xff] }
  0x74   : > { %7545 = vmatmul.mubr.msk.bf16.vlgmr.msra.gmra.mrb[0].mxu0 %vm388_vm1, %v9471_v21  ;;  %v1363_v40 = vld [vmem:[#allocation2 + $0x189] sm:$0xff]  ;;  %v9595_v23 = vpack.c.bf16 %v1362_v39, %v1361_v27 }
  0x75   : > { %7577 = vmatpush3.bf16.msra.mxu0 %v1438_v29  ;;  %7548 = vmatprep.mubr.msk.bf16.mxu0 %vm388_vm1, %v9473_v52  ;;  %v9534_v29 = vpack.c.bf16 %v842_v12, %v841_v17  ;;  %v1354_v17 = vld [vmem:[#allocation2 + $0xf1] sm:$0xff]  ;;  %v1355_v12 = vld [vmem:[#allocation2 + $0x109] sm:$0xff] }
  0x76   : > { %8735 = vmatprep.subr.msk.bf16.mxu0 %vm962_vm0, %v9480_v30  ;;  %v9565_v30 = vpack.c.bf16 %v1348_v58, %v1347_v26  ;;  %v9579_v18 = vpack.c.bf16 %v1354_v17, %v1353_v5  ;;  %v9581_v19 = vpack.c.bf16 %v1356_v31, %v1355_v12  ;;  %v1365_v24 = vld [vmem:[#allocation2 + $0x1a9] sm:$0xff] }
  0x77   : > { %v9603_v56 = vpack.c.bf16 %v1366_v1, %v1365_v24  ;;  %v1369_v58 = vld [vmem:[#allocation2 + $0x1e9] sm:$0xff] }
  0x78   : > { %v9611_v8 = vpack.c.bf16 %v1370_v25, %v1369_v58  ;;  %v6908_v4 = vld [vmem:[%s10944_s3 + $0xa] sm:$0x3]  ;;  %v1928_v17 = vld [vmem:[#allocation2 + $0x30] sm:$0xff] }
  0x79   : > { %v1927_v5 = vld [vmem:[#allocation2 + $0x28] sm:$0xff]  ;;  %v1930_v20 = vld [vmem:[#allocation2 + $0x50] sm:$0xff] }
  0x7a   : > { %v1959_v31 = vpack.c.bf16 %v1928_v17, %v1927_v5  ;;  %v1929_v43 = vld [vmem:[#allocation2 + $0x48] sm:$0xff]  ;;  %v1932_v10 = vld [vmem:[#allocation2 + $0x70] sm:$0xff] }
  0x7b   : > { %v1931_v48 = vld [vmem:[#allocation2 + $0x68] sm:$0xff]  ;;  %v9655_v27 = vpack.c.bf16 %v1930_v20, %v1929_v43  ;;  %v2823_v24 = vld [vmem:[#allocation2 + $0x110] sm:$0xff] }
  0x7c   : > { %7549 = vmatmul.mubr.msk.bf16.gmra.mrb[4].mxu0 %vm388_vm1, %v9488_v53  ;;  %v9657_v39 = vpack.c.bf16 %v1932_v10, %v1931_v48  ;;  %v2820_v2 = vld [vmem:[#allocation2 + $0xe8] sm:$0xff]  ;;  %v2825_v58 = vld [vmem:[#allocation2 + $0x130] sm:$0xff] }
  0x7d   : > { %7552 = vmatprep.mubr.msk.bf16.mxu0 %vm388_vm1, %v9490_v34  ;;  %v2826_v25 = vld [vmem:[#allocation2 + $0x148] sm:$0xff]  ;;  %v2829_v5 = vld [vmem:[#allocation2 + $0x170] sm:$0xff] }
  0x7e   : > { %v2830_v17 = vld [vmem:[#allocation2 + $0x188] sm:$0xff]  ;;  %v2833_v48 = vld [vmem:[#allocation2 + $0x1b0] sm:$0xff] }
  0x7f   : > { %v2832_v20 = vld [vmem:[#allocation2 + $0x1a8] sm:$0xff] }
  0x80   : > { %v2853_v10 = vpack.c.bf16 %v2833_v48, %v2832_v20 }
  0x84   : > { %7553 = vmatmul.mubr.msk.bf16.gmra.mrb[8].mxu0 %vm388_vm1, %v9496_v41 }
  0x85   : > { %7556 = vmatprep.mubr.msk.bf16.mxu0 %vm388_vm1, %v9498_v42 }
  0x8c   : > { %7557 = vmatmul.mubr.msk.bf16.gmra.mrb[12].mxu0 %vm388_vm1, %v9504_v37 }
  0x8d   : > { %7560 = vmatprep.mubr.msk.bf16.mxu0 %vm388_vm1, %v9506_v47 }
  0x94   : > { %7561 = vmatmul.mubr.msk.bf16.gmra.mrb[16].mxu0 %vm388_vm1, %v9518_v59 }
  0x95   : > { %7564 = vmatprep.mubr.msk.bf16.mxu0 %vm388_vm1, %v9520_v62 }
  0x9c   : > { %7565 = vmatmul.mubr.msk.bf16.gmra.mrb[20].mxu0 %vm388_vm1, %v9526_v15 }
  0x9d   : > { %7568 = vmatprep.mubr.msk.bf16.mxu0 %vm388_vm1, %v9528_v11 }
  0xa4   : > { %7569 = vmatmul.mubr.msk.bf16.gmra.mrb[24].mxu0 %vm388_vm1, %v9534_v29 }
  0xa5   : > { %7572 = vmatprep.mubr.msk.bf16.mxu0 %vm388_vm1, %v9536_v32 }
  0xac   : > { %7573 = vmatmul.mubr.msk.bf16.gmra.mrb[28].mxu0 %vm388_vm1, %v9544_v45 }
  0xad   : > { %7578 = vmatprep.mubr.msk.bf16.mxu0 %vm388_vm1, %v1371_v46  ;;  %v1364_v46 = vld [vmem:[#allocation2 + $0x191] sm:$0xff] }
  0xae   : > { %v9597_v16 = vpack.c.bf16 %v1364_v46, %v1363_v40  ;;  %v2320_v40 = vsel %vm962_vm0, %v6908_v4, 0  ;;  %v6925_v46 = vld [vmem:[%s10944_s3 + $0xc] sm:$0x3] }
  0xb4   : > { %7579 = vmatmul.mubr.msk.bf16.vlgmr.msra.gmra.mrb[0].mxu0 %vm388_vm1, %v9549_v49 }
  0xb5   : > { %7611 = vmatpush3.bf16.msra.mxu0 %v1732_v54  ;;  %7582 = vmatprep.mubr.msk.bf16.mxu0 %vm388_vm1, %v9551_v0  ;;  %v1367_v54 = vld [vmem:[#allocation2 + $0x1c9] sm:$0xff] }
  0xb6   : > { %8736 = vmatprep.subr.msk.bf16.mxu0 %vm962_vm0, %v6891_v3  ;;  %v9605_v26 = vpack.c.bf16 %v1368_v55, %v1367_v54  ;;  %v1664_v3 = vld [vmem:[#allocation2 + $0x20f] sm:$0xff] }
  0xb7   : > { %v2824_v55 = vld [vmem:[#allocation2 + $0x128] sm:$0xff] }
  0xbc   : > { %7583 = vmatmul.mubr.msk.bf16.gmra.mrb[4].mxu0 %vm388_vm1, %v9563_v60 }
  0xbd   : > { %7586 = vmatprep.mubr.msk.bf16.mxu0 %vm388_vm1, %v9565_v30 }
  0xc4   : > { %7587 = vmatmul.mubr.msk.bf16.gmra.mrb[8].mxu0 %vm388_vm1, %v9571_v7 }
  0xc5   : > { %7590 = vmatprep.mubr.msk.bf16.mxu0 %vm388_vm1, %v9573_v9 }
  0xcc   : > { %7591 = vmatmul.mubr.msk.bf16.gmra.mrb[12].mxu0 %vm388_vm1, %v9579_v18 }
  0xcd   : > { %7594 = vmatprep.mubr.msk.bf16.mxu0 %vm388_vm1, %v9581_v19 }
  0xd4   : > { %7595 = vmatmul.mubr.msk.bf16.gmra.mrb[16].mxu0 %vm388_vm1, %v9587_v33 }
  0xd5   : > { %7598 = vmatprep.mubr.msk.bf16.mxu0 %vm388_vm1, %v9589_v35 }
  0xdc   : > { %7599 = vmatmul.mubr.msk.bf16.gmra.mrb[20].mxu0 %vm388_vm1, %v9595_v23 }
  0xdd   : > { %7602 = vmatprep.mubr.msk.bf16.mxu0 %vm388_vm1, %v9597_v16 }
  0xe4   : > { %7603 = vmatmul.mubr.msk.bf16.gmra.mrb[24].mxu0 %vm388_vm1, %v9603_v56 }
  0xe5   : > { %7606 = vmatprep.mubr.msk.bf16.mxu0 %vm388_vm1, %v9605_v26 }
  0xec   : > { %7607 = vmatmul.mubr.msk.bf16.gmra.mrb[28].mxu0 %vm388_vm1, %v9611_v8 }
  0xed   : > { %7612 = vmatprep.mubr.msk.bf16.mxu0 %vm388_vm1, %v9471_v21  ;;  %v1663_v21 = vld [vmem:[#allocation2 + $0x207] sm:$0xff] }
  0xee   : > { %v9650_v12 = vpack.c.bf16 %v1664_v3, %v1663_v21  ;;  %v2828_v3 = vld [vmem:[#allocation2 + $0x168] sm:$0xff] }
  0xf4   : > { %7613 = vmatmul.mubr.msk.bf16.vlgmr.msra.gmra.mrb[0].mxu0 %vm388_vm1, %v9473_v52 }
  0xf5   : > { %7645 = vmatpush3.bf16.msra.mxu0 %v2026_v6  ;;  %7616 = vmatprep.mubr.msk.bf16.mxu0 %vm388_vm1, %v9488_v53  ;;  %v2827_v6 = vld [vmem:[#allocation2 + $0x150] sm:$0xff] }
  0xf6   : > { %8737 = vmatprep.subr.msk.bf16.mxu0 %vm962_vm0, %v6908_v4  ;;  %v2849_v4 = vpack.c.bf16 %v2825_v58, %v2824_v55  ;;  %v2850_v21 = vpack.c.bf16 %v2827_v6, %v2826_v25 }
  0xfc   : > { %7617 = vmatmul.mubr.msk.bf16.gmra.mrb[4].mxu0 %vm388_vm1, %v9490_v34 }
  0xfd   : > { %7620 = vmatprep.mubr.msk.bf16.mxu0 %vm388_vm1, %v9496_v41 }
 0x104   : > { %7621 = vmatmul.mubr.msk.bf16.gmra.mrb[8].mxu0 %vm388_vm1, %v9498_v42 }
 0x105   : > { %7624 = vmatprep.mubr.msk.bf16.mxu0 %vm388_vm1, %v9504_v37 }
 0x10c   : > { %7625 = vmatmul.mubr.msk.bf16.gmra.mrb[12].mxu0 %vm388_vm1, %v9506_v47 }
 0x10d   : > { %7628 = vmatprep.mubr.msk.bf16.mxu0 %vm388_vm1, %v9518_v59 }
 0x114   : > { %7629 = vmatmul.mubr.msk.bf16.gmra.mrb[16].mxu0 %vm388_vm1, %v9520_v62 }
 0x115   : > { %7632 = vmatprep.mubr.msk.bf16.mxu0 %vm388_vm1, %v9526_v15 }
 0x11c   : > { %7633 = vmatmul.mubr.msk.bf16.gmra.mrb[20].mxu0 %vm388_vm1, %v9528_v11 }
 0x11d   : > { %7636 = vmatprep.mubr.msk.bf16.mxu0 %vm388_vm1, %v9534_v29 }
 0x124   : > { %7637 = vmatmul.mubr.msk.bf16.gmra.mrb[24].mxu0 %vm388_vm1, %v9536_v32 }
 0x125   : > { %7640 = vmatprep.mubr.msk.bf16.mxu0 %vm388_vm1, %v9544_v45 }
 0x12c   : > { %7641 = vmatmul.mubr.msk.bf16.gmra.mrb[28].mxu0 %vm388_vm1, %v9650_v12 }
 0x12d   : > { %7646 = vmatprep.mubr.msk.bf16.mxu0 %vm388_vm1, %v1959_v31  ;;  %v2851_v31 = vpack.c.bf16 %v2829_v5, %v2828_v3 }
 0x134   : > { %7647 = vmatmul.mubr.msk.bf16.vlgmr.msra.gmra.mrb[0].mxu0 %vm388_vm1, %v9655_v27 }
 0x135   : > { %7679 = vmatpush3.bf16.msra.mxu0 %v2320_v40  ;;  %7650 = vmatprep.mubr.msk.bf16.mxu0 %vm388_vm1, %v9657_v39 }
 0x136   : > { %8738 = vmatprep.subr.msk.bf16.mxu0 %vm962_vm0, %v6925_v46 }
 0x13c   : > { %7651 = vmatmul.mubr.msk.bf16.gmra.mrb[4].mxu0 %vm388_vm1, %v9302_v57  ;;  %v1957_v57 = vld [vmem:[#allocation2 + $0x208] sm:$0xff] }
 0x13d   : > { %7654 = vmatprep.mubr.msk.bf16.mxu0 %vm388_vm1, %v9335_v28  ;;  %v1958_v28 = vld [vmem:[#allocation2 + $0x210] sm:$0xff] }
 0x144   : > { %7655 = vmatmul.mubr.msk.bf16.gmra.mrb[8].mxu0 %vm388_vm1, %v9346_v36  ;;  %v9692_v36 = vpack.c.bf16 %v1958_v28, %v1957_v57 }
 0x145   : > { %7658 = vmatprep.mubr.msk.bf16.mxu0 %vm388_vm1, %v9382_v14  ;;  %v2615_v14 = vsel %vm962_vm0, %v6925_v46, 0 }
 0x14c   : > { %7659 = vmatmul.mubr.msk.bf16.gmra.mrb[12].mxu0 %vm388_vm1, %v9385_v61  ;;  %v6942_v61 = vld [vmem:[%s10944_s3 + $0xe] sm:$0x3] }
 0x14d   : > { %7662 = vmatprep.mubr.msk.bf16.mxu0 %vm388_vm1, %v9421_v51  ;;  %v2251_v51 = vld [vmem:[#allocation2 + $0x209] sm:$0xff] }
 0x154   : > { %7663 = vmatmul.mubr.msk.bf16.gmra.mrb[16].mxu0 %vm388_vm1, %v9428_v63  ;;  %v2252_v63 = vld [vmem:[#allocation2 + $0x211] sm:$0xff] }
 0x155   : > { %7666 = vmatprep.mubr.msk.bf16.mxu0 %vm388_vm1, %v9440_v38  ;;  %v9731_v38 = vpack.c.bf16 %v2252_v63, %v2251_v51 }
 0x15c   : > { %7667 = vmatmul.mubr.msk.bf16.gmra.mrb[20].mxu0 %vm388_vm1, %v9443_v22  ;;  %v2909_v22 = vsel %vm962_vm0, %v6942_v61, 0 }
 0x15d   : > { %7670 = vmatprep.mubr.msk.bf16.mxu0 %vm388_vm1, %v9458_v44  ;;  %v9741_v44 = vld [vmem:[%s10944_s3 + $0x10] sm:$0x3] }
 0x164   : > { %7671 = vmatmul.mubr.msk.bf16.gmra.mrb[24].mxu0 %vm388_vm1, %v9460_v13 }
 0x165   : > { %7674 = vmatprep.mubr.msk.bf16.mxu0 %vm388_vm1, %v9466_v50 }
 0x16c   : > { %7675 = vmatmul.mubr.msk.bf16.gmra.mrb[28].mxu0 %vm388_vm1, %v9692_v36 }
 0x16d   : > { %7680 = vmatprep.mubr.msk.bf16.mxu0 %vm388_vm1, %v9549_v49  ;;  %v2822_v49 = vld [vmem:[#allocation2 + $0x108] sm:$0xff] }
 0x16e   : > { %v2848_v54 = vpack.c.bf16 %v2823_v24, %v2822_v49 }
 0x174   : > { %7681 = vmatmul.mubr.msk.bf16.vlgmr.msra.gmra.mrb[0].mxu0 %vm388_vm1, %v9551_v0 }
 0x175   : > { %7713 = vmatpush3.bf16.msra.mxu0 %v2615_v14  ;;  %7684 = vmatprep.mubr.msk.bf16.mxu0 %vm388_vm1, %v9563_v60 }
 0x176   : > { %8739 = vmatprep.subr.msk.bf16.mxu0 %vm962_vm0, %v6942_v61 }
 0x17c   : > { %7685 = vmatmul.mubr.msk.bf16.gmra.mrb[4].mxu0 %vm388_vm1, %v9565_v30 }
 0x17d   : > { %7688 = vmatprep.mubr.msk.bf16.mxu0 %vm388_vm1, %v9571_v7 }
 0x184   : > { %7689 = vmatmul.mubr.msk.bf16.gmra.mrb[8].mxu0 %vm388_vm1, %v9573_v9 }
 0x185   : > { %7692 = vmatprep.mubr.msk.bf16.mxu0 %vm388_vm1, %v9579_v18 }
 0x18c   : > { %7693 = vmatmul.mubr.msk.bf16.gmra.mrb[12].mxu0 %vm388_vm1, %v9581_v19 }
 0x18d   : > { %7696 = vmatprep.mubr.msk.bf16.mxu0 %vm388_vm1, %v9587_v33 }
 0x194   : > { %7697 = vmatmul.mubr.msk.bf16.gmra.mrb[16].mxu0 %vm388_vm1, %v9589_v35 }
 0x195   : > { %7700 = vmatprep.mubr.msk.bf16.mxu0 %vm388_vm1, %v9595_v23 }
 0x19c   : > { %7701 = vmatmul.mubr.msk.bf16.gmra.mrb[20].mxu0 %vm388_vm1, %v9597_v16 }
 0x19d   : > { %7704 = vmatprep.mubr.msk.bf16.mxu0 %vm388_vm1, %v9603_v56 }
 0x1a4   : > { %7705 = vmatmul.mubr.msk.bf16.gmra.mrb[24].mxu0 %vm388_vm1, %v9605_v26 }
 0x1a5   : > { %7708 = vmatprep.mubr.msk.bf16.mxu0 %vm388_vm1, %v9611_v8 }
 0x1ac   : > { %7709 = vmatmul.mubr.msk.bf16.gmra.mrb[28].mxu0 %vm388_vm1, %v9731_v38 }
 0x1ad   : > { %7714 = vmatprep.mubr.msk.bf16.mxu0 %vm388_vm1, %v9473_v52  ;;  %v2546_v52 = vld [vmem:[#allocation2 + $0x227] sm:$0xff] }
 0x1b4   : > { %7715 = vmatmul.mubr.msk.bf16.vlgmr.msra.gmra.mrb[0].mxu0 %vm388_vm1, %v9488_v53  ;;  %v2547_v53 = vld [vmem:[#allocation2 + $0x22f] sm:$0xff] }
 0x1b5   : > { %7747 = vmatpush3.bf16.msra.mxu0 %v2909_v22  ;;  %7718 = vmatprep.mubr.msk.bf16.mxu0 %vm388_vm1, %v9490_v34  ;;  %v2563_v34 = vpack.c.bf16 %v2547_v53, %v2546_v52 }
 0x1b6   : > { %8740 = vmatprep.subr.msk.bf16.mxu0 %vm962_vm0, %v9741_v44 }
 0x1bc   : > { %7719 = vmatmul.mubr.msk.bf16.gmra.mrb[4].mxu0 %vm388_vm1, %v9496_v41  ;;  %v2814_v41 = vld [vmem:[#allocation2 + $0x88] sm:$0xff] }
 0x1bd   : > { %7722 = vmatprep.mubr.msk.bf16.mxu0 %vm388_vm1, %v9498_v42  ;;  %v2815_v42 = vld [vmem:[#allocation2 + $0x90] sm:$0xff] }
 0x1c4   : > { %7723 = vmatmul.mubr.msk.bf16.gmra.mrb[8].mxu0 %vm388_vm1, %v9504_v37  ;;  %v2844_v37 = vpack.c.bf16 %v2815_v42, %v2814_v41 }
 0x1c5   : > { %7726 = vmatprep.mubr.msk.bf16.mxu0 %vm388_vm1, %v9506_v47  ;;  %v3203_v47 = vsel %vm962_vm0, %v9741_v44, 0 }
 0x1cc   : > { %7727 = vmatmul.mubr.msk.bf16.gmra.mrb[12].mxu0 %vm388_vm1, %v9518_v59  ;;  %v2816_v59 = vld [vmem:[#allocation2 + $0xa8] sm:$0xff] }
 0x1cd   : > { %7730 = vmatprep.mubr.msk.bf16.mxu0 %vm388_vm1, %v9520_v62  ;;  %v2817_v62 = vld [vmem:[#allocation2 + $0xb0] sm:$0xff] }
 0x1d4   : > { %7731 = vmatmul.mubr.msk.bf16.gmra.mrb[16].mxu0 %vm388_vm1, %v9526_v15  ;;  %v2818_v15 = vld [vmem:[#allocation2 + $0xc8] sm:$0xff] }
 0x1d5   : > { %7734 = vmatprep.mubr.msk.bf16.mxu0 %vm388_vm1, %v9528_v11  ;;  %v2819_v11 = vld [vmem:[#allocation2 + $0xd0] sm:$0xff] }
 0x1dc   : > { %7735 = vmatmul.mubr.msk.bf16.gmra.mrb[20].mxu0 %vm388_vm1, %v9534_v29  ;;  %v2845_v29 = vpack.c.bf16 %v2817_v62, %v2816_v59 }
 0x1dd   : > { %7738 = vmatprep.mubr.msk.bf16.mxu0 %vm388_vm1, %v9536_v32  ;;  %v2846_v32 = vpack.c.bf16 %v2819_v11, %v2818_v15 }
 0x1e4   : > { %7739 = vmatmul.mubr.msk.bf16.gmra.mrb[24].mxu0 %vm388_vm1, %v9544_v45  ;;  %v2821_v45 = vld [vmem:[#allocation2 + $0xf0] sm:$0xff] }
 0x1e5   : > { %7742 = vmatprep.mubr.msk.bf16.mxu0 %vm388_vm1, %v9650_v12  ;;  %v2847_v1 = vpack.c.bf16 %v2821_v45, %v2820_v2  ;;  %v2831_v12 = vld [vmem:[#allocation2 + $0x190] sm:$0xff] }
 0x1e6   : > { %v2852_v43 = vpack.c.bf16 %v2831_v12, %v2830_v17 }
 0x1ec   : > { %7743 = vmatmul.mubr.msk.bf16.gmra.mrb[28].mxu0 %vm388_vm1, %v2563_v34 }
 0x1ed   : > { %7748 = vmatprep.mubr.msk.bf16.mxu0 %vm388_vm1, %v9655_v27  ;;  %v2840_v27 = vld [vmem:[#allocation2 + $0x228] sm:$0xff] }
 0x1f4   : > { %7749 = vmatmul.mubr.msk.bf16.vlgmr.msra.gmra.mrb[0].mxu0 %vm388_vm1, %v9657_v39  ;;  %v2841_v39 = vld [vmem:[#allocation2 + $0x230] sm:$0xff] }
 0x1f5   : > { %7781 = vmatpush3.bf16.msra.mxu0 %v3203_v47  ;;  %7752 = vmatprep.mubr.msk.bf16.mxu0 %vm388_vm1, %v2844_v37  ;;  %v2857_v40 = vpack.c.bf16 %v2841_v39, %v2840_v27 }
 0x1fc   : > { %7753 = vmatmul.mubr.msk.bf16.gmra.mrb[4].mxu0 %vm388_vm1, %v2845_v29 }
 0x1fd   : > { %7756 = vmatprep.mubr.msk.bf16.mxu0 %vm388_vm1, %v2846_v32 }
 0x204   : > { %7757 = vmatmul.mubr.msk.bf16.gmra.mrb[8].mxu0 %vm388_vm1, %v2847_v1 }
 0x205   : > { %7760 = vmatprep.mubr.msk.bf16.mxu0 %vm388_vm1, %v2848_v54 }
 0x20c   : > { %7761 = vmatmul.mubr.msk.bf16.gmra.mrb[12].mxu0 %vm388_vm1, %v2849_v4 }
 0x20d   : > { %7764 = vmatprep.mubr.msk.bf16.mxu0 %vm388_vm1, %v2850_v21 }
 0x214   : > { %7765 = vmatmul.mubr.msk.bf16.gmra.mrb[16].mxu0 %vm388_vm1, %v2851_v31 }
 0x215   : > { %7768 = vmatprep.mubr.msk.bf16.mxu0 %vm388_vm1, %v2852_v43 }
 0x21c   : > { %7769 = vmatmul.mubr.msk.bf16.gmra.mrb[20].mxu0 %vm388_vm1, %v2853_v10 }
 0x21d   : > { %7772 = vmatprep.mubr.msk.bf16.mxu0 %vm388_vm1, %v9460_v13  ;;  %v3134_v13 = vld [vmem:[#allocation2 + $0x229] sm:$0xff] }
 0x224   : > { %7773 = vmatmul.mubr.msk.bf16.gmra.mrb[24].mxu0 %vm388_vm1, %v9466_v50  ;;  %v3135_v50 = vld [vmem:[#allocation2 + $0x231] sm:$0xff] }
 0x225   : > { %7776 = vmatprep.mubr.msk.bf16.mxu0 %vm388_vm1, %v9692_v36 }
 0x22c   : > { %7777 = vmatmul.mubr.msk.bf16.gmra.mrb[28].mxu0 %vm388_vm1, %v2857_v40 }
 0x22d   : > { %7782 = vmatprep.mubr.msk.bf16.mxu0 %vm388_vm1, %v9551_v0  ;;  %v3151_v0 = vpack.c.bf16 %v3135_v50, %v3134_v13 }
 0x234   : > { %7783 = vmatmul.mubr.msk.bf16.vlgmr.msra.gmra.mrb[0].mxu0 %vm388_vm1, %v9563_v60  ;;  %v7011_v60 = vld [vmem:[%s10948_s7 + $0x4] sm:$0xf] }
 0x235   : > { %7786 = vmatprep.mubr.msk.bf16.mxu0 %vm388_vm1, %v9565_v30  ;;  %8741 = vmatprep.subr.msk.bf16.mxu0 %vm3887_vm7, %v7011_v60  ;;  %v3889_v30 = vsel %vm3887_vm7, %v7011_v60, 0 }
 0x236   : > { %8742 = vmatprep.subr.msk.bf16.mxu1 %vm3887_vm7, %v7011_v60  ;;  %7815 = vmatpush3.bf16.msra.mxu0 %v3889_v30 }
 0x237   : > { %8155 = vmatpush3.bf16.msra.mxu1 %v3889_v30 }
 0x23c   : > { %7787 = vmatmul.mubr.msk.bf16.gmra.mrb[4].mxu0 %vm388_vm1, %v9571_v7  ;;  %v3789_v7 = vld [vmem:[#allocation3 + $0x8] sm:$0xff] }
 0x23d   : > { %7790 = vmatprep.mubr.msk.bf16.mxu0 %vm388_vm1, %v9573_v9  ;;  %v3790_v9 = vld [vmem:[#allocation3 + $0x10] sm:$0xff] }
 0x244   : > { %7791 = vmatmul.mubr.msk.bf16.gmra.mrb[8].mxu0 %vm388_vm1, %v9579_v18  ;;  %v3821_v18 = vpack.c.bf16 %v3790_v9, %v3789_v7 }
 0x245   : > { %7794 = vmatprep.mubr.msk.bf16.mxu0 %vm388_vm1, %v9581_v19  ;;  %v9926_v19 = vld [vmem:[%s10948_s7] sm:$0xf] }
 0x246   : > { %8743 = vmatprep.subr.msk.bf16.mxu1 %vm3887_vm7, %v9926_v19 }
 0x24c   : > { %7795 = vmatmul.mubr.msk.bf16.gmra.mrb[12].mxu0 %vm388_vm1, %v9587_v33  ;;  %v9933_v33 = vld [vmem:[%s10945_s4] ss:$0 sm:$0xff] }
 0x24d   : > { %7798 = vmatprep.mubr.msk.bf16.mxu0 %vm388_vm1, %v9589_v35 }
 0x254   : > { %7799 = vmatmul.mubr.msk.bf16.gmra.mrb[16].mxu0 %vm388_vm1, %v9595_v23  ;;  %v9938_v23 = vld [vmem:[%s10946_s5] ss:$0 sm:$0xff] }
 0x255   : > { %7802 = vmatprep.mubr.msk.bf16.mxu0 %vm388_vm1, %v9597_v16 }
 0x25c   : > { %7803 = vmatmul.mubr.msk.bf16.gmra.mrb[20].mxu0 %vm388_vm1, %v9603_v56 }
 0x25d   : > { %7806 = vmatprep.mubr.msk.bf16.mxu0 %vm388_vm1, %v9605_v26  ;;  %v9944_v26 = vld [vmem:[%s10947_s6] ss:$0 sm:$0xff] }
 0x264   : > { %7807 = vmatmul.mubr.msk.bf16.gmra.mrb[24].mxu0 %vm388_vm1, %v9611_v8 }
 0x265   : > { %7810 = vmatprep.mubr.msk.bf16.mxu0 %vm388_vm1, %v9731_v38 }
 0x26c   : > { %7811 = vmatmul.mubr.msk.bf16.gmra.mrb[28].mxu0 %vm388_vm1, %v3151_v0 }
 0x26d   : > { %7816 = vmatprep.mubr.msk.bf16.mxu0 %vm434_vm6, %v3821_v18 }
 0x307   : > { %v7784_v35 = vpop.f32.mrb[0].mxu0 }
 0x308   : > { %v3407_v16 = vadd.f32 %v7784_v35, %v9933_v33  ;;  %v3239_v56 = vpop.f32.mrb[1].mxu0 }
 0x309   : > { %v3405_v8 = vadd.f32 %v9933_v33, %v3239_v56  ;;  %v7785_v46 = vpop.f32.mrb[2].mxu0 }
 0x30a   : > { %v3446_v57 = vmul.f32 %v9938_v23, %v3407_v16  ;;  %v3408_v28 = vadd.f32 %v7785_v46, %v9933_v33  ;;  %v3242_v36 = vpop.f32.mrb[3].mxu0 }
 0x30b   : > { %v3444_v14 = vmul.f32 %v9938_v23, %v3405_v8  ;;  %v3406_v61 = vadd.f32 %v9933_v33, %v3242_v36 }
 0x30c   : > { %v9952_v51 = vadd.f32 %v9944_v26, %v3446_v57  ;;  %v3447_v63 = vmul.f32 %v9938_v23, %v3408_v28 }
 0x30d   : > { %v9956_v38 = vadd.f32 %v9944_v26, %v3444_v14  ;;  %v3445_v22 = vmul.f32 %v9938_v23, %v3406_v61 }
 0x30e   : > { %v3549_v44 = vmin.f32 %v9952_v51, 0.0  ;;  %v9961_v52 = vadd.f32 %v9944_v26, %v3447_v63  ;;  %vm3517_vm8 = vcmp.gt.f32.partialorder %v9952_v51, 0.0 }
 0x30f   : > { %v3547_v53 = vmin.f32 %v9956_v38, 0.0  ;;  %v9965_v34 = vadd.f32 %v9944_v26, %v3445_v22  ;;  %v7788_v41 = vpop.f32.mrb[4].mxu0  ;;  %vm3515_vm9 = vcmp.gt.f32.partialorder %v9956_v38, 0.0 }
 0x310   : > { %v3583_v42 = vmul.f32 1.442695, %v3549_v44  ;;  %v3550_v37 = vmin.f32 %v9961_v52, 0.0  ;;  %v3411_v47 = vadd.f32 %v7788_v41, %v9933_v33  ;;  %v3255_v59 = vpop.f32.mrb[5].mxu0  ;;  %vm3518_vm10 = vcmp.gt.f32.partialorder %v9961_v52, 0.0 }
 0x311   : > { %v3579_v62 = vmul.f32 1.442695, %v3547_v53  ;;  %v3548_v15 = vmin.f32 %v9965_v34, 0.0  ;;  %v3409_v11 = vadd.f32 %v9933_v33, %v3255_v59  ;;  %v7789_v29 = vpop.f32.mrb[6].mxu0  ;;  %vm3516_vm11 = vcmp.gt.f32.partialorder %v9965_v34, 0.0 }
 0x312   : > { %8825 = vpow2.f32 %v3583_v42  ;;  %v3585_v32 = vmul.f32 1.442695, %v3550_v37  ;;  %v3450_v2 = vmul.f32 %v9938_v23, %v3411_v47  ;;  %v3412_v45 = vadd.f32 %v7789_v29, %v9933_v33  ;;  %v3258_v49 = vpop.f32.mrb[7].mxu0 }
 0x313   : > { %8827 = vpow2.f32 %v3579_v62  ;;  %v3581_v24 = vmul.f32 1.442695, %v3548_v15  ;;  %v3448_v1 = vmul.f32 %v9938_v23, %v3409_v11  ;;  %v3410_v54 = vadd.f32 %v9933_v33, %v3258_v49 }
 0x314   : > { %8829 = vpow2.f32 %v3585_v32  ;;  %v9976_v55 = vadd.f32 %v9944_v26, %v3450_v2  ;;  %v3451_v58 = vmul.f32 %v9938_v23, %v3412_v45 }
 0x315   : > { %8831 = vpow2.f32 %v3581_v24  ;;  %v9980_v25 = vadd.f32 %v9944_v26, %v3448_v1  ;;  %v3449_v6 = vmul.f32 %v9938_v23, %v3410_v54 }
 0x316   : > { %v3553_v4 = vmin.f32 %v9976_v55, 0.0  ;;  %v9985_v21 = vadd.f32 %v9944_v26, %v3451_v58  ;;  %vm3521_vm12 = vcmp.gt.f32.partialorder %v9976_v55, 0.0 }
 0x317   : > { %v3551_v3 = vmin.f32 %v9980_v25, 0.0  ;;  %v9989_v5 = vadd.f32 %v9944_v26, %v3449_v6  ;;  %v7792_v17 = vpop.f32.mrb[8].mxu0  ;;  %vm3519_vm13 = vcmp.gt.f32.partialorder %v9980_v25, 0.0 }
 0x318   : > { %v3591_v12 = vmul.f32 1.442695, %v3553_v4  ;;  %v3554_v31 = vmin.f32 %v9985_v21, 0.0  ;;  %v3415_v43 = vadd.f32 %v7792_v17, %v9933_v33  ;;  %v3271_v20 = vpop.f32.mrb[9].mxu0  ;;  %vm3522_vm14 = vcmp.gt.f32.partialorder %v9985_v21, 0.0 }
 0x319   : > { %v3587_v48 = vmul.f32 1.442695, %v3551_v3  ;;  %v3552_v10 = vmin.f32 %v9989_v5, 0.0  ;;  %v3413_v27 = vadd.f32 %v9933_v33, %v3271_v20  ;;  %v7793_v39 = vpop.f32.mrb[10].mxu0  ;;  %vm3520_vm15 = vcmp.gt.f32.partialorder %v9989_v5, 0.0 }
 0x31a   : > { %8833 = vpow2.f32 %v3591_v12  ;;  %v3593_v40 = vmul.f32 1.442695, %v3554_v31  ;;  %v3454_v13 = vmul.f32 %v9938_v23, %v3415_v43  ;;  %v3416_v50 = vadd.f32 %v7793_v39, %v9933_v33  ;;  %v3274_v0 = vpop.f32.mrb[11].mxu0 }
 0x31b   : > { %8835 = vpow2.f32 %v3587_v48  ;;  %v3589_v60 = vmul.f32 1.442695, %v3552_v10  ;;  %v3452_v30 = vmul.f32 %v9938_v23, %v3413_v27  ;;  %v3414_v7 = vadd.f32 %v9933_v33, %v3274_v0 }
 0x31c   : > { %v8826_v9 = vpop.eup %8825  ;;  %8837 = vpow2.f32 %v3593_v40  ;;  %v10002_v18 = vadd.f32 %v9944_v26, %v3454_v13  ;;  %v3455_v35 = vmul.f32 %v9938_v23, %v3416_v50 }
 0x31d   : > { %v8828_v16 = vpop.eup %8827  ;;  %v6981_v56 = vadd.f32 -1.0, %v8826_v9  ;;  %8839 = vpow2.f32 %v3589_v60  ;;  %v10006_v8 = vadd.f32 %v9944_v26, %v3452_v30  ;;  %v3453_v46 = vmul.f32 %v9938_v23, %v3414_v7 }
 0x31e   : > { %v8830_v57 = vpop.eup %8829  ;;  %v6979_v28 = vadd.f32 -1.0, %v8828_v16  ;;  %v3557_v36 = vmin.f32 %v10002_v18, 0.0  ;;  %v10012_v14 = vadd.f32 %v9944_v26, %v3455_v35  ;;  %vm3525_vm2 = vcmp.gt.f32.partialorder %v10002_v18, 0.0 }
 0x31f   : > { %v8832_v61 = vpop.eup %8831  ;;  %v3677_v63 = vsel %vm3517_vm8, %v9952_v51, %v6981_v56  ;;  %v6982_v22 = vadd.f32 -1.0, %v8830_v57  ;;  %v3555_v44 = vmin.f32 %v10006_v8, 0.0  ;;  %v7796_v53 = vpop.f32.mrb[12].mxu0  ;;  %v10030_v15 = vadd.f32 %v9944_v26, %v3453_v46 }
 0x320   : > { %3710 = vst.msk [vmem:[#allocation3 + $0x48] sm:$0xff] %vm434_vm6, %v3677_v63  ;;  %v3675_v41 = vsel %vm3515_vm9, %v9956_v38, %v6979_v28  ;;  %v6980_v42 = vadd.f32 -1.0, %v8832_v61  ;;  %v3599_v37 = vmul.f32 1.442695, %v3557_v36  ;;  %v3287_v47 = vpop.f32.mrb[13].mxu0  ;;  %v3558_v62 = vmin.f32 %v10012_v14, 0.0 }
 0x321   : > { %3708 = vst.msk [vmem:[#allocation3 + $0x28] sm:$0xff] %vm434_vm6, %v3675_v41  ;;  %v3678_v51 = vsel %vm3518_vm10, %v9961_v52, %v6982_v22  ;;  %v3595_v59 = vmul.f32 1.442695, %v3555_v44  ;;  %v7797_v11 = vpop.f32.mrb[14].mxu0  ;;  %v3419_v29 = vadd.f32 %v7796_v53, %v9933_v33  ;;  %v3417_v32 = vadd.f32 %v9933_v33, %v3287_v47 }
 0x322   : > { %3711 = vst.msk [vmem:[#allocation3 + $0x50] sm:$0xff] %vm434_vm6, %v3678_v51  ;;  %v3676_v38 = vsel %vm3516_vm11, %v9965_v34, %v6980_v42  ;;  %8841 = vpow2.f32 %v3599_v37  ;;  %v3290_v2 = vpop.f32.mrb[15].mxu0  ;;  %v3601_v52 = vmul.f32 1.442695, %v3558_v62  ;;  %v3556_v45 = vmin.f32 %v10030_v15, 0.0 }
 0x323   : > { %3709 = vst.msk [vmem:[#allocation3 + $0x30] sm:$0xff] %vm434_vm6, %v3676_v38  ;;  %8843 = vpow2.f32 %v3595_v59  ;;  %v3458_v24 = vmul.f32 %v9938_v23, %v3419_v29  ;;  %v3456_v1 = vmul.f32 %v9938_v23, %v3417_v32  ;;  %v3420_v34 = vadd.f32 %v7797_v11, %v9933_v33 }
 0x324   : > { %v8834_v49 = vpop.eup %8833  ;;  %v3418_v54 = vadd.f32 %v9933_v33, %v3290_v2  ;;  %8845 = vpow2.f32 %v3601_v52  ;;  %v3597_v4 = vmul.f32 1.442695, %v3556_v45  ;;  %vm3523_vm3 = vcmp.gt.f32.partialorder %v10006_v8, 0.0 }
 0x325   : > { %v8836_v58 = vpop.eup %8835  ;;  %v6985_v6 = vadd.f32 -1.0, %v8834_v49  ;;  %v10047_v12 = vadd.f32 %v9944_v26, %v3458_v24  ;;  %v10050_v31 = vadd.f32 %v9944_v26, %v3456_v1  ;;  %v3459_v43 = vmul.f32 %v9938_v23, %v3420_v34 }
 0x326   : > { %v8838_v3 = vpop.eup %8837  ;;  %v6983_v17 = vadd.f32 -1.0, %v8836_v58  ;;  %8847 = vpow2.f32 %v3597_v4  ;;  %v3457_v27 = vmul.f32 %v9938_v23, %v3418_v54  ;;  %vm3526_vm4 = vcmp.gt.f32.partialorder %v10012_v14, 0.0 }
 0x327   : > { %v8840_v20 = vpop.eup %8839  ;;  %v3681_v48 = vsel %vm3521_vm12, %v9976_v55, %v6985_v6  ;;  %v6986_v10 = vadd.f32 -1.0, %v8838_v3  ;;  %v7800_v39 = vpop.f32.mrb[16].mxu0  ;;  %v3561_v50 = vmin.f32 %v10047_v12, 0.0  ;;  %v3559_v60 = vmin.f32 %v10050_v31, 0.0  ;;  %v3793_v4 = vld [vmem:[#allocation3 + $0x48] sm:$0xff] }
 0x328   : > { %3714 = vst.msk [vmem:[#allocation3 + $0x88] sm:$0xff] %vm434_vm6, %v3681_v48  ;;  %v3679_v40 = vsel %vm3519_vm13, %v9980_v25, %v6983_v17  ;;  %v6984_v13 = vadd.f32 -1.0, %v8840_v20  ;;  %v3303_v0 = vpop.f32.mrb[17].mxu0  ;;  %v10070_v30 = vadd.f32 %v9944_v26, %v3459_v43  ;;  %v10075_v35 = vadd.f32 %v9944_v26, %v3457_v27  ;;  %v3791_v1 = vld [vmem:[#allocation3 + $0x28] sm:$0xff] }
 0x329   : > { %3712 = vst.msk [vmem:[#allocation3 + $0x68] sm:$0xff] %vm434_vm6, %v3679_v40  ;;  %v3682_v55 = vsel %vm3522_vm14, %v9985_v21, %v6986_v10  ;;  %v7801_v25 = vpop.f32.mrb[18].mxu0  ;;  %v3607_v9 = vmul.f32 1.442695, %v3561_v50  ;;  %v3423_v16 = vadd.f32 %v7800_v39, %v9933_v33  ;;  %v3603_v21 = vmul.f32 1.442695, %v3559_v60 }
 0x32a   : > { %3715 = vst.msk [vmem:[#allocation3 + $0x90] sm:$0xff] %vm434_vm6, %v3682_v55  ;;  %v3680_v7 = vsel %vm3520_vm15, %v9989_v5, %v6984_v13  ;;  %v3306_v56 = vpop.f32.mrb[19].mxu0  ;;  %v3562_v46 = vmin.f32 %v10070_v30, 0.0  ;;  %v3421_v57 = vadd.f32 %v9933_v33, %v3303_v0  ;;  %v3560_v5 = vmin.f32 %v10075_v35, 0.0  ;;  %v3792_v11 = vld [vmem:[#allocation3 + $0x30] sm:$0xff] }
 0x32b   : > { %3713 = vst.msk [vmem:[#allocation3 + $0x70] sm:$0xff] %vm434_vm6, %v3680_v7  ;;  %8849 = vpow2.f32 %v3607_v9  ;;  %v3462_v36 = vmul.f32 %v9938_v23, %v3423_v16  ;;  %v3424_v37 = vadd.f32 %v7801_v25, %v9933_v33  ;;  %v3422_v62 = vadd.f32 %v9933_v33, %v3306_v56  ;;  %v3794_v2 = vld [vmem:[#allocation3 + $0x50] sm:$0xff] }
 0x32c   : > { %v8842_v28 = vpop.eup %8841  ;;  %8851 = vpow2.f32 %v3603_v21  ;;  %v3609_v22 = vmul.f32 1.442695, %v3562_v46  ;;  %v3460_v44 = vmul.f32 %v9938_v23, %v3421_v57  ;;  %v3605_v41 = vmul.f32 1.442695, %v3560_v5 }
 0x32d   : > { %v8844_v61 = vpop.eup %8843  ;;  %v6989_v63 = vadd.f32 -1.0, %v8842_v28  ;;  %v10087_v42 = vadd.f32 %v9944_v26, %v3462_v36  ;;  %vm3524_vm5 = vcmp.gt.f32.partialorder %v10030_v15, 0.0  ;;  %vm3529_vm8 = vcmp.gt.f32.partialorder %v10047_v12, 0.0 }
 0x32e   : > { %v6987_v53 = vadd.f32 -1.0, %v8844_v61  ;;  %v8846_v47 = vpop.eup %8845  ;;  %8853 = vpow2.f32 %v3609_v22  ;;  %v10094_v59 = vadd.f32 %v9944_v26, %v3460_v44  ;;  %v3463_v24 = vmul.f32 %v9938_v23, %v3424_v37 }
 0x32f   : > { %v3685_v51 = vsel %vm3525_vm2, %v10002_v18, %v6989_v63  ;;  %v7804_v38 = vpop.f32.mrb[20].mxu0  ;;  %v6990_v32 = vadd.f32 -1.0, %v8846_v47  ;;  %8855 = vpow2.f32 %v3605_v41  ;;  %v3565_v45 = vmin.f32 %v10087_v42, 0.0 }
 0x330   : > { %3718 = vst.msk [vmem:[#allocation3 + $0xc8] sm:$0xff] %vm434_vm6, %v3685_v51  ;;  %v3683_v29 = vsel %vm3523_vm3, %v10006_v8, %v6987_v53  ;;  %v3319_v18 = vpop.f32.mrb[21].mxu0  ;;  %v8848_v52 = vpop.eup %8847  ;;  %v3563_v49 = vmin.f32 %v10094_v59, 0.0  ;;  %v3461_v58 = vmul.f32 %v9938_v23, %v3422_v62  ;;  %v10111_v6 = vpack.c.bf16 %v3792_v11, %v3791_v1 }
 0x331   : > { %3716 = vst.msk [vmem:[#allocation3 + $0xa8] sm:$0xff] %vm434_vm6, %v3683_v29  ;;  %v7805_v34 = vpop.f32.mrb[22].mxu0  ;;  %v3686_v8 = vsel %vm3526_vm4, %v10012_v14, %v6990_v32  ;;  %v6988_v54 = vadd.f32 -1.0, %v8848_v52  ;;  %v3615_v17 = vmul.f32 1.442695, %v3565_v45  ;;  %v10115_v20 = vadd.f32 %v9944_v26, %v3463_v24  ;;  %v3798_v11 = vld [vmem:[#allocation3 + $0x90] sm:$0xff] }
 0x332   : > { %v3322_v3 = vpop.f32.mrb[23].mxu0  ;;  %3719 = vst.msk [vmem:[#allocation3 + $0xd0] sm:$0xff] %vm434_vm6, %v3686_v8  ;;  %v3611_v43 = vmul.f32 1.442695, %v3563_v49  ;;  %v10117_v48 = vpack.c.bf16 %v3794_v2, %v3793_v4  ;;  %v10123_v10 = vadd.f32 %v9944_v26, %v3461_v58  ;;  %7817 = vmatmul.mubr.msk.bf16.vlgmr.msra.gmra.mrb[32].mxu0 %vm434_vm6, %v10111_v6  ;;  %v3427_v27 = vadd.f32 %v7804_v38, %v9933_v33  ;;  %v3795_v32 = vld [vmem:[#allocation3 + $0x68] sm:$0xff] }
 0x333   : > { %v3684_v14 = vsel %vm3524_vm5, %v10030_v15, %v6988_v54  ;;  %v3425_v39 = vadd.f32 %v9933_v33, %v3319_v18  ;;  %vm3527_vm9 = vcmp.gt.f32.partialorder %v10050_v31, 0.0  ;;  %8857 = vpow2.f32 %v3615_v17  ;;  %v3797_v49 = vld [vmem:[#allocation3 + $0x88] sm:$0xff] }
 0x334   : > { %3717 = vst.msk [vmem:[#allocation3 + $0xb0] sm:$0xff] %vm434_vm6, %v3684_v14  ;;  %v3566_v40 = vmin.f32 %v10115_v20, 0.0  ;;  %7820 = vmatprep.mubr.msk.bf16.mxu0 %vm434_vm6, %v10117_v48  ;;  %v3428_v15 = vadd.f32 %v7805_v34, %v9933_v33  ;;  %vm3530_vm10 = vcmp.gt.f32.partialorder %v10070_v30, 0.0  ;;  %8859 = vpow2.f32 %v3611_v43 }
 0x335   : > { %v8850_v13 = vpop.eup %8849  ;;  %v3564_v50 = vmin.f32 %v10123_v10, 0.0  ;;  %v3466_v0 = vmul.f32 %v9938_v23, %v3427_v27  ;;  %v3464_v7 = vmul.f32 %v9938_v23, %v3425_v39  ;;  %v3426_v57 = vadd.f32 %v9933_v33, %v3322_v3 }
 0x336   : > { %v8852_v55 = vpop.eup %8851  ;;  %v6993_v60 = vadd.f32 -1.0, %v8850_v13  ;;  %v3617_v25 = vmul.f32 1.442695, %v3566_v40  ;;  %v3467_v9 = vmul.f32 %v9938_v23, %v3428_v15  ;;  %vm3528_vm11 = vcmp.gt.f32.partialorder %v10075_v35, 0.0 }
 0x337   : > { %v7808_v16 = vpop.f32.mrb[24].mxu0  ;;  %v6991_v56 = vadd.f32 -1.0, %v8852_v55  ;;  %v3613_v21 = vmul.f32 1.442695, %v3564_v50  ;;  %v10141_v46 = vadd.f32 %v9944_v26, %v3466_v0  ;;  %v10148_v61 = vadd.f32 %v9944_v26, %v3464_v7 }
 0x338   : > { %v3335_v28 = vpop.f32.mrb[25].mxu0  ;;  %v8854_v5 = vpop.eup %8853  ;;  %v3689_v36 = vsel %vm3529_vm8, %v10047_v12, %v6993_v60  ;;  %8861 = vpow2.f32 %v3617_v25  ;;  %v10151_v63 = vadd.f32 %v9944_v26, %v3467_v9  ;;  %v3796_v12 = vld [vmem:[#allocation3 + $0x70] sm:$0xff]  ;;  %vm3533_vm12 = vcmp.gt.f32.partialorder %v10087_v42, 0.0  ;;  %v3799_v25 = vld [vmem:[#allocation3 + $0xa8] sm:$0xff] }
 0x339   : > { %v7809_v22 = vpop.f32.mrb[26].mxu0  ;;  %v8856_v44 = vpop.eup %8855  ;;  %3722 = vst.msk [vmem:[#allocation3 + $0x108] sm:$0xff] %vm434_vm6, %v3689_v36  ;;  %v3687_v53 = vsel %vm3527_vm9, %v10050_v31, %v6991_v56  ;;  %v6994_v41 = vadd.f32 -1.0, %v8854_v5  ;;  %8863 = vpow2.f32 %v3613_v21  ;;  %v3569_v51 = vmin.f32 %v10141_v46, 0.0 }
 0x33a   : > { %v3338_v37 = vpop.f32.mrb[27].mxu0  ;;  %3720 = vst.msk [vmem:[#allocation3 + $0xe8] sm:$0xff] %vm434_vm6, %v3687_v53  ;;  %v6992_v47 = vadd.f32 -1.0, %v8856_v44  ;;  %v3567_v62 = vmin.f32 %v10148_v61, 0.0  ;;  %vm3531_vm13 = vcmp.gt.f32.partialorder %v10094_v59, 0.0  ;;  %v3570_v38 = vmin.f32 %v10151_v63, 0.0 }
 0x33b   : > { %v3690_v31 = vsel %vm3530_vm10, %v10070_v30, %v6994_v41  ;;  %v3465_v29 = vmul.f32 %v9938_v23, %v3426_v57  ;;  %v3623_v18 = vmul.f32 1.442695, %v3569_v51  ;;  %v10172_v45 = vpack.c.bf16 %v3796_v12, %v3795_v32  ;;  %v3800_v14 = vld [vmem:[#allocation3 + $0xb0] sm:$0xff] }
 0x33c   : > { %3723 = vst.msk [vmem:[#allocation3 + $0x110] sm:$0xff] %vm434_vm6, %v3690_v31  ;;  %v3688_v2 = vsel %vm3528_vm11, %v10075_v35, %v6992_v47  ;;  %v3619_v52 = vmul.f32 1.442695, %v3567_v62  ;;  %v3625_v30 = vmul.f32 1.442695, %v3570_v38  ;;  %v10178_v1 = vpack.c.bf16 %v3798_v11, %v3797_v49  ;;  %v3802_v44 = vld [vmem:[#allocation3 + $0xd0] sm:$0xff] }
 0x33d   : > { %3721 = vst.msk [vmem:[#allocation3 + $0xf0] sm:$0xff] %vm434_vm6, %v3688_v2  ;;  %v10176_v24 = vadd.f32 %v9944_v26, %v3465_v29  ;;  %v3431_v34 = vadd.f32 %v7808_v16, %v9933_v33  ;;  %v8858_v8 = vpop.eup %8857  ;;  %8865 = vpow2.f32 %v3623_v18  ;;  %7821 = vmatmul.mubr.msk.bf16.gmra.mrb[36].mxu0 %vm434_vm6, %v10172_v45  ;;  %v3429_v35 = vadd.f32 %v9933_v33, %v3335_v28  ;;  %v3801_v62 = vld [vmem:[#allocation3 + $0xc8] sm:$0xff] }
 0x33e   : > { %v3432_v54 = vadd.f32 %v7809_v22, %v9933_v33  ;;  %v3430_v58 = vadd.f32 %v9933_v33, %v3338_v37  ;;  %v8860_v3 = vpop.eup %8859  ;;  %v6997_v17 = vadd.f32 -1.0, %v8858_v8  ;;  %vm3534_vm14 = vcmp.gt.f32.partialorder %v10115_v20, 0.0  ;;  %7824 = vmatprep.mubr.msk.bf16.mxu0 %vm434_vm6, %v10178_v1 }
 0x33f   : > { %v7812_v4 = vpop.f32.mrb[28].mxu0  ;;  %8867 = vpow2.f32 %v3619_v52  ;;  %v3568_v43 = vmin.f32 %v10176_v24, 0.0  ;;  %v6995_v39 = vadd.f32 -1.0, %v8860_v3  ;;  %v3470_v40 = vmul.f32 %v9938_v23, %v3431_v34 }
 0x340   : > { %v3351_v27 = vpop.f32.mrb[29].mxu0  ;;  %8869 = vpow2.f32 %v3625_v30  ;;  %v3468_v15 = vmul.f32 %v9938_v23, %v3429_v35  ;;  %v3693_v50 = vsel %vm3533_vm12, %v10087_v42, %v6997_v17  ;;  %v3471_v55 = vmul.f32 %v9938_v23, %v3432_v54 }
 0x341   : > { %v7813_v13 = vpop.f32.mrb[30].mxu0  ;;  %v3621_v0 = vmul.f32 1.442695, %v3568_v43  ;;  %v3469_v60 = vmul.f32 %v9938_v23, %v3430_v58  ;;  %3726 = vst.msk [vmem:[#allocation3 + $0x148] sm:$0xff] %vm434_vm6, %v3693_v50  ;;  %v3691_v16 = vsel %vm3531_vm13, %v10094_v59, %v6995_v39  ;;  %v10202_v56 = vadd.f32 %v9944_v26, %v3470_v40 }
 0x342   : > { %v3354_v7 = vpop.f32.mrb[31].mxu0  ;;  %v8862_v9 = vpop.eup %8861  ;;  %v10205_v21 = vadd.f32 %v9944_v26, %v3468_v15  ;;  %v10207_v42 = vpack.c.bf16 %v3800_v14, %v3799_v25  ;;  %3724 = vst.msk [vmem:[#allocation3 + $0x128] sm:$0xff] %vm434_vm6, %v3691_v16  ;;  %v10211_v5 = vadd.f32 %v9944_v26, %v3471_v55  ;;  %vm3532_vm15 = vcmp.gt.f32.partialorder %v10123_v10, 0.0 }
 0x343   : > { %v8864_v57 = vpop.eup %8863  ;;  %v6998_v28 = vadd.f32 -1.0, %v8862_v9  ;;  %8871 = vpow2.f32 %v3621_v0  ;;  %v10214_v36 = vadd.f32 %v9944_v26, %v3469_v60  ;;  %vm3537_vm2 = vcmp.gt.f32.partialorder %v10141_v46, 0.0  ;;  %v3806_v58 = vld [vmem:[#allocation3 + $0x110] sm:$0xff]  ;;  %v3803_v0 = vld [vmem:[#allocation3 + $0xe8] sm:$0xff] }
 0x344   : > { %v6996_v59 = vadd.f32 -1.0, %v8864_v57  ;;  %v3573_v22 = vmin.f32 %v10202_v56, 0.0  ;;  %vm3535_vm3 = vcmp.gt.f32.partialorder %v10148_v61, 0.0  ;;  %v3571_v41 = vmin.f32 %v10205_v21, 0.0  ;;  %v3804_v39 = vld [vmem:[#allocation3 + $0xf0] sm:$0xff] }
 0x345   : > { %v3694_v53 = vsel %vm3534_vm14, %v10115_v20, %v6998_v28  ;;  %v3574_v12 = vmin.f32 %v10211_v5, 0.0  ;;  %vm3538_vm4 = vcmp.gt.f32.partialorder %v10151_v63, 0.0  ;;  %v3572_v51 = vmin.f32 %v10214_v36, 0.0  ;;  %7825 = vmatmul.mubr.msk.bf16.gmra.mrb[40].mxu0 %vm434_vm6, %v10207_v42 }
 0x346   : > { %3727 = vst.msk [vmem:[#allocation3 + $0x150] sm:$0xff] %vm434_vm6, %v3694_v53  ;;  %v3692_v37 = vsel %vm3532_vm15, %v10123_v10, %v6996_v59  ;;  %v3631_v47 = vmul.f32 1.442695, %v3573_v22  ;;  %v3627_v20 = vmul.f32 1.442695, %v3571_v41  ;;  %v10232_v31 = vpack.c.bf16 %v3802_v44, %v3801_v62 }
 0x347   : > { %3725 = vst.msk [vmem:[#allocation3 + $0x130] sm:$0xff] %vm434_vm6, %v3692_v37  ;;  %v3633_v11 = vmul.f32 1.442695, %v3574_v12  ;;  %v3435_v38 = vadd.f32 %v7812_v4, %v9933_v33  ;;  %v8866_v29 = vpop.eup %8865  ;;  %v3629_v10 = vmul.f32 1.442695, %v3572_v51  ;;  %v3433_v32 = vadd.f32 %v9933_v33, %v3351_v27 }
 0x348   : > { %8873 = vpow2.f32 %v3631_v47  ;;  %v3436_v2 = vadd.f32 %v7813_v13, %v9933_v33  ;;  %v7001_v52 = vadd.f32 -1.0, %v8866_v29  ;;  %7828 = vmatprep.mubr.msk.bf16.mxu0 %vm434_vm6, %v10232_v31  ;;  %v3434_v30 = vadd.f32 %v9933_v33, %v3354_v7  ;;  %v3809_v44 = vld [vmem:[#allocation3 + $0x148] sm:$0xff] }
 0x349   : > { %v8868_v18 = vpop.eup %8867  ;;  %8875 = vpow2.f32 %v3627_v20  ;;  %v3474_v49 = vmul.f32 %v9938_v23, %v3435_v38  ;;  %v3472_v35 = vmul.f32 %v9938_v23, %v3433_v32  ;;  %vm3536_vm5 = vcmp.gt.f32.partialorder %v10176_v24, 0.0  ;;  %v3807_v16 = vld [vmem:[#allocation3 + $0x128] sm:$0xff] }
 0x34a   : > { %v8870_v34 = vpop.eup %8869  ;;  %v6999_v8 = vadd.f32 -1.0, %v8868_v18  ;;  %8877 = vpow2.f32 %v3633_v11  ;;  %v3475_v54 = vmul.f32 %v9938_v23, %v3436_v2  ;;  %v3697_v4 = vsel %vm3537_vm2, %v10141_v46, %v7001_v52  ;;  %v3805_v46 = vld [vmem:[#allocation3 + $0x108] sm:$0xff] }
 0x34b   : > { %v7002_v3 = vadd.f32 -1.0, %v8870_v34  ;;  %8879 = vpow2.f32 %v3629_v10  ;;  %v10247_v17 = vadd.f32 %v9944_v26, %v3474_v49  ;;  %3730 = vst.msk [vmem:[#allocation3 + $0x188] sm:$0xff] %vm434_vm6, %v3697_v4  ;;  %v10254_v43 = vadd.f32 %v9944_v26, %v3472_v35 }
 0x34c   : > { %v3695_v33 = vsel %vm3535_vm3, %v10148_v61, %v6999_v8  ;;  %v10257_v14 = vadd.f32 %v9944_v26, %v3475_v54  ;;  %v3473_v27 = vmul.f32 %v9938_v23, %v3434_v30  ;;  %v10265_v61 = vpack.c.bf16 %v3806_v58, %v3805_v46 }
 0x34d   : > { %v8872_v40 = vpop.eup %8871  ;;  %3728 = vst.msk [vmem:[#allocation3 + $0x168] sm:$0xff] %vm434_vm6, %v3695_v33  ;;  %v3698_v15 = vsel %vm3538_vm4, %v10151_v63, %v7002_v3  ;;  %v3577_v13 = vmin.f32 %v10247_v17, 0.0  ;;  %v3575_v23 = vmin.f32 %v10254_v43, 0.0  ;;  %v3810_v60 = vld [vmem:[#allocation3 + $0x150] sm:$0xff]  ;;  %v10276_v63 = vpack.c.bf16 %v3804_v39, %v3803_v0 }
 0x34e   : > { %3731 = vst.msk [vmem:[#allocation3 + $0x190] sm:$0xff] %vm434_vm6, %v3698_v15  ;;  %v7000_v50 = vadd.f32 -1.0, %v8872_v40  ;;  %v3808_v55 = vld [vmem:[#allocation3 + $0x130] sm:$0xff]  ;;  %v3578_v7 = vmin.f32 %v10257_v14, 0.0  ;;  %v10272_v9 = vadd.f32 %v9944_v26, %v3473_v27  ;;  %7832 = vmatprep.mubr.msk.bf16.mxu1 %vm434_vm6, %v10265_v61  ;;  %v4101_v22 = vsel %vm3887_vm7, %v9926_v19, 0 }
 0x34f   : > { %v3639_v25 = vmul.f32 1.442695, %v3577_v13  ;;  %v3635_v28 = vmul.f32 1.442695, %v3575_v23  ;;  %v10279_v59 = vpack.c.bf16 %v3808_v55, %v3807_v16  ;;  %7829 = vmatmul.mubr.msk.bf16.gmra.mrb[44].mxu0 %vm434_vm6, %v10276_v63  ;;  %v10287_v41 = vpack.c.bf16 %v3810_v60, %v3809_v44  ;;  %v10354_v44 = vld [vmem:[%s10948_s7 + $0xc] sm:$0xf] }
 0x350   : > { %v3696_v57 = vsel %vm3536_vm5, %v10176_v24, %v7000_v50  ;;  %v3641_v26 = vmul.f32 1.442695, %v3578_v7  ;;  %v3576_v53 = vmin.f32 %v10272_v9, 0.0  ;;  %v10292_v24 = vld [vmem:[%s10948_s7 + $0x8] sm:$0xf]  ;;  %vm3541_vm8 = vcmp.gt.f32.partialorder %v10202_v56, 0.0 }
 0x351   : > { %3729 = vst.msk [vmem:[#allocation3 + $0x170] sm:$0xff] %vm434_vm6, %v3696_v57  ;;  %8881 = vpow2.f32 %v3639_v25  ;;  %7833 = vmatmul.mubr.msk.bf16.vlgmr.msra.gmra.mrb[0].mxu1 %vm434_vm6, %v10279_v59  ;;  %vm3539_vm9 = vcmp.gt.f32.partialorder %v10205_v21, 0.0  ;;  %vm3542_vm10 = vcmp.gt.f32.partialorder %v10211_v5, 0.0  ;;  %vm3540_vm11 = vcmp.gt.f32.partialorder %v10214_v36, 0.0  ;;  %v3741_v50 = vld [vmem:[#allocation3 + $0xf] sm:$0xff] }
 0x352   : > { %v8874_v12 = vpop.eup %8873  ;;  %8883 = vpow2.f32 %v3635_v28  ;;  %v3637_v47 = vmul.f32 1.442695, %v3576_v53  ;;  %7849 = vmatpush3.bf16.msra.mxu1 %v4101_v22  ;;  %7836 = vmatprep.mubr.msk.bf16.mxu1 %vm434_vm6, %v10287_v41  ;;  %vm3545_vm12 = vcmp.gt.f32.partialorder %v10247_v17, 0.0  ;;  %vm3543_vm13 = vcmp.gt.f32.partialorder %v10254_v43, 0.0  ;;  %v3743_v25 = vld [vmem:[#allocation3 + $0x2f] sm:$0xff]  ;;  %v3744_v28 = vld [vmem:[#allocation3 + $0x47] sm:$0xff] }
 0x353   : > { %v8876_v19 = vpop.eup %8875  ;;  %v7005_v37 = vadd.f32 -1.0, %v8874_v12  ;;  %8885 = vpow2.f32 %v3641_v26  ;;  %8744 = vmatprep.subr.msk.bf16.mxu1 %vm3887_vm7, %v10292_v24  ;;  %vm3546_vm14 = vcmp.gt.f32.partialorder %v10257_v14, 0.0  ;;  %vm3544_vm15 = vcmp.gt.f32.partialorder %v10272_v9, 0.0  ;;  %v3745_v7 = vld [vmem:[#allocation3 + $0x4f] sm:$0xff] }
 0x354   : > { %v8878_v51 = vpop.eup %8877  ;;  %v7003_v62 = vadd.f32 -1.0, %v8876_v19  ;;  %8887 = vpow2.f32 %v3637_v47  ;;  %v3811_v18 = vld [vmem:[#allocation3 + $0x168] sm:$0xff]  ;;  %v4363_v57 = vsel %vm3887_vm7, %v10292_v24, 0  ;;  %v10349_v22 = vpack.c.bf16 %v3745_v7, %v3744_v28  ;;  %v4269_v28 = vld [vmem:[#allocation3 + $0x51] sm:$0xff] }
 0x355   : > { %v8880_v20 = vpop.eup %8879  ;;  %v3701_v11 = vsel %vm3541_vm8, %v10202_v56, %v7005_v37  ;;  %v7006_v38 = vadd.f32 -1.0, %v8878_v51  ;;  %v3814_v2 = vld [vmem:[#allocation3 + $0x190] sm:$0xff]  ;;  %v3746_v24 = vld [vmem:[#allocation3 + $0x67] sm:$0xff] }
 0x356   : > { %3734 = vst.msk [vmem:[#allocation3 + $0x1c8] sm:$0xff] %vm434_vm6, %v3701_v11  ;;  %v3699_v29 = vsel %vm3539_vm9, %v10205_v21, %v7003_v62  ;;  %v7004_v10 = vadd.f32 -1.0, %v8880_v20  ;;  %v3813_v21 = vld [vmem:[#allocation3 + $0x188] sm:$0xff] }
 0x357   : > { %3732 = vst.msk [vmem:[#allocation3 + $0x1a8] sm:$0xff] %vm434_vm6, %v3699_v29  ;;  %v3702_v32 = vsel %vm3542_vm10, %v10211_v5, %v7006_v38  ;;  %v10314_v30 = vpack.c.bf16 %v3814_v2, %v3813_v21  ;;  %v3747_v26 = vld [vmem:[#allocation3 + $0x6f] sm:$0xff]  ;;  %v3748_v19 = vld [vmem:[#allocation3 + $0x87] sm:$0xff] }
 0x358   : > { %3735 = vst.msk [vmem:[#allocation3 + $0x1d0] sm:$0xff] %vm434_vm6, %v3702_v32  ;;  %v3700_v56 = vsel %vm3540_vm11, %v10214_v36, %v7004_v10  ;;  %v3812_v52 = vld [vmem:[#allocation3 + $0x170] sm:$0xff]  ;;  %v10362_v12 = vpack.c.bf16 %v3747_v26, %v3746_v24  ;;  %v3750_v62 = vld [vmem:[#allocation3 + $0xa7] sm:$0xff] }
 0x359   : > { %3733 = vst.msk [vmem:[#allocation3 + $0x1b0] sm:$0xff] %vm434_vm6, %v3700_v56  ;;  %v10312_v49 = vpack.c.bf16 %v3812_v52, %v3811_v18  ;;  %v3749_v53 = vld [vmem:[#allocation3 + $0x8f] sm:$0xff]  ;;  %v3752_v11 = vld [vmem:[#allocation3 + $0xc7] sm:$0xff] }
 0x35a   : > { %v10364_v37 = vpack.c.bf16 %v3749_v53, %v3748_v19  ;;  %v3751_v47 = vld [vmem:[#allocation3 + $0xaf] sm:$0xff]  ;;  %v3754_v32 = vld [vmem:[#allocation3 + $0xe7] sm:$0xff]  ;;  %v4657_v53 = vsel %vm3887_vm7, %v10354_v44, 0 }
 0x35b   : > { %v8882_v34 = vpop.eup %8881  ;;  %7837 = vmatmul.mubr.msk.bf16.gmra.mrb[4].mxu1 %vm434_vm6, %v10312_v49  ;;  %v3753_v51 = vld [vmem:[#allocation3 + $0xcf] sm:$0xff]  ;;  %v10370_v20 = vpack.c.bf16 %v3751_v47, %v3750_v62  ;;  %v3756_v56 = vld [vmem:[#allocation3 + $0x107] sm:$0xff] }
 0x35c   : > { %v8884_v5 = vpop.eup %8883  ;;  %v7009_v8 = vadd.f32 -1.0, %v8882_v34  ;;  %7840 = vmatprep.mubr.msk.bf16.mxu1 %vm434_vm6, %v10314_v30  ;;  %v10372_v38 = vpack.c.bf16 %v3753_v51, %v3752_v11  ;;  %v3755_v29 = vld [vmem:[#allocation3 + $0xef] sm:$0xff]  ;;  %v3758_v34 = vld [vmem:[#allocation3 + $0x127] sm:$0xff] }
 0x35d   : > { %v8886_v35 = vpop.eup %8885  ;;  %v7007_v36 = vadd.f32 -1.0, %v8884_v5  ;;  %v3817_v15 = vld [vmem:[#allocation3 + $0x1c8] sm:$0xff]  ;;  %v10378_v2 = vpack.c.bf16 %v3755_v29, %v3754_v32  ;;  %v7078_v19 = vld [vmem:[%s10948_s7 + $0x10] sm:$0xf] }
 0x35e   : > { %v3705_v54 = vsel %vm3545_vm12, %v10247_v17, %v7009_v8  ;;  %v7010_v58 = vadd.f32 -1.0, %v8886_v35  ;;  %v8888_v4 = vpop.eup %8887  ;;  %v3815_v39 = vld [vmem:[#allocation3 + $0x1a8] sm:$0xff]  ;;  %v4271_v51 = vld [vmem:[#allocation3 + $0x71] sm:$0xff] }
 0x35f   : > { %3738 = vst.msk [vmem:[#allocation3 + $0x208] sm:$0xff] %vm434_vm6, %v3705_v54  ;;  %v3703_v3 = vsel %vm3543_vm13, %v10254_v43, %v7007_v36  ;;  %v3818_v33 = vld [vmem:[#allocation3 + $0x1d0] sm:$0xff]  ;;  %v7008_v46 = vadd.f32 -1.0, %v8888_v4  ;;  %v3760_v8 = vld [vmem:[#allocation3 + $0x147] sm:$0xff] }
 0x360   : > { %3736 = vst.msk [vmem:[#allocation3 + $0x1e8] sm:$0xff] %vm434_vm6, %v3703_v3  ;;  %v3706_v27 = vsel %vm3546_vm14, %v10257_v14, %v7010_v58  ;;  %v3816_v40 = vld [vmem:[#allocation3 + $0x1b0] sm:$0xff]  ;;  %v10333_v43 = vpack.c.bf16 %v3818_v33, %v3817_v15  ;;  %v3740_v14 = vld [vmem:[#allocation3 + $0x7] sm:$0xff] }
 0x361   : > { %3739 = vst.msk [vmem:[#allocation3 + $0x210] sm:$0xff] %vm434_vm6, %v3706_v27  ;;  %v10330_v17 = vpack.c.bf16 %v3816_v40, %v3815_v39  ;;  %v3704_v13 = vsel %vm3544_vm15, %v10272_v9, %v7008_v46  ;;  %v3772_v55 = vpack.c.bf16 %v3741_v50, %v3740_v14  ;;  %v3742_v9 = vld [vmem:[#allocation3 + $0x27] sm:$0xff]  ;;  %v3757_v10 = vld [vmem:[#allocation3 + $0x10f] sm:$0xff] }
 0x362   : > { %3737 = vst.msk [vmem:[#allocation3 + $0x1f0] sm:$0xff] %vm434_vm6, %v3704_v13  ;;  %v10345_v16 = vpack.c.bf16 %v3743_v25, %v3742_v9  ;;  %v10380_v18 = vpack.c.bf16 %v3757_v10, %v3756_v56  ;;  %v3759_v52 = vld [vmem:[#allocation3 + $0x12f] sm:$0xff]  ;;  %v3762_v58 = vld [vmem:[#allocation3 + $0x167] sm:$0xff] }
 0x363   : > { %7841 = vmatmul.mubr.msk.bf16.gmra.mrb[8].mxu1 %vm434_vm6, %v10330_v17  ;;  %v3761_v21 = vld [vmem:[#allocation3 + $0x14f] sm:$0xff]  ;;  %v10386_v5 = vpack.c.bf16 %v3759_v52, %v3758_v34  ;;  %v3764_v3 = vld [vmem:[#allocation3 + $0x187] sm:$0xff] }
 0x364   : > { %7844 = vmatprep.mubr.msk.bf16.mxu1 %vm434_vm6, %v10333_v43  ;;  %v10388_v35 = vpack.c.bf16 %v3761_v21, %v3760_v8  ;;  %v3763_v36 = vld [vmem:[#allocation3 + $0x16f] sm:$0xff]  ;;  %v3766_v39 = vld [vmem:[#allocation3 + $0x1a7] sm:$0xff] }
 0x365   : > { %v3765_v54 = vld [vmem:[#allocation3 + $0x18f] sm:$0xff]  ;;  %v10394_v4 = vpack.c.bf16 %v3763_v36, %v3762_v58  ;;  %v3768_v15 = vld [vmem:[#allocation3 + $0x1c7] sm:$0xff] }
 0x366   : > { %v10396_v33 = vpack.c.bf16 %v3765_v54, %v3764_v3  ;;  %v3767_v27 = vld [vmem:[#allocation3 + $0x1af] sm:$0xff] }
 0x367   : > { %v3819_v23 = vld [vmem:[#allocation3 + $0x1e8] sm:$0xff]  ;;  %v10402_v40 = vpack.c.bf16 %v3767_v27, %v3766_v39  ;;  %v4265_v50 = vld [vmem:[#allocation3 + $0x11] sm:$0xff] }
 0x368   : > { %v3769_v46 = vld [vmem:[#allocation3 + $0x1cf] sm:$0xff] }
 0x369   : > { %v3820_v0 = vld [vmem:[#allocation3 + $0x1f0] sm:$0xff]  ;;  %v10404_v13 = vpack.c.bf16 %v3769_v46, %v3768_v15 }
 0x36a   : > { %v10340_v60 = vpack.c.bf16 %v3820_v0, %v3819_v23  ;;  %v4264_v14 = vld [vmem:[#allocation3 + $0x9] sm:$0xff]  ;;  %v4267_v9 = vld [vmem:[#allocation3 + $0x31] sm:$0xff] }
 0x36b   : > { %v3771_v23 = vld [vmem:[#allocation3 + $0x1ef] sm:$0xff]  ;;  %v3770_v0 = vld [vmem:[#allocation3 + $0x1e7] sm:$0xff] }
 0x36c   : > { %7845 = vmatmul.mubr.msk.bf16.gmra.mrb[12].mxu1 %vm434_vm6, %v10340_v60  ;;  %v10410_v25 = vpack.c.bf16 %v3771_v23, %v3770_v0  ;;  %v4266_v7 = vld [vmem:[#allocation3 + $0x29] sm:$0xff]  ;;  %v4273_v11 = vld [vmem:[#allocation3 + $0x91] sm:$0xff] }
 0x36d   : > { %7850 = vmatprep.mubr.msk.bf16.mxu1 %vm434_vm6, %v3772_v55  ;;  %v4296_v55 = vpack.c.bf16 %v4265_v50, %v4264_v14  ;;  %v10415_v26 = vpack.c.bf16 %v4267_v9, %v4266_v7  ;;  %v4270_v47 = vld [vmem:[#allocation3 + $0x69] sm:$0xff]  ;;  %v4275_v32 = vld [vmem:[#allocation3 + $0xb1] sm:$0xff] }
 0x36e   : > { %v4272_v62 = vld [vmem:[#allocation3 + $0x89] sm:$0xff]  ;;  %v4277_v52 = vld [vmem:[#allocation3 + $0xd1] sm:$0xff] }
 0x36f   : > { %v10431_v29 = vpack.c.bf16 %v4273_v11, %v4272_v62  ;;  %v4274_v10 = vld [vmem:[#allocation3 + $0xa9] sm:$0xff]  ;;  %v4279_v36 = vld [vmem:[#allocation3 + $0xf1] sm:$0xff] }
 0x370   : > { %v4276_v56 = vld [vmem:[#allocation3 + $0xc9] sm:$0xff]  ;;  %v10437_v21 = vpack.c.bf16 %v4275_v32, %v4274_v10  ;;  %v4281_v58 = vld [vmem:[#allocation3 + $0x111] sm:$0xff] }
 0x371   : > { %v10439_v34 = vpack.c.bf16 %v4277_v52, %v4276_v56  ;;  %v4278_v8 = vld [vmem:[#allocation3 + $0xe9] sm:$0xff]  ;;  %v4283_v39 = vld [vmem:[#allocation3 + $0x131] sm:$0xff] }
 0x372   : > { %v4280_v54 = vld [vmem:[#allocation3 + $0x109] sm:$0xff]  ;;  %v10445_v3 = vpack.c.bf16 %v4279_v36, %v4278_v8  ;;  %v4285_v14 = vld [vmem:[#allocation3 + $0x151] sm:$0xff]  ;;  %v4951_v8 = vsel %vm3887_vm7, %v7078_v19, 0 }
 0x373   : > { %v10447_v27 = vpack.c.bf16 %v4281_v58, %v4280_v54  ;;  %v4282_v46 = vld [vmem:[#allocation3 + $0x129] sm:$0xff]  ;;  %v4289_v9 = vld [vmem:[#allocation3 + $0x191] sm:$0xff] }
 0x374   : > { %7851 = vmatmul.mubr.msk.bf16.vlgmr.msra.gmra.mrb[16].mxu1 %vm434_vm6, %v10345_v16  ;;  %v4284_v15 = vld [vmem:[#allocation3 + $0x149] sm:$0xff]  ;;  %v10453_v50 = vpack.c.bf16 %v4283_v39, %v4282_v46  ;;  %v4293_v62 = vld [vmem:[#allocation3 + $0x1d1] sm:$0xff] }
 0x375   : > { %7883 = vmatpush3.bf16.msra.mxu1 %v4363_v57  ;;  %7854 = vmatprep.mubr.msk.bf16.mxu1 %vm434_vm6, %v10349_v22  ;;  %v4268_v57 = vld [vmem:[#allocation3 + $0x49] sm:$0xff]  ;;  %v10455_v23 = vpack.c.bf16 %v4285_v14, %v4284_v15  ;;  %v4295_v56 = vld [vmem:[#allocation3 + $0x1f1] sm:$0xff] }
 0x376   : > { %8745 = vmatprep.subr.msk.bf16.mxu1 %vm3887_vm7, %v10354_v44  ;;  %v10419_v24 = vpack.c.bf16 %v4269_v28, %v4268_v57  ;;  %v10429_v44 = vpack.c.bf16 %v4271_v51, %v4270_v47  ;;  %v4286_v0 = vld [vmem:[#allocation3 + $0x169] sm:$0xff]  ;;  %v4291_v47 = vld [vmem:[#allocation3 + $0x1b1] sm:$0xff] }
 0x377   : > { %v4288_v7 = vld [vmem:[#allocation3 + $0x189] sm:$0xff]  ;;  %v7095_v36 = vld [vmem:[%s10948_s7 + $0x14] sm:$0xf] }
 0x378   : > { %v10463_v28 = vpack.c.bf16 %v4289_v9, %v4288_v7  ;;  %v4292_v51 = vld [vmem:[#allocation3 + $0x1c9] sm:$0xff] }
 0x379   : > { %v10471_v10 = vpack.c.bf16 %v4293_v62, %v4292_v51  ;;  %v4294_v32 = vld [vmem:[#allocation3 + $0x1e9] sm:$0xff] }
 0x37a   : > { %v10477_v52 = vpack.c.bf16 %v4295_v56, %v4294_v32  ;;  %v4589_v32 = vld [vmem:[#allocation3 + $0x20f] sm:$0xff]  ;;  %v4588_v56 = vld [vmem:[#allocation3 + $0x207] sm:$0xff] }
 0x37c   : > { %7855 = vmatmul.mubr.msk.bf16.gmra.mrb[20].mxu1 %vm434_vm6, %v10362_v12 }
 0x37d   : > { %7858 = vmatprep.mubr.msk.bf16.mxu1 %vm434_vm6, %v10364_v37 }
 0x384   : > { %7859 = vmatmul.mubr.msk.bf16.gmra.mrb[24].mxu1 %vm434_vm6, %v10370_v20 }
 0x385   : > { %7862 = vmatprep.mubr.msk.bf16.mxu1 %vm434_vm6, %v10372_v38 }
 0x38c   : > { %7863 = vmatmul.mubr.msk.bf16.gmra.mrb[28].mxu1 %vm434_vm6, %v10378_v2 }
 0x38d   : > { %7866 = vmatprep.mubr.msk.bf16.mxu1 %vm434_vm6, %v10380_v18 }
 0x394   : > { %7867 = vmatmul.mubr.msk.bf16.gmra.mrb[0].mxu1 %vm434_vm6, %v10386_v5 }
 0x395   : > { %7870 = vmatprep.mubr.msk.bf16.mxu1 %vm434_vm6, %v10388_v35 }
 0x39c   : > { %7871 = vmatmul.mubr.msk.bf16.gmra.mrb[4].mxu1 %vm434_vm6, %v10394_v4 }
 0x39d   : > { %7874 = vmatprep.mubr.msk.bf16.mxu1 %vm434_vm6, %v10396_v33 }
 0x3a4   : > { %7875 = vmatmul.mubr.msk.bf16.gmra.mrb[8].mxu1 %vm434_vm6, %v10402_v40 }
 0x3a5   : > { %7878 = vmatprep.mubr.msk.bf16.mxu1 %vm434_vm6, %v10404_v13 }
 0x3ac   : > { %7879 = vmatmul.mubr.msk.bf16.gmra.mrb[12].mxu1 %vm434_vm6, %v10410_v25 }
 0x3ad   : > { %7884 = vmatprep.mubr.msk.bf16.mxu1 %vm434_vm6, %v4296_v55  ;;  %v4287_v55 = vld [vmem:[#allocation3 + $0x171] sm:$0xff] }
 0x3ae   : > { %v10461_v57 = vpack.c.bf16 %v4287_v55, %v4286_v0 }
 0x3b4   : > { %7885 = vmatmul.mubr.msk.bf16.vlgmr.msra.gmra.mrb[16].mxu1 %vm434_vm6, %v10415_v26 }
 0x3b5   : > { %7917 = vmatpush3.bf16.msra.mxu1 %v4657_v53  ;;  %7888 = vmatprep.mubr.msk.bf16.mxu1 %vm434_vm6, %v10419_v24  ;;  %v4290_v53 = vld [vmem:[#allocation3 + $0x1a9] sm:$0xff] }
 0x3b6   : > { %8746 = vmatprep.subr.msk.bf16.mxu1 %vm3887_vm7, %v7078_v19  ;;  %v10469_v11 = vpack.c.bf16 %v4291_v47, %v4290_v53 }
 0x3bc   : > { %7889 = vmatmul.mubr.msk.bf16.gmra.mrb[20].mxu1 %vm434_vm6, %v10429_v44 }
 0x3bd   : > { %7892 = vmatprep.mubr.msk.bf16.mxu1 %vm434_vm6, %v10431_v29 }
 0x3c4   : > { %7893 = vmatmul.mubr.msk.bf16.gmra.mrb[24].mxu1 %vm434_vm6, %v10437_v21 }
 0x3c5   : > { %7896 = vmatprep.mubr.msk.bf16.mxu1 %vm434_vm6, %v10439_v34 }
 0x3cc   : > { %7897 = vmatmul.mubr.msk.bf16.gmra.mrb[28].mxu1 %vm434_vm6, %v10445_v3 }
 0x3cd   : > { %7900 = vmatprep.mubr.msk.bf16.mxu1 %vm434_vm6, %v10447_v27 }
 0x3d4   : > { %7901 = vmatmul.mubr.msk.bf16.gmra.mrb[0].mxu1 %vm434_vm6, %v10453_v50 }
 0x3d5   : > { %7904 = vmatprep.mubr.msk.bf16.mxu1 %vm434_vm6, %v10455_v23 }
 0x3dc   : > { %7905 = vmatmul.mubr.msk.bf16.gmra.mrb[4].mxu1 %vm434_vm6, %v10461_v57 }
 0x3dd   : > { %7908 = vmatprep.mubr.msk.bf16.mxu1 %vm434_vm6, %v10463_v28 }
 0x3e4   : > { %7909 = vmatmul.mubr.msk.bf16.gmra.mrb[8].mxu1 %vm434_vm6, %v10469_v11 }
 0x3e5   : > { %7912 = vmatprep.mubr.msk.bf16.mxu1 %vm434_vm6, %v10471_v10 }
 0x3ec   : > { %7913 = vmatmul.mubr.msk.bf16.gmra.mrb[12].mxu1 %vm434_vm6, %v10477_v52 }
 0x3ed   : > { %7918 = vmatprep.mubr.msk.bf16.mxu1 %vm434_vm6, %v10345_v16 }
 0x3f4   : > { %7919 = vmatmul.mubr.msk.bf16.vlgmr.msra.gmra.mrb[16].mxu1 %vm434_vm6, %v10349_v22 }
 0x3f5   : > { %7951 = vmatpush3.bf16.msra.mxu1 %v4951_v8  ;;  %7922 = vmatprep.mubr.msk.bf16.mxu1 %vm434_vm6, %v10362_v12  ;;  %v10548_v8 = vpack.c.bf16 %v4589_v32, %v4588_v56  ;;  %v5742_v32 = vld [vmem:[#allocation3 + $0xb0] sm:$0xff] }
 0x3f6   : > { %8747 = vmatprep.subr.msk.bf16.mxu1 %vm3887_vm7, %v7095_v36  ;;  %v5744_v56 = vld [vmem:[#allocation3 + $0xd0] sm:$0xff] }
 0x3fc   : > { %7923 = vmatmul.mubr.msk.bf16.gmra.mrb[20].mxu1 %vm434_vm6, %v10364_v37 }
 0x3fd   : > { %7926 = vmatprep.mubr.msk.bf16.mxu1 %vm434_vm6, %v10370_v20 }
 0x404   : > { %7927 = vmatmul.mubr.msk.bf16.gmra.mrb[24].mxu1 %vm434_vm6, %v10372_v38 }
 0x405   : > { %7930 = vmatprep.mubr.msk.bf16.mxu1 %vm434_vm6, %v10378_v2  ;;  %v10500_v16 = vpop.f32.mrb[32].mxu0 }
 0x406   : > { %v10502_v19 = vpop.f32.mrb[33].mxu0 }
 0x407   : > { %v10504_v54 = vpop.f32.mrb[34].mxu0 }
 0x408   : > { %v10506_v58 = vpop.f32.mrb[35].mxu0 }
 0x40c   : > { %7931 = vmatmul.mubr.msk.bf16.gmra.mrb[28].mxu1 %vm434_vm6, %v10380_v18 }
 0x40d   : > { %7934 = vmatprep.mubr.msk.bf16.mxu1 %vm434_vm6, %v10386_v5 }
 0x410   : > { %v10512_v46 = vpop.f32.mrb[36].mxu0 }
 0x411   : > { %v10514_v39 = vpop.f32.mrb[37].mxu0 }
 0x412   : > { %v10516_v15 = vpop.f32.mrb[38].mxu0 }
 0x413   : > { %v10518_v14 = vpop.f32.mrb[39].mxu0 }
 0x414   : > { %7935 = vmatmul.mubr.msk.bf16.gmra.mrb[0].mxu1 %vm434_vm6, %v10388_v35 }
 0x415   : > { %7938 = vmatprep.mubr.msk.bf16.mxu1 %vm434_vm6, %v10394_v4 }
 0x418   : > { %v10524_v0 = vpop.f32.mrb[40].mxu0 }
 0x419   : > { %v10526_v55 = vpop.f32.mrb[41].mxu0 }
 0x41a   : > { %v10528_v7 = vpop.f32.mrb[42].mxu0 }
 0x41b   : > { %v10530_v9 = vpop.f32.mrb[43].mxu0 }
 0x41c   : > { %7939 = vmatmul.mubr.msk.bf16.gmra.mrb[4].mxu1 %vm434_vm6, %v10396_v33 }
 0x41d   : > { %7942 = vmatprep.mubr.msk.bf16.mxu1 %vm434_vm6, %v10402_v40 }
 0x422   : > { %v10536_v53 = vpop.f32.mrb[44].mxu0 }
 0x423   : > { %v10538_v47 = vpop.f32.mrb[45].mxu0 }
 0x424   : > { %10954 = vst [vmem:[#allocation4_spill] sm:$0xff] %v10538_v47  ;;  %7943 = vmatmul.mubr.msk.bf16.gmra.mrb[8].mxu1 %vm434_vm6, %v10404_v13  ;;  %v10542_v51 = vpop.f32.mrb[46].mxu0  ;;  %v5245_v47 = vsel %vm3887_vm7, %v7095_v36, 0 }
 0x425   : > { %10955 = vst [vmem:[#allocation5_spill] sm:$0xff] %v10542_v51  ;;  %7946 = vmatprep.mubr.msk.bf16.mxu1 %vm434_vm6, %v10410_v25  ;;  %v10546_v62 = vpop.f32.mrb[47].mxu0  ;;  %v7112_v51 = vld [vmem:[%s10948_s7 + $0x18] sm:$0xf] }
 0x42c   : > { %7947 = vmatmul.mubr.msk.bf16.gmra.mrb[12].mxu1 %vm434_vm6, %v10548_v8 }
 0x42d   : > { %7952 = vmatprep.mubr.msk.bf16.mxu1 %vm434_vm6, %v10111_v6  ;;  %v4883_v6 = vld [vmem:[#allocation3 + $0x210] sm:$0xff] }
 0x434   : > { %7953 = vmatmul.mubr.msk.bf16.vlgmr.msra.gmra.mrb[16].mxu1 %vm434_vm6, %v10117_v48  ;;  %v4882_v48 = vld [vmem:[#allocation3 + $0x208] sm:$0xff] }
 0x435   : > { %7985 = vmatpush3.bf16.msra.mxu1 %v5245_v47  ;;  %7956 = vmatprep.mubr.msk.bf16.mxu1 %vm434_vm6, %v10172_v45  ;;  %v10587_v45 = vpack.c.bf16 %v4883_v6, %v4882_v48  ;;  %v5743_v48 = vld [vmem:[#allocation3 + $0xc8] sm:$0xff] }
 0x436   : > { %8748 = vmatprep.subr.msk.bf16.mxu1 %vm3887_vm7, %v7112_v51 }
 0x43c   : > { %7957 = vmatmul.mubr.msk.bf16.gmra.mrb[20].mxu1 %vm434_vm6, %v10178_v1  ;;  %v5540_v1 = vsel %vm3887_vm7, %v7112_v51, 0  ;;  %v7146_v51 = vld [vmem:[%s10948_s7 + $0x20] sm:$0xf] }
 0x43d   : > { %7960 = vmatprep.mubr.msk.bf16.mxu1 %vm434_vm6, %v10207_v42  ;;  %v7129_v42 = vld [vmem:[%s10948_s7 + $0x1c] sm:$0xf] }
 0x43e   : > { %v5834_v47 = vsel %vm3887_vm7, %v7129_v42, 0 }
 0x444   : > { %7961 = vmatmul.mubr.msk.bf16.gmra.mrb[24].mxu1 %vm434_vm6, %v10232_v31  ;;  %v5176_v31 = vld [vmem:[#allocation3 + $0x209] sm:$0xff] }
 0x445   : > { %7964 = vmatprep.mubr.msk.bf16.mxu1 %vm434_vm6, %v10276_v63 }
 0x44c   : > { %7965 = vmatmul.mubr.msk.bf16.gmra.mrb[28].mxu1 %vm434_vm6, %v10265_v61 }
 0x44d   : > { %7968 = vmatprep.mubr.msk.bf16.mxu1 %vm434_vm6, %v10279_v59 }
 0x454   : > { %7969 = vmatmul.mubr.msk.bf16.gmra.mrb[0].mxu1 %vm434_vm6, %v10287_v41 }
 0x455   : > { %7972 = vmatprep.mubr.msk.bf16.mxu1 %vm434_vm6, %v10312_v49 }
 0x45c   : > { %7973 = vmatmul.mubr.msk.bf16.gmra.mrb[4].mxu1 %vm434_vm6, %v10314_v30 }
 0x45d   : > { %7976 = vmatprep.mubr.msk.bf16.mxu1 %vm434_vm6, %v10330_v17 }
 0x464   : > { %7977 = vmatmul.mubr.msk.bf16.gmra.mrb[8].mxu1 %vm434_vm6, %v10333_v43 }
 0x465   : > { %7980 = vmatprep.mubr.msk.bf16.mxu1 %vm434_vm6, %v10340_v60 }
 0x46c   : > { %7981 = vmatmul.mubr.msk.bf16.gmra.mrb[12].mxu1 %vm434_vm6, %v10587_v45 }
 0x46d   : > { %7986 = vmatprep.mubr.msk.bf16.mxu1 %vm434_vm6, %v10415_v26  ;;  %v5177_v26 = vld [vmem:[#allocation3 + $0x211] sm:$0xff] }
 0x46e   : > { %v10626_v36 = vpack.c.bf16 %v5177_v26, %v5176_v31  ;;  %v6375_v31 = vld [vmem:[%s9086_s29 + $0x68] sm:$0xff] }
 0x474   : > { %7987 = vmatmul.mubr.msk.bf16.vlgmr.msra.gmra.mrb[16].mxu1 %vm434_vm6, %v10419_v24 }
 0x475   : > { %8019 = vmatpush3.bf16.msra.mxu1 %v5540_v1  ;;  %7990 = vmatprep.mubr.msk.bf16.mxu1 %vm434_vm6, %v10429_v44  ;;  %v5771_v1 = vpack.c.bf16 %v5744_v56, %v5743_v48  ;;  %v6390_v48 = vld [vmem:[%s9086_s29 + $0xe0] sm:$0xff] }
 0x476   : > { %8749 = vmatprep.subr.msk.bf16.mxu1 %vm3887_vm7, %v7129_v42  ;;  %v6374_v42 = vld [vmem:[%s9086_s29 + $0x60] sm:$0xff] }
 0x47c   : > { %7991 = vmatmul.mubr.msk.bf16.gmra.mrb[20].mxu1 %vm434_vm6, %v10431_v29 }
 0x47d   : > { %7994 = vmatprep.mubr.msk.bf16.mxu1 %vm434_vm6, %v10437_v21 }
 0x484   : > { %7995 = vmatmul.mubr.msk.bf16.gmra.mrb[24].mxu1 %vm434_vm6, %v10439_v34 }
 0x485   : > { %7998 = vmatprep.mubr.msk.bf16.mxu1 %vm434_vm6, %v10445_v3 }
 0x48c   : > { %7999 = vmatmul.mubr.msk.bf16.gmra.mrb[28].mxu1 %vm434_vm6, %v10447_v27 }
 0x48d   : > { %8002 = vmatprep.mubr.msk.bf16.mxu1 %vm434_vm6, %v10453_v50 }
 0x494   : > { %8003 = vmatmul.mubr.msk.bf16.gmra.mrb[0].mxu1 %vm434_vm6, %v10455_v23 }
 0x495   : > { %8006 = vmatprep.mubr.msk.bf16.mxu1 %vm434_vm6, %v10461_v57 }
 0x49c   : > { %8007 = vmatmul.mubr.msk.bf16.gmra.mrb[4].mxu1 %vm434_vm6, %v10463_v28 }
 0x49d   : > { %8010 = vmatprep.mubr.msk.bf16.mxu1 %vm434_vm6, %v10469_v11 }
 0x4a4   : > { %8011 = vmatmul.mubr.msk.bf16.gmra.mrb[8].mxu1 %vm434_vm6, %v10471_v10 }
 0x4a5   : > { %8014 = vmatprep.mubr.msk.bf16.mxu1 %vm434_vm6, %v10477_v52 }
 0x4ac   : > { %8015 = vmatmul.mubr.msk.bf16.gmra.mrb[12].mxu1 %vm434_vm6, %v10626_v36 }
 0x4ad   : > { %8020 = vmatprep.mubr.msk.bf16.mxu1 %vm434_vm6, %v10349_v22  ;;  %v5471_v22 = vld [vmem:[#allocation3 + $0x227] sm:$0xff] }
 0x4b4   : > { %8021 = vmatmul.mubr.msk.bf16.vlgmr.msra.gmra.mrb[16].mxu1 %vm434_vm6, %v10362_v12  ;;  %v5472_v12 = vld [vmem:[#allocation3 + $0x22f] sm:$0xff] }
 0x4b5   : > { %8053 = vmatpush3.bf16.msra.mxu1 %v5834_v47  ;;  %8024 = vmatprep.mubr.msk.bf16.mxu1 %vm434_vm6, %v10364_v37  ;;  %v5488_v37 = vpack.c.bf16 %v5472_v12, %v5471_v22  ;;  %v6376_v47 = vld [vmem:[%s9086_s29 + $0x70] sm:$0xff]  ;;  %v6378_v22 = vld [vmem:[%s9086_s29 + $0x80] sm:$0xff]  ;;  %v6379_v12 = vld [vmem:[%s9086_s29 + $0x88] sm:$0xff] }
 0x4b6   : > { %8750 = vmatprep.subr.msk.bf16.mxu1 %vm3887_vm7, %v7146_v51 }
 0x4bc   : > { %8025 = vmatmul.mubr.msk.bf16.gmra.mrb[20].mxu1 %vm434_vm6, %v10370_v20  ;;  %v5736_v20 = vld [vmem:[#allocation3 + $0x50] sm:$0xff] }
 0x4bd   : > { %8028 = vmatprep.mubr.msk.bf16.mxu1 %vm434_vm6, %v10372_v38  ;;  %v5735_v38 = vld [vmem:[#allocation3 + $0x48] sm:$0xff] }
 0x4c4   : > { %8029 = vmatmul.mubr.msk.bf16.gmra.mrb[24].mxu1 %vm434_vm6, %v10378_v2  ;;  %v5767_v2 = vpack.c.bf16 %v5736_v20, %v5735_v38  ;;  %v6402_v20 = vpack.c.bf16 %v6379_v12, %v6378_v22  ;;  %v6380_v38 = vld [vmem:[%s9086_s29 + $0x90] sm:$0xff] }
 0x4c5   : > { %8032 = vmatprep.mubr.msk.bf16.mxu1 %vm434_vm6, %v10380_v18  ;;  %v5738_v18 = vld [vmem:[#allocation3 + $0x70] sm:$0xff] }
 0x4cc   : > { %8033 = vmatmul.mubr.msk.bf16.gmra.mrb[28].mxu1 %vm434_vm6, %v10386_v5  ;;  %v5740_v5 = vld [vmem:[#allocation3 + $0x90] sm:$0xff] }
 0x4cd   : > { %8036 = vmatprep.mubr.msk.bf16.mxu1 %vm434_vm6, %v10388_v35  ;;  %v5737_v35 = vld [vmem:[#allocation3 + $0x68] sm:$0xff] }
 0x4d4   : > { %8037 = vmatmul.mubr.msk.bf16.gmra.mrb[0].mxu1 %vm434_vm6, %v10394_v4  ;;  %v5768_v4 = vpack.c.bf16 %v5738_v18, %v5737_v35  ;;  %v6382_v18 = vld [vmem:[%s9086_s29 + $0xa0] sm:$0xff] }
 0x4d5   : > { %8040 = vmatprep.mubr.msk.bf16.mxu1 %vm434_vm6, %v10396_v33  ;;  %v6128_v33 = vsel %vm3887_vm7, %v7146_v51, 0  ;;  %v6377_v51 = vld [vmem:[%s9086_s29 + $0x78] sm:$0xff] }
 0x4dc   : > { %8041 = vmatmul.mubr.msk.bf16.gmra.mrb[4].mxu1 %vm434_vm6, %v10402_v40  ;;  %v5739_v40 = vld [vmem:[#allocation3 + $0x88] sm:$0xff] }
 0x4dd   : > { %8044 = vmatprep.mubr.msk.bf16.mxu1 %vm434_vm6, %v10404_v13  ;;  %v5769_v13 = vpack.c.bf16 %v5740_v5, %v5739_v40  ;;  %v6383_v5 = vld [vmem:[%s9086_s29 + $0xa8] sm:$0xff]  ;;  %v6385_v40 = vld [vmem:[%s9086_s29 + $0xb8] sm:$0xff] }
 0x4e4   : > { %8045 = vmatmul.mubr.msk.bf16.gmra.mrb[8].mxu1 %vm434_vm6, %v10410_v25  ;;  %v6410_v25 = vld [vmem:[%s10950_s9] sm:$0x3] }
 0x4e5   : > { %8048 = vmatprep.mubr.msk.bf16.mxu1 %vm434_vm6, %v10548_v8  ;;  %v5741_v8 = vld [vmem:[#allocation3 + $0xa8] sm:$0xff] }
 0x4e6   : > { %v5770_v6 = vpack.c.bf16 %v5742_v32, %v5741_v8  ;;  %v6388_v8 = vld [vmem:[%s9086_s29 + $0xd0] sm:$0xff] }
 0x4ec   : > { %8049 = vmatmul.mubr.msk.bf16.gmra.mrb[12].mxu1 %vm434_vm6, %v5488_v37  ;;  %v6401_v37 = vpack.c.bf16 %v6377_v51, %v6376_v47 }
 0x4ed   : > { %8054 = vmatprep.mubr.msk.bf16.mxu1 %vm434_vm6, %v5767_v2  ;;  %v6381_v2 = vld [vmem:[%s9086_s29 + $0x98] sm:$0xff] }
 0x4ee   : > { %v6403_v35 = vpack.c.bf16 %v6381_v2, %v6380_v38 }
 0x4f4   : > { %8055 = vmatmul.mubr.msk.bf16.vlgmr.msra.gmra.mrb[16].mxu1 %vm434_vm6, %v5768_v4  ;;  %v6404_v4 = vpack.c.bf16 %v6383_v5, %v6382_v18 }
 0x4f5   : > { %8087 = vmatpush3.bf16.msra.mxu1 %v6128_v33  ;;  %8058 = vmatprep.mubr.msk.bf16.mxu1 %vm434_vm6, %v5769_v13  ;;  %v6384_v33 = vld [vmem:[%s9086_s29 + $0xb0] sm:$0xff]  ;;  %v6386_v13 = vld [vmem:[%s9086_s29 + $0xc0] sm:$0xff] }
 0x4f6   : > { %8751 = vmatprep.subr.msk.bf16.mxu1 %vm962_vm0, %v6410_v25  ;;  %v6405_v32 = vpack.c.bf16 %v6385_v40, %v6384_v33 }
 0x4fc   : > { %8059 = vmatmul.mubr.msk.bf16.gmra.mrb[20].mxu1 %vm434_vm6, %v5770_v6  ;;  %v6389_v6 = vld [vmem:[%s9086_s29 + $0xd8] sm:$0xff] }
 0x4fd   : > { %8062 = vmatprep.mubr.msk.bf16.mxu1 %vm434_vm6, %v5771_v1  ;;  %v6391_v1 = vld [vmem:[%s9086_s29 + $0xe8] sm:$0xff] }
 0x504   : > { %8063 = vmatmul.mubr.msk.bf16.gmra.mrb[24].mxu1 %vm434_vm6, %v10276_v63  ;;  %v5766_v63 = vld [vmem:[#allocation3 + $0x230] sm:$0xff] }
 0x505   : > { %8066 = vmatprep.mubr.msk.bf16.mxu1 %vm434_vm6, %v10265_v61  ;;  %v5765_v61 = vld [vmem:[#allocation3 + $0x228] sm:$0xff] }
 0x50c   : > { %8067 = vmatmul.mubr.msk.bf16.gmra.mrb[28].mxu1 %vm434_vm6, %v10279_v59  ;;  %v5782_v59 = vpack.c.bf16 %v5766_v63, %v5765_v61  ;;  %v6407_v61 = vpack.c.bf16 %v6389_v6, %v6388_v8  ;;  %v6408_v63 = vpack.c.bf16 %v6391_v1, %v6390_v48  ;;  %v10957_v6 = vld [vmem:[#allocation5_spill] sm:$0xff] }
 0x50d   : > { %8070 = vmatprep.mubr.msk.bf16.mxu1 %vm434_vm6, %v10287_v41  ;;  %v6460_v41 = vsel %vm962_vm0, %v6410_v25, 0  ;;  %v6387_v25 = vld [vmem:[%s9086_s29 + $0xc8] sm:$0xff] }
 0x50e   : > { %v6406_v56 = vpack.c.bf16 %v6387_v25, %v6386_v13 }
 0x514   : > { %8071 = vmatmul.mubr.msk.bf16.gmra.mrb[0].mxu1 %vm434_vm6, %v10312_v49  ;;  %v6059_v49 = vld [vmem:[#allocation3 + $0x229] sm:$0xff] }
 0x515   : > { %8074 = vmatprep.mubr.msk.bf16.mxu1 %vm434_vm6, %v10314_v30  ;;  %v6060_v30 = vld [vmem:[#allocation3 + $0x231] sm:$0xff] }
 0x51c   : > { %8075 = vmatmul.mubr.msk.bf16.gmra.mrb[4].mxu1 %vm434_vm6, %v10330_v17  ;;  %v6362_v17 = vld [vmem:[%s9086_s29] sm:$0xff] }
 0x51d   : > { %8078 = vmatprep.mubr.msk.bf16.mxu1 %vm434_vm6, %v10333_v43  ;;  %v6363_v43 = vld [vmem:[%s9086_s29 + $0x8] sm:$0xff] }
 0x524   : > { %8079 = vmatmul.mubr.msk.bf16.gmra.mrb[8].mxu1 %vm434_vm6, %v10340_v60  ;;  %v6076_v60 = vpack.c.bf16 %v6060_v30, %v6059_v49  ;;  %v10780_v30 = vld [vmem:[%s10949_s8] ss:$0 sm:$0xff] }
 0x525   : > { %8082 = vmatprep.mubr.msk.bf16.mxu1 %vm434_vm6, %v10587_v45  ;;  %v6373_v45 = vld [vmem:[%s9086_s29 + $0x58] sm:$0xff]  ;;  %v8176_v38 = vadd.f32 %v10528_v7, %v10780_v30  ;;  %v8184_v48 = vadd.f32 %v10957_v6, %v10780_v30 }
 0x52c   : > { %8083 = vmatmul.mubr.msk.bf16.gmra.mrb[12].mxu1 %vm434_vm6, %v5782_v59  ;;  %v6392_v59 = vld [vmem:[%s9086_s29 + $0xf0] sm:$0xff] }
 0x52d   : > { %8088 = vmatprep.mubr.msk.bf16.mxu1 %vm434_vm6, %v10419_v24  ;;  %v6394_v24 = vpack.c.bf16 %v6363_v43, %v6362_v17  ;;  %v8156_v17 = vadd.f32 %v10500_v16, %v10780_v30  ;;  %v8158_v43 = vadd.f32 %v10780_v30, %v10502_v19 }
 0x534   : > { %8089 = vmatmul.mubr.msk.bf16.vlgmr.msra.gmra.mrb[16].mxu1 %vm434_vm6, %v10429_v44  ;;  %v6364_v44 = vld [vmem:[%s9086_s29 + $0x10] sm:$0xff] }
 0x535   : > { %8121 = vmatpush3.bf16.msra.mxu1 %v6460_v41  ;;  %8092 = vmatprep.mubr.msk.bf16.mxu1 %vm434_vm6, %v10431_v29  ;;  %v6365_v29 = vld [vmem:[%s9086_s29 + $0x18] sm:$0xff] }
 0x536   : > { %v6393_v41 = vld [vmem:[%s9086_s29 + $0xf8] sm:$0xff] }
 0x537   : > { %v6409_v49 = vpack.c.bf16 %v6393_v41, %v6392_v59 }
 0x53c   : > { %8093 = vmatmul.mubr.msk.bf16.gmra.mrb[20].mxu1 %vm434_vm6, %v10437_v21  ;;  %v6366_v21 = vld [vmem:[%s9086_s29 + $0x20] sm:$0xff] }
 0x53d   : > { %8096 = vmatprep.mubr.msk.bf16.mxu1 %vm434_vm6, %v10439_v34  ;;  %v6367_v34 = vld [vmem:[%s9086_s29 + $0x28] sm:$0xff] }
 0x544   : > { %8097 = vmatmul.mubr.msk.bf16.gmra.mrb[24].mxu1 %vm434_vm6, %v10445_v3  ;;  %v6395_v3 = vpack.c.bf16 %v6365_v29, %v6364_v44  ;;  %v8160_v44 = vadd.f32 %v10504_v54, %v10780_v30 }
 0x545   : > { %8100 = vmatprep.mubr.msk.bf16.mxu1 %vm434_vm6, %v10447_v27  ;;  %v6396_v27 = vpack.c.bf16 %v6367_v34, %v6366_v21  ;;  %v8162_v34 = vadd.f32 %v10780_v30, %v10506_v58 }
 0x54c   : > { %8101 = vmatmul.mubr.msk.bf16.gmra.mrb[28].mxu1 %vm434_vm6, %v10453_v50  ;;  %v6368_v50 = vld [vmem:[%s9086_s29 + $0x30] sm:$0xff] }
 0x54d   : > { %8104 = vmatprep.mubr.msk.bf16.mxu1 %vm434_vm6, %v10455_v23  ;;  %v6369_v23 = vld [vmem:[%s9086_s29 + $0x38] sm:$0xff] }
 0x554   : > { %8105 = vmatmul.mubr.msk.bf16.gmra.mrb[0].mxu1 %vm434_vm6, %v10461_v57  ;;  %v6370_v57 = vld [vmem:[%s9086_s29 + $0x40] sm:$0xff] }
 0x555   : > { %8108 = vmatprep.mubr.msk.bf16.mxu1 %vm434_vm6, %v10463_v28  ;;  %v6371_v28 = vld [vmem:[%s9086_s29 + $0x48] sm:$0xff] }
 0x55c   : > { %8109 = vmatmul.mubr.msk.bf16.gmra.mrb[4].mxu1 %vm434_vm6, %v10469_v11  ;;  %v6397_v11 = vpack.c.bf16 %v6369_v23, %v6368_v50 }
 0x55d   : > { %8112 = vmatprep.mubr.msk.bf16.mxu1 %vm434_vm6, %v10471_v10  ;;  %v6398_v10 = vpack.c.bf16 %v6371_v28, %v6370_v57  ;;  %v8164_v28 = vadd.f32 %v10512_v46, %v10780_v30  ;;  %v8170_v46 = vadd.f32 %v10780_v30, %v10518_v14  ;;  %v8172_v14 = vadd.f32 %v10524_v0, %v10780_v30 }
 0x55e   : > { %v8178_v0 = vadd.f32 %v10780_v30, %v10530_v9  ;;  %v8180_v9 = vadd.f32 %v10536_v53, %v10780_v30  ;;  %v8186_v53 = vadd.f32 %v10780_v30, %v10546_v62 }
 0x564   : > { %8113 = vmatmul.mubr.msk.bf16.gmra.mrb[8].mxu1 %vm434_vm6, %v10477_v52  ;;  %v6372_v52 = vld [vmem:[%s9086_s29 + $0x50] sm:$0xff] }
 0x565   : > { %8116 = vmatprep.mubr.msk.bf16.mxu1 %vm434_vm6, %v10626_v36  ;;  %v6399_v26 = vpack.c.bf16 %v6373_v45, %v6372_v52  ;;  %v6400_v36 = vpack.c.bf16 %v6375_v31, %v6374_v42  ;;  %v8168_v52 = vadd.f32 %v10516_v15, %v10780_v30 }
 0x56c   : > { %8117 = vmatmul.mubr.msk.bf16.gmra.mrb[12].mxu1 %vm434_vm6, %v6076_v60 }
 0x56d   : > { %8122 = vmatprep.mubr.msk.bf16.mxu1 %vm388_vm1, %v6394_v24  ;;  %v10789_v24 = vld [vmem:[%s10951_s10] ss:$0 sm:$0xff] }
 0x574   : > { %8123 = vmatmul.mubr.msk.bf16.vlgmr.msra.gmra.mrb[16].mxu1 %vm388_vm1, %v6395_v3 }
 0x575   : > { %8126 = vmatprep.mubr.msk.bf16.mxu1 %vm388_vm1, %v6396_v27 }
 0x57c   : > { %8127 = vmatmul.mubr.msk.bf16.gmra.mrb[20].mxu1 %vm388_vm1, %v6397_v11  ;;  %v8166_v11 = vadd.f32 %v10780_v30, %v10514_v39 }
 0x57d   : > { %8130 = vmatprep.mubr.msk.bf16.mxu1 %vm388_vm1, %v6398_v10 }
 0x584   : > { %8131 = vmatmul.mubr.msk.bf16.gmra.mrb[24].mxu1 %vm388_vm1, %v6399_v26 }
 0x585   : > { %8134 = vmatprep.mubr.msk.bf16.mxu1 %vm388_vm1, %v6400_v36 }
 0x58c   : > { %8135 = vmatmul.mubr.msk.bf16.gmra.mrb[28].mxu1 %vm388_vm1, %v6401_v37  ;;  %v8174_v37 = vadd.f32 %v10780_v30, %v10526_v55 }
 0x58d   : > { %8138 = vmatprep.mubr.msk.bf16.mxu1 %vm388_vm1, %v6402_v20 }
 0x594   : > { %8139 = vmatmul.mubr.msk.bf16.gmra.mrb[0].mxu1 %vm388_vm1, %v6403_v35 }
 0x595   : > { %8142 = vmatprep.mubr.msk.bf16.mxu1 %vm388_vm1, %v6404_v4 }
 0x59c   : > { %8143 = vmatmul.mubr.msk.bf16.gmra.mrb[4].mxu1 %vm388_vm1, %v6405_v32  ;;  %v10956_v32 = vld [vmem:[#allocation4_spill] sm:$0xff] }
 0x59d   : > { %8146 = vmatprep.mubr.msk.bf16.mxu1 %vm388_vm1, %v6406_v56  ;;  %v8182_v56 = vadd.f32 %v10780_v30, %v10956_v32 }
 0x5a4   : > { %8147 = vmatmul.mubr.msk.bf16.gmra.mrb[8].mxu1 %vm388_vm1, %v6407_v61 }
 0x5a5   : > { %8150 = vmatprep.mubr.msk.bf16.mxu1 %vm388_vm1, %v6408_v63 }
 0x5ac   : > { %8151 = vmatmul.mubr.msk.bf16.gmra.mrb[12].mxu1 %vm388_vm1, %v6409_v49 }
 0x647   : > { %v8124_v60 = vpop.f32.mrb[16].mxu1 }
 0x648   : > { %v8157_v29 = vadd.f32 %v8156_v17, %v8124_v60  ;;  %v6496_v21 = vpop.f32.mrb[17].mxu1 }
 0x649   : > { %v8159_v16 = vadd.f32 %v8158_v43, %v6496_v21  ;;  %v8125_v19 = vpop.f32.mrb[18].mxu1 }
 0x64a   : > { %v6664_v3 = vadd.f32 %v8157_v29, %v10789_v24  ;;  %v8161_v54 = vadd.f32 %v8160_v44, %v8125_v19  ;;  %v6499_v27 = vpop.f32.mrb[19].mxu1 }
 0x64b   : > { %v6662_v50 = vadd.f32 %v8159_v16, %v10789_v24  ;;  %v8163_v23 = vadd.f32 %v8162_v34, %v6499_v27 }
 0x64c   : > { %6696 = vst.msk [vmem:[%s10800_s13 + $0x10] sm:$0xff] %vm434_vm6, %v6664_v3  ;;  %v6665_v58 = vadd.f32 %v8161_v54, %v10789_v24 }
 0x64d   : > { %6694 = vst.msk [vmem:[%s10800_s13] sm:$0xff] %vm434_vm6, %v6662_v50  ;;  %v6663_v57 = vadd.f32 %v8163_v23, %v10789_v24 }
 0x64e   : > { %6697 = vst.msk [vmem:[%s10800_s13 + $0x18] sm:$0xff] %vm434_vm6, %v6665_v58 }
 0x64f   : > { %6695 = vst.msk [vmem:[%s10800_s13 + $0x8] sm:$0xff] %vm434_vm6, %v6663_v57  ;;  %v8128_v10 = vpop.f32.mrb[20].mxu1 }
 0x650   : > { %v8165_v45 = vadd.f32 %v8164_v28, %v8128_v10  ;;  %v6512_v42 = vpop.f32.mrb[21].mxu1 }
 0x651   : > { %v8167_v31 = vadd.f32 %v8166_v11, %v6512_v42  ;;  %v8129_v26 = vpop.f32.mrb[22].mxu1 }
 0x652   : > { %v6668_v36 = vadd.f32 %v8165_v45, %v10789_v24  ;;  %v8169_v47 = vadd.f32 %v8168_v52, %v8129_v26  ;;  %v6515_v39 = vpop.f32.mrb[23].mxu1 }
 0x653   : > { %v6666_v51 = vadd.f32 %v8167_v31, %v10789_v24  ;;  %v8171_v22 = vadd.f32 %v8170_v46, %v6515_v39 }
 0x654   : > { %6700 = vst.msk [vmem:[%s10800_s13 + $0x30] sm:$0xff] %vm434_vm6, %v6668_v36  ;;  %v6669_v15 = vadd.f32 %v8169_v47, %v10789_v24 }
 0x655   : > { %6698 = vst.msk [vmem:[%s10800_s13 + $0x20] sm:$0xff] %vm434_vm6, %v6666_v51  ;;  %v6667_v12 = vadd.f32 %v8171_v22, %v10789_v24 }
 0x656   : > { %6701 = vst.msk [vmem:[%s10800_s13 + $0x38] sm:$0xff] %vm434_vm6, %v6669_v15 }
 0x657   : > { %6699 = vst.msk [vmem:[%s10800_s13 + $0x28] sm:$0xff] %vm434_vm6, %v6667_v12  ;;  %v8132_v20 = vpop.f32.mrb[24].mxu1 }
 0x658   : > { %v8173_v2 = vadd.f32 %v8172_v14, %v8132_v20  ;;  %v6528_v18 = vpop.f32.mrb[25].mxu1 }
 0x659   : > { %v8175_v5 = vadd.f32 %v8174_v37, %v6528_v18  ;;  %v8133_v35 = vpop.f32.mrb[26].mxu1 }
 0x65a   : > { %v6672_v4 = vadd.f32 %v8173_v2, %v10789_v24  ;;  %v8177_v33 = vadd.f32 %v8176_v38, %v8133_v35  ;;  %v6531_v55 = vpop.f32.mrb[27].mxu1 }
 0x65b   : > { %v6670_v40 = vadd.f32 %v8175_v5, %v10789_v24  ;;  %v8179_v13 = vadd.f32 %v8178_v0, %v6531_v55 }
 0x65c   : > { %6704 = vst.msk [vmem:[%s10800_s13 + $0x50] sm:$0xff] %vm434_vm6, %v6672_v4  ;;  %v6673_v7 = vadd.f32 %v8177_v33, %v10789_v24 }
 0x65d   : > { %6702 = vst.msk [vmem:[%s10800_s13 + $0x40] sm:$0xff] %vm434_vm6, %v6670_v40  ;;  %v6671_v25 = vadd.f32 %v8179_v13, %v10789_v24 }
 0x65e   : > { %6705 = vst.msk [vmem:[%s10800_s13 + $0x58] sm:$0xff] %vm434_vm6, %v6673_v7 }
 0x65f   : > { %6703 = vst.msk [vmem:[%s10800_s13 + $0x48] sm:$0xff] %vm434_vm6, %v6671_v25  ;;  %v8136_v8 = vpop.f32.mrb[28].mxu1 }
 0x660   : > { %v8181_v1 = vadd.f32 %v8180_v9, %v8136_v8  ;;  %v6544_v61 = vpop.f32.mrb[29].mxu1 }
 0x661   : > { %v8183_v63 = vadd.f32 %v8182_v56, %v6544_v61  ;;  %v8137_v59 = vpop.f32.mrb[30].mxu1 }
 0x662   : > { %v6676_v41 = vadd.f32 %v8181_v1, %v10789_v24  ;;  %v8185_v49 = vadd.f32 %v8184_v48, %v8137_v59  ;;  %v6547_v17 = vpop.f32.mrb[31].mxu1 }
 0x663   : > { %v6674_v43 = vadd.f32 %v8183_v63, %v10789_v24  ;;  %v8187_v60 = vadd.f32 %v8186_v53, %v6547_v17 }
 0x664   : > { %6708 = vst.msk [vmem:[%s10800_s13 + $0x70] sm:$0xff] %vm434_vm6, %v6676_v41  ;;  %v6677_v44 = vadd.f32 %v8185_v49, %v10789_v24 }
 0x665   : > { %6706 = vst.msk [vmem:[%s10800_s13 + $0x60] sm:$0xff] %vm434_vm6, %v6674_v43  ;;  %v6675_v29 = vadd.f32 %v8187_v60, %v10789_v24 }
 0x666   : > { %6709 = vst.msk [vmem:[%s10800_s13 + $0x78] sm:$0xff] %vm434_vm6, %v6677_v44 }
 0x667   : > { %6707 = vst.msk [vmem:[%s10800_s13 + $0x68] sm:$0xff] %vm434_vm6, %v6675_v29  ;;  %v8140_v62 = vpop.f32.mrb[0].mxu1 }
 0x668   : > { %v8188_v21 = vadd.f32 %v8140_v62, %v10780_v30  ;;  %v6560_v34 = vpop.f32.mrb[1].mxu1 }
 0x669   : > { %v8189_v16 = vadd.f32 %v10780_v30, %v6560_v34  ;;  %v8141_v19 = vpop.f32.mrb[2].mxu1 }
 0x66a   : > { %v6680_v3 = vadd.f32 %v8188_v21, %v10789_v24  ;;  %v8190_v54 = vadd.f32 %v8141_v19, %v10780_v30  ;;  %v6563_v27 = vpop.f32.mrb[3].mxu1 }
 0x66b   : > { %v6678_v50 = vadd.f32 %v8189_v16, %v10789_v24  ;;  %v8191_v23 = vadd.f32 %v10780_v30, %v6563_v27 }
 0x66c   : > { %6712 = vst.msk [vmem:[%s10800_s13 + $0x90] sm:$0xff] %vm434_vm6, %v6680_v3  ;;  %v6681_v58 = vadd.f32 %v8190_v54, %v10789_v24 }
 0x66d   : > { %6710 = vst.msk [vmem:[%s10800_s13 + $0x80] sm:$0xff] %vm434_vm6, %v6678_v50  ;;  %v6679_v57 = vadd.f32 %v8191_v23, %v10789_v24 }
 0x66e   : > { %6713 = vst.msk [vmem:[%s10800_s13 + $0x98] sm:$0xff] %vm434_vm6, %v6681_v58 }
 0x66f   : > { %6711 = vst.msk [vmem:[%s10800_s13 + $0x88] sm:$0xff] %vm434_vm6, %v6679_v57  ;;  %v8144_v28 = vpop.f32.mrb[4].mxu1 }
 0x670   : > { %v8192_v11 = vadd.f32 %v8144_v28, %v10780_v30  ;;  %v6576_v10 = vpop.f32.mrb[5].mxu1 }
 0x671   : > { %v8193_v52 = vadd.f32 %v10780_v30, %v6576_v10  ;;  %v8145_v45 = vpop.f32.mrb[6].mxu1 }
 0x672   : > { %v6684_v42 = vadd.f32 %v8192_v11, %v10789_v24  ;;  %v8194_v46 = vadd.f32 %v8145_v45, %v10780_v30  ;;  %v6579_v31 = vpop.f32.mrb[7].mxu1 }
 0x673   : > { %v6682_v26 = vadd.f32 %v8193_v52, %v10789_v24  ;;  %v8195_v36 = vadd.f32 %v10780_v30, %v6579_v31 }
 0x674   : > { %6716 = vst.msk [vmem:[%s10800_s13 + $0xb0] sm:$0xff] %vm434_vm6, %v6684_v42  ;;  %v6685_v47 = vadd.f32 %v8194_v46, %v10789_v24 }
 0x675   : > { %6714 = vst.msk [vmem:[%s10800_s13 + $0xa0] sm:$0xff] %vm434_vm6, %v6682_v26  ;;  %v6683_v39 = vadd.f32 %v8195_v36, %v10789_v24 }
 0x676   : > { %6717 = vst.msk [vmem:[%s10800_s13 + $0xb8] sm:$0xff] %vm434_vm6, %v6685_v47 }
 0x677   : > { %6715 = vst.msk [vmem:[%s10800_s13 + $0xa8] sm:$0xff] %vm434_vm6, %v6683_v39  ;;  %v8148_v51 = vpop.f32.mrb[8].mxu1 }
 0x678   : > { %v8196_v22 = vadd.f32 %v8148_v51, %v10780_v30  ;;  %v6592_v15 = vpop.f32.mrb[9].mxu1 }
 0x679   : > { %v8197_v12 = vadd.f32 %v10780_v30, %v6592_v15  ;;  %v8149_v14 = vpop.f32.mrb[10].mxu1 }
 0x67a   : > { %v6688_v37 = vadd.f32 %v8196_v22, %v10789_v24  ;;  %v8198_v20 = vadd.f32 %v8149_v14, %v10780_v30  ;;  %v6595_v38 = vpop.f32.mrb[11].mxu1 }
 0x67b   : > { %v6686_v2 = vadd.f32 %v8197_v12, %v10789_v24  ;;  %v8199_v18 = vadd.f32 %v10780_v30, %v6595_v38 }
 0x67c   : > { %6720 = vst.msk [vmem:[%s10800_s13 + $0xd0] sm:$0xff] %vm434_vm6, %v6688_v37  ;;  %v6689_v0 = vadd.f32 %v8198_v20, %v10789_v24 }
 0x67d   : > { %6718 = vst.msk [vmem:[%s10800_s13 + $0xc0] sm:$0xff] %vm434_vm6, %v6686_v2  ;;  %v6687_v5 = vadd.f32 %v8199_v18, %v10789_v24 }
 0x67e   : > { %6721 = vst.msk [vmem:[%s10800_s13 + $0xd8] sm:$0xff] %vm434_vm6, %v6689_v0 }
 0x67f   : > { %6719 = vst.msk [vmem:[%s10800_s13 + $0xc8] sm:$0xff] %vm434_vm6, %v6687_v5  ;;  %v8152_v35 = vpop.f32.mrb[12].mxu1 }
 0x680   : > { %v8200_v4 = vadd.f32 %v8152_v35, %v10780_v30  ;;  %v6608_v33 = vpop.f32.mrb[13].mxu1 }
 0x681   : > { %v8201_v55 = vadd.f32 %v10780_v30, %v6608_v33  ;;  %v8153_v40 = vpop.f32.mrb[14].mxu1 }
 0x682   : > { %v6692_v13 = vadd.f32 %v8200_v4, %v10789_v24  ;;  %v8202_v7 = vadd.f32 %v8153_v40, %v10780_v30  ;;  %v6611_v25 = vpop.f32.mrb[15].mxu1 }
 0x683   : > { %v6690_v9 = vadd.f32 %v8201_v55, %v10789_v24  ;;  %v8203_v32 = vadd.f32 %v10780_v30, %v6611_v25 }
 0x684   : > { %6724 = vst.msk [vmem:[%s10800_s13 + $0xf0] sm:$0xff] %vm434_vm6, %v6692_v13  ;;  %v6693_v56 = vadd.f32 %v8202_v7, %v10789_v24 }
 0x685   : > { %6722 = vst.msk [vmem:[%s10800_s13 + $0xe0] sm:$0xff] %vm434_vm6, %v6690_v9  ;;  %v6691_v8 = vadd.f32 %v8203_v32, %v10789_v24 }
 0x686   : > { %6725 = vst.msk [vmem:[%s10800_s13 + $0xf8] sm:$0xff] %vm434_vm6, %v6693_v56 }
 0x687   : > { %6723 = vst.msk [vmem:[%s10800_s13 + $0xe8] sm:$0xff] %vm434_vm6, %v6691_v8 }
 0x688 PF: > { %s21_s17 = sadd.s32 1, %s8895_s17  }
 0x689   : > { %p18_p4 = scmp.ge.s32.totalorder %s21_s17, 4  }
 0x68b   :  { %20 = sbr.rel (!%p18_p4) target bundleno = 1 (0x1), region = 116 }

// kernel: tpu_custom_call.1
= control target key start
LH: loop header
LB: loop body
LE: loop exit
PB: predicated region body
PF: predicated region fallthrough
CT: control target
= control target key end

     0   :  { %s8958_s17 = smov 0   ;;  %s10941_s0 = inlined_call_operand.vmem [shape: f32[2,16,16,4], index: 0, kind: input, shape index: {}]   ;;  %s10942_s1 = inlined_call_operand.vmem [shape: f32[1,4], index: 1, kind: input, shape index: {}]   ;;  %s10943_s2 = inlined_call_operand.vmem [shape: f32[1,4], index: 2, kind: input, shape index: {}]   ;;  %s10944_s3 = inlined_call_operand.vmem [shape: bf16[9,4,8], index: 3, kind: input, shape index: {}]   ;;  %s10945_s4 = inlined_call_operand.vmem [shape: f32[1,8], index: 4, kind: input, shape index: {}]   ;;  %s10946_s5 = inlined_call_operand.vmem [shape: f32[1,8], index: 5, kind: input, shape index: {}]   ;;  %s10947_s6 = inlined_call_operand.vmem [shape: f32[1,8], index: 6, kind: input, shape index: {}]   ;;  %s10948_s7 = inlined_call_operand.vmem [shape: bf16[9,8,8], index: 7, kind: input, shape index: {}]   ;;  %s10949_s8 = inlined_call_operand.vmem [shape: f32[1,8], index: 8, kind: input, shape index: {}]   ;;  %s10950_s9 = inlined_call_operand.vmem [shape: bf16[4,8], index: 9, kind: input, shape index: {}]   ;;  %s10951_s10 = inlined_call_operand.vmem [shape: f32[1,8], index: 10, kind: input, shape index: {}]   ;;  %s10952_s11 = inlined_call_operand.vmem [shape: f32[2,16,16,8], index: 11, kind: output, shape index: {}]  }
   0x1 LB: > { %s6781_s18 = sadd.s32 4294967295, %s8895_s17   ;;  %p6785_p0 = scmp.ge.s32.totalorder %s8895_s17, 1  ;;  %s8895_s17 = sphi %s8958_s17, %s21_s17  }
   0x2   : > { %p337_p1 = scmp.lt.s32.totalorder %s8895_s17, 3 }
   0x4   : > { %p338_p2 = pnand %p6785_p0, %p337_p1 }
   0x6   : > { %341 = sbr.rel (%p338_p2) target bundleno = 1672 (0x688), region = 64 }
   0xd   : > { %v6824_v0 = vld [vmem:[%s10944_s3 + $0x2] sm:$0x3]  ;;  %vm962_vm0 = vcmask 1041408   ;;  %vm388_vm1 = vcmask 31744   ;;  %p8971_p3 = scmp.lt.s32.totalorder %s6781_s18, 1  ;;  %v8897_v2 = vmov 0.0  }
   0xe   : > { %8732 = vmatprep.subr.msk.bf16.mxu0 %vm962_vm0, %v6824_v0  ;;  %v964_v1 = vsel %vm962_vm0, %v6824_v0, 0  ;;  %390 = vst.msk [vmem:[#allocation2 + $0x8] sm:$0xff] %vm388_vm1, %v8897_v2  ;;  %391 = vst.msk [vmem:[#allocation2 + $0x10] sm:$0xff] %vm388_vm1, %v8897_v2  ;;  %v863_v3 = vld [vmem:[%s10944_s3] sm:$0x3] }
   0xf   : > { %389 = vst.msk [vmem:[#allocation2] sm:$0xff] %vm388_vm1, %v8897_v2  ;;  %392 = vst.msk [vmem:[#allocation2 + $0x18] sm:$0xff] %vm388_vm1, %v8897_v2  ;;  %7509 = vmatpush3.bf16.msra.mxu0 %v964_v1  ;;  %s10959_s18 = smov (!%p8971_p3, %s6781_s18), 1  ;;  %v9079_v4 = vld [vmem:[%s10942_s1] ss:$0 sm:$0xff]  ;;  %v9133_v37 = vsel %vm962_vm0, %v863_v3, 0 }
  0x10   : > { %394 = vst.msk [vmem:[#allocation2 + $0x220] sm:$0xff] %vm388_vm1, %v8897_v2  ;;  %395 = vst.msk [vmem:[#allocation2 + $0x228] sm:$0xff] %vm388_vm1, %v8897_v2  ;;  %8733 = vmatprep.subr.msk.bf16.mxu0 %vm962_vm0, %v863_v3  ;;  %s7183_s24 = sshll.u32 %s10959_s18, 8  ;;  %v9091_v5 = vld [vmem:[%s10943_s2] ss:$0 sm:$0xff] }
  0x11   : > { %396 = vst.msk [vmem:[#allocation2 + $0x230] sm:$0xff] %vm388_vm1, %v8897_v2  ;;  %397 = vst.msk [vmem:[#allocation2 + $0x238] sm:$0xff] %vm388_vm1, %v8897_v2  ;;  %s9086_s29 = scalar_lea.vmem %s10941_s0, %s7183_s24  ;;  %s10800_s13 = scalar_lea.vmem %s10952_s11, %s7183_s24 }
  0x12   : > { %399 = vst.msk [vmem:[#allocation2 + $0x20] sm:$0xff] %vm388_vm1, %v8897_v2  ;;  %400 = vst.msk [vmem:[#allocation2 + $0x40] sm:$0xff] %vm388_vm1, %v8897_v2  ;;  %v480_v6 = vld [vmem:[%s9086_s29] sm:$0xff]  ;;  %v481_v7 = vld [vmem:[%s9086_s29 + $0x8] sm:$0xff] }
  0x13   : > { %401 = vst.msk [vmem:[#allocation2 + $0x60] sm:$0xff] %vm388_vm1, %v8897_v2  ;;  %402 = vst.msk [vmem:[#allocation2 + $0x80] sm:$0xff] %vm388_vm1, %v8897_v2  ;;  %v482_v8 = vld [vmem:[%s9086_s29 + $0x10] sm:$0xff]  ;;  %v519_v9 = vmul.f32 %v9079_v4, %v480_v6  ;;  %v520_v10 = vmul.f32 %v9079_v4, %v481_v7  ;;  %v483_v11 = vld [vmem:[%s9086_s29 + $0x18] sm:$0xff] }
  0x14   : > { %403 = vst.msk [vmem:[#allocation2 + $0xa0] sm:$0xff] %vm388_vm1, %v8897_v2  ;;  %404 = vst.msk [vmem:[#allocation2 + $0xc0] sm:$0xff] %vm388_vm1, %v8897_v2  ;;  %v521_v12 = vmul.f32 %v9079_v4, %v482_v8  ;;  %v484_v13 = vld [vmem:[%s9086_s29 + $0x20] sm:$0xff]  ;;  %v485_v14 = vld [vmem:[%s9086_s29 + $0x28] sm:$0xff]  ;;  %v522_v17 = vmul.f32 %v9079_v4, %v483_v11 }
  0x15   : > { %405 = vst.msk [vmem:[#allocation2 + $0xe0] sm:$0xff] %vm388_vm1, %v8897_v2  ;;  %406 = vst.msk [vmem:[#allocation2 + $0x100] sm:$0xff] %vm388_vm1, %v8897_v2  ;;  %v864_v15 = vld [vmem:[#allocation2 + $0x8] sm:$0xff]  ;;  %v865_v16 = vld [vmem:[#allocation2 + $0x10] sm:$0xff]  ;;  %v523_v18 = vmul.f32 %v9079_v4, %v484_v13  ;;  %v524_v19 = vmul.f32 %v9079_v4, %v485_v14  ;;  %v9107_v22 = vadd.f32 %v9091_v5, %v519_v9 }
  0x16   : > { %407 = vst.msk [vmem:[#allocation2 + $0x120] sm:$0xff] %vm388_vm1, %v8897_v2  ;;  %408 = vst.msk [vmem:[#allocation2 + $0x140] sm:$0xff] %vm388_vm1, %v8897_v2  ;;  %v486_v20 = vld [vmem:[%s9086_s29 + $0x30] sm:$0xff]  ;;  %v896_v21 = vpack.c.bf16 %v865_v16, %v864_v15  ;;  %v9110_v23 = vadd.f32 %v9091_v5, %v520_v10  ;;  %v9113_v24 = vadd.f32 %v9091_v5, %v521_v12  ;;  %v487_v33 = vld [vmem:[%s9086_s29 + $0x38] sm:$0xff] }
  0x17   : > { %409 = vst.msk [vmem:[#allocation2 + $0x160] sm:$0xff] %vm388_vm1, %v8897_v2  ;;  %410 = vst.msk [vmem:[#allocation2 + $0x180] sm:$0xff] %vm388_vm1, %v8897_v2  ;;  %v9116_v25 = vadd.f32 %v9091_v5, %v522_v17  ;;  %v9119_v26 = vadd.f32 %v9091_v5, %v523_v18  ;;  %v9122_v27 = vadd.f32 %v9091_v5, %v524_v19  ;;  %v622_v28 = vmin.f32 %v9107_v22, 0.0  ;;  %v488_v34 = vld [vmem:[%s9086_s29 + $0x40] sm:$0xff]  ;;  %v489_v38 = vld [vmem:[%s9086_s29 + $0x48] sm:$0xff] }
  0x18   : > { %411 = vst.msk [vmem:[#allocation2 + $0x1a0] sm:$0xff] %vm388_vm1, %v8897_v2  ;;  %412 = vst.msk [vmem:[#allocation2 + $0x1c0] sm:$0xff] %vm388_vm1, %v8897_v2  ;;  %7510 = vmatprep.mubr.msk.bf16.mxu0 %vm388_vm1, %v896_v21  ;;  %v623_v29 = vmin.f32 %v9110_v23, 0.0  ;;  %v525_v30 = vmul.f32 %v9079_v4, %v486_v20  ;;  %v624_v31 = vmin.f32 %v9113_v24, 0.0  ;;  %v526_v43 = vmul.f32 %v9079_v4, %v487_v33  ;;  %v490_v46 = vld [vmem:[%s9086_s29 + $0x50] sm:$0xff]  ;;  %v491_v54 = vld [vmem:[%s9086_s29 + $0x58] sm:$0xff] }
  0x19   : > { %413 = vst.msk [vmem:[#allocation2 + $0x1e0] sm:$0xff] %vm388_vm1, %v8897_v2  ;;  %414 = vst.msk [vmem:[#allocation2 + $0x200] sm:$0xff] %vm388_vm1, %v8897_v2  ;;  %v625_v32 = vmin.f32 %v9116_v25, 0.0  ;;  %v654_v35 = vmul.f32 1.442695, %v622_v28  ;;  %v626_v41 = vmin.f32 %v9119_v26, 0.0  ;;  %v527_v45 = vmul.f32 %v9079_v4, %v488_v34 }
  0x1a   : > { %417 = vst.msk [vmem:[#allocation2 + $0x38] sm:$0xff] %vm388_vm1, %v8897_v2  ;;  %418 = vst.msk [vmem:[#allocation2 + $0x58] sm:$0xff] %vm388_vm1, %v8897_v2  ;;  %v656_v36 = vmul.f32 1.442695, %v623_v29  ;;  %v658_v39 = vmul.f32 1.442695, %v624_v31  ;;  %v9140_v44 = vadd.f32 %v9091_v5, %v525_v30  ;;  %v528_v49 = vmul.f32 %v9079_v4, %v489_v38 }
  0x1b   : > { %419 = vst.msk [vmem:[#allocation2 + $0x78] sm:$0xff] %vm388_vm1, %v8897_v2  ;;  %420 = vst.msk [vmem:[#allocation2 + $0x98] sm:$0xff] %vm388_vm1, %v8897_v2  ;;  %v660_v40 = vmul.f32 1.442695, %v625_v32  ;;  %v627_v42 = vmin.f32 %v9122_v27, 0.0  ;;  %8761 = vpow2.f32 %v654_v35  ;;  %vm590_vm2 = vcmp.gt.f32.partialorder %v9107_v22, 0.0 }
  0x1c   : > { %421 = vst.msk [vmem:[#allocation2 + $0xb8] sm:$0xff] %vm388_vm1, %v8897_v2  ;;  %422 = vst.msk [vmem:[#allocation2 + $0xd8] sm:$0xff] %vm388_vm1, %v8897_v2  ;;  %8763 = vpow2.f32 %v656_v36  ;;  %v662_v47 = vmul.f32 1.442695, %v626_v41  ;;  %v9147_v50 = vadd.f32 %v9091_v5, %v526_v43  ;;  %v628_v51 = vmin.f32 %v9140_v44, 0.0  ;;  %v492_v58 = vld [vmem:[%s9086_s29 + $0x60] sm:$0xff] }
  0x1d   : > { %423 = vst.msk [vmem:[#allocation2 + $0xf8] sm:$0xff] %vm388_vm1, %v8897_v2  ;;  %424 = vst.msk [vmem:[#allocation2 + $0x118] sm:$0xff] %vm388_vm1, %v8897_v2  ;;  %v664_v48 = vmul.f32 1.442695, %v627_v42  ;;  %8765 = vpow2.f32 %v658_v39  ;;  %v9151_v52 = vadd.f32 %v9091_v5, %v527_v45  ;;  %v9154_v53 = vadd.f32 %v9091_v5, %v528_v49  ;;  %v493_v59 = vld [vmem:[%s9086_s29 + $0x68] sm:$0xff]  ;;  %v494_v11 = vld [vmem:[%s9086_s29 + $0x70] sm:$0xff] }
  0x1e   : > { %425 = vst.msk [vmem:[#allocation2 + $0x138] sm:$0xff] %vm388_vm1, %v8897_v2  ;;  %426 = vst.msk [vmem:[#allocation2 + $0x158] sm:$0xff] %vm388_vm1, %v8897_v2  ;;  %8767 = vpow2.f32 %v660_v40  ;;  %v529_v55 = vmul.f32 %v9079_v4, %v490_v46  ;;  %vm591_vm3 = vcmp.gt.f32.partialorder %v9110_v23, 0.0  ;;  %v629_v56 = vmin.f32 %v9147_v50, 0.0  ;;  %v495_v29 = vld [vmem:[%s9086_s29 + $0x78] sm:$0xff]  ;;  %v496_v40 = vld [vmem:[%s9086_s29 + $0x80] sm:$0xff] }
  0x1f   : > { %427 = vst.msk [vmem:[#allocation2 + $0x178] sm:$0xff] %vm388_vm1, %v8897_v2  ;;  %428 = vst.msk [vmem:[#allocation2 + $0x198] sm:$0xff] %vm388_vm1, %v8897_v2  ;;  %8769 = vpow2.f32 %v662_v47  ;;  %v666_v57 = vmul.f32 1.442695, %v628_v51  ;;  %vm592_vm4 = vcmp.gt.f32.partialorder %v9113_v24, 0.0  ;;  %vm593_vm5 = vcmp.gt.f32.partialorder %v9116_v25, 0.0 }
  0x20   : > { %429 = vst.msk [vmem:[#allocation2 + $0x1b8] sm:$0xff] %vm388_vm1, %v8897_v2  ;;  %430 = vst.msk [vmem:[#allocation2 + $0x1d8] sm:$0xff] %vm388_vm1, %v8897_v2  ;;  %8771 = vpow2.f32 %v664_v48  ;;  %v630_v60 = vmin.f32 %v9151_v52, 0.0  ;;  %vm594_vm6 = vcmp.gt.f32.partialorder %v9119_v26, 0.0  ;;  %v668_v61 = vmul.f32 1.442695, %v629_v56 }
  0x21   : > { %431 = vst.msk [vmem:[#allocation2 + $0x1f8] sm:$0xff] %vm388_vm1, %v8897_v2  ;;  %432 = vst.msk [vmem:[#allocation2 + $0x218] sm:$0xff] %vm388_vm1, %v8897_v2  ;;  %8773 = vpow2.f32 %v666_v57  ;;  %v631_v62 = vmin.f32 %v9154_v53, 0.0  ;;  %v530_v63 = vmul.f32 %v9079_v4, %v491_v54  ;;  %v9169_v1 = vadd.f32 %v9091_v5, %v529_v55  ;;  %v497_v45 = vld [vmem:[%s9086_s29 + $0x88] sm:$0xff] }
  0x22   : > { %398 = vst.msk [vmem:[#allocation2] sm:$0xff] %vm388_vm1, %v8897_v2  ;;  %415 = vst.msk [vmem:[#allocation2 + $0x220] sm:$0xff] %vm388_vm1, %v8897_v2  ;;  %v670_v0 = vmul.f32 1.442695, %v630_v60  ;;  %v531_v3 = vmul.f32 %v9079_v4, %v492_v58  ;;  %v532_v6 = vmul.f32 %v9079_v4, %v493_v59  ;;  %vm595_vm7 = vcmp.gt.f32.partialorder %v9122_v27, 0.0 }
  0x23   : > { %416 = vst.msk [vmem:[#allocation2 + $0x18] sm:$0xff] %vm388_vm1, %v8897_v2  ;;  %433 = vst.msk [vmem:[#allocation2 + $0x238] sm:$0xff] %vm388_vm1, %v8897_v2  ;;  %8775 = vpow2.f32 %v668_v61  ;;  %v672_v7 = vmul.f32 1.442695, %v631_v62  ;;  %v9175_v8 = vadd.f32 %v9091_v5, %v530_v63  ;;  %vm596_vm8 = vcmp.gt.f32.partialorder %v9140_v44, 0.0 }
  0x24   : > { %8777 = vpow2.f32 %v670_v0  ;;  %v632_v9 = vmin.f32 %v9169_v1, 0.0  ;;  %v9180_v10 = vadd.f32 %v9091_v5, %v531_v3  ;;  %vm597_vm9 = vcmp.gt.f32.partialorder %v9147_v50, 0.0 }
  0x25   : > { %v8762_v12 = vpop.eup %8761  ;;  %8779 = vpow2.f32 %v672_v7  ;;  %v633_v13 = vmin.f32 %v9175_v8, 0.0  ;;  %v9186_v14 = vadd.f32 %v9091_v5, %v532_v6  ;;  %vm598_vm10 = vcmp.gt.f32.partialorder %v9151_v52, 0.0 }
  0x26   : > { %v8764_v15 = vpop.eup %8763  ;;  %v6792_v16 = vadd.f32 -1.0, %v8762_v12  ;;  %v674_v17 = vmul.f32 1.442695, %v632_v9  ;;  %v634_v18 = vmin.f32 %v9180_v10, 0.0  ;;  %vm599_vm11 = vcmp.gt.f32.partialorder %v9154_v53, 0.0 }
  0x27   : > { %v8766_v19 = vpop.eup %8765  ;;  %v6793_v20 = vadd.f32 -1.0, %v8764_v15  ;;  %v676_v21 = vmul.f32 1.442695, %v633_v13  ;;  %v635_v28 = vmin.f32 %v9186_v14, 0.0  ;;  %v533_v30 = vmul.f32 %v9079_v4, %v494_v11  ;;  %v499_v11 = vld [vmem:[%s9086_s29 + $0x98] sm:$0xff] }
  0x28   : > { %v8768_v31 = vpop.eup %8767  ;;  %v750_v32 = vsel %vm590_vm2, %v9107_v22, %v6792_v16  ;;  %v6794_v33 = vadd.f32 -1.0, %v8766_v19  ;;  %8781 = vpow2.f32 %v674_v17  ;;  %v678_v34 = vmul.f32 1.442695, %v634_v18  ;;  %v500_v16 = vld [vmem:[%s9086_s29 + $0xa0] sm:$0xff] }
  0x29   : > { %v8770_v35 = vpop.eup %8769  ;;  %v751_v36 = vsel %vm591_vm3, %v9110_v23, %v6793_v20  ;;  %783 = vst.msk [vmem:[#allocation2 + $0x28] sm:$0xff] %vm388_vm1, %v750_v32  ;;  %v6795_v38 = vadd.f32 -1.0, %v8768_v31  ;;  %8783 = vpow2.f32 %v676_v21  ;;  %v680_v39 = vmul.f32 1.442695, %v635_v28 }
  0x2a   : > { %v8772_v41 = vpop.eup %8771  ;;  %784 = vst.msk [vmem:[#allocation2 + $0x30] sm:$0xff] %vm388_vm1, %v751_v36  ;;  %v752_v22 = vsel %vm592_vm4, %v9113_v24, %v6794_v33  ;;  %v6796_v42 = vadd.f32 -1.0, %v8770_v35  ;;  %8785 = vpow2.f32 %v678_v34  ;;  %v534_v43 = vmul.f32 %v9079_v4, %v495_v29 }
  0x2b   : > { %v8774_v46 = vpop.eup %8773  ;;  %v753_v23 = vsel %vm593_vm5, %v9116_v25, %v6795_v38  ;;  %785 = vst.msk [vmem:[#allocation2 + $0x48] sm:$0xff] %vm388_vm1, %v752_v22  ;;  %v6797_v47 = vadd.f32 -1.0, %v8772_v41  ;;  %8787 = vpow2.f32 %v680_v39  ;;  %v9213_v48 = vadd.f32 %v9091_v5, %v533_v30 }
  0x2c   : > { %786 = vst.msk [vmem:[#allocation2 + $0x50] sm:$0xff] %vm388_vm1, %v753_v23  ;;  %v754_v24 = vsel %vm594_vm6, %v9119_v26, %v6796_v42  ;;  %v6798_v49 = vadd.f32 -1.0, %v8774_v46  ;;  %v9220_v51 = vadd.f32 %v9091_v5, %v534_v43  ;;  %v535_v25 = vmul.f32 %v9079_v4, %v496_v40  ;;  %v498_v26 = vld [vmem:[%s9086_s29 + $0x90] sm:$0xff] }
  0x2d   : > { %v8776_v54 = vpop.eup %8775  ;;  %v755_v55 = vsel %vm595_vm7, %v9122_v27, %v6797_v47  ;;  %787 = vst.msk [vmem:[#allocation2 + $0x68] sm:$0xff] %vm388_vm1, %v754_v24  ;;  %vm600_vm12 = vcmp.gt.f32.partialorder %v9169_v1, 0.0  ;;  %v636_v56 = vmin.f32 %v9213_v48, 0.0  ;;  %v536_v57 = vmul.f32 %v9079_v4, %v497_v45  ;;  %v501_v45 = vld [vmem:[%s9086_s29 + $0xa8] sm:$0xff]  ;;  %v502_v47 = vld [vmem:[%s9086_s29 + $0xb0] sm:$0xff]  ;;  %v503_v24 = vld [vmem:[%s9086_s29 + $0xb8] sm:$0xff] }
  0x2e   : > { %v8778_v58 = vpop.eup %8777  ;;  %788 = vst.msk [vmem:[#allocation2 + $0x70] sm:$0xff] %vm388_vm1, %v755_v55  ;;  %v6799_v59 = vadd.f32 -1.0, %v8776_v54  ;;  %v756_v60 = vsel %vm596_vm8, %v9140_v44, %v6798_v49  ;;  %vm601_vm13 = vcmp.gt.f32.partialorder %v9175_v8, 0.0  ;;  %v637_v27 = vmin.f32 %v9220_v51, 0.0 }
  0x2f   : > { %v8780_v61 = vpop.eup %8779  ;;  %789 = vst.msk [vmem:[#allocation2 + $0x88] sm:$0xff] %vm388_vm1, %v756_v60  ;;  %v6800_v62 = vadd.f32 -1.0, %v8778_v58  ;;  %v682_v63 = vmul.f32 1.442695, %v636_v56  ;;  %v9239_v0 = vadd.f32 %v9091_v5, %v535_v25  ;;  %v9242_v3 = vadd.f32 %v9091_v5, %v536_v57 }
  0x30   : > { %v866_v6 = vld [vmem:[#allocation2 + $0x28] sm:$0xff]  ;;  %v757_v44 = vsel %vm597_vm9, %v9147_v50, %v6799_v59  ;;  %v6801_v7 = vadd.f32 -1.0, %v8780_v61  ;;  %v684_v9 = vmul.f32 1.442695, %v637_v27  ;;  %v537_v12 = vmul.f32 %v9079_v4, %v498_v26 }
  0x31   : > { %v867_v13 = vld [vmem:[#allocation2 + $0x30] sm:$0xff]  ;;  %790 = vst.msk [vmem:[#allocation2 + $0x90] sm:$0xff] %vm388_vm1, %v757_v44  ;;  %v758_v15 = vsel %vm598_vm10, %v9151_v52, %v6800_v62  ;;  %vm602_vm14 = vcmp.gt.f32.partialorder %v9180_v10, 0.0  ;;  %vm603_vm15 = vcmp.gt.f32.partialorder %v9186_v14, 0.0  ;;  %8789 = vpow2.f32 %v682_v63 }
  0x32   : > { %v8782_v17 = vpop.eup %8781  ;;  %v897_v50 = vpack.c.bf16 %v867_v13, %v866_v6  ;;  %v868_v18 = vld [vmem:[#allocation2 + $0x48] sm:$0xff]  ;;  %v759_v19 = vsel %vm599_vm11, %v9154_v53, %v6801_v7  ;;  %791 = vst.msk [vmem:[#allocation2 + $0xa8] sm:$0xff] %vm388_vm1, %v758_v15  ;;  %8791 = vpow2.f32 %v684_v9  ;;  %v638_v20 = vmin.f32 %v9239_v0, 0.0  ;;  %v9270_v53 = vld [vmem:[%s10944_s3 + $0x4] sm:$0x3] }
  0x33   : > { %v8784_v21 = vpop.eup %8783  ;;  %v869_v52 = vld [vmem:[#allocation2 + $0x50] sm:$0xff]  ;;  %792 = vst.msk [vmem:[#allocation2 + $0xb0] sm:$0xff] %vm388_vm1, %v759_v19  ;;  %v6802_v28 = vadd.f32 -1.0, %v8782_v17  ;;  %v639_v29 = vmin.f32 %v9242_v3, 0.0  ;;  %v538_v30 = vmul.f32 %v9079_v4, %v499_v11  ;;  %v9265_v31 = vadd.f32 %v9091_v5, %v537_v12  ;;  %v505_v17 = vld [vmem:[%s9086_s29 + $0xc8] sm:$0xff] }
  0x34   : > { %v8786_v32 = vpop.eup %8785  ;;  %7511 = vmatmul.mubr.msk.bf16.vlgmr.msra.gmra.mrb[0].mxu0 %vm388_vm1, %v897_v50  ;;  %v898_v33 = vpack.c.bf16 %v869_v52, %v868_v18  ;;  %v870_v34 = vld [vmem:[#allocation2 + $0x68] sm:$0xff]  ;;  %v6803_v35 = vadd.f32 -1.0, %v8784_v21  ;;  %v686_v36 = vmul.f32 1.442695, %v638_v20  ;;  %v539_v38 = vmul.f32 %v9079_v4, %v500_v16  ;;  %v506_v50 = vld [vmem:[%s9086_s29 + $0xd0] sm:$0xff] }
  0x35   : > { %v8788_v39 = vpop.eup %8787  ;;  %7543 = vmatpush3.bf16.msra.mxu0 %v9133_v37  ;;  %v871_v40 = vld [vmem:[#allocation2 + $0x70] sm:$0xff]  ;;  %v760_v41 = vsel %vm600_vm12, %v9169_v1, %v6802_v28  ;;  %v6804_v22 = vadd.f32 -1.0, %v8786_v32  ;;  %v688_v42 = vmul.f32 1.442695, %v639_v29  ;;  %v9279_v43 = vadd.f32 %v9091_v5, %v538_v30 }
  0x36   : > { %7514 = vmatprep.mubr.msk.bf16.mxu0 %vm388_vm1, %v898_v33  ;;  %v872_v46 = vld [vmem:[#allocation2 + $0x88] sm:$0xff]  ;;  %v761_v23 = vsel %vm601_vm13, %v9175_v8, %v6803_v35  ;;  %793 = vst.msk [vmem:[#allocation2 + $0xc8] sm:$0xff] %vm388_vm1, %v760_v41  ;;  %v6805_v37 = vadd.f32 -1.0, %v8788_v39  ;;  %8793 = vpow2.f32 %v686_v36  ;;  %8734 = vmatprep.subr.msk.bf16.mxu0 %vm962_vm0, %v9270_v53  ;;  %v899_v1 = vpack.c.bf16 %v871_v40, %v870_v34  ;;  %v507_v34 = vld [vmem:[%s9086_s29 + $0xd8] sm:$0xff] }
  0x37   : > { %794 = vst.msk [vmem:[#allocation2 + $0xd0] sm:$0xff] %vm388_vm1, %v761_v23  ;;  %v762_v49 = vsel %vm602_vm14, %v9180_v10, %v6804_v22  ;;  %8795 = vpow2.f32 %v688_v42  ;;  %v640_v54 = vmin.f32 %v9265_v31, 0.0  ;;  %v641_v55 = vmin.f32 %v9279_v43, 0.0  ;;  %v508_v42 = vld [vmem:[%s9086_s29 + $0xe0] sm:$0xff] }
  0x38   : > { %v873_v25 = vld [vmem:[#allocation2 + $0x90] sm:$0xff]  ;;  %v763_v8 = vsel %vm603_vm15, %v9186_v14, %v6805_v37  ;;  %795 = vst.msk [vmem:[#allocation2 + $0xe8] sm:$0xff] %vm388_vm1, %v762_v49  ;;  %v540_v56 = vmul.f32 %v9079_v4, %v501_v45  ;;  %v9306_v10 = vadd.f32 %v9091_v5, %v539_v38  ;;  %v541_v26 = vmul.f32 %v9079_v4, %v502_v47  ;;  %v504_v14 = vld [vmem:[%s9086_s29 + $0xc0] sm:$0xff]  ;;  %v509_v37 = vld [vmem:[%s9086_s29 + $0xe8] sm:$0xff] }
  0x39   : > { %v9302_v57 = vpack.c.bf16 %v873_v25, %v872_v46  ;;  %796 = vst.msk [vmem:[#allocation2 + $0xf0] sm:$0xff] %vm388_vm1, %v763_v8  ;;  %v542_v58 = vmul.f32 %v9079_v4, %v503_v24  ;;  %v690_v59 = vmul.f32 1.442695, %v640_v54  ;;  %v692_v60 = vmul.f32 1.442695, %v641_v55  ;;  %v874_v44 = vld [vmem:[#allocation2 + $0xa8] sm:$0xff] }
  0x3a   : > { %v9312_v27 = vadd.f32 %v9091_v5, %v540_v56  ;;  %vm604_vm2 = vcmp.gt.f32.partialorder %v9213_v48, 0.0  ;;  %vm605_vm3 = vcmp.gt.f32.partialorder %v9220_v51, 0.0  ;;  %v642_v62 = vmin.f32 %v9306_v10, 0.0  ;;  %v875_v7 = vld [vmem:[#allocation2 + $0xb0] sm:$0xff] }
  0x3b   : > { %v8790_v61 = vpop.eup %8789  ;;  %v9318_v63 = vadd.f32 %v9091_v5, %v541_v26  ;;  %8797 = vpow2.f32 %v690_v59  ;;  %v543_v12 = vmul.f32 %v9079_v4, %v504_v14  ;;  %v9326_v16 = vadd.f32 %v9091_v5, %v542_v58 }
  0x3c   : > { %v8792_v6 = vpop.eup %8791  ;;  %7515 = vmatmul.mubr.msk.bf16.gmra.mrb[4].mxu0 %vm388_vm1, %v899_v1  ;;  %v6806_v9 = vadd.f32 -1.0, %v8790_v61  ;;  %v643_v11 = vmin.f32 %v9312_v27, 0.0  ;;  %8799 = vpow2.f32 %v692_v60  ;;  %v694_v15 = vmul.f32 1.442695, %v642_v62 }
  0x3d   : > { %7518 = vmatprep.mubr.msk.bf16.mxu0 %vm388_vm1, %v9302_v57  ;;  %v6807_v13 = vadd.f32 -1.0, %v8792_v6  ;;  %v876_v18 = vld [vmem:[#allocation2 + $0xc8] sm:$0xff]  ;;  %vm606_vm4 = vcmp.gt.f32.partialorder %v9239_v0, 0.0  ;;  %v644_v52 = vmin.f32 %v9318_v63, 0.0  ;;  %v9335_v28 = vpack.c.bf16 %v875_v7, %v874_v44 }
  0x3e   : > { %v877_v19 = vld [vmem:[#allocation2 + $0xd0] sm:$0xff]  ;;  %v764_v20 = vsel %vm604_vm2, %v9213_v48, %v6806_v9  ;;  %v696_v21 = vmul.f32 1.442695, %v643_v11  ;;  %vm607_vm5 = vcmp.gt.f32.partialorder %v9242_v3, 0.0  ;;  %8801 = vpow2.f32 %v694_v15 }
  0x3f   : > { %v765_v29 = vsel %vm605_vm3, %v9220_v51, %v6807_v13  ;;  %797 = vst.msk [vmem:[#allocation2 + $0x108] sm:$0xff] %vm388_vm1, %v764_v20  ;;  %v645_v48 = vmin.f32 %v9326_v16, 0.0  ;;  %v698_v32 = vmul.f32 1.442695, %v644_v52  ;;  %v544_v33 = vmul.f32 %v9079_v4, %v505_v17  ;;  %v878_v47 = vld [vmem:[#allocation2 + $0xe8] sm:$0xff] }
  0x40   : > { %v8794_v30 = vpop.eup %8793  ;;  %798 = vst.msk [vmem:[#allocation2 + $0x110] sm:$0xff] %vm388_vm1, %v765_v29  ;;  %8803 = vpow2.f32 %v696_v21  ;;  %v9346_v36 = vpack.c.bf16 %v877_v19, %v876_v18  ;;  %v9349_v38 = vadd.f32 %v9091_v5, %v543_v12  ;;  %v545_v39 = vmul.f32 %v9079_v4, %v506_v50  ;;  %v879_v24 = vld [vmem:[#allocation2 + $0xf0] sm:$0xff] }
  0x41   : > { %v8796_v35 = vpop.eup %8795  ;;  %v6808_v51 = vadd.f32 -1.0, %v8794_v30  ;;  %8805 = vpow2.f32 %v698_v32  ;;  %v700_v41 = vmul.f32 1.442695, %v645_v48  ;;  %v9353_v22 = vadd.f32 %v9091_v5, %v544_v33 }
  0x42   : > { %v6809_v40 = vadd.f32 -1.0, %v8796_v35  ;;  %v646_v46 = vmin.f32 %v9349_v38, 0.0  ;;  %v546_v23 = vmul.f32 %v9079_v4, %v507_v34  ;;  %v9373_v25 = vadd.f32 %v9091_v5, %v545_v39 }
  0x43   : > { %v766_v45 = vsel %vm606_vm4, %v9239_v0, %v6808_v51  ;;  %8807 = vpow2.f32 %v700_v41  ;;  %v647_v49 = vmin.f32 %v9353_v22, 0.0  ;;  %v547_v54 = vmul.f32 %v9079_v4, %v508_v42 }
  0x44   : > { %7519 = vmatmul.mubr.msk.bf16.gmra.mrb[8].mxu0 %vm388_vm1, %v9335_v28  ;;  %v767_v1 = vsel %vm607_vm5, %v9242_v3, %v6809_v40  ;;  %799 = vst.msk [vmem:[#allocation2 + $0x128] sm:$0xff] %vm388_vm1, %v766_v45  ;;  %v702_v0 = vmul.f32 1.442695, %v646_v46  ;;  %v9376_v8 = vadd.f32 %v9091_v5, %v546_v23  ;;  %vm608_vm6 = vcmp.gt.f32.partialorder %v9265_v31, 0.0 }
  0x45   : > { %7522 = vmatprep.mubr.msk.bf16.mxu0 %vm388_vm1, %v9346_v36  ;;  %800 = vst.msk [vmem:[#allocation2 + $0x130] sm:$0xff] %vm388_vm1, %v767_v1  ;;  %v8798_v3 = vpop.eup %8797  ;;  %vm609_vm7 = vcmp.gt.f32.partialorder %v9279_v43, 0.0  ;;  %v704_v56 = vmul.f32 1.442695, %v647_v49  ;;  %v548_v26 = vmul.f32 %v9079_v4, %v509_v37  ;;  %v9382_v14 = vpack.c.bf16 %v879_v24, %v878_v47 }
  0x46   : > { %v880_v55 = vld [vmem:[#allocation2 + $0x108] sm:$0xff]  ;;  %v8800_v58 = vpop.eup %8799  ;;  %v6810_v60 = vadd.f32 -1.0, %v8798_v3  ;;  %vm610_vm8 = vcmp.gt.f32.partialorder %v9306_v10, 0.0  ;;  %8809 = vpow2.f32 %v702_v0  ;;  %v648_v6 = vmin.f32 %v9373_v25, 0.0 }
  0x47   : > { %v881_v59 = vld [vmem:[#allocation2 + $0x110] sm:$0xff]  ;;  %v6811_v62 = vadd.f32 -1.0, %v8800_v58  ;;  %8811 = vpow2.f32 %v704_v56  ;;  %v649_v9 = vmin.f32 %v9376_v8, 0.0  ;;  %v9391_v11 = vadd.f32 %v9091_v5, %v547_v54 }
  0x48   : > { %v9385_v61 = vpack.c.bf16 %v881_v59, %v880_v55  ;;  %v8802_v44 = vpop.eup %8801  ;;  %v768_v7 = vsel %vm608_vm6, %v9265_v31, %v6810_v60  ;;  %v9394_v12 = vadd.f32 %v9091_v5, %v548_v26  ;;  %vm611_vm9 = vcmp.gt.f32.partialorder %v9312_v27, 0.0 }
  0x49   : > { %v769_v15 = vsel %vm609_vm7, %v9279_v43, %v6811_v62  ;;  %801 = vst.msk [vmem:[#allocation2 + $0x148] sm:$0xff] %vm388_vm1, %v768_v7  ;;  %v6812_v17 = vadd.f32 -1.0, %v8802_v44  ;;  %v706_v50 = vmul.f32 1.442695, %v648_v6  ;;  %vm612_vm10 = vcmp.gt.f32.partialorder %v9318_v63, 0.0 }
  0x4a   : > { %v8804_v13 = vpop.eup %8803  ;;  %802 = vst.msk [vmem:[#allocation2 + $0x150] sm:$0xff] %vm388_vm1, %v769_v15  ;;  %v708_v18 = vmul.f32 1.442695, %v649_v9  ;;  %v650_v20 = vmin.f32 %v9391_v11, 0.0  ;;  %v651_v21 = vmin.f32 %v9394_v12, 0.0  ;;  %vm613_vm11 = vcmp.gt.f32.partialorder %v9326_v16, 0.0 }
  0x4b   : > { %v6813_v31 = vadd.f32 -1.0, %v8804_v13  ;;  %v8806_v19 = vpop.eup %8805  ;;  %v770_v43 = vsel %vm610_vm8, %v9306_v10, %v6812_v17  ;;  %8813 = vpow2.f32 %v706_v50  ;;  %v882_v52 = vld [vmem:[#allocation2 + $0x128] sm:$0xff]  ;;  %vm614_vm12 = vcmp.gt.f32.partialorder %v9349_v38, 0.0 }
  0x4c   : > { %7523 = vmatmul.mubr.msk.bf16.gmra.mrb[12].mxu0 %vm388_vm1, %v9382_v14  ;;  %v883_v29 = vld [vmem:[#allocation2 + $0x130] sm:$0xff]  ;;  %803 = vst.msk [vmem:[#allocation2 + $0x168] sm:$0xff] %vm388_vm1, %v770_v43  ;;  %v6814_v48 = vadd.f32 -1.0, %v8806_v19  ;;  %8815 = vpow2.f32 %v708_v18  ;;  %v710_v10 = vmul.f32 1.442695, %v650_v20  ;;  %vm615_vm13 = vcmp.gt.f32.partialorder %v9353_v22, 0.0 }
  0x4d   : > { %7526 = vmatprep.mubr.msk.bf16.mxu0 %vm388_vm1, %v9385_v61  ;;  %v771_v30 = vsel %vm611_vm9, %v9312_v27, %v6813_v31  ;;  %v8808_v32 = vpop.eup %8807  ;;  %v712_v33 = vmul.f32 1.442695, %v651_v21  ;;  %v9421_v51 = vpack.c.bf16 %v883_v29, %v882_v52  ;;  %vm616_vm14 = vcmp.gt.f32.partialorder %v9373_v25, 0.0  ;;  %v815_v17 = vld [vmem:[#allocation2 + $0x7] sm:$0xff]  ;;  %v818_v19 = vld [vmem:[#allocation2 + $0x2f] sm:$0xff] }
  0x4e   : > { %804 = vst.msk [vmem:[#allocation2 + $0x170] sm:$0xff] %vm388_vm1, %v771_v30  ;;  %v6815_v34 = vadd.f32 -1.0, %v8808_v32  ;;  %v772_v35 = vsel %vm612_vm10, %v9318_v63, %v6814_v48  ;;  %8817 = vpow2.f32 %v710_v10  ;;  %vm617_vm15 = vcmp.gt.f32.partialorder %v9376_v8, 0.0  ;;  %v817_v18 = vld [vmem:[#allocation2 + $0x27] sm:$0xff]  ;;  %v820_v20 = vld [vmem:[#allocation2 + $0x4f] sm:$0xff] }
  0x4f   : > { %805 = vst.msk [vmem:[#allocation2 + $0x188] sm:$0xff] %vm388_vm1, %v772_v35  ;;  %8819 = vpow2.f32 %v712_v33  ;;  %vm618_vm2 = vcmp.gt.f32.partialorder %v9391_v11, 0.0  ;;  %vm619_vm3 = vcmp.gt.f32.partialorder %v9394_v12, 0.0  ;;  %v819_v43 = vld [vmem:[#allocation2 + $0x47] sm:$0xff]  ;;  %v9471_v21 = vpack.c.bf16 %v818_v19, %v817_v18  ;;  %v822_v32 = vld [vmem:[#allocation2 + $0x6f] sm:$0xff] }
  0x50   : > { %v8810_v27 = vpop.eup %8809  ;;  %v884_v39 = vld [vmem:[#allocation2 + $0x148] sm:$0xff]  ;;  %v773_v40 = vsel %vm613_vm11, %v9326_v16, %v6815_v34  ;;  %v9473_v52 = vpack.c.bf16 %v820_v20, %v819_v43  ;;  %v1438_v29 = vsel %vm962_vm0, %v9270_v53, 0  ;;  %v9480_v30 = vld [vmem:[%s10944_s3 + $0x6] sm:$0x3]  ;;  %vm434_vm6 = vcmask 64512  }
  0x51   : > { %v8812_v41 = vpop.eup %8811  ;;  %v885_v42 = vld [vmem:[#allocation2 + $0x150] sm:$0xff]  ;;  %806 = vst.msk [vmem:[#allocation2 + $0x190] sm:$0xff] %vm388_vm1, %v773_v40  ;;  %v6816_v45 = vadd.f32 -1.0, %v8810_v27  ;;  %v821_v48 = vld [vmem:[#allocation2 + $0x67] sm:$0xff]  ;;  %vm3887_vm7 = vcmask 1043456  }
  0x52   : > { %v9428_v63 = vpack.c.bf16 %v885_v42, %v884_v39  ;;  %v6817_v46 = vadd.f32 -1.0, %v8812_v41  ;;  %v823_v10 = vld [vmem:[#allocation2 + $0x87] sm:$0xff]  ;;  %v824_v33 = vld [vmem:[#allocation2 + $0x8f] sm:$0xff]  ;;  %v9488_v53 = vpack.c.bf16 %v822_v32, %v821_v48  ;;  %435 = vst.msk [vmem:[#allocation3] sm:$0xff] %vm434_vm6, %v8897_v2  ;;  %436 = vst.msk [vmem:[#allocation3 + $0x8] sm:$0xff] %vm434_vm6, %v8897_v2 }
  0x53   : > { %v774_v23 = vsel %vm614_vm12, %v9349_v38, %v6816_v45  ;;  %v886_v16 = vld [vmem:[#allocation2 + $0x168] sm:$0xff]  ;;  %v9490_v34 = vpack.c.bf16 %v824_v33, %v823_v10  ;;  %437 = vst.msk [vmem:[#allocation3 + $0x10] sm:$0xff] %vm434_vm6, %v8897_v2  ;;  %438 = vst.msk [vmem:[#allocation3 + $0x18] sm:$0xff] %vm434_vm6, %v8897_v2 }
  0x54   : > { %7527 = vmatmul.mubr.msk.bf16.gmra.mrb[16].mxu0 %vm388_vm1, %v9421_v51  ;;  %v775_v47 = vsel %vm615_vm13, %v9353_v22, %v6817_v46  ;;  %807 = vst.msk [vmem:[#allocation2 + $0x1a8] sm:$0xff] %vm388_vm1, %v774_v23  ;;  %v825_v35 = vld [vmem:[#allocation2 + $0xa7] sm:$0xff]  ;;  %v826_v27 = vld [vmem:[#allocation2 + $0xaf] sm:$0xff] }
  0x55   : > { %7530 = vmatprep.mubr.msk.bf16.mxu0 %vm388_vm1, %v9428_v63  ;;  %v887_v37 = vld [vmem:[#allocation2 + $0x170] sm:$0xff]  ;;  %v8814_v24 = vpop.eup %8813  ;;  %808 = vst.msk [vmem:[#allocation2 + $0x1b0] sm:$0xff] %vm388_vm1, %v775_v47  ;;  %v827_v39 = vld [vmem:[#allocation2 + $0xc7] sm:$0xff]  ;;  %v9496_v41 = vpack.c.bf16 %v826_v27, %v825_v35 }
  0x56   : > { %v8816_v1 = vpop.eup %8815  ;;  %v888_v49 = vld [vmem:[#allocation2 + $0x188] sm:$0xff]  ;;  %v6818_v0 = vadd.f32 -1.0, %v8814_v24  ;;  %v9440_v38 = vpack.c.bf16 %v887_v37, %v886_v16  ;;  %v510_v24 = vld [vmem:[%s9086_s29 + $0xf0] sm:$0xff]  ;;  %440 = vst.msk [vmem:[#allocation3 + $0x220] sm:$0xff] %vm434_vm6, %v8897_v2  ;;  %441 = vst.msk [vmem:[#allocation3 + $0x228] sm:$0xff] %vm434_vm6, %v8897_v2 }
  0x57   : > { %v6819_v54 = vadd.f32 -1.0, %v8816_v1  ;;  %v828_v40 = vld [vmem:[#allocation2 + $0xcf] sm:$0xff]  ;;  %v829_v45 = vld [vmem:[#allocation2 + $0xe7] sm:$0xff]  ;;  %v511_v1 = vld [vmem:[%s9086_s29 + $0xf8] sm:$0xff]  ;;  %442 = vst.msk [vmem:[#allocation3 + $0x230] sm:$0xff] %vm434_vm6, %v8897_v2 }
  0x58   : > { %v889_v3 = vld [vmem:[#allocation2 + $0x190] sm:$0xff]  ;;  %v776_v55 = vsel %vm616_vm14, %v9373_v25, %v6818_v0  ;;  %v8818_v56 = vpop.eup %8817  ;;  %v9498_v42 = vpack.c.bf16 %v828_v40, %v827_v39  ;;  %v831_v23 = vld [vmem:[#allocation2 + $0x107] sm:$0xff]  ;;  %v550_v0 = vmul.f32 %v9079_v4, %v511_v1  ;;  %443 = vst.msk [vmem:[#allocation3 + $0x238] sm:$0xff] %vm434_vm6, %v8897_v2  ;;  %445 = vst.msk [vmem:[#allocation3 + $0x20] sm:$0xff] %vm434_vm6, %v8897_v2 }
  0x59   : > { %v9443_v22 = vpack.c.bf16 %v889_v3, %v888_v49  ;;  %v777_v26 = vsel %vm617_vm15, %v9376_v8, %v6819_v54  ;;  %809 = vst.msk [vmem:[#allocation2 + $0x1c8] sm:$0xff] %vm388_vm1, %v776_v55  ;;  %v8820_v58 = vpop.eup %8819  ;;  %v6820_v59 = vadd.f32 -1.0, %v8818_v56  ;;  %v830_v46 = vld [vmem:[#allocation2 + $0xef] sm:$0xff]  ;;  %v549_v49 = vmul.f32 %v9079_v4, %v510_v24  ;;  %v833_v54 = vld [vmem:[#allocation2 + $0x127] sm:$0xff] }
  0x5a   : > { %810 = vst.msk [vmem:[#allocation2 + $0x1d0] sm:$0xff] %vm388_vm1, %v777_v26  ;;  %v6821_v60 = vadd.f32 -1.0, %v8820_v58  ;;  %v832_v16 = vld [vmem:[#allocation2 + $0x10f] sm:$0xff]  ;;  %v9504_v37 = vpack.c.bf16 %v830_v46, %v829_v45  ;;  %v835_v55 = vld [vmem:[#allocation2 + $0x147] sm:$0xff]  ;;  %v589_v58 = vadd.f32 %v9091_v5, %v550_v0 }
  0x5b   : > { %v890_v25 = vld [vmem:[#allocation2 + $0x1a8] sm:$0xff]  ;;  %v778_v8 = vsel %vm618_vm2, %v9391_v11, %v6820_v59  ;;  %v9506_v47 = vpack.c.bf16 %v832_v16, %v831_v23  ;;  %v588_v26 = vadd.f32 %v9091_v5, %v549_v49  ;;  %v1340_v40 = vld [vmem:[#allocation2 + $0x11] sm:$0xff]  ;;  %446 = vst.msk [vmem:[#allocation3 + $0x40] sm:$0xff] %vm434_vm6, %v8897_v2  ;;  %447 = vst.msk [vmem:[#allocation3 + $0x60] sm:$0xff] %vm434_vm6, %v8897_v2 }
  0x5c   : > { %7531 = vmatmul.mubr.msk.bf16.gmra.mrb[20].mxu0 %vm388_vm1, %v9440_v38  ;;  %v891_v62 = vld [vmem:[#allocation2 + $0x1b0] sm:$0xff]  ;;  %v779_v6 = vsel %vm619_vm3, %v9394_v12, %v6821_v60  ;;  %811 = vst.msk [vmem:[#allocation2 + $0x1e8] sm:$0xff] %vm388_vm1, %v778_v8  ;;  %v837_v4 = vld [vmem:[#allocation2 + $0x167] sm:$0xff]  ;;  %vm621_vm5 = vcmp.gt.f32.partialorder %v589_v58, 0.0 }
  0x5d   : > { %7534 = vmatprep.mubr.msk.bf16.mxu0 %vm388_vm1, %v9443_v22  ;;  %812 = vst.msk [vmem:[#allocation2 + $0x1f0] sm:$0xff] %vm388_vm1, %v779_v6  ;;  %v9458_v44 = vpack.c.bf16 %v891_v62, %v890_v25  ;;  %v816_v12 = vld [vmem:[#allocation2 + $0xf] sm:$0xff]  ;;  %v652_v60 = vmin.f32 %v588_v26, 0.0  ;;  %v653_v25 = vmin.f32 %v589_v58, 0.0  ;;  %vm620_vm4 = vcmp.gt.f32.partialorder %v588_v26, 0.0 }
  0x5e   : > { %v847_v31 = vpack.c.bf16 %v816_v12, %v815_v17  ;;  %v834_v3 = vld [vmem:[#allocation2 + $0x12f] sm:$0xff]  ;;  %v841_v17 = vld [vmem:[#allocation2 + $0x1a7] sm:$0xff]  ;;  %448 = vst.msk [vmem:[#allocation3 + $0x80] sm:$0xff] %vm434_vm6, %v8897_v2  ;;  %449 = vst.msk [vmem:[#allocation3 + $0xa0] sm:$0xff] %vm434_vm6, %v8897_v2 }
  0x5f   : > { %v836_v56 = vld [vmem:[#allocation2 + $0x14f] sm:$0xff]  ;;  %v9518_v59 = vpack.c.bf16 %v834_v3, %v833_v54  ;;  %v714_v8 = vmul.f32 1.442695, %v652_v60  ;;  %v716_v6 = vmul.f32 1.442695, %v653_v25  ;;  %v1732_v54 = vsel %vm962_vm0, %v9480_v30, 0 }
  0x60   : > { %v892_v7 = vld [vmem:[#allocation2 + $0x1c8] sm:$0xff]  ;;  %v9520_v62 = vpack.c.bf16 %v836_v56, %v835_v55  ;;  %v1342_v16 = vld [vmem:[#allocation2 + $0x31] sm:$0xff]  ;;  %450 = vst.msk [vmem:[#allocation3 + $0xc0] sm:$0xff] %vm434_vm6, %v8897_v2  ;;  %451 = vst.msk [vmem:[#allocation3 + $0xe0] sm:$0xff] %vm434_vm6, %v8897_v2 }
  0x61   : > { %v893_v9 = vld [vmem:[#allocation2 + $0x1d0] sm:$0xff]  ;;  %8821 = vpow2.f32 %v714_v8  ;;  %v843_v18 = vld [vmem:[#allocation2 + $0x1c7] sm:$0xff]  ;;  %452 = vst.msk [vmem:[#allocation3 + $0x100] sm:$0xff] %vm434_vm6, %v8897_v2  ;;  %453 = vst.msk [vmem:[#allocation3 + $0x120] sm:$0xff] %vm434_vm6, %v8897_v2 }
  0x62   : > { %v9460_v13 = vpack.c.bf16 %v893_v9, %v892_v7  ;;  %v838_v7 = vld [vmem:[#allocation2 + $0x16f] sm:$0xff]  ;;  %8823 = vpow2.f32 %v716_v6  ;;  %v839_v9 = vld [vmem:[#allocation2 + $0x187] sm:$0xff]  ;;  %454 = vst.msk [vmem:[#allocation3 + $0x140] sm:$0xff] %vm434_vm6, %v8897_v2  ;;  %455 = vst.msk [vmem:[#allocation3 + $0x160] sm:$0xff] %vm434_vm6, %v8897_v2 }
  0x63   : > { %v894_v15 = vld [vmem:[#allocation2 + $0x1e8] sm:$0xff]  ;;  %v1344_v1 = vld [vmem:[#allocation2 + $0x51] sm:$0xff]  ;;  %456 = vst.msk [vmem:[#allocation3 + $0x180] sm:$0xff] %vm434_vm6, %v8897_v2  ;;  %457 = vst.msk [vmem:[#allocation3 + $0x1a0] sm:$0xff] %vm434_vm6, %v8897_v2 }
  0x64   : > { %7535 = vmatmul.mubr.msk.bf16.gmra.mrb[24].mxu0 %vm388_vm1, %v9458_v44  ;;  %v895_v11 = vld [vmem:[#allocation2 + $0x1f0] sm:$0xff]  ;;  %v845_v35 = vld [vmem:[#allocation2 + $0x1e7] sm:$0xff]  ;;  %458 = vst.msk [vmem:[#allocation3 + $0x1c0] sm:$0xff] %vm434_vm6, %v8897_v2  ;;  %459 = vst.msk [vmem:[#allocation3 + $0x1e0] sm:$0xff] %vm434_vm6, %v8897_v2 }
  0x65   : > { %7538 = vmatprep.mubr.msk.bf16.mxu0 %vm388_vm1, %v9460_v13  ;;  %v9466_v50 = vpack.c.bf16 %v895_v11, %v894_v15  ;;  %v840_v5 = vld [vmem:[#allocation2 + $0x18f] sm:$0xff]  ;;  %v9526_v15 = vpack.c.bf16 %v838_v7, %v837_v4  ;;  %v6891_v3 = vld [vmem:[%s10944_s3 + $0x8] sm:$0x3]  ;;  %460 = vst.msk [vmem:[#allocation3 + $0x200] sm:$0xff] %vm434_vm6, %v8897_v2  ;;  %463 = vst.msk [vmem:[#allocation3 + $0x38] sm:$0xff] %vm434_vm6, %v8897_v2 }
  0x66   : > { %v9528_v11 = vpack.c.bf16 %v840_v5, %v839_v9  ;;  %v842_v12 = vld [vmem:[#allocation2 + $0x1af] sm:$0xff]  ;;  %464 = vst.msk [vmem:[#allocation3 + $0x58] sm:$0xff] %vm434_vm6, %v8897_v2  ;;  %465 = vst.msk [vmem:[#allocation3 + $0x78] sm:$0xff] %vm434_vm6, %v8897_v2 }
  0x67   : > { %v844_v19 = vld [vmem:[#allocation2 + $0x1cf] sm:$0xff]  ;;  %466 = vst.msk [vmem:[#allocation3 + $0x98] sm:$0xff] %vm434_vm6, %v8897_v2  ;;  %467 = vst.msk [vmem:[#allocation3 + $0xb8] sm:$0xff] %vm434_vm6, %v8897_v2 }
  0x68   : > { %v9536_v32 = vpack.c.bf16 %v844_v19, %v843_v18  ;;  %v846_v27 = vld [vmem:[#allocation2 + $0x1ef] sm:$0xff]  ;;  %468 = vst.msk [vmem:[#allocation3 + $0xd8] sm:$0xff] %vm434_vm6, %v8897_v2  ;;  %469 = vst.msk [vmem:[#allocation3 + $0xf8] sm:$0xff] %vm434_vm6, %v8897_v2 }
  0x69   : > { %v1339_v39 = vld [vmem:[#allocation2 + $0x9] sm:$0xff]  ;;  %v9544_v45 = vpack.c.bf16 %v846_v27, %v845_v35  ;;  %v1346_v56 = vld [vmem:[#allocation2 + $0x71] sm:$0xff]  ;;  %470 = vst.msk [vmem:[#allocation3 + $0x118] sm:$0xff] %vm434_vm6, %v8897_v2  ;;  %471 = vst.msk [vmem:[#allocation3 + $0x138] sm:$0xff] %vm434_vm6, %v8897_v2 }
  0x6a   : > { %v1371_v46 = vpack.c.bf16 %v1340_v40, %v1339_v39  ;;  %v1341_v23 = vld [vmem:[#allocation2 + $0x29] sm:$0xff]  ;;  %v1350_v8 = vld [vmem:[#allocation2 + $0xb1] sm:$0xff]  ;;  %472 = vst.msk [vmem:[#allocation3 + $0x158] sm:$0xff] %vm434_vm6, %v8897_v2  ;;  %473 = vst.msk [vmem:[#allocation3 + $0x178] sm:$0xff] %vm434_vm6, %v8897_v2 }
  0x6b   : > { %v1343_v24 = vld [vmem:[#allocation2 + $0x49] sm:$0xff]  ;;  %v9549_v49 = vpack.c.bf16 %v1342_v16, %v1341_v23  ;;  %v1352_v4 = vld [vmem:[#allocation2 + $0xd1] sm:$0xff]  ;;  %474 = vst.msk [vmem:[#allocation3 + $0x198] sm:$0xff] %vm434_vm6, %v8897_v2  ;;  %475 = vst.msk [vmem:[#allocation3 + $0x1b8] sm:$0xff] %vm434_vm6, %v8897_v2 }
  0x6c   : > { %7539 = vmatmul.mubr.msk.bf16.gmra.mrb[28].mxu0 %vm388_vm1, %v9466_v50  ;;  %v9551_v0 = vpack.c.bf16 %v1344_v1, %v1343_v24  ;;  %v1345_v55 = vld [vmem:[#allocation2 + $0x69] sm:$0xff]  ;;  %v1362_v39 = vld [vmem:[#allocation2 + $0x171] sm:$0xff]  ;;  %476 = vst.msk [vmem:[#allocation3 + $0x1d8] sm:$0xff] %vm434_vm6, %v8897_v2  ;;  %477 = vst.msk [vmem:[#allocation3 + $0x1f8] sm:$0xff] %vm434_vm6, %v8897_v2 }
  0x6d   : > { %7544 = vmatprep.mubr.msk.bf16.mxu0 %vm388_vm1, %v847_v31  ;;  %v8822_v31 = vpop.eup %8821  ;;  %v9563_v60 = vpack.c.bf16 %v1346_v56, %v1345_v55  ;;  %v1349_v25 = vld [vmem:[#allocation2 + $0xa9] sm:$0xff]  ;;  %v1366_v1 = vld [vmem:[#allocation2 + $0x1b1] sm:$0xff]  ;;  %478 = vst.msk [vmem:[#allocation3 + $0x218] sm:$0xff] %vm434_vm6, %v8897_v2  ;;  %444 = vst.msk [vmem:[#allocation3] sm:$0xff] %vm434_vm6, %v8897_v2 }
  0x6e   : > { %v8824_v43 = vpop.eup %8823  ;;  %v6822_v20 = vadd.f32 -1.0, %v8822_v31  ;;  %v1351_v6 = vld [vmem:[#allocation2 + $0xc9] sm:$0xff]  ;;  %v9571_v7 = vpack.c.bf16 %v1350_v8, %v1349_v25  ;;  %v1356_v31 = vld [vmem:[#allocation2 + $0x111] sm:$0xff]  ;;  %461 = vst.msk [vmem:[#allocation3 + $0x220] sm:$0xff] %vm434_vm6, %v8897_v2  ;;  %462 = vst.msk [vmem:[#allocation3 + $0x18] sm:$0xff] %vm434_vm6, %v8897_v2 }
  0x6f   : > { %v6823_v48 = vadd.f32 -1.0, %v8824_v43  ;;  %v9573_v9 = vpack.c.bf16 %v1352_v4, %v1351_v6  ;;  %v1353_v5 = vld [vmem:[#allocation2 + $0xe9] sm:$0xff]  ;;  %v1368_v55 = vld [vmem:[#allocation2 + $0x1d1] sm:$0xff]  ;;  %v2026_v6 = vsel %vm962_vm0, %v6891_v3, 0  ;;  %479 = vst.msk [vmem:[#allocation3 + $0x238] sm:$0xff] %vm434_vm6, %v8897_v2 }
  0x70   : > { %v780_v10 = vsel %vm620_vm4, %v588_v26, %v6822_v20  ;;  %v1347_v26 = vld [vmem:[#allocation2 + $0x89] sm:$0xff]  ;;  %v1358_v20 = vld [vmem:[#allocation2 + $0x131] sm:$0xff] }
  0x71   : > { %v781_v33 = vsel %vm621_vm5, %v589_v58, %v6823_v48  ;;  %813 = vst.msk [vmem:[#allocation2 + $0x208] sm:$0xff] %vm388_vm1, %v780_v10  ;;  %v1348_v58 = vld [vmem:[#allocation2 + $0x91] sm:$0xff]  ;;  %v1357_v43 = vld [vmem:[#allocation2 + $0x129] sm:$0xff] }
  0x72   : > { %814 = vst.msk [vmem:[#allocation2 + $0x210] sm:$0xff] %vm388_vm1, %v781_v33  ;;  %v1359_v48 = vld [vmem:[#allocation2 + $0x149] sm:$0xff]  ;;  %v1360_v10 = vld [vmem:[#allocation2 + $0x151] sm:$0xff]  ;;  %v9587_v33 = vpack.c.bf16 %v1358_v20, %v1357_v43 }
  0x73   : > { %v9589_v35 = vpack.c.bf16 %v1360_v10, %v1359_v48  ;;  %v1361_v27 = vld [vmem:[#allocation2 + $0x169] sm:$0xff]  ;;  %v1370_v25 = vld [vmem:[#allocation2 + $0x1f1] sm:$0xff] }
  0x74   : > { %7545 = vmatmul.mubr.msk.bf16.vlgmr.msra.gmra.mrb[0].mxu0 %vm388_vm1, %v9471_v21  ;;  %v1363_v40 = vld [vmem:[#allocation2 + $0x189] sm:$0xff]  ;;  %v9595_v23 = vpack.c.bf16 %v1362_v39, %v1361_v27 }
  0x75   : > { %7577 = vmatpush3.bf16.msra.mxu0 %v1438_v29  ;;  %7548 = vmatprep.mubr.msk.bf16.mxu0 %vm388_vm1, %v9473_v52  ;;  %v9534_v29 = vpack.c.bf16 %v842_v12, %v841_v17  ;;  %v1354_v17 = vld [vmem:[#allocation2 + $0xf1] sm:$0xff]  ;;  %v1355_v12 = vld [vmem:[#allocation2 + $0x109] sm:$0xff] }
  0x76   : > { %8735 = vmatprep.subr.msk.bf16.mxu0 %vm962_vm0, %v9480_v30  ;;  %v9565_v30 = vpack.c.bf16 %v1348_v58, %v1347_v26  ;;  %v9579_v18 = vpack.c.bf16 %v1354_v17, %v1353_v5  ;;  %v9581_v19 = vpack.c.bf16 %v1356_v31, %v1355_v12  ;;  %v1365_v24 = vld [vmem:[#allocation2 + $0x1a9] sm:$0xff] }
  0x77   : > { %v9603_v56 = vpack.c.bf16 %v1366_v1, %v1365_v24  ;;  %v1369_v58 = vld [vmem:[#allocation2 + $0x1e9] sm:$0xff] }
  0x78   : > { %v9611_v8 = vpack.c.bf16 %v1370_v25, %v1369_v58  ;;  %v6908_v4 = vld [vmem:[%s10944_s3 + $0xa] sm:$0x3]  ;;  %v1928_v17 = vld [vmem:[#allocation2 + $0x30] sm:$0xff] }
  0x79   : > { %v1927_v5 = vld [vmem:[#allocation2 + $0x28] sm:$0xff]  ;;  %v1930_v20 = vld [vmem:[#allocation2 + $0x50] sm:$0xff] }
  0x7a   : > { %v1959_v31 = vpack.c.bf16 %v1928_v17, %v1927_v5  ;;  %v1929_v43 = vld [vmem:[#allocation2 + $0x48] sm:$0xff]  ;;  %v1932_v10 = vld [vmem:[#allocation2 + $0x70] sm:$0xff] }
  0x7b   : > { %v1931_v48 = vld [vmem:[#allocation2 + $0x68] sm:$0xff]  ;;  %v9655_v27 = vpack.c.bf16 %v1930_v20, %v1929_v43  ;;  %v2823_v24 = vld [vmem:[#allocation2 + $0x110] sm:$0xff] }
  0x7c   : > { %7549 = vmatmul.mubr.msk.bf16.gmra.mrb[4].mxu0 %vm388_vm1, %v9488_v53  ;;  %v9657_v39 = vpack.c.bf16 %v1932_v10, %v1931_v48  ;;  %v2820_v2 = vld [vmem:[#allocation2 + $0xe8] sm:$0xff]  ;;  %v2825_v58 = vld [vmem:[#allocation2 + $0x130] sm:$0xff] }
  0x7d   : > { %7552 = vmatprep.mubr.msk.bf16.mxu0 %vm388_vm1, %v9490_v34  ;;  %v2826_v25 = vld [vmem:[#allocation2 + $0x148] sm:$0xff]  ;;  %v2829_v5 = vld [vmem:[#allocation2 + $0x170] sm:$0xff] }
  0x7e   : > { %v2830_v17 = vld [vmem:[#allocation2 + $0x188] sm:$0xff]  ;;  %v2833_v48 = vld [vmem:[#allocation2 + $0x1b0] sm:$0xff] }
  0x7f   : > { %v2832_v20 = vld [vmem:[#allocation2 + $0x1a8] sm:$0xff] }
  0x80   : > { %v2853_v10 = vpack.c.bf16 %v2833_v48, %v2832_v20 }
  0x84   : > { %7553 = vmatmul.mubr.msk.bf16.gmra.mrb[8].mxu0 %vm388_vm1, %v9496_v41 }
  0x85   : > { %7556 = vmatprep.mubr.msk.bf16.mxu0 %vm388_vm1, %v9498_v42 }
  0x8c   : > { %7557 = vmatmul.mubr.msk.bf16.gmra.mrb[12].mxu0 %vm388_vm1, %v9504_v37 }
  0x8d   : > { %7560 = vmatprep.mubr.msk.bf16.mxu0 %vm388_vm1, %v9506_v47 }
  0x94   : > { %7561 = vmatmul.mubr.msk.bf16.gmra.mrb[16].mxu0 %vm388_vm1, %v9518_v59 }
  0x95   : > { %7564 = vmatprep.mubr.msk.bf16.mxu0 %vm388_vm1, %v9520_v62 }
  0x9c   : > { %7565 = vmatmul.mubr.msk.bf16.gmra.mrb[20].mxu0 %vm388_vm1, %v9526_v15 }
  0x9d   : > { %7568 = vmatprep.mubr.msk.bf16.mxu0 %vm388_vm1, %v9528_v11 }
  0xa4   : > { %7569 = vmatmul.mubr.msk.bf16.gmra.mrb[24].mxu0 %vm388_vm1, %v9534_v29 }
  0xa5   : > { %7572 = vmatprep.mubr.msk.bf16.mxu0 %vm388_vm1, %v9536_v32 }
  0xac   : > { %7573 = vmatmul.mubr.msk.bf16.gmra.mrb[28].mxu0 %vm388_vm1, %v9544_v45 }
  0xad   : > { %7578 = vmatprep.mubr.msk.bf16.mxu0 %vm388_vm1, %v1371_v46  ;;  %v1364_v46 = vld [vmem:[#allocation2 + $0x191] sm:$0xff] }
  0xae   : > { %v9597_v16 = vpack.c.bf16 %v1364_v46, %v1363_v40  ;;  %v2320_v40 = vsel %vm962_vm0, %v6908_v4, 0  ;;  %v6925_v46 = vld [vmem:[%s10944_s3 + $0xc] sm:$0x3] }
  0xb4   : > { %7579 = vmatmul.mubr.msk.bf16.vlgmr.msra.gmra.mrb[0].mxu0 %vm388_vm1, %v9549_v49 }
  0xb5   : > { %7611 = vmatpush3.bf16.msra.mxu0 %v1732_v54  ;;  %7582 = vmatprep.mubr.msk.bf16.mxu0 %vm388_vm1, %v9551_v0  ;;  %v1367_v54 = vld [vmem:[#allocation2 + $0x1c9] sm:$0xff] }
  0xb6   : > { %8736 = vmatprep.subr.msk.bf16.mxu0 %vm962_vm0, %v6891_v3  ;;  %v9605_v26 = vpack.c.bf16 %v1368_v55, %v1367_v54  ;;  %v1664_v3 = vld [vmem:[#allocation2 + $0x20f] sm:$0xff] }
  0xb7   : > { %v2824_v55 = vld [vmem:[#allocation2 + $0x128] sm:$0xff] }
  0xbc   : > { %7583 = vmatmul.mubr.msk.bf16.gmra.mrb[4].mxu0 %vm388_vm1, %v9563_v60 }
  0xbd   : > { %7586 = vmatprep.mubr.msk.bf16.mxu0 %vm388_vm1, %v9565_v30 }
  0xc4   : > { %7587 = vmatmul.mubr.msk.bf16.gmra.mrb[8].mxu0 %vm388_vm1, %v9571_v7 }
  0xc5   : > { %7590 = vmatprep.mubr.msk.bf16.mxu0 %vm388_vm1, %v9573_v9 }
  0xcc   : > { %7591 = vmatmul.mubr.msk.bf16.gmra.mrb[12].mxu0 %vm388_vm1, %v9579_v18 }
  0xcd   : > { %7594 = vmatprep.mubr.msk.bf16.mxu0 %vm388_vm1, %v9581_v19 }
  0xd4   : > { %7595 = vmatmul.mubr.msk.bf16.gmra.mrb[16].mxu0 %vm388_vm1, %v9587_v33 }
  0xd5   : > { %7598 = vmatprep.mubr.msk.bf16.mxu0 %vm388_vm1, %v9589_v35 }
  0xdc   : > { %7599 = vmatmul.mubr.msk.bf16.gmra.mrb[20].mxu0 %vm388_vm1, %v9595_v23 }
  0xdd   : > { %7602 = vmatprep.mubr.msk.bf16.mxu0 %vm388_vm1, %v9597_v16 }
  0xe4   : > { %7603 = vmatmul.mubr.msk.bf16.gmra.mrb[24].mxu0 %vm388_vm1, %v9603_v56 }
  0xe5   : > { %7606 = vmatprep.mubr.msk.bf16.mxu0 %vm388_vm1, %v9605_v26 }
  0xec   : > { %7607 = vmatmul.mubr.msk.bf16.gmra.mrb[28].mxu0 %vm388_vm1, %v9611_v8 }
  0xed   : > { %7612 = vmatprep.mubr.msk.bf16.mxu0 %vm388_vm1, %v9471_v21  ;;  %v1663_v21 = vld [vmem:[#allocation2 + $0x207] sm:$0xff] }
  0xee   : > { %v9650_v12 = vpack.c.bf16 %v1664_v3, %v1663_v21  ;;  %v2828_v3 = vld [vmem:[#allocation2 + $0x168] sm:$0xff] }
  0xf4   : > { %7613 = vmatmul.mubr.msk.bf16.vlgmr.msra.gmra.mrb[0].mxu0 %vm388_vm1, %v9473_v52 }
  0xf5   : > { %7645 = vmatpush3.bf16.msra.mxu0 %v2026_v6  ;;  %7616 = vmatprep.mubr.msk.bf16.mxu0 %vm388_vm1, %v9488_v53  ;;  %v2827_v6 = vld [vmem:[#allocation2 + $0x150] sm:$0xff] }
  0xf6   : > { %8737 = vmatprep.subr.msk.bf16.mxu0 %vm962_vm0, %v6908_v4  ;;  %v2849_v4 = vpack.c.bf16 %v2825_v58, %v2824_v55  ;;  %v2850_v21 = vpack.c.bf16 %v2827_v6, %v2826_v25 }
  0xfc   : > { %7617 = vmatmul.mubr.msk.bf16.gmra.mrb[4].mxu0 %vm388_vm1, %v9490_v34 }
  0xfd   : > { %7620 = vmatprep.mubr.msk.bf16.mxu0 %vm388_vm1, %v9496_v41 }
 0x104   : > { %7621 = vmatmul.mubr.msk.bf16.gmra.mrb[8].mxu0 %vm388_vm1, %v9498_v42 }
 0x105   : > { %7624 = vmatprep.mubr.msk.bf16.mxu0 %vm388_vm1, %v9504_v37 }
 0x10c   : > { %7625 = vmatmul.mubr.msk.bf16.gmra.mrb[12].mxu0 %vm388_vm1, %v9506_v47 }
 0x10d   : > { %7628 = vmatprep.mubr.msk.bf16.mxu0 %vm388_vm1, %v9518_v59 }
 0x114   : > { %7629 = vmatmul.mubr.msk.bf16.gmra.mrb[16].mxu0 %vm388_vm1, %v9520_v62 }
 0x115   : > { %7632 = vmatprep.mubr.msk.bf16.mxu0 %vm388_vm1, %v9526_v15 }
 0x11c   : > { %7633 = vmatmul.mubr.msk.bf16.gmra.mrb[20].mxu0 %vm388_vm1, %v9528_v11 }
 0x11d   : > { %7636 = vmatprep.mubr.msk.bf16.mxu0 %vm388_vm1, %v9534_v29 }
 0x124   : > { %7637 = vmatmul.mubr.msk.bf16.gmra.mrb[24].mxu0 %vm388_vm1, %v9536_v32 }
 0x125   : > { %7640 = vmatprep.mubr.msk.bf16.mxu0 %vm388_vm1, %v9544_v45 }
 0x12c   : > { %7641 = vmatmul.mubr.msk.bf16.gmra.mrb[28].mxu0 %vm388_vm1, %v9650_v12 }
 0x12d   : > { %7646 = vmatprep.mubr.msk.bf16.mxu0 %vm388_vm1, %v1959_v31  ;;  %v2851_v31 = vpack.c.bf16 %v2829_v5, %v2828_v3 }
 0x134   : > { %7647 = vmatmul.mubr.msk.bf16.vlgmr.msra.gmra.mrb[0].mxu0 %vm388_vm1, %v9655_v27 }
 0x135   : > { %7679 = vmatpush3.bf16.msra.mxu0 %v2320_v40  ;;  %7650 = vmatprep.mubr.msk.bf16.mxu0 %vm388_vm1, %v9657_v39 }
 0x136   : > { %8738 = vmatprep.subr.msk.bf16.mxu0 %vm962_vm0, %v6925_v46 }
 0x13c   : > { %7651 = vmatmul.mubr.msk.bf16.gmra.mrb[4].mxu0 %vm388_vm1, %v9302_v57  ;;  %v1957_v57 = vld [vmem:[#allocation2 + $0x208] sm:$0xff] }
 0x13d   : > { %7654 = vmatprep.mubr.msk.bf16.mxu0 %vm388_vm1, %v9335_v28  ;;  %v1958_v28 = vld [vmem:[#allocation2 + $0x210] sm:$0xff] }
 0x144   : > { %7655 = vmatmul.mubr.msk.bf16.gmra.mrb[8].mxu0 %vm388_vm1, %v9346_v36  ;;  %v9692_v36 = vpack.c.bf16 %v1958_v28, %v1957_v57 }
 0x145   : > { %7658 = vmatprep.mubr.msk.bf16.mxu0 %vm388_vm1, %v9382_v14  ;;  %v2615_v14 = vsel %vm962_vm0, %v6925_v46, 0 }
 0x14c   : > { %7659 = vmatmul.mubr.msk.bf16.gmra.mrb[12].mxu0 %vm388_vm1, %v9385_v61  ;;  %v6942_v61 = vld [vmem:[%s10944_s3 + $0xe] sm:$0x3] }
 0x14d   : > { %7662 = vmatprep.mubr.msk.bf16.mxu0 %vm388_vm1, %v9421_v51  ;;  %v2251_v51 = vld [vmem:[#allocation2 + $0x209] sm:$0xff] }
 0x154   : > { %7663 = vmatmul.mubr.msk.bf16.gmra.mrb[16].mxu0 %vm388_vm1, %v9428_v63  ;;  %v2252_v63 = vld [vmem:[#allocation2 + $0x211] sm:$0xff] }
 0x155   : > { %7666 = vmatprep.mubr.msk.bf16.mxu0 %vm388_vm1, %v9440_v38  ;;  %v9731_v38 = vpack.c.bf16 %v2252_v63, %v2251_v51 }
 0x15c   : > { %7667 = vmatmul.mubr.msk.bf16.gmra.mrb[20].mxu0 %vm388_vm1, %v9443_v22  ;;  %v2909_v22 = vsel %vm962_vm0, %v6942_v61, 0 }
 0x15d   : > { %7670 = vmatprep.mubr.msk.bf16.mxu0 %vm388_vm1, %v9458_v44  ;;  %v9741_v44 = vld [vmem:[%s10944_s3 + $0x10] sm:$0x3] }
 0x164   : > { %7671 = vmatmul.mubr.msk.bf16.gmra.mrb[24].mxu0 %vm388_vm1, %v9460_v13 }
 0x165   : > { %7674 = vmatprep.mubr.msk.bf16.mxu0 %vm388_vm1, %v9466_v50 }
 0x16c   : > { %7675 = vmatmul.mubr.msk.bf16.gmra.mrb[28].mxu0 %vm388_vm1, %v9692_v36 }
 0x16d   : > { %7680 = vmatprep.mubr.msk.bf16.mxu0 %vm388_vm1, %v9549_v49  ;;  %v2822_v49 = vld [vmem:[#allocation2 + $0x108] sm:$0xff] }
 0x16e   : > { %v2848_v54 = vpack.c.bf16 %v2823_v24, %v2822_v49 }
 0x174   : > { %7681 = vmatmul.mubr.msk.bf16.vlgmr.msra.gmra.mrb[0].mxu0 %vm388_vm1, %v9551_v0 }
 0x175   : > { %7713 = vmatpush3.bf16.msra.mxu0 %v2615_v14  ;;  %7684 = vmatprep.mubr.msk.bf16.mxu0 %vm388_vm1, %v9563_v60 }
 0x176   : > { %8739 = vmatprep.subr.msk.bf16.mxu0 %vm962_vm0, %v6942_v61 }
 0x17c   : > { %7685 = vmatmul.mubr.msk.bf16.gmra.mrb[4].mxu0 %vm388_vm1, %v9565_v30 }
 0x17d   : > { %7688 = vmatprep.mubr.msk.bf16.mxu0 %vm388_vm1, %v9571_v7 }
 0x184   : > { %7689 = vmatmul.mubr.msk.bf16.gmra.mrb[8].mxu0 %vm388_vm1, %v9573_v9 }
 0x185   : > { %7692 = vmatprep.mubr.msk.bf16.mxu0 %vm388_vm1, %v9579_v18 }
 0x18c   : > { %7693 = vmatmul.mubr.msk.bf16.gmra.mrb[12].mxu0 %vm388_vm1, %v9581_v19 }
 0x18d   : > { %7696 = vmatprep.mubr.msk.bf16.mxu0 %vm388_vm1, %v9587_v33 }
 0x194   : > { %7697 = vmatmul.mubr.msk.bf16.gmra.mrb[16].mxu0 %vm388_vm1, %v9589_v35 }
 0x195   : > { %7700 = vmatprep.mubr.msk.bf16.mxu0 %vm388_vm1, %v9595_v23 }
 0x19c   : > { %7701 = vmatmul.mubr.msk.bf16.gmra.mrb[20].mxu0 %vm388_vm1, %v9597_v16 }
 0x19d   : > { %7704 = vmatprep.mubr.msk.bf16.mxu0 %vm388_vm1, %v9603_v56 }
 0x1a4   : > { %7705 = vmatmul.mubr.msk.bf16.gmra.mrb[24].mxu0 %vm388_vm1, %v9605_v26 }
 0x1a5   : > { %7708 = vmatprep.mubr.msk.bf16.mxu0 %vm388_vm1, %v9611_v8 }
 0x1ac   : > { %7709 = vmatmul.mubr.msk.bf16.gmra.mrb[28].mxu0 %vm388_vm1, %v9731_v38 }
 0x1ad   : > { %7714 = vmatprep.mubr.msk.bf16.mxu0 %vm388_vm1, %v9473_v52  ;;  %v2546_v52 = vld [vmem:[#allocation2 + $0x227] sm:$0xff] }
 0x1b4   : > { %7715 = vmatmul.mubr.msk.bf16.vlgmr.msra.gmra.mrb[0].mxu0 %vm388_vm1, %v9488_v53  ;;  %v2547_v53 = vld [vmem:[#allocation2 + $0x22f] sm:$0xff] }
 0x1b5   : > { %7747 = vmatpush3.bf16.msra.mxu0 %v2909_v22  ;;  %7718 = vmatprep.mubr.msk.bf16.mxu0 %vm388_vm1, %v9490_v34  ;;  %v2563_v34 = vpack.c.bf16 %v2547_v53, %v2546_v52 }
 0x1b6   : > { %8740 = vmatprep.subr.msk.bf16.mxu0 %vm962_vm0, %v9741_v44 }
 0x1bc   : > { %7719 = vmatmul.mubr.msk.bf16.gmra.mrb[4].mxu0 %vm388_vm1, %v9496_v41  ;;  %v2814_v41 = vld [vmem:[#allocation2 + $0x88] sm:$0xff] }
 0x1bd   : > { %7722 = vmatprep.mubr.msk.bf16.mxu0 %vm388_vm1, %v9498_v42  ;;  %v2815_v42 = vld [vmem:[#allocation2 + $0x90] sm:$0xff] }
 0x1c4   : > { %7723 = vmatmul.mubr.msk.bf16.gmra.mrb[8].mxu0 %vm388_vm1, %v9504_v37  ;;  %v2844_v37 = vpack.c.bf16 %v2815_v42, %v2814_v41 }
 0x1c5   : > { %7726 = vmatprep.mubr.msk.bf16.mxu0 %vm388_vm1, %v9506_v47  ;;  %v3203_v47 = vsel %vm962_vm0, %v9741_v44, 0 }
 0x1cc   : > { %7727 = vmatmul.mubr.msk.bf16.gmra.mrb[12].mxu0 %vm388_vm1, %v9518_v59  ;;  %v2816_v59 = vld [vmem:[#allocation2 + $0xa8] sm:$0xff] }
 0x1cd   : > { %7730 = vmatprep.mubr.msk.bf16.mxu0 %vm388_vm1, %v9520_v62  ;;  %v2817_v62 = vld [vmem:[#allocation2 + $0xb0] sm:$0xff] }
 0x1d4   : > { %7731 = vmatmul.mubr.msk.bf16.gmra.mrb[16].mxu0 %vm388_vm1, %v9526_v15  ;;  %v2818_v15 = vld [vmem:[#allocation2 + $0xc8] sm:$0xff] }
 0x1d5   : > { %7734 = vmatprep.mubr.msk.bf16.mxu0 %vm388_vm1, %v9528_v11  ;;  %v2819_v11 = vld [vmem:[#allocation2 + $0xd0] sm:$0xff] }
 0x1dc   : > { %7735 = vmatmul.mubr.msk.bf16.gmra.mrb[20].mxu0 %vm388_vm1, %v9534_v29  ;;  %v2845_v29 = vpack.c.bf16 %v2817_v62, %v2816_v59 }
 0x1dd   : > { %7738 = vmatprep.mubr.msk.bf16.mxu0 %vm388_vm1, %v9536_v32  ;;  %v2846_v32 = vpack.c.bf16 %v2819_v11, %v2818_v15 }
 0x1e4   : > { %7739 = vmatmul.mubr.msk.bf16.gmra.mrb[24].mxu0 %vm388_vm1, %v9544_v45  ;;  %v2821_v45 = vld [vmem:[#allocation2 + $0xf0] sm:$0xff] }
 0x1e5   : > { %7742 = vmatprep.mubr.msk.bf16.mxu0 %vm388_vm1, %v9650_v12  ;;  %v2847_v1 = vpack.c.bf16 %v2821_v45, %v2820_v2  ;;  %v2831_v12 = vld [vmem:[#allocation2 + $0x190] sm:$0xff] }
 0x1e6   : > { %v2852_v43 = vpack.c.bf16 %v2831_v12, %v2830_v17 }
 0x1ec   : > { %7743 = vmatmul.mubr.msk.bf16.gmra.mrb[28].mxu0 %vm388_vm1, %v2563_v34 }
 0x1ed   : > { %7748 = vmatprep.mubr.msk.bf16.mxu0 %vm388_vm1, %v9655_v27  ;;  %v2840_v27 = vld [vmem:[#allocation2 + $0x228] sm:$0xff] }
 0x1f4   : > { %7749 = vmatmul.mubr.msk.bf16.vlgmr.msra.gmra.mrb[0].mxu0 %vm388_vm1, %v9657_v39  ;;  %v2841_v39 = vld [vmem:[#allocation2 + $0x230] sm:$0xff] }
 0x1f5   : > { %7781 = vmatpush3.bf16.msra.mxu0 %v3203_v47  ;;  %7752 = vmatprep.mubr.msk.bf16.mxu0 %vm388_vm1, %v2844_v37  ;;  %v2857_v40 = vpack.c.bf16 %v2841_v39, %v2840_v27 }
 0x1fc   : > { %7753 = vmatmul.mubr.msk.bf16.gmra.mrb[4].mxu0 %vm388_vm1, %v2845_v29 }
 0x1fd   : > { %7756 = vmatprep.mubr.msk.bf16.mxu0 %vm388_vm1, %v2846_v32 }
 0x204   : > { %7757 = vmatmul.mubr.msk.bf16.gmra.mrb[8].mxu0 %vm388_vm1, %v2847_v1 }
 0x205   : > { %7760 = vmatprep.mubr.msk.bf16.mxu0 %vm388_vm1, %v2848_v54 }
 0x20c   : > { %7761 = vmatmul.mubr.msk.bf16.gmra.mrb[12].mxu0 %vm388_vm1, %v2849_v4 }
 0x20d   : > { %7764 = vmatprep.mubr.msk.bf16.mxu0 %vm388_vm1, %v2850_v21 }
 0x214   : > { %7765 = vmatmul.mubr.msk.bf16.gmra.mrb[16].mxu0 %vm388_vm1, %v2851_v31 }
 0x215   : > { %7768 = vmatprep.mubr.msk.bf16.mxu0 %vm388_vm1, %v2852_v43 }
 0x21c   : > { %7769 = vmatmul.mubr.msk.bf16.gmra.mrb[20].mxu0 %vm388_vm1, %v2853_v10 }
 0x21d   : > { %7772 = vmatprep.mubr.msk.bf16.mxu0 %vm388_vm1, %v9460_v13  ;;  %v3134_v13 = vld [vmem:[#allocation2 + $0x229] sm:$0xff] }
 0x224   : > { %7773 = vmatmul.mubr.msk.bf16.gmra.mrb[24].mxu0 %vm388_vm1, %v9466_v50  ;;  %v3135_v50 = vld [vmem:[#allocation2 + $0x231] sm:$0xff] }
 0x225   : > { %7776 = vmatprep.mubr.msk.bf16.mxu0 %vm388_vm1, %v9692_v36 }
 0x22c   : > { %7777 = vmatmul.mubr.msk.bf16.gmra.mrb[28].mxu0 %vm388_vm1, %v2857_v40 }
 0x22d   : > { %7782 = vmatprep.mubr.msk.bf16.mxu0 %vm388_vm1, %v9551_v0  ;;  %v3151_v0 = vpack.c.bf16 %v3135_v50, %v3134_v13 }
 0x234   : > { %7783 = vmatmul.mubr.msk.bf16.vlgmr.msra.gmra.mrb[0].mxu0 %vm388_vm1, %v9563_v60  ;;  %v7011_v60 = vld [vmem:[%s10948_s7 + $0x4] sm:$0xf] }
 0x235   : > { %7786 = vmatprep.mubr.msk.bf16.mxu0 %vm388_vm1, %v9565_v30  ;;  %8741 = vmatprep.subr.msk.bf16.mxu0 %vm3887_vm7, %v7011_v60  ;;  %v3889_v30 = vsel %vm3887_vm7, %v7011_v60, 0 }
 0x236   : > { %8742 = vmatprep.subr.msk.bf16.mxu1 %vm3887_vm7, %v7011_v60  ;;  %7815 = vmatpush3.bf16.msra.mxu0 %v3889_v30 }
 0x237   : > { %8155 = vmatpush3.bf16.msra.mxu1 %v3889_v30 }
 0x23c   : > { %7787 = vmatmul.mubr.msk.bf16.gmra.mrb[4].mxu0 %vm388_vm1, %v9571_v7  ;;  %v3789_v7 = vld [vmem:[#allocation3 + $0x8] sm:$0xff] }
 0x23d   : > { %7790 = vmatprep.mubr.msk.bf16.mxu0 %vm388_vm1, %v9573_v9  ;;  %v3790_v9 = vld [vmem:[#allocation3 + $0x10] sm:$0xff] }
 0x244   : > { %7791 = vmatmul.mubr.msk.bf16.gmra.mrb[8].mxu0 %vm388_vm1, %v9579_v18  ;;  %v3821_v18 = vpack.c.bf16 %v3790_v9, %v3789_v7 }
 0x245   : > { %7794 = vmatprep.mubr.msk.bf16.mxu0 %vm388_vm1, %v9581_v19  ;;  %v9926_v19 = vld [vmem:[%s10948_s7] sm:$0xf] }
 0x246   : > { %8743 = vmatprep.subr.msk.bf16.mxu1 %vm3887_vm7, %v9926_v19 }
 0x24c   : > { %7795 = vmatmul.mubr.msk.bf16.gmra.mrb[12].mxu0 %vm388_vm1, %v9587_v33  ;;  %v9933_v33 = vld [vmem:[%s10945_s4] ss:$0 sm:$0xff] }
 0x24d   : > { %7798 = vmatprep.mubr.msk.bf16.mxu0 %vm388_vm1, %v9589_v35 }
 0x254   : > { %7799 = vmatmul.mubr.msk.bf16.gmra.mrb[16].mxu0 %vm388_vm1, %v9595_v23  ;;  %v9938_v23 = vld [vmem:[%s10946_s5] ss:$0 sm:$0xff] }
 0x255   : > { %7802 = vmatprep.mubr.msk.bf16.mxu0 %vm388_vm1, %v9597_v16 }
 0x25c   : > { %7803 = vmatmul.mubr.msk.bf16.gmra.mrb[20].mxu0 %vm388_vm1, %v9603_v56 }
 0x25d   : > { %7806 = vmatprep.mubr.msk.bf16.mxu0 %vm388_vm1, %v9605_v26  ;;  %v9944_v26 = vld [vmem:[%s10947_s6] ss:$0 sm:$0xff] }
 0x264   : > { %7807 = vmatmul.mubr.msk.bf16.gmra.mrb[24].mxu0 %vm388_vm1, %v9611_v8 }
 0x265   : > { %7810 = vmatprep.mubr.msk.bf16.mxu0 %vm388_vm1, %v9731_v38 }
 0x26c   : > { %7811 = vmatmul.mubr.msk.bf16.gmra.mrb[28].mxu0 %vm388_vm1, %v3151_v0 }
 0x26d   : > { %7816 = vmatprep.mubr.msk.bf16.mxu0 %vm434_vm6, %v3821_v18 }
 0x307   : > { %v7784_v35 = vpop.f32.mrb[0].mxu0 }
 0x308   : > { %v3407_v16 = vadd.f32 %v7784_v35, %v9933_v33  ;;  %v3239_v56 = vpop.f32.mrb[1].mxu0 }
 0x309   : > { %v3405_v8 = vadd.f32 %v9933_v33, %v3239_v56  ;;  %v7785_v46 = vpop.f32.mrb[2].mxu0 }
 0x30a   : > { %v3446_v57 = vmul.f32 %v9938_v23, %v3407_v16  ;;  %v3408_v28 = vadd.f32 %v7785_v46, %v9933_v33  ;;  %v3242_v36 = vpop.f32.mrb[3].mxu0 }
 0x30b   : > { %v3444_v14 = vmul.f32 %v9938_v23, %v3405_v8  ;;  %v3406_v61 = vadd.f32 %v9933_v33, %v3242_v36 }
 0x30c   : > { %v9952_v51 = vadd.f32 %v9944_v26, %v3446_v57  ;;  %v3447_v63 = vmul.f32 %v9938_v23, %v3408_v28 }
 0x30d   : > { %v9956_v38 = vadd.f32 %v9944_v26, %v3444_v14  ;;  %v3445_v22 = vmul.f32 %v9938_v23, %v3406_v61 }
 0x30e   : > { %v3549_v44 = vmin.f32 %v9952_v51, 0.0  ;;  %v9961_v52 = vadd.f32 %v9944_v26, %v3447_v63  ;;  %vm3517_vm8 = vcmp.gt.f32.partialorder %v9952_v51, 0.0 }
 0x30f   : > { %v3547_v53 = vmin.f32 %v9956_v38, 0.0  ;;  %v9965_v34 = vadd.f32 %v9944_v26, %v3445_v22  ;;  %v7788_v41 = vpop.f32.mrb[4].mxu0  ;;  %vm3515_vm9 = vcmp.gt.f32.partialorder %v9956_v38, 0.0 }
 0x310   : > { %v3583_v42 = vmul.f32 1.442695, %v3549_v44  ;;  %v3550_v37 = vmin.f32 %v9961_v52, 0.0  ;;  %v3411_v47 = vadd.f32 %v7788_v41, %v9933_v33  ;;  %v3255_v59 = vpop.f32.mrb[5].mxu0  ;;  %vm3518_vm10 = vcmp.gt.f32.partialorder %v9961_v52, 0.0 }
 0x311   : > { %v3579_v62 = vmul.f32 1.442695, %v3547_v53  ;;  %v3548_v15 = vmin.f32 %v9965_v34, 0.0  ;;  %v3409_v11 = vadd.f32 %v9933_v33, %v3255_v59  ;;  %v7789_v29 = vpop.f32.mrb[6].mxu0  ;;  %vm3516_vm11 = vcmp.gt.f32.partialorder %v9965_v34, 0.0 }
 0x312   : > { %8825 = vpow2.f32 %v3583_v42  ;;  %v3585_v32 = vmul.f32 1.442695, %v3550_v37  ;;  %v3450_v2 = vmul.f32 %v9938_v23, %v3411_v47  ;;  %v3412_v45 = vadd.f32 %v7789_v29, %v9933_v33  ;;  %v3258_v49 = vpop.f32.mrb[7].mxu0 }
 0x313   : > { %8827 = vpow2.f32 %v3579_v62  ;;  %v3581_v24 = vmul.f32 1.442695, %v3548_v15  ;;  %v3448_v1 = vmul.f32 %v9938_v23, %v3409_v11  ;;  %v3410_v54 = vadd.f32 %v9933_v33, %v3258_v49 }
 0x314   : > { %8829 = vpow2.f32 %v3585_v32  ;;  %v9976_v55 = vadd.f32 %v9944_v26, %v3450_v2  ;;  %v3451_v58 = vmul.f32 %v9938_v23, %v3412_v45 }
 0x315   : > { %8831 = vpow2.f32 %v3581_v24  ;;  %v9980_v25 = vadd.f32 %v9944_v26, %v3448_v1  ;;  %v3449_v6 = vmul.f32 %v9938_v23, %v3410_v54 }
 0x316   : > { %v3553_v4 = vmin.f32 %v9976_v55, 0.0  ;;  %v9985_v21 = vadd.f32 %v9944_v26, %v3451_v58  ;;  %vm3521_vm12 = vcmp.gt.f32.partialorder %v9976_v55, 0.0 }
 0x317   : > { %v3551_v3 = vmin.f32 %v9980_v25, 0.0  ;;  %v9989_v5 = vadd.f32 %v9944_v26, %v3449_v6  ;;  %v7792_v17 = vpop.f32.mrb[8].mxu0  ;;  %vm3519_vm13 = vcmp.gt.f32.partialorder %v9980_v25, 0.0 }
 0x318   : > { %v3591_v12 = vmul.f32 1.442695, %v3553_v4  ;;  %v3554_v31 = vmin.f32 %v9985_v21, 0.0  ;;  %v3415_v43 = vadd.f32 %v7792_v17, %v9933_v33  ;;  %v3271_v20 = vpop.f32.mrb[9].mxu0  ;;  %vm3522_vm14 = vcmp.gt.f32.partialorder %v9985_v21, 0.0 }
 0x319   : > { %v3587_v48 = vmul.f32 1.442695, %v3551_v3  ;;  %v3552_v10 = vmin.f32 %v9989_v5, 0.0  ;;  %v3413_v27 = vadd.f32 %v9933_v33, %v3271_v20  ;;  %v7793_v39 = vpop.f32.mrb[10].mxu0  ;;  %vm3520_vm15 = vcmp.gt.f32.partialorder %v9989_v5, 0.0 }
 0x31a   : > { %8833 = vpow2.f32 %v3591_v12  ;;  %v3593_v40 = vmul.f32 1.442695, %v3554_v31  ;;  %v3454_v13 = vmul.f32 %v9938_v23, %v3415_v43  ;;  %v3416_v50 = vadd.f32 %v7793_v39, %v9933_v33  ;;  %v3274_v0 = vpop.f32.mrb[11].mxu0 }
 0x31b   : > { %8835 = vpow2.f32 %v3587_v48  ;;  %v3589_v60 = vmul.f32 1.442695, %v3552_v10  ;;  %v3452_v30 = vmul.f32 %v9938_v23, %v3413_v27  ;;  %v3414_v7 = vadd.f32 %v9933_v33, %v3274_v0 }
 0x31c   : > { %v8826_v9 = vpop.eup %8825  ;;  %8837 = vpow2.f32 %v3593_v40  ;;  %v10002_v18 = vadd.f32 %v9944_v26, %v3454_v13  ;;  %v3455_v35 = vmul.f32 %v9938_v23, %v3416_v50 }
 0x31d   : > { %v8828_v16 = vpop.eup %8827  ;;  %v6981_v56 = vadd.f32 -1.0, %v8826_v9  ;;  %8839 = vpow2.f32 %v3589_v60  ;;  %v10006_v8 = vadd.f32 %v9944_v26, %v3452_v30  ;;  %v3453_v46 = vmul.f32 %v9938_v23, %v3414_v7 }
 0x31e   : > { %v8830_v57 = vpop.eup %8829  ;;  %v6979_v28 = vadd.f32 -1.0, %v8828_v16  ;;  %v3557_v36 = vmin.f32 %v10002_v18, 0.0  ;;  %v10012_v14 = vadd.f32 %v9944_v26, %v3455_v35  ;;  %vm3525_vm2 = vcmp.gt.f32.partialorder %v10002_v18, 0.0 }
 0x31f   : > { %v8832_v61 = vpop.eup %8831  ;;  %v3677_v63 = vsel %vm3517_vm8, %v9952_v51, %v6981_v56  ;;  %v6982_v22 = vadd.f32 -1.0, %v8830_v57  ;;  %v3555_v44 = vmin.f32 %v10006_v8, 0.0  ;;  %v7796_v53 = vpop.f32.mrb[12].mxu0  ;;  %v10030_v15 = vadd.f32 %v9944_v26, %v3453_v46 }
 0x320   : > { %3710 = vst.msk [vmem:[#allocation3 + $0x48] sm:$0xff] %vm434_vm6, %v3677_v63  ;;  %v3675_v41 = vsel %vm3515_vm9, %v9956_v38, %v6979_v28  ;;  %v6980_v42 = vadd.f32 -1.0, %v8832_v61  ;;  %v3599_v37 = vmul.f32 1.442695, %v3557_v36  ;;  %v3287_v47 = vpop.f32.mrb[13].mxu0  ;;  %v3558_v62 = vmin.f32 %v10012_v14, 0.0 }
 0x321   : > { %3708 = vst.msk [vmem:[#allocation3 + $0x28] sm:$0xff] %vm434_vm6, %v3675_v41  ;;  %v3678_v51 = vsel %vm3518_vm10, %v9961_v52, %v6982_v22  ;;  %v3595_v59 = vmul.f32 1.442695, %v3555_v44  ;;  %v7797_v11 = vpop.f32.mrb[14].mxu0  ;;  %v3419_v29 = vadd.f32 %v7796_v53, %v9933_v33  ;;  %v3417_v32 = vadd.f32 %v9933_v33, %v3287_v47 }
 0x322   : > { %3711 = vst.msk [vmem:[#allocation3 + $0x50] sm:$0xff] %vm434_vm6, %v3678_v51  ;;  %v3676_v38 = vsel %vm3516_vm11, %v9965_v34, %v6980_v42  ;;  %8841 = vpow2.f32 %v3599_v37  ;;  %v3290_v2 = vpop.f32.mrb[15].mxu0  ;;  %v3601_v52 = vmul.f32 1.442695, %v3558_v62  ;;  %v3556_v45 = vmin.f32 %v10030_v15, 0.0 }
 0x323   : > { %3709 = vst.msk [vmem:[#allocation3 + $0x30] sm:$0xff] %vm434_vm6, %v3676_v38  ;;  %8843 = vpow2.f32 %v3595_v59  ;;  %v3458_v24 = vmul.f32 %v9938_v23, %v3419_v29  ;;  %v3456_v1 = vmul.f32 %v9938_v23, %v3417_v32  ;;  %v3420_v34 = vadd.f32 %v7797_v11, %v9933_v33 }
 0x324   : > { %v8834_v49 = vpop.eup %8833  ;;  %v3418_v54 = vadd.f32 %v9933_v33, %v3290_v2  ;;  %8845 = vpow2.f32 %v3601_v52  ;;  %v3597_v4 = vmul.f32 1.442695, %v3556_v45  ;;  %vm3523_vm3 = vcmp.gt.f32.partialorder %v10006_v8, 0.0 }
 0x325   : > { %v8836_v58 = vpop.eup %8835  ;;  %v6985_v6 = vadd.f32 -1.0, %v8834_v49  ;;  %v10047_v12 = vadd.f32 %v9944_v26, %v3458_v24  ;;  %v10050_v31 = vadd.f32 %v9944_v26, %v3456_v1  ;;  %v3459_v43 = vmul.f32 %v9938_v23, %v3420_v34 }
 0x326   : > { %v8838_v3 = vpop.eup %8837  ;;  %v6983_v17 = vadd.f32 -1.0, %v8836_v58  ;;  %8847 = vpow2.f32 %v3597_v4  ;;  %v3457_v27 = vmul.f32 %v9938_v23, %v3418_v54  ;;  %vm3526_vm4 = vcmp.gt.f32.partialorder %v10012_v14, 0.0 }
 0x327   : > { %v8840_v20 = vpop.eup %8839  ;;  %v3681_v48 = vsel %vm3521_vm12, %v9976_v55, %v6985_v6  ;;  %v6986_v10 = vadd.f32 -1.0, %v8838_v3  ;;  %v7800_v39 = vpop.f32.mrb[16].mxu0  ;;  %v3561_v50 = vmin.f32 %v10047_v12, 0.0  ;;  %v3559_v60 = vmin.f32 %v10050_v31, 0.0  ;;  %v3793_v4 = vld [vmem:[#allocation3 + $0x48] sm:$0xff] }
 0x328   : > { %3714 = vst.msk [vmem:[#allocation3 + $0x88] sm:$0xff] %vm434_vm6, %v3681_v48  ;;  %v3679_v40 = vsel %vm3519_vm13, %v9980_v25, %v6983_v17  ;;  %v6984_v13 = vadd.f32 -1.0, %v8840_v20  ;;  %v3303_v0 = vpop.f32.mrb[17].mxu0  ;;  %v10070_v30 = vadd.f32 %v9944_v26, %v3459_v43  ;;  %v10075_v35 = vadd.f32 %v9944_v26, %v3457_v27  ;;  %v3791_v1 = vld [vmem:[#allocation3 + $0x28] sm:$0xff] }
 0x329   : > { %3712 = vst.msk [vmem:[#allocation3 + $0x68] sm:$0xff] %vm434_vm6, %v3679_v40  ;;  %v3682_v55 = vsel %vm3522_vm14, %v9985_v21, %v6986_v10  ;;  %v7801_v25 = vpop.f32.mrb[18].mxu0  ;;  %v3607_v9 = vmul.f32 1.442695, %v3561_v50  ;;  %v3423_v16 = vadd.f32 %v7800_v39, %v9933_v33  ;;  %v3603_v21 = vmul.f32 1.442695, %v3559_v60 }
 0x32a   : > { %3715 = vst.msk [vmem:[#allocation3 + $0x90] sm:$0xff] %vm434_vm6, %v3682_v55  ;;  %v3680_v7 = vsel %vm3520_vm15, %v9989_v5, %v6984_v13  ;;  %v3306_v56 = vpop.f32.mrb[19].mxu0  ;;  %v3562_v46 = vmin.f32 %v10070_v30, 0.0  ;;  %v3421_v57 = vadd.f32 %v9933_v33, %v3303_v0  ;;  %v3560_v5 = vmin.f32 %v10075_v35, 0.0  ;;  %v3792_v11 = vld [vmem:[#allocation3 + $0x30] sm:$0xff] }
 0x32b   : > { %3713 = vst.msk [vmem:[#allocation3 + $0x70] sm:$0xff] %vm434_vm6, %v3680_v7  ;;  %8849 = vpow2.f32 %v3607_v9  ;;  %v3462_v36 = vmul.f32 %v9938_v23, %v3423_v16  ;;  %v3424_v37 = vadd.f32 %v7801_v25, %v9933_v33  ;;  %v3422_v62 = vadd.f32 %v9933_v33, %v3306_v56  ;;  %v3794_v2 = vld [vmem:[#allocation3 + $0x50] sm:$0xff] }
 0x32c   : > { %v8842_v28 = vpop.eup %8841  ;;  %8851 = vpow2.f32 %v3603_v21  ;;  %v3609_v22 = vmul.f32 1.442695, %v3562_v46  ;;  %v3460_v44 = vmul.f32 %v9938_v23, %v3421_v57  ;;  %v3605_v41 = vmul.f32 1.442695, %v3560_v5 }
 0x32d   : > { %v8844_v61 = vpop.eup %8843  ;;  %v6989_v63 = vadd.f32 -1.0, %v8842_v28  ;;  %v10087_v42 = vadd.f32 %v9944_v26, %v3462_v36  ;;  %vm3524_vm5 = vcmp.gt.f32.partialorder %v10030_v15, 0.0  ;;  %vm3529_vm8 = vcmp.gt.f32.partialorder %v10047_v12, 0.0 }
 0x32e   : > { %v6987_v53 = vadd.f32 -1.0, %v8844_v61  ;;  %v8846_v47 = vpop.eup %8845  ;;  %8853 = vpow2.f32 %v3609_v22  ;;  %v10094_v59 = vadd.f32 %v9944_v26, %v3460_v44  ;;  %v3463_v24 = vmul.f32 %v9938_v23, %v3424_v37 }
 0x32f   : > { %v3685_v51 = vsel %vm3525_vm2, %v10002_v18, %v6989_v63  ;;  %v7804_v38 = vpop.f32.mrb[20].mxu0  ;;  %v6990_v32 = vadd.f32 -1.0, %v8846_v47  ;;  %8855 = vpow2.f32 %v3605_v41  ;;  %v3565_v45 = vmin.f32 %v10087_v42, 0.0 }
 0x330   : > { %3718 = vst.msk [vmem:[#allocation3 + $0xc8] sm:$0xff] %vm434_vm6, %v3685_v51  ;;  %v3683_v29 = vsel %vm3523_vm3, %v10006_v8, %v6987_v53  ;;  %v3319_v18 = vpop.f32.mrb[21].mxu0  ;;  %v8848_v52 = vpop.eup %8847  ;;  %v3563_v49 = vmin.f32 %v10094_v59, 0.0  ;;  %v3461_v58 = vmul.f32 %v9938_v23, %v3422_v62  ;;  %v10111_v6 = vpack.c.bf16 %v3792_v11, %v3791_v1 }
 0x331   : > { %3716 = vst.msk [vmem:[#allocation3 + $0xa8] sm:$0xff] %vm434_vm6, %v3683_v29  ;;  %v7805_v34 = vpop.f32.mrb[22].mxu0  ;;  %v3686_v8 = vsel %vm3526_vm4, %v10012_v14, %v6990_v32  ;;  %v6988_v54 = vadd.f32 -1.0, %v8848_v52  ;;  %v3615_v17 = vmul.f32 1.442695, %v3565_v45  ;;  %v10115_v20 = vadd.f32 %v9944_v26, %v3463_v24  ;;  %v3798_v11 = vld [vmem:[#allocation3 + $0x90] sm:$0xff] }
 0x332   : > { %v3322_v3 = vpop.f32.mrb[23].mxu0  ;;  %3719 = vst.msk [vmem:[#allocation3 + $0xd0] sm:$0xff] %vm434_vm6, %v3686_v8  ;;  %v3611_v43 = vmul.f32 1.442695, %v3563_v49  ;;  %v10117_v48 = vpack.c.bf16 %v3794_v2, %v3793_v4  ;;  %v10123_v10 = vadd.f32 %v9944_v26, %v3461_v58  ;;  %7817 = vmatmul.mubr.msk.bf16.vlgmr.msra.gmra.mrb[32].mxu0 %vm434_vm6, %v10111_v6  ;;  %v3427_v27 = vadd.f32 %v7804_v38, %v9933_v33  ;;  %v3795_v32 = vld [vmem:[#allocation3 + $0x68] sm:$0xff] }
 0x333   : > { %v3684_v14 = vsel %vm3524_vm5, %v10030_v15, %v6988_v54  ;;  %v3425_v39 = vadd.f32 %v9933_v33, %v3319_v18  ;;  %vm3527_vm9 = vcmp.gt.f32.partialorder %v10050_v31, 0.0  ;;  %8857 = vpow2.f32 %v3615_v17  ;;  %v3797_v49 = vld [vmem:[#allocation3 + $0x88] sm:$0xff] }
 0x334   : > { %3717 = vst.msk [vmem:[#allocation3 + $0xb0] sm:$0xff] %vm434_vm6, %v3684_v14  ;;  %v3566_v40 = vmin.f32 %v10115_v20, 0.0  ;;  %7820 = vmatprep.mubr.msk.bf16.mxu0 %vm434_vm6, %v10117_v48  ;;  %v3428_v15 = vadd.f32 %v7805_v34, %v9933_v33  ;;  %vm3530_vm10 = vcmp.gt.f32.partialorder %v10070_v30, 0.0  ;;  %8859 = vpow2.f32 %v3611_v43 }
 0x335   : > { %v8850_v13 = vpop.eup %8849  ;;  %v3564_v50 = vmin.f32 %v10123_v10, 0.0  ;;  %v3466_v0 = vmul.f32 %v9938_v23, %v3427_v27  ;;  %v3464_v7 = vmul.f32 %v9938_v23, %v3425_v39  ;;  %v3426_v57 = vadd.f32 %v9933_v33, %v3322_v3 }
 0x336   : > { %v8852_v55 = vpop.eup %8851  ;;  %v6993_v60 = vadd.f32 -1.0, %v8850_v13  ;;  %v3617_v25 = vmul.f32 1.442695, %v3566_v40  ;;  %v3467_v9 = vmul.f32 %v9938_v23, %v3428_v15  ;;  %vm3528_vm11 = vcmp.gt.f32.partialorder %v10075_v35, 0.0 }
 0x337   : > { %v7808_v16 = vpop.f32.mrb[24].mxu0  ;;  %v6991_v56 = vadd.f32 -1.0, %v8852_v55  ;;  %v3613_v21 = vmul.f32 1.442695, %v3564_v50  ;;  %v10141_v46 = vadd.f32 %v9944_v26, %v3466_v0  ;;  %v10148_v61 = vadd.f32 %v9944_v26, %v3464_v7 }
 0x338   : > { %v3335_v28 = vpop.f32.mrb[25].mxu0  ;;  %v8854_v5 = vpop.eup %8853  ;;  %v3689_v36 = vsel %vm3529_vm8, %v10047_v12, %v6993_v60  ;;  %8861 = vpow2.f32 %v3617_v25  ;;  %v10151_v63 = vadd.f32 %v9944_v26, %v3467_v9  ;;  %v3796_v12 = vld [vmem:[#allocation3 + $0x70] sm:$0xff]  ;;  %vm3533_vm12 = vcmp.gt.f32.partialorder %v10087_v42, 0.0  ;;  %v3799_v25 = vld [vmem:[#allocation3 + $0xa8] sm:$0xff] }
 0x339   : > { %v7809_v22 = vpop.f32.mrb[26].mxu0  ;;  %v8856_v44 = vpop.eup %8855  ;;  %3722 = vst.msk [vmem:[#allocation3 + $0x108] sm:$0xff] %vm434_vm6, %v3689_v36  ;;  %v3687_v53 = vsel %vm3527_vm9, %v10050_v31, %v6991_v56  ;;  %v6994_v41 = vadd.f32 -1.0, %v8854_v5  ;;  %8863 = vpow2.f32 %v3613_v21  ;;  %v3569_v51 = vmin.f32 %v10141_v46, 0.0 }
 0x33a   : > { %v3338_v37 = vpop.f32.mrb[27].mxu0  ;;  %3720 = vst.msk [vmem:[#allocation3 + $0xe8] sm:$0xff] %vm434_vm6, %v3687_v53  ;;  %v6992_v47 = vadd.f32 -1.0, %v8856_v44  ;;  %v3567_v62 = vmin.f32 %v10148_v61, 0.0  ;;  %vm3531_vm13 = vcmp.gt.f32.partialorder %v10094_v59, 0.0  ;;  %v3570_v38 = vmin.f32 %v10151_v63, 0.0 }
 0x33b   : > { %v3690_v31 = vsel %vm3530_vm10, %v10070_v30, %v6994_v41  ;;  %v3465_v29 = vmul.f32 %v9938_v23, %v3426_v57  ;;  %v3623_v18 = vmul.f32 1.442695, %v3569_v51  ;;  %v10172_v45 = vpack.c.bf16 %v3796_v12, %v3795_v32  ;;  %v3800_v14 = vld [vmem:[#allocation3 + $0xb0] sm:$0xff] }
 0x33c   : > { %3723 = vst.msk [vmem:[#allocation3 + $0x110] sm:$0xff] %vm434_vm6, %v3690_v31  ;;  %v3688_v2 = vsel %vm3528_vm11, %v10075_v35, %v6992_v47  ;;  %v3619_v52 = vmul.f32 1.442695, %v3567_v62  ;;  %v3625_v30 = vmul.f32 1.442695, %v3570_v38  ;;  %v10178_v1 = vpack.c.bf16 %v3798_v11, %v3797_v49  ;;  %v3802_v44 = vld [vmem:[#allocation3 + $0xd0] sm:$0xff] }
 0x33d   : > { %3721 = vst.msk [vmem:[#allocation3 + $0xf0] sm:$0xff] %vm434_vm6, %v3688_v2  ;;  %v10176_v24 = vadd.f32 %v9944_v26, %v3465_v29  ;;  %v3431_v34 = vadd.f32 %v7808_v16, %v9933_v33  ;;  %v8858_v8 = vpop.eup %8857  ;;  %8865 = vpow2.f32 %v3623_v18  ;;  %7821 = vmatmul.mubr.msk.bf16.gmra.mrb[36].mxu0 %vm434_vm6, %v10172_v45  ;;  %v3429_v35 = vadd.f32 %v9933_v33, %v3335_v28  ;;  %v3801_v62 = vld [vmem:[#allocation3 + $0xc8] sm:$0xff] }
 0x33e   : > { %v3432_v54 = vadd.f32 %v7809_v22, %v9933_v33  ;;  %v3430_v58 = vadd.f32 %v9933_v33, %v3338_v37  ;;  %v8860_v3 = vpop.eup %8859  ;;  %v6997_v17 = vadd.f32 -1.0, %v8858_v8  ;;  %vm3534_vm14 = vcmp.gt.f32.partialorder %v10115_v20, 0.0  ;;  %7824 = vmatprep.mubr.msk.bf16.mxu0 %vm434_vm6, %v10178_v1 }
 0x33f   : > { %v7812_v4 = vpop.f32.mrb[28].mxu0  ;;  %8867 = vpow2.f32 %v3619_v52  ;;  %v3568_v43 = vmin.f32 %v10176_v24, 0.0  ;;  %v6995_v39 = vadd.f32 -1.0, %v8860_v3  ;;  %v3470_v40 = vmul.f32 %v9938_v23, %v3431_v34 }
 0x340   : > { %v3351_v27 = vpop.f32.mrb[29].mxu0  ;;  %8869 = vpow2.f32 %v3625_v30  ;;  %v3468_v15 = vmul.f32 %v9938_v23, %v3429_v35  ;;  %v3693_v50 = vsel %vm3533_vm12, %v10087_v42, %v6997_v17  ;;  %v3471_v55 = vmul.f32 %v9938_v23, %v3432_v54 }
 0x341   : > { %v7813_v13 = vpop.f32.mrb[30].mxu0  ;;  %v3621_v0 = vmul.f32 1.442695, %v3568_v43  ;;  %v3469_v60 = vmul.f32 %v9938_v23, %v3430_v58  ;;  %3726 = vst.msk [vmem:[#allocation3 + $0x148] sm:$0xff] %vm434_vm6, %v3693_v50  ;;  %v3691_v16 = vsel %vm3531_vm13, %v10094_v59, %v6995_v39  ;;  %v10202_v56 = vadd.f32 %v9944_v26, %v3470_v40 }
 0x342   : > { %v3354_v7 = vpop.f32.mrb[31].mxu0  ;;  %v8862_v9 = vpop.eup %8861  ;;  %v10205_v21 = vadd.f32 %v9944_v26, %v3468_v15  ;;  %v10207_v42 = vpack.c.bf16 %v3800_v14, %v3799_v25  ;;  %3724 = vst.msk [vmem:[#allocation3 + $0x128] sm:$0xff] %vm434_vm6, %v3691_v16  ;;  %v10211_v5 = vadd.f32 %v9944_v26, %v3471_v55  ;;  %vm3532_vm15 = vcmp.gt.f32.partialorder %v10123_v10, 0.0 }
 0x343   : > { %v8864_v57 = vpop.eup %8863  ;;  %v6998_v28 = vadd.f32 -1.0, %v8862_v9  ;;  %8871 = vpow2.f32 %v3621_v0  ;;  %v10214_v36 = vadd.f32 %v9944_v26, %v3469_v60  ;;  %vm3537_vm2 = vcmp.gt.f32.partialorder %v10141_v46, 0.0  ;;  %v3806_v58 = vld [vmem:[#allocation3 + $0x110] sm:$0xff]  ;;  %v3803_v0 = vld [vmem:[#allocation3 + $0xe8] sm:$0xff] }
 0x344   : > { %v6996_v59 = vadd.f32 -1.0, %v8864_v57  ;;  %v3573_v22 = vmin.f32 %v10202_v56, 0.0  ;;  %vm3535_vm3 = vcmp.gt.f32.partialorder %v10148_v61, 0.0  ;;  %v3571_v41 = vmin.f32 %v10205_v21, 0.0  ;;  %v3804_v39 = vld [vmem:[#allocation3 + $0xf0] sm:$0xff] }
 0x345   : > { %v3694_v53 = vsel %vm3534_vm14, %v10115_v20, %v6998_v28  ;;  %v3574_v12 = vmin.f32 %v10211_v5, 0.0  ;;  %vm3538_vm4 = vcmp.gt.f32.partialorder %v10151_v63, 0.0  ;;  %v3572_v51 = vmin.f32 %v10214_v36, 0.0  ;;  %7825 = vmatmul.mubr.msk.bf16.gmra.mrb[40].mxu0 %vm434_vm6, %v10207_v42 }
 0x346   : > { %3727 = vst.msk [vmem:[#allocation3 + $0x150] sm:$0xff] %vm434_vm6, %v3694_v53  ;;  %v3692_v37 = vsel %vm3532_vm15, %v10123_v10, %v6996_v59  ;;  %v3631_v47 = vmul.f32 1.442695, %v3573_v22  ;;  %v3627_v20 = vmul.f32 1.442695, %v3571_v41  ;;  %v10232_v31 = vpack.c.bf16 %v3802_v44, %v3801_v62 }
 0x347   : > { %3725 = vst.msk [vmem:[#allocation3 + $0x130] sm:$0xff] %vm434_vm6, %v3692_v37  ;;  %v3633_v11 = vmul.f32 1.442695, %v3574_v12  ;;  %v3435_v38 = vadd.f32 %v7812_v4, %v9933_v33  ;;  %v8866_v29 = vpop.eup %8865  ;;  %v3629_v10 = vmul.f32 1.442695, %v3572_v51  ;;  %v3433_v32 = vadd.f32 %v9933_v33, %v3351_v27 }
 0x348   : > { %8873 = vpow2.f32 %v3631_v47  ;;  %v3436_v2 = vadd.f32 %v7813_v13, %v9933_v33  ;;  %v7001_v52 = vadd.f32 -1.0, %v8866_v29  ;;  %7828 = vmatprep.mubr.msk.bf16.mxu0 %vm434_vm6, %v10232_v31  ;;  %v3434_v30 = vadd.f32 %v9933_v33, %v3354_v7  ;;  %v3809_v44 = vld [vmem:[#allocation3 + $0x148] sm:$0xff] }
 0x349   : > { %v8868_v18 = vpop.eup %8867  ;;  %8875 = vpow2.f32 %v3627_v20  ;;  %v3474_v49 = vmul.f32 %v9938_v23, %v3435_v38  ;;  %v3472_v35 = vmul.f32 %v9938_v23, %v3433_v32  ;;  %vm3536_vm5 = vcmp.gt.f32.partialorder %v10176_v24, 0.0  ;;  %v3807_v16 = vld [vmem:[#allocation3 + $0x128] sm:$0xff] }
 0x34a   : > { %v8870_v34 = vpop.eup %8869  ;;  %v6999_v8 = vadd.f32 -1.0, %v8868_v18  ;;  %8877 = vpow2.f32 %v3633_v11  ;;  %v3475_v54 = vmul.f32 %v9938_v23, %v3436_v2  ;;  %v3697_v4 = vsel %vm3537_vm2, %v10141_v46, %v7001_v52  ;;  %v3805_v46 = vld [vmem:[#allocation3 + $0x108] sm:$0xff] }
 0x34b   : > { %v7002_v3 = vadd.f32 -1.0, %v8870_v34  ;;  %8879 = vpow2.f32 %v3629_v10  ;;  %v10247_v17 = vadd.f32 %v9944_v26, %v3474_v49  ;;  %3730 = vst.msk [vmem:[#allocation3 + $0x188] sm:$0xff] %vm434_vm6, %v3697_v4  ;;  %v10254_v43 = vadd.f32 %v9944_v26, %v3472_v35 }
 0x34c   : > { %v3695_v33 = vsel %vm3535_vm3, %v10148_v61, %v6999_v8  ;;  %v10257_v14 = vadd.f32 %v9944_v26, %v3475_v54  ;;  %v3473_v27 = vmul.f32 %v9938_v23, %v3434_v30  ;;  %v10265_v61 = vpack.c.bf16 %v3806_v58, %v3805_v46 }
 0x34d   : > { %v8872_v40 = vpop.eup %8871  ;;  %3728 = vst.msk [vmem:[#allocation3 + $0x168] sm:$0xff] %vm434_vm6, %v3695_v33  ;;  %v3698_v15 = vsel %vm3538_vm4, %v10151_v63, %v7002_v3  ;;  %v3577_v13 = vmin.f32 %v10247_v17, 0.0  ;;  %v3575_v23 = vmin.f32 %v10254_v43, 0.0  ;;  %v3810_v60 = vld [vmem:[#allocation3 + $0x150] sm:$0xff]  ;;  %v10276_v63 = vpack.c.bf16 %v3804_v39, %v3803_v0 }
 0x34e   : > { %3731 = vst.msk [vmem:[#allocation3 + $0x190] sm:$0xff] %vm434_vm6, %v3698_v15  ;;  %v7000_v50 = vadd.f32 -1.0, %v8872_v40  ;;  %v3808_v55 = vld [vmem:[#allocation3 + $0x130] sm:$0xff]  ;;  %v3578_v7 = vmin.f32 %v10257_v14, 0.0  ;;  %v10272_v9 = vadd.f32 %v9944_v26, %v3473_v27  ;;  %7832 = vmatprep.mubr.msk.bf16.mxu1 %vm434_vm6, %v10265_v61  ;;  %v4101_v22 = vsel %vm3887_vm7, %v9926_v19, 0 }
 0x34f   : > { %v3639_v25 = vmul.f32 1.442695, %v3577_v13  ;;  %v3635_v28 = vmul.f32 1.442695, %v3575_v23  ;;  %v10279_v59 = vpack.c.bf16 %v3808_v55, %v3807_v16  ;;  %7829 = vmatmul.mubr.msk.bf16.gmra.mrb[44].mxu0 %vm434_vm6, %v10276_v63  ;;  %v10287_v41 = vpack.c.bf16 %v3810_v60, %v3809_v44  ;;  %v10354_v44 = vld [vmem:[%s10948_s7 + $0xc] sm:$0xf] }
 0x350   : > { %v3696_v57 = vsel %vm3536_vm5, %v10176_v24, %v7000_v50  ;;  %v3641_v26 = vmul.f32 1.442695, %v3578_v7  ;;  %v3576_v53 = vmin.f32 %v10272_v9, 0.0  ;;  %v10292_v24 = vld [vmem:[%s10948_s7 + $0x8] sm:$0xf]  ;;  %vm3541_vm8 = vcmp.gt.f32.partialorder %v10202_v56, 0.0 }
 0x351   : > { %3729 = vst.msk [vmem:[#allocation3 + $0x170] sm:$0xff] %vm434_vm6, %v3696_v57  ;;  %8881 = vpow2.f32 %v3639_v25  ;;  %7833 = vmatmul.mubr.msk.bf16.vlgmr.msra.gmra.mrb[0].mxu1 %vm434_vm6, %v10279_v59  ;;  %vm3539_vm9 = vcmp.gt.f32.partialorder %v10205_v21, 0.0  ;;  %vm3542_vm10 = vcmp.gt.f32.partialorder %v10211_v5, 0.0  ;;  %vm3540_vm11 = vcmp.gt.f32.partialorder %v10214_v36, 0.0  ;;  %v3741_v50 = vld [vmem:[#allocation3 + $0xf] sm:$0xff] }
 0x352   : > { %v8874_v12 = vpop.eup %8873  ;;  %8883 = vpow2.f32 %v3635_v28  ;;  %v3637_v47 = vmul.f32 1.442695, %v3576_v53  ;;  %7849 = vmatpush3.bf16.msra.mxu1 %v4101_v22  ;;  %7836 = vmatprep.mubr.msk.bf16.mxu1 %vm434_vm6, %v10287_v41  ;;  %vm3545_vm12 = vcmp.gt.f32.partialorder %v10247_v17, 0.0  ;;  %vm3543_vm13 = vcmp.gt.f32.partialorder %v10254_v43, 0.0  ;;  %v3743_v25 = vld [vmem:[#allocation3 + $0x2f] sm:$0xff]  ;;  %v3744_v28 = vld [vmem:[#allocation3 + $0x47] sm:$0xff] }
 0x353   : > { %v8876_v19 = vpop.eup %8875  ;;  %v7005_v37 = vadd.f32 -1.0, %v8874_v12  ;;  %8885 = vpow2.f32 %v3641_v26  ;;  %8744 = vmatprep.subr.msk.bf16.mxu1 %vm3887_vm7, %v10292_v24  ;;  %vm3546_vm14 = vcmp.gt.f32.partialorder %v10257_v14, 0.0  ;;  %vm3544_vm15 = vcmp.gt.f32.partialorder %v10272_v9, 0.0  ;;  %v3745_v7 = vld [vmem:[#allocation3 + $0x4f] sm:$0xff] }
 0x354   : > { %v8878_v51 = vpop.eup %8877  ;;  %v7003_v62 = vadd.f32 -1.0, %v8876_v19  ;;  %8887 = vpow2.f32 %v3637_v47  ;;  %v3811_v18 = vld [vmem:[#allocation3 + $0x168] sm:$0xff]  ;;  %v4363_v57 = vsel %vm3887_vm7, %v10292_v24, 0  ;;  %v10349_v22 = vpack.c.bf16 %v3745_v7, %v3744_v28  ;;  %v4269_v28 = vld [vmem:[#allocation3 + $0x51] sm:$0xff] }
 0x355   : > { %v8880_v20 = vpop.eup %8879  ;;  %v3701_v11 = vsel %vm3541_vm8, %v10202_v56, %v7005_v37  ;;  %v7006_v38 = vadd.f32 -1.0, %v8878_v51  ;;  %v3814_v2 = vld [vmem:[#allocation3 + $0x190] sm:$0xff]  ;;  %v3746_v24 = vld [vmem:[#allocation3 + $0x67] sm:$0xff] }
 0x356   : > { %3734 = vst.msk [vmem:[#allocation3 + $0x1c8] sm:$0xff] %vm434_vm6, %v3701_v11  ;;  %v3699_v29 = vsel %vm3539_vm9, %v10205_v21, %v7003_v62  ;;  %v7004_v10 = vadd.f32 -1.0, %v8880_v20  ;;  %v3813_v21 = vld [vmem:[#allocation3 + $0x188] sm:$0xff] }
 0x357   : > { %3732 = vst.msk [vmem:[#allocation3 + $0x1a8] sm:$0xff] %vm434_vm6, %v3699_v29  ;;  %v3702_v32 = vsel %vm3542_vm10, %v10211_v5, %v7006_v38  ;;  %v10314_v30 = vpack.c.bf16 %v3814_v2, %v3813_v21  ;;  %v3747_v26 = vld [vmem:[#allocation3 + $0x6f] sm:$0xff]  ;;  %v3748_v19 = vld [vmem:[#allocation3 + $0x87] sm:$0xff] }
 0x358   : > { %3735 = vst.msk [vmem:[#allocation3 + $0x1d0] sm:$0xff] %vm434_vm6, %v3702_v32  ;;  %v3700_v56 = vsel %vm3540_vm11, %v10214_v36, %v7004_v10  ;;  %v3812_v52 = vld [vmem:[#allocation3 + $0x170] sm:$0xff]  ;;  %v10362_v12 = vpack.c.bf16 %v3747_v26, %v3746_v24  ;;  %v3750_v62 = vld [vmem:[#allocation3 + $0xa7] sm:$0xff] }
 0x359   : > { %3733 = vst.msk [vmem:[#allocation3 + $0x1b0] sm:$0xff] %vm434_vm6, %v3700_v56  ;;  %v10312_v49 = vpack.c.bf16 %v3812_v52, %v3811_v18  ;;  %v3749_v53 = vld [vmem:[#allocation3 + $0x8f] sm:$0xff]  ;;  %v3752_v11 = vld [vmem:[#allocation3 + $0xc7] sm:$0xff] }
 0x35a   : > { %v10364_v37 = vpack.c.bf16 %v3749_v53, %v3748_v19  ;;  %v3751_v47 = vld [vmem:[#allocation3 + $0xaf] sm:$0xff]  ;;  %v3754_v32 = vld [vmem:[#allocation3 + $0xe7] sm:$0xff]  ;;  %v4657_v53 = vsel %vm3887_vm7, %v10354_v44, 0 }
 0x35b   : > { %v8882_v34 = vpop.eup %8881  ;;  %7837 = vmatmul.mubr.msk.bf16.gmra.mrb[4].mxu1 %vm434_vm6, %v10312_v49  ;;  %v3753_v51 = vld [vmem:[#allocation3 + $0xcf] sm:$0xff]  ;;  %v10370_v20 = vpack.c.bf16 %v3751_v47, %v3750_v62  ;;  %v3756_v56 = vld [vmem:[#allocation3 + $0x107] sm:$0xff] }
 0x35c   : > { %v8884_v5 = vpop.eup %8883  ;;  %v7009_v8 = vadd.f32 -1.0, %v8882_v34  ;;  %7840 = vmatprep.mubr.msk.bf16.mxu1 %vm434_vm6, %v10314_v30  ;;  %v10372_v38 = vpack.c.bf16 %v3753_v51, %v3752_v11  ;;  %v3755_v29 = vld [vmem:[#allocation3 + $0xef] sm:$0xff]  ;;  %v3758_v34 = vld [vmem:[#allocation3 + $0x127] sm:$0xff] }
 0x35d   : > { %v8886_v35 = vpop.eup %8885  ;;  %v7007_v36 = vadd.f32 -1.0, %v8884_v5  ;;  %v3817_v15 = vld [vmem:[#allocation3 + $0x1c8] sm:$0xff]  ;;  %v10378_v2 = vpack.c.bf16 %v3755_v29, %v3754_v32  ;;  %v7078_v19 = vld [vmem:[%s10948_s7 + $0x10] sm:$0xf] }
 0x35e   : > { %v3705_v54 = vsel %vm3545_vm12, %v10247_v17, %v7009_v8  ;;  %v7010_v58 = vadd.f32 -1.0, %v8886_v35  ;;  %v8888_v4 = vpop.eup %8887  ;;  %v3815_v39 = vld [vmem:[#allocation3 + $0x1a8] sm:$0xff]  ;;  %v4271_v51 = vld [vmem:[#allocation3 + $0x71] sm:$0xff] }
 0x35f   : > { %3738 = vst.msk [vmem:[#allocation3 + $0x208] sm:$0xff] %vm434_vm6, %v3705_v54  ;;  %v3703_v3 = vsel %vm3543_vm13, %v10254_v43, %v7007_v36  ;;  %v3818_v33 = vld [vmem:[#allocation3 + $0x1d0] sm:$0xff]  ;;  %v7008_v46 = vadd.f32 -1.0, %v8888_v4  ;;  %v3760_v8 = vld [vmem:[#allocation3 + $0x147] sm:$0xff] }
 0x360   : > { %3736 = vst.msk [vmem:[#allocation3 + $0x1e8] sm:$0xff] %vm434_vm6, %v3703_v3  ;;  %v3706_v27 = vsel %vm3546_vm14, %v10257_v14, %v7010_v58  ;;  %v3816_v40 = vld [vmem:[#allocation3 + $0x1b0] sm:$0xff]  ;;  %v10333_v43 = vpack.c.bf16 %v3818_v33, %v3817_v15  ;;  %v3740_v14 = vld [vmem:[#allocation3 + $0x7] sm:$0xff] }
 0x361   : > { %3739 = vst.msk [vmem:[#allocation3 + $0x210] sm:$0xff] %vm434_vm6, %v3706_v27  ;;  %v10330_v17 = vpack.c.bf16 %v3816_v40, %v3815_v39  ;;  %v3704_v13 = vsel %vm3544_vm15, %v10272_v9, %v7008_v46  ;;  %v3772_v55 = vpack.c.bf16 %v3741_v50, %v3740_v14  ;;  %v3742_v9 = vld [vmem:[#allocation3 + $0x27] sm:$0xff]  ;;  %v3757_v10 = vld [vmem:[#allocation3 + $0x10f] sm:$0xff] }
 0x362   : > { %3737 = vst.msk [vmem:[#allocation3 + $0x1f0] sm:$0xff] %vm434_vm6, %v3704_v13  ;;  %v10345_v16 = vpack.c.bf16 %v3743_v25, %v3742_v9  ;;  %v10380_v18 = vpack.c.bf16 %v3757_v10, %v3756_v56  ;;  %v3759_v52 = vld [vmem:[#allocation3 + $0x12f] sm:$0xff]  ;;  %v3762_v58 = vld [vmem:[#allocation3 + $0x167] sm:$0xff] }
 0x363   : > { %7841 = vmatmul.mubr.msk.bf16.gmra.mrb[8].mxu1 %vm434_vm6, %v10330_v17  ;;  %v3761_v21 = vld [vmem:[#allocation3 + $0x14f] sm:$0xff]  ;;  %v10386_v5 = vpack.c.bf16 %v3759_v52, %v3758_v34  ;;  %v3764_v3 = vld [vmem:[#allocation3 + $0x187] sm:$0xff] }
 0x364   : > { %7844 = vmatprep.mubr.msk.bf16.mxu1 %vm434_vm6, %v10333_v43  ;;  %v10388_v35 = vpack.c.bf16 %v3761_v21, %v3760_v8  ;;  %v3763_v36 = vld [vmem:[#allocation3 + $0x16f] sm:$0xff]  ;;  %v3766_v39 = vld [vmem:[#allocation3 + $0x1a7] sm:$0xff] }
 0x365   : > { %v3765_v54 = vld [vmem:[#allocation3 + $0x18f] sm:$0xff]  ;;  %v10394_v4 = vpack.c.bf16 %v3763_v36, %v3762_v58  ;;  %v3768_v15 = vld [vmem:[#allocation3 + $0x1c7] sm:$0xff] }
 0x366   : > { %v10396_v33 = vpack.c.bf16 %v3765_v54, %v3764_v3  ;;  %v3767_v27 = vld [vmem:[#allocation3 + $0x1af] sm:$0xff] }
 0x367   : > { %v3819_v23 = vld [vmem:[#allocation3 + $0x1e8] sm:$0xff]  ;;  %v10402_v40 = vpack.c.bf16 %v3767_v27, %v3766_v39  ;;  %v4265_v50 = vld [vmem:[#allocation3 + $0x11] sm:$0xff] }
 0x368   : > { %v3769_v46 = vld [vmem:[#allocation3 + $0x1cf] sm:$0xff] }
 0x369   : > { %v3820_v0 = vld [vmem:[#allocation3 + $0x1f0] sm:$0xff]  ;;  %v10404_v13 = vpack.c.bf16 %v3769_v46, %v3768_v15 }
 0x36a   : > { %v10340_v60 = vpack.c.bf16 %v3820_v0, %v3819_v23  ;;  %v4264_v14 = vld [vmem:[#allocation3 + $0x9] sm:$0xff]  ;;  %v4267_v9 = vld [vmem:[#allocation3 + $0x31] sm:$0xff] }
 0x36b   : > { %v3771_v23 = vld [vmem:[#allocation3 + $0x1ef] sm:$0xff]  ;;  %v3770_v0 = vld [vmem:[#allocation3 + $0x1e7] sm:$0xff] }
 0x36c   : > { %7845 = vmatmul.mubr.msk.bf16.gmra.mrb[12].mxu1 %vm434_vm6, %v10340_v60  ;;  %v10410_v25 = vpack.c.bf16 %v3771_v23, %v3770_v0  ;;  %v4266_v7 = vld [vmem:[#allocation3 + $0x29] sm:$0xff]  ;;  %v4273_v11 = vld [vmem:[#allocation3 + $0x91] sm:$0xff] }
 0x36d   : > { %7850 = vmatprep.mubr.msk.bf16.mxu1 %vm434_vm6, %v3772_v55  ;;  %v4296_v55 = vpack.c.bf16 %v4265_v50, %v4264_v14  ;;  %v10415_v26 = vpack.c.bf16 %v4267_v9, %v4266_v7  ;;  %v4270_v47 = vld [vmem:[#allocation3 + $0x69] sm:$0xff]  ;;  %v4275_v32 = vld [vmem:[#allocation3 + $0xb1] sm:$0xff] }
 0x36e   : > { %v4272_v62 = vld [vmem:[#allocation3 + $0x89] sm:$0xff]  ;;  %v4277_v52 = vld [vmem:[#allocation3 + $0xd1] sm:$0xff] }
 0x36f   : > { %v10431_v29 = vpack.c.bf16 %v4273_v11, %v4272_v62  ;;  %v4274_v10 = vld [vmem:[#allocation3 + $0xa9] sm:$0xff]  ;;  %v4279_v36 = vld [vmem:[#allocation3 + $0xf1] sm:$0xff] }
 0x370   : > { %v4276_v56 = vld [vmem:[#allocation3 + $0xc9] sm:$0xff]  ;;  %v10437_v21 = vpack.c.bf16 %v4275_v32, %v4274_v10  ;;  %v4281_v58 = vld [vmem:[#allocation3 + $0x111] sm:$0xff] }
 0x371   : > { %v10439_v34 = vpack.c.bf16 %v4277_v52, %v4276_v56  ;;  %v4278_v8 = vld [vmem:[#allocation3 + $0xe9] sm:$0xff]  ;;  %v4283_v39 = vld [vmem:[#allocation3 + $0x131] sm:$0xff] }
 0x372   : > { %v4280_v54 = vld [vmem:[#allocation3 + $0x109] sm:$0xff]  ;;  %v10445_v3 = vpack.c.bf16 %v4279_v36, %v4278_v8  ;;  %v4285_v14 = vld [vmem:[#allocation3 + $0x151] sm:$0xff]  ;;  %v4951_v8 = vsel %vm3887_vm7, %v7078_v19, 0 }
 0x373   : > { %v10447_v27 = vpack.c.bf16 %v4281_v58, %v4280_v54  ;;  %v4282_v46 = vld [vmem:[#allocation3 + $0x129] sm:$0xff]  ;;  %v4289_v9 = vld [vmem:[#allocation3 + $0x191] sm:$0xff] }
 0x374   : > { %7851 = vmatmul.mubr.msk.bf16.vlgmr.msra.gmra.mrb[16].mxu1 %vm434_vm6, %v10345_v16  ;;  %v4284_v15 = vld [vmem:[#allocation3 + $0x149] sm:$0xff]  ;;  %v10453_v50 = vpack.c.bf16 %v4283_v39, %v4282_v46  ;;  %v4293_v62 = vld [vmem:[#allocation3 + $0x1d1] sm:$0xff] }
 0x375   : > { %7883 = vmatpush3.bf16.msra.mxu1 %v4363_v57  ;;  %7854 = vmatprep.mubr.msk.bf16.mxu1 %vm434_vm6, %v10349_v22  ;;  %v4268_v57 = vld [vmem:[#allocation3 + $0x49] sm:$0xff]  ;;  %v10455_v23 = vpack.c.bf16 %v4285_v14, %v4284_v15  ;;  %v4295_v56 = vld [vmem:[#allocation3 + $0x1f1] sm:$0xff] }
 0x376   : > { %8745 = vmatprep.subr.msk.bf16.mxu1 %vm3887_vm7, %v10354_v44  ;;  %v10419_v24 = vpack.c.bf16 %v4269_v28, %v4268_v57  ;;  %v10429_v44 = vpack.c.bf16 %v4271_v51, %v4270_v47  ;;  %v4286_v0 = vld [vmem:[#allocation3 + $0x169] sm:$0xff]  ;;  %v4291_v47 = vld [vmem:[#allocation3 + $0x1b1] sm:$0xff] }
 0x377   : > { %v4288_v7 = vld [vmem:[#allocation3 + $0x189] sm:$0xff]  ;;  %v7095_v36 = vld [vmem:[%s10948_s7 + $0x14] sm:$0xf] }
 0x378   : > { %v10463_v28 = vpack.c.bf16 %v4289_v9, %v4288_v7  ;;  %v4292_v51 = vld [vmem:[#allocation3 + $0x1c9] sm:$0xff] }
 0x379   : > { %v10471_v10 = vpack.c.bf16 %v4293_v62, %v4292_v51  ;;  %v4294_v32 = vld [vmem:[#allocation3 + $0x1e9] sm:$0xff] }
 0x37a   : > { %v10477_v52 = vpack.c.bf16 %v4295_v56, %v4294_v32  ;;  %v4589_v32 = vld [vmem:[#allocation3 + $0x20f] sm:$0xff]  ;;  %v4588_v56 = vld [vmem:[#allocation3 + $0x207] sm:$0xff] }
 0x37c   : > { %7855 = vmatmul.mubr.msk.bf16.gmra.mrb[20].mxu1 %vm434_vm6, %v10362_v12 }
 0x37d   : > { %7858 = vmatprep.mubr.msk.bf16.mxu1 %vm434_vm6, %v10364_v37 }
 0x384   : > { %7859 = vmatmul.mubr.msk.bf16.gmra.mrb[24].mxu1 %vm434_vm6, %v10370_v20 }
 0x385   : > { %7862 = vmatprep.mubr.msk.bf16.mxu1 %vm434_vm6, %v10372_v38 }
 0x38c   : > { %7863 = vmatmul.mubr.msk.bf16.gmra.mrb[28].mxu1 %vm434_vm6, %v10378_v2 }
 0x38d   : > { %7866 = vmatprep.mubr.msk.bf16.mxu1 %vm434_vm6, %v10380_v18 }
 0x394   : > { %7867 = vmatmul.mubr.msk.bf16.gmra.mrb[0].mxu1 %vm434_vm6, %v10386_v5 }
 0x395   : > { %7870 = vmatprep.mubr.msk.bf16.mxu1 %vm434_vm6, %v10388_v35 }
 0x39c   : > { %7871 = vmatmul.mubr.msk.bf16.gmra.mrb[4].mxu1 %vm434_vm6, %v10394_v4 }
 0x39d   : > { %7874 = vmatprep.mubr.msk.bf16.mxu1 %vm434_vm6, %v10396_v33 }
 0x3a4   : > { %7875 = vmatmul.mubr.msk.bf16.gmra.mrb[8].mxu1 %vm434_vm6, %v10402_v40 }
 0x3a5   : > { %7878 = vmatprep.mubr.msk.bf16.mxu1 %vm434_vm6, %v10404_v13 }
 0x3ac   : > { %7879 = vmatmul.mubr.msk.bf16.gmra.mrb[12].mxu1 %vm434_vm6, %v10410_v25 }
 0x3ad   : > { %7884 = vmatprep.mubr.msk.bf16.mxu1 %vm434_vm6, %v4296_v55  ;;  %v4287_v55 = vld [vmem:[#allocation3 + $0x171] sm:$0xff] }
 0x3ae   : > { %v10461_v57 = vpack.c.bf16 %v4287_v55, %v4286_v0 }
 0x3b4   : > { %7885 = vmatmul.mubr.msk.bf16.vlgmr.msra.gmra.mrb[16].mxu1 %vm434_vm6, %v10415_v26 }
 0x3b5   : > { %7917 = vmatpush3.bf16.msra.mxu1 %v4657_v53  ;;  %7888 = vmatprep.mubr.msk.bf16.mxu1 %vm434_vm6, %v10419_v24  ;;  %v4290_v53 = vld [vmem:[#allocation3 + $0x1a9] sm:$0xff] }
 0x3b6   : > { %8746 = vmatprep.subr.msk.bf16.mxu1 %vm3887_vm7, %v7078_v19  ;;  %v10469_v11 = vpack.c.bf16 %v4291_v47, %v4290_v53 }
 0x3bc   : > { %7889 = vmatmul.mubr.msk.bf16.gmra.mrb[20].mxu1 %vm434_vm6, %v10429_v44 }
 0x3bd   : > { %7892 = vmatprep.mubr.msk.bf16.mxu1 %vm434_vm6, %v10431_v29 }
 0x3c4   : > { %7893 = vmatmul.mubr.msk.bf16.gmra.mrb[24].mxu1 %vm434_vm6, %v10437_v21 }
 0x3c5   : > { %7896 = vmatprep.mubr.msk.bf16.mxu1 %vm434_vm6, %v10439_v34 }
 0x3cc   : > { %7897 = vmatmul.mubr.msk.bf16.gmra.mrb[28].mxu1 %vm434_vm6, %v10445_v3 }
 0x3cd   : > { %7900 = vmatprep.mubr.msk.bf16.mxu1 %vm434_vm6, %v10447_v27 }
 0x3d4   : > { %7901 = vmatmul.mubr.msk.bf16.gmra.mrb[0].mxu1 %vm434_vm6, %v10453_v50 }
 0x3d5   : > { %7904 = vmatprep.mubr.msk.bf16.mxu1 %vm434_vm6, %v10455_v23 }
 0x3dc   : > { %7905 = vmatmul.mubr.msk.bf16.gmra.mrb[4].mxu1 %vm434_vm6, %v10461_v57 }
 0x3dd   : > { %7908 = vmatprep.mubr.msk.bf16.mxu1 %vm434_vm6, %v10463_v28 }
 0x3e4   : > { %7909 = vmatmul.mubr.msk.bf16.gmra.mrb[8].mxu1 %vm434_vm6, %v10469_v11 }
 0x3e5   : > { %7912 = vmatprep.mubr.msk.bf16.mxu1 %vm434_vm6, %v10471_v10 }
 0x3ec   : > { %7913 = vmatmul.mubr.msk.bf16.gmra.mrb[12].mxu1 %vm434_vm6, %v10477_v52 }
 0x3ed   : > { %7918 = vmatprep.mubr.msk.bf16.mxu1 %vm434_vm6, %v10345_v16 }
 0x3f4   : > { %7919 = vmatmul.mubr.msk.bf16.vlgmr.msra.gmra.mrb[16].mxu1 %vm434_vm6, %v10349_v22 }
 0x3f5   : > { %7951 = vmatpush3.bf16.msra.mxu1 %v4951_v8  ;;  %7922 = vmatprep.mubr.msk.bf16.mxu1 %vm434_vm6, %v10362_v12  ;;  %v10548_v8 = vpack.c.bf16 %v4589_v32, %v4588_v56  ;;  %v5742_v32 = vld [vmem:[#allocation3 + $0xb0] sm:$0xff] }
 0x3f6   : > { %8747 = vmatprep.subr.msk.bf16.mxu1 %vm3887_vm7, %v7095_v36  ;;  %v5744_v56 = vld [vmem:[#allocation3 + $0xd0] sm:$0xff] }
 0x3fc   : > { %7923 = vmatmul.mubr.msk.bf16.gmra.mrb[20].mxu1 %vm434_vm6, %v10364_v37 }
 0x3fd   : > { %7926 = vmatprep.mubr.msk.bf16.mxu1 %vm434_vm6, %v10370_v20 }
 0x404   : > { %7927 = vmatmul.mubr.msk.bf16.gmra.mrb[24].mxu1 %vm434_vm6, %v10372_v38 }
 0x405   : > { %7930 = vmatprep.mubr.msk.bf16.mxu1 %vm434_vm6, %v10378_v2  ;;  %v10500_v16 = vpop.f32.mrb[32].mxu0 }
 0x406   : > { %v10502_v19 = vpop.f32.mrb[33].mxu0 }
 0x407   : > { %v10504_v54 = vpop.f32.mrb[34].mxu0 }
 0x408   : > { %v10506_v58 = vpop.f32.mrb[35].mxu0 }
 0x40c   : > { %7931 = vmatmul.mubr.msk.bf16.gmra.mrb[28].mxu1 %vm434_vm6, %v10380_v18 }
 0x40d   : > { %7934 = vmatprep.mubr.msk.bf16.mxu1 %vm434_vm6, %v10386_v5 }
 0x410   : > { %v10512_v46 = vpop.f32.mrb[36].mxu0 }
 0x411   : > { %v10514_v39 = vpop.f32.mrb[37].mxu0 }
 0x412   : > { %v10516_v15 = vpop.f32.mrb[38].mxu0 }
 0x413   : > { %v10518_v14 = vpop.f32.mrb[39].mxu0 }
 0x414   : > { %7935 = vmatmul.mubr.msk.bf16.gmra.mrb[0].mxu1 %vm434_vm6, %v10388_v35 }
 0x415   : > { %7938 = vmatprep.mubr.msk.bf16.mxu1 %vm434_vm6, %v10394_v4 }
 0x418   : > { %v10524_v0 = vpop.f32.mrb[40].mxu0 }
 0x419   : > { %v10526_v55 = vpop.f32.mrb[41].mxu0 }
 0x41a   : > { %v10528_v7 = vpop.f32.mrb[42].mxu0 }
 0x41b   : > { %v10530_v9 = vpop.f32.mrb[43].mxu0 }
 0x41c   : > { %7939 = vmatmul.mubr.msk.bf16.gmra.mrb[4].mxu1 %vm434_vm6, %v10396_v33 }
 0x41d   : > { %7942 = vmatprep.mubr.msk.bf16.mxu1 %vm434_vm6, %v10402_v40 }
 0x422   : > { %v10536_v53 = vpop.f32.mrb[44].mxu0 }
 0x423   : > { %v10538_v47 = vpop.f32.mrb[45].mxu0 }
 0x424   : > { %10954 = vst [vmem:[#allocation4_spill] sm:$0xff] %v10538_v47  ;;  %7943 = vmatmul.mubr.msk.bf16.gmra.mrb[8].mxu1 %vm434_vm6, %v10404_v13  ;;  %v10542_v51 = vpop.f32.mrb[46].mxu0  ;;  %v5245_v47 = vsel %vm3887_vm7, %v7095_v36, 0 }
 0x425   : > { %10955 = vst [vmem:[#allocation5_spill] sm:$0xff] %v10542_v51  ;;  %7946 = vmatprep.mubr.msk.bf16.mxu1 %vm434_vm6, %v10410_v25  ;;  %v10546_v62 = vpop.f32.mrb[47].mxu0  ;;  %v7112_v51 = vld [vmem:[%s10948_s7 + $0x18] sm:$0xf] }
 0x42c   : > { %7947 = vmatmul.mubr.msk.bf16.gmra.mrb[12].mxu1 %vm434_vm6, %v10548_v8 }
 0x42d   : > { %7952 = vmatprep.mubr.msk.bf16.mxu1 %vm434_vm6, %v10111_v6  ;;  %v4883_v6 = vld [vmem:[#allocation3 + $0x210] sm:$0xff] }
 0x434   : > { %7953 = vmatmul.mubr.msk.bf16.vlgmr.msra.gmra.mrb[16].mxu1 %vm434_vm6, %v10117_v48  ;;  %v4882_v48 = vld [vmem:[#allocation3 + $0x208] sm:$0xff] }
 0x435   : > { %7985 = vmatpush3.bf16.msra.mxu1 %v5245_v47  ;;  %7956 = vmatprep.mubr.msk.bf16.mxu1 %vm434_vm6, %v10172_v45  ;;  %v10587_v45 = vpack.c.bf16 %v4883_v6, %v4882_v48  ;;  %v5743_v48 = vld [vmem:[#allocation3 + $0xc8] sm:$0xff] }
 0x436   : > { %8748 = vmatprep.subr.msk.bf16.mxu1 %vm3887_vm7, %v7112_v51 }
 0x43c   : > { %7957 = vmatmul.mubr.msk.bf16.gmra.mrb[20].mxu1 %vm434_vm6, %v10178_v1  ;;  %v5540_v1 = vsel %vm3887_vm7, %v7112_v51, 0  ;;  %v7146_v51 = vld [vmem:[%s10948_s7 + $0x20] sm:$0xf] }
 0x43d   : > { %7960 = vmatprep.mubr.msk.bf16.mxu1 %vm434_vm6, %v10207_v42  ;;  %v7129_v42 = vld [vmem:[%s10948_s7 + $0x1c] sm:$0xf] }
 0x43e   : > { %v5834_v47 = vsel %vm3887_vm7, %v7129_v42, 0 }
 0x444   : > { %7961 = vmatmul.mubr.msk.bf16.gmra.mrb[24].mxu1 %vm434_vm6, %v10232_v31  ;;  %v5176_v31 = vld [vmem:[#allocation3 + $0x209] sm:$0xff] }
 0x445   : > { %7964 = vmatprep.mubr.msk.bf16.mxu1 %vm434_vm6, %v10276_v63 }
 0x44c   : > { %7965 = vmatmul.mubr.msk.bf16.gmra.mrb[28].mxu1 %vm434_vm6, %v10265_v61 }
 0x44d   : > { %7968 = vmatprep.mubr.msk.bf16.mxu1 %vm434_vm6, %v10279_v59 }
 0x454   : > { %7969 = vmatmul.mubr.msk.bf16.gmra.mrb[0].mxu1 %vm434_vm6, %v10287_v41 }
 0x455   : > { %7972 = vmatprep.mubr.msk.bf16.mxu1 %vm434_vm6, %v10312_v49 }
 0x45c   : > { %7973 = vmatmul.mubr.msk.bf16.gmra.mrb[4].mxu1 %vm434_vm6, %v10314_v30 }
 0x45d   : > { %7976 = vmatprep.mubr.msk.bf16.mxu1 %vm434_vm6, %v10330_v17 }
 0x464   : > { %7977 = vmatmul.mubr.msk.bf16.gmra.mrb[8].mxu1 %vm434_vm6, %v10333_v43 }
 0x465   : > { %7980 = vmatprep.mubr.msk.bf16.mxu1 %vm434_vm6, %v10340_v60 }
 0x46c   : > { %7981 = vmatmul.mubr.msk.bf16.gmra.mrb[12].mxu1 %vm434_vm6, %v10587_v45 }
 0x46d   : > { %7986 = vmatprep.mubr.msk.bf16.mxu1 %vm434_vm6, %v10415_v26  ;;  %v5177_v26 = vld [vmem:[#allocation3 + $0x211] sm:$0xff] }
 0x46e   : > { %v10626_v36 = vpack.c.bf16 %v5177_v26, %v5176_v31  ;;  %v6375_v31 = vld [vmem:[%s9086_s29 + $0x68] sm:$0xff] }
 0x474   : > { %7987 = vmatmul.mubr.msk.bf16.vlgmr.msra.gmra.mrb[16].mxu1 %vm434_vm6, %v10419_v24 }
 0x475   : > { %8019 = vmatpush3.bf16.msra.mxu1 %v5540_v1  ;;  %7990 = vmatprep.mubr.msk.bf16.mxu1 %vm434_vm6, %v10429_v44  ;;  %v5771_v1 = vpack.c.bf16 %v5744_v56, %v5743_v48  ;;  %v6390_v48 = vld [vmem:[%s9086_s29 + $0xe0] sm:$0xff] }
 0x476   : > { %8749 = vmatprep.subr.msk.bf16.mxu1 %vm3887_vm7, %v7129_v42  ;;  %v6374_v42 = vld [vmem:[%s9086_s29 + $0x60] sm:$0xff] }
 0x47c   : > { %7991 = vmatmul.mubr.msk.bf16.gmra.mrb[20].mxu1 %vm434_vm6, %v10431_v29 }
 0x47d   : > { %7994 = vmatprep.mubr.msk.bf16.mxu1 %vm434_vm6, %v10437_v21 }
 0x484   : > { %7995 = vmatmul.mubr.msk.bf16.gmra.mrb[24].mxu1 %vm434_vm6, %v10439_v34 }
 0x485   : > { %7998 = vmatprep.mubr.msk.bf16.mxu1 %vm434_vm6, %v10445_v3 }
 0x48c   : > { %7999 = vmatmul.mubr.msk.bf16.gmra.mrb[28].mxu1 %vm434_vm6, %v10447_v27 }
 0x48d   : > { %8002 = vmatprep.mubr.msk.bf16.mxu1 %vm434_vm6, %v10453_v50 }
 0x494   : > { %8003 = vmatmul.mubr.msk.bf16.gmra.mrb[0].mxu1 %vm434_vm6, %v10455_v23 }
 0x495   : > { %8006 = vmatprep.mubr.msk.bf16.mxu1 %vm434_vm6, %v10461_v57 }
 0x49c   : > { %8007 = vmatmul.mubr.msk.bf16.gmra.mrb[4].mxu1 %vm434_vm6, %v10463_v28 }
 0x49d   : > { %8010 = vmatprep.mubr.msk.bf16.mxu1 %vm434_vm6, %v10469_v11 }
 0x4a4   : > { %8011 = vmatmul.mubr.msk.bf16.gmra.mrb[8].mxu1 %vm434_vm6, %v10471_v10 }
 0x4a5   : > { %8014 = vmatprep.mubr.msk.bf16.mxu1 %vm434_vm6, %v10477_v52 }
 0x4ac   : > { %8015 = vmatmul.mubr.msk.bf16.gmra.mrb[12].mxu1 %vm434_vm6, %v10626_v36 }
 0x4ad   : > { %8020 = vmatprep.mubr.msk.bf16.mxu1 %vm434_vm6, %v10349_v22  ;;  %v5471_v22 = vld [vmem:[#allocation3 + $0x227] sm:$0xff] }
 0x4b4   : > { %8021 = vmatmul.mubr.msk.bf16.vlgmr.msra.gmra.mrb[16].mxu1 %vm434_vm6, %v10362_v12  ;;  %v5472_v12 = vld [vmem:[#allocation3 + $0x22f] sm:$0xff] }
 0x4b5   : > { %8053 = vmatpush3.bf16.msra.mxu1 %v5834_v47  ;;  %8024 = vmatprep.mubr.msk.bf16.mxu1 %vm434_vm6, %v10364_v37  ;;  %v5488_v37 = vpack.c.bf16 %v5472_v12, %v5471_v22  ;;  %v6376_v47 = vld [vmem:[%s9086_s29 + $0x70] sm:$0xff]  ;;  %v6378_v22 = vld [vmem:[%s9086_s29 + $0x80] sm:$0xff]  ;;  %v6379_v12 = vld [vmem:[%s9086_s29 + $0x88] sm:$0xff] }
 0x4b6   : > { %8750 = vmatprep.subr.msk.bf16.mxu1 %vm3887_vm7, %v7146_v51 }
 0x4bc   : > { %8025 = vmatmul.mubr.msk.bf16.gmra.mrb[20].mxu1 %vm434_vm6, %v10370_v20  ;;  %v5736_v20 = vld [vmem:[#allocation3 + $0x50] sm:$0xff] }
 0x4bd   : > { %8028 = vmatprep.mubr.msk.bf16.mxu1 %vm434_vm6, %v10372_v38  ;;  %v5735_v38 = vld [vmem:[#allocation3 + $0x48] sm:$0xff] }
 0x4c4   : > { %8029 = vmatmul.mubr.msk.bf16.gmra.mrb[24].mxu1 %vm434_vm6, %v10378_v2  ;;  %v5767_v2 = vpack.c.bf16 %v5736_v20, %v5735_v38  ;;  %v6402_v20 = vpack.c.bf16 %v6379_v12, %v6378_v22  ;;  %v6380_v38 = vld [vmem:[%s9086_s29 + $0x90] sm:$0xff] }
 0x4c5   : > { %8032 = vmatprep.mubr.msk.bf16.mxu1 %vm434_vm6, %v10380_v18  ;;  %v5738_v18 = vld [vmem:[#allocation3 + $0x70] sm:$0xff] }
 0x4cc   : > { %8033 = vmatmul.mubr.msk.bf16.gmra.mrb[28].mxu1 %vm434_vm6, %v10386_v5  ;;  %v5740_v5 = vld [vmem:[#allocation3 + $0x90] sm:$0xff] }
 0x4cd   : > { %8036 = vmatprep.mubr.msk.bf16.mxu1 %vm434_vm6, %v10388_v35  ;;  %v5737_v35 = vld [vmem:[#allocation3 + $0x68] sm:$0xff] }
 0x4d4   : > { %8037 = vmatmul.mubr.msk.bf16.gmra.mrb[0].mxu1 %vm434_vm6, %v10394_v4  ;;  %v5768_v4 = vpack.c.bf16 %v5738_v18, %v5737_v35  ;;  %v6382_v18 = vld [vmem:[%s9086_s29 + $0xa0] sm:$0xff] }
 0x4d5   : > { %8040 = vmatprep.mubr.msk.bf16.mxu1 %vm434_vm6, %v10396_v33  ;;  %v6128_v33 = vsel %vm3887_vm7, %v7146_v51, 0  ;;  %v6377_v51 = vld [vmem:[%s9086_s29 + $0x78] sm:$0xff] }
 0x4dc   : > { %8041 = vmatmul.mubr.msk.bf16.gmra.mrb[4].mxu1 %vm434_vm6, %v10402_v40  ;;  %v5739_v40 = vld [vmem:[#allocation3 + $0x88] sm:$0xff] }
 0x4dd   : > { %8044 = vmatprep.mubr.msk.bf16.mxu1 %vm434_vm6, %v10404_v13  ;;  %v5769_v13 = vpack.c.bf16 %v5740_v5, %v5739_v40  ;;  %v6383_v5 = vld [vmem:[%s9086_s29 + $0xa8] sm:$0xff]  ;;  %v6385_v40 = vld [vmem:[%s9086_s29 + $0xb8] sm:$0xff] }
 0x4e4   : > { %8045 = vmatmul.mubr.msk.bf16.gmra.mrb[8].mxu1 %vm434_vm6, %v10410_v25  ;;  %v6410_v25 = vld [vmem:[%s10950_s9] sm:$0x3] }
 0x4e5   : > { %8048 = vmatprep.mubr.msk.bf16.mxu1 %vm434_vm6, %v10548_v8  ;;  %v5741_v8 = vld [vmem:[#allocation3 + $0xa8] sm:$0xff] }
 0x4e6   : > { %v5770_v6 = vpack.c.bf16 %v5742_v32, %v5741_v8  ;;  %v6388_v8 = vld [vmem:[%s9086_s29 + $0xd0] sm:$0xff] }
 0x4ec   : > { %8049 = vmatmul.mubr.msk.bf16.gmra.mrb[12].mxu1 %vm434_vm6, %v5488_v37  ;;  %v6401_v37 = vpack.c.bf16 %v6377_v51, %v6376_v47 }
 0x4ed   : > { %8054 = vmatprep.mubr.msk.bf16.mxu1 %vm434_vm6, %v5767_v2  ;;  %v6381_v2 = vld [vmem:[%s9086_s29 + $0x98] sm:$0xff] }
 0x4ee   : > { %v6403_v35 = vpack.c.bf16 %v6381_v2, %v6380_v38 }
 0x4f4   : > { %8055 = vmatmul.mubr.msk.bf16.vlgmr.msra.gmra.mrb[16].mxu1 %vm434_vm6, %v5768_v4  ;;  %v6404_v4 = vpack.c.bf16 %v6383_v5, %v6382_v18 }
 0x4f5   : > { %8087 = vmatpush3.bf16.msra.mxu1 %v6128_v33  ;;  %8058 = vmatprep.mubr.msk.bf16.mxu1 %vm434_vm6, %v5769_v13  ;;  %v6384_v33 = vld [vmem:[%s9086_s29 + $0xb0] sm:$0xff]  ;;  %v6386_v13 = vld [vmem:[%s9086_s29 + $0xc0] sm:$0xff] }
 0x4f6   : > { %8751 = vmatprep.subr.msk.bf16.mxu1 %vm962_vm0, %v6410_v25  ;;  %v6405_v32 = vpack.c.bf16 %v6385_v40, %v6384_v33 }
 0x4fc   : > { %8059 = vmatmul.mubr.msk.bf16.gmra.mrb[20].mxu1 %vm434_vm6, %v5770_v6  ;;  %v6389_v6 = vld [vmem:[%s9086_s29 + $0xd8] sm:$0xff] }
 0x4fd   : > { %8062 = vmatprep.mubr.msk.bf16.mxu1 %vm434_vm6, %v5771_v1  ;;  %v6391_v1 = vld [vmem:[%s9086_s29 + $0xe8] sm:$0xff] }
 0x504   : > { %8063 = vmatmul.mubr.msk.bf16.gmra.mrb[24].mxu1 %vm434_vm6, %v10276_v63  ;;  %v5766_v63 = vld [vmem:[#allocation3 + $0x230] sm:$0xff] }
 0x505   : > { %8066 = vmatprep.mubr.msk.bf16.mxu1 %vm434_vm6, %v10265_v61  ;;  %v5765_v61 = vld [vmem:[#allocation3 + $0x228] sm:$0xff] }
 0x50c   : > { %8067 = vmatmul.mubr.msk.bf16.gmra.mrb[28].mxu1 %vm434_vm6, %v10279_v59  ;;  %v5782_v59 = vpack.c.bf16 %v5766_v63, %v5765_v61  ;;  %v6407_v61 = vpack.c.bf16 %v6389_v6, %v6388_v8  ;;  %v6408_v63 = vpack.c.bf16 %v6391_v1, %v6390_v48  ;;  %v10957_v6 = vld [vmem:[#allocation5_spill] sm:$0xff] }
 0x50d   : > { %8070 = vmatprep.mubr.msk.bf16.mxu1 %vm434_vm6, %v10287_v41  ;;  %v6460_v41 = vsel %vm962_vm0, %v6410_v25, 0  ;;  %v6387_v25 = vld [vmem:[%s9086_s29 + $0xc8] sm:$0xff] }
 0x50e   : > { %v6406_v56 = vpack.c.bf16 %v6387_v25, %v6386_v13 }
 0x514   : > { %8071 = vmatmul.mubr.msk.bf16.gmra.mrb[0].mxu1 %vm434_vm6, %v10312_v49  ;;  %v6059_v49 = vld [vmem:[#allocation3 + $0x229] sm:$0xff] }
 0x515   : > { %8074 = vmatprep.mubr.msk.bf16.mxu1 %vm434_vm6, %v10314_v30  ;;  %v6060_v30 = vld [vmem:[#allocation3 + $0x231] sm:$0xff] }
 0x51c   : > { %8075 = vmatmul.mubr.msk.bf16.gmra.mrb[4].mxu1 %vm434_vm6, %v10330_v17  ;;  %v6362_v17 = vld [vmem:[%s9086_s29] sm:$0xff] }
 0x51d   : > { %8078 = vmatprep.mubr.msk.bf16.mxu1 %vm434_vm6, %v10333_v43  ;;  %v6363_v43 = vld [vmem:[%s9086_s29 + $0x8] sm:$0xff] }
 0x524   : > { %8079 = vmatmul.mubr.msk.bf16.gmra.mrb[8].mxu1 %vm434_vm6, %v10340_v60  ;;  %v6076_v60 = vpack.c.bf16 %v6060_v30, %v6059_v49  ;;  %v10780_v30 = vld [vmem:[%s10949_s8] ss:$0 sm:$0xff] }
 0x525   : > { %8082 = vmatprep.mubr.msk.bf16.mxu1 %vm434_vm6, %v10587_v45  ;;  %v6373_v45 = vld [vmem:[%s9086_s29 + $0x58] sm:$0xff]  ;;  %v8176_v38 = vadd.f32 %v10528_v7, %v10780_v30  ;;  %v8184_v48 = vadd.f32 %v10957_v6, %v10780_v30 }
 0x52c   : > { %8083 = vmatmul.mubr.msk.bf16.gmra.mrb[12].mxu1 %vm434_vm6, %v5782_v59  ;;  %v6392_v59 = vld [vmem:[%s9086_s29 + $0xf0] sm:$0xff] }
 0x52d   : > { %8088 = vmatprep.mubr.msk.bf16.mxu1 %vm434_vm6, %v10419_v24  ;;  %v6394_v24 = vpack.c.bf16 %v6363_v43, %v6362_v17  ;;  %v8156_v17 = vadd.f32 %v10500_v16, %v10780_v30  ;;  %v8158_v43 = vadd.f32 %v10780_v30, %v10502_v19 }
 0x534   : > { %8089 = vmatmul.mubr.msk.bf16.vlgmr.msra.gmra.mrb[16].mxu1 %vm434_vm6, %v10429_v44  ;;  %v6364_v44 = vld [vmem:[%s9086_s29 + $0x10] sm:$0xff] }
 0x535   : > { %8121 = vmatpush3.bf16.msra.mxu1 %v6460_v41  ;;  %8092 = vmatprep.mubr.msk.bf16.mxu1 %vm434_vm6, %v10431_v29  ;;  %v6365_v29 = vld [vmem:[%s9086_s29 + $0x18] sm:$0xff] }
 0x536   : > { %v6393_v41 = vld [vmem:[%s9086_s29 + $0xf8] sm:$0xff] }
 0x537   : > { %v6409_v49 = vpack.c.bf16 %v6393_v41, %v6392_v59 }
 0x53c   : > { %8093 = vmatmul.mubr.msk.bf16.gmra.mrb[20].mxu1 %vm434_vm6, %v10437_v21  ;;  %v6366_v21 = vld [vmem:[%s9086_s29 + $0x20] sm:$0xff] }
 0x53d   : > { %8096 = vmatprep.mubr.msk.bf16.mxu1 %vm434_vm6, %v10439_v34  ;;  %v6367_v34 = vld [vmem:[%s9086_s29 + $0x28] sm:$0xff] }
 0x544   : > { %8097 = vmatmul.mubr.msk.bf16.gmra.mrb[24].mxu1 %vm434_vm6, %v10445_v3  ;;  %v6395_v3 = vpack.c.bf16 %v6365_v29, %v6364_v44  ;;  %v8160_v44 = vadd.f32 %v10504_v54, %v10780_v30 }
 0x545   : > { %8100 = vmatprep.mubr.msk.bf16.mxu1 %vm434_vm6, %v10447_v27  ;;  %v6396_v27 = vpack.c.bf16 %v6367_v34, %v6366_v21  ;;  %v8162_v34 = vadd.f32 %v10780_v30, %v10506_v58 }
 0x54c   : > { %8101 = vmatmul.mubr.msk.bf16.gmra.mrb[28].mxu1 %vm434_vm6, %v10453_v50  ;;  %v6368_v50 = vld [vmem:[%s9086_s29 + $0x30] sm:$0xff] }
 0x54d   : > { %8104 = vmatprep.mubr.msk.bf16.mxu1 %vm434_vm6, %v10455_v23  ;;  %v6369_v23 = vld [vmem:[%s9086_s29 + $0x38] sm:$0xff] }
 0x554   : > { %8105 = vmatmul.mubr.msk.bf16.gmra.mrb[0].mxu1 %vm434_vm6, %v10461_v57  ;;  %v6370_v57 = vld [vmem:[%s9086_s29 + $0x40] sm:$0xff] }
 0x555   : > { %8108 = vmatprep.mubr.msk.bf16.mxu1 %vm434_vm6, %v10463_v28  ;;  %v6371_v28 = vld [vmem:[%s9086_s29 + $0x48] sm:$0xff] }
 0x55c   : > { %8109 = vmatmul.mubr.msk.bf16.gmra.mrb[4].mxu1 %vm434_vm6, %v10469_v11  ;;  %v6397_v11 = vpack.c.bf16 %v6369_v23, %v6368_v50 }
 0x55d   : > { %8112 = vmatprep.mubr.msk.bf16.mxu1 %vm434_vm6, %v10471_v10  ;;  %v6398_v10 = vpack.c.bf16 %v6371_v28, %v6370_v57  ;;  %v8164_v28 = vadd.f32 %v10512_v46, %v10780_v30  ;;  %v8170_v46 = vadd.f32 %v10780_v30, %v10518_v14  ;;  %v8172_v14 = vadd.f32 %v10524_v0, %v10780_v30 }
 0x55e   : > { %v8178_v0 = vadd.f32 %v10780_v30, %v10530_v9  ;;  %v8180_v9 = vadd.f32 %v10536_v53, %v10780_v30  ;;  %v8186_v53 = vadd.f32 %v10780_v30, %v10546_v62 }
 0x564   : > { %8113 = vmatmul.mubr.msk.bf16.gmra.mrb[8].mxu1 %vm434_vm6, %v10477_v52  ;;  %v6372_v52 = vld [vmem:[%s9086_s29 + $0x50] sm:$0xff] }
 0x565   : > { %8116 = vmatprep.mubr.msk.bf16.mxu1 %vm434_vm6, %v10626_v36  ;;  %v6399_v26 = vpack.c.bf16 %v6373_v45, %v6372_v52  ;;  %v6400_v36 = vpack.c.bf16 %v6375_v31, %v6374_v42  ;;  %v8168_v52 = vadd.f32 %v10516_v15, %v10780_v30 }
 0x56c   : > { %8117 = vmatmul.mubr.msk.bf16.gmra.mrb[12].mxu1 %vm434_vm6, %v6076_v60 }
 0x56d   : > { %8122 = vmatprep.mubr.msk.bf16.mxu1 %vm388_vm1, %v6394_v24  ;;  %v10789_v24 = vld [vmem:[%s10951_s10] ss:$0 sm:$0xff] }
 0x574   : > { %8123 = vmatmul.mubr.msk.bf16.vlgmr.msra.gmra.mrb[16].mxu1 %vm388_vm1, %v6395_v3 }
 0x575   : > { %8126 = vmatprep.mubr.msk.bf16.mxu1 %vm388_vm1, %v6396_v27 }
 0x57c   : > { %8127 = vmatmul.mubr.msk.bf16.gmra.mrb[20].mxu1 %vm388_vm1, %v6397_v11  ;;  %v8166_v11 = vadd.f32 %v10780_v30, %v10514_v39 }
 0x57d   : > { %8130 = vmatprep.mubr.msk.bf16.mxu1 %vm388_vm1, %v6398_v10 }
 0x584   : > { %8131 = vmatmul.mubr.msk.bf16.gmra.mrb[24].mxu1 %vm388_vm1, %v6399_v26 }
 0x585   : > { %8134 = vmatprep.mubr.msk.bf16.mxu1 %vm388_vm1, %v6400_v36 }
 0x58c   : > { %8135 = vmatmul.mubr.msk.bf16.gmra.mrb[28].mxu1 %vm388_vm1, %v6401_v37  ;;  %v8174_v37 = vadd.f32 %v10780_v30, %v10526_v55 }
 0x58d   : > { %8138 = vmatprep.mubr.msk.bf16.mxu1 %vm388_vm1, %v6402_v20 }
 0x594   : > { %8139 = vmatmul.mubr.msk.bf16.gmra.mrb[0].mxu1 %vm388_vm1, %v6403_v35 }
 0x595   : > { %8142 = vmatprep.mubr.msk.bf16.mxu1 %vm388_vm1, %v6404_v4 }
 0x59c   : > { %8143 = vmatmul.mubr.msk.bf16.gmra.mrb[4].mxu1 %vm388_vm1, %v6405_v32  ;;  %v10956_v32 = vld [vmem:[#allocation4_spill] sm:$0xff] }
 0x59d   : > { %8146 = vmatprep.mubr.msk.bf16.mxu1 %vm388_vm1, %v6406_v56  ;;  %v8182_v56 = vadd.f32 %v10780_v30, %v10956_v32 }
 0x5a4   : > { %8147 = vmatmul.mubr.msk.bf16.gmra.mrb[8].mxu1 %vm388_vm1, %v6407_v61 }
 0x5a5   : > { %8150 = vmatprep.mubr.msk.bf16.mxu1 %vm388_vm1, %v6408_v63 }
 0x5ac   : > { %8151 = vmatmul.mubr.msk.bf16.gmra.mrb[12].mxu1 %vm388_vm1, %v6409_v49 }
 0x647   : > { %v8124_v60 = vpop.f32.mrb[16].mxu1 }
 0x648   : > { %v8157_v29 = vadd.f32 %v8156_v17, %v8124_v60  ;;  %v6496_v21 = vpop.f32.mrb[17].mxu1 }
 0x649   : > { %v8159_v16 = vadd.f32 %v8158_v43, %v6496_v21  ;;  %v8125_v19 = vpop.f32.mrb[18].mxu1 }
 0x64a   : > { %v6664_v3 = vadd.f32 %v8157_v29, %v10789_v24  ;;  %v8161_v54 = vadd.f32 %v8160_v44, %v8125_v19  ;;  %v6499_v27 = vpop.f32.mrb[19].mxu1 }
 0x64b   : > { %v6662_v50 = vadd.f32 %v8159_v16, %v10789_v24  ;;  %v8163_v23 = vadd.f32 %v8162_v34, %v6499_v27 }
 0x64c   : > { %6696 = vst.msk [vmem:[%s10800_s13 + $0x10] sm:$0xff] %vm434_vm6, %v6664_v3  ;;  %v6665_v58 = vadd.f32 %v8161_v54, %v10789_v24 }
 0x64d   : > { %6694 = vst.msk [vmem:[%s10800_s13] sm:$0xff] %vm434_vm6, %v6662_v50  ;;  %v6663_v57 = vadd.f32 %v8163_v23, %v10789_v24 }
 0x64e   : > { %6697 = vst.msk [vmem:[%s10800_s13 + $0x18] sm:$0xff] %vm434_vm6, %v6665_v58 }
 0x64f   : > { %6695 = vst.msk [vmem:[%s10800_s13 + $0x8] sm:$0xff] %vm434_vm6, %v6663_v57  ;;  %v8128_v10 = vpop.f32.mrb[20].mxu1 }
 0x650   : > { %v8165_v45 = vadd.f32 %v8164_v28, %v8128_v10  ;;  %v6512_v42 = vpop.f32.mrb[21].mxu1 }
 0x651   : > { %v8167_v31 = vadd.f32 %v8166_v11, %v6512_v42  ;;  %v8129_v26 = vpop.f32.mrb[22].mxu1 }
 0x652   : > { %v6668_v36 = vadd.f32 %v8165_v45, %v10789_v24  ;;  %v8169_v47 = vadd.f32 %v8168_v52, %v8129_v26  ;;  %v6515_v39 = vpop.f32.mrb[23].mxu1 }
 0x653   : > { %v6666_v51 = vadd.f32 %v8167_v31, %v10789_v24  ;;  %v8171_v22 = vadd.f32 %v8170_v46, %v6515_v39 }
 0x654   : > { %6700 = vst.msk [vmem:[%s10800_s13 + $0x30] sm:$0xff] %vm434_vm6, %v6668_v36  ;;  %v6669_v15 = vadd.f32 %v8169_v47, %v10789_v24 }
 0x655   : > { %6698 = vst.msk [vmem:[%s10800_s13 + $0x20] sm:$0xff] %vm434_vm6, %v6666_v51  ;;  %v6667_v12 = vadd.f32 %v8171_v22, %v10789_v24 }
 0x656   : > { %6701 = vst.msk [vmem:[%s10800_s13 + $0x38] sm:$0xff] %vm434_vm6, %v6669_v15 }
 0x657   : > { %6699 = vst.msk [vmem:[%s10800_s13 + $0x28] sm:$0xff] %vm434_vm6, %v6667_v12  ;;  %v8132_v20 = vpop.f32.mrb[24].mxu1 }
 0x658   : > { %v8173_v2 = vadd.f32 %v8172_v14, %v8132_v20  ;;  %v6528_v18 = vpop.f32.mrb[25].mxu1 }
 0x659   : > { %v8175_v5 = vadd.f32 %v8174_v37, %v6528_v18  ;;  %v8133_v35 = vpop.f32.mrb[26].mxu1 }
 0x65a   : > { %v6672_v4 = vadd.f32 %v8173_v2, %v10789_v24  ;;  %v8177_v33 = vadd.f32 %v8176_v38, %v8133_v35  ;;  %v6531_v55 = vpop.f32.mrb[27].mxu1 }
 0x65b   : > { %v6670_v40 = vadd.f32 %v8175_v5, %v10789_v24  ;;  %v8179_v13 = vadd.f32 %v8178_v0, %v6531_v55 }
 0x65c   : > { %6704 = vst.msk [vmem:[%s10800_s13 + $0x50] sm:$0xff] %vm434_vm6, %v6672_v4  ;;  %v6673_v7 = vadd.f32 %v8177_v33, %v10789_v24 }
 0x65d   : > { %6702 = vst.msk [vmem:[%s10800_s13 + $0x40] sm:$0xff] %vm434_vm6, %v6670_v40  ;;  %v6671_v25 = vadd.f32 %v8179_v13, %v10789_v24 }
 0x65e   : > { %6705 = vst.msk [vmem:[%s10800_s13 + $0x58] sm:$0xff] %vm434_vm6, %v6673_v7 }
 0x65f   : > { %6703 = vst.msk [vmem:[%s10800_s13 + $0x48] sm:$0xff] %vm434_vm6, %v6671_v25  ;;  %v8136_v8 = vpop.f32.mrb[28].mxu1 }
 0x660   : > { %v8181_v1 = vadd.f32 %v8180_v9, %v8136_v8  ;;  %v6544_v61 = vpop.f32.mrb[29].mxu1 }
 0x661   : > { %v8183_v63 = vadd.f32 %v8182_v56, %v6544_v61  ;;  %v8137_v59 = vpop.f32.mrb[30].mxu1 }
 0x662   : > { %v6676_v41 = vadd.f32 %v8181_v1, %v10789_v24  ;;  %v8185_v49 = vadd.f32 %v8184_v48, %v8137_v59  ;;  %v6547_v17 = vpop.f32.mrb[31].mxu1 }
 0x663   : > { %v6674_v43 = vadd.f32 %v8183_v63, %v10789_v24  ;;  %v8187_v60 = vadd.f32 %v8186_v53, %v6547_v17 }
 0x664   : > { %6708 = vst.msk [vmem:[%s10800_s13 + $0x70] sm:$0xff] %vm434_vm6, %v6676_v41  ;;  %v6677_v44 = vadd.f32 %v8185_v49, %v10789_v24 }
 0x665   : > { %6706 = vst.msk [vmem:[%s10800_s13 + $0x60] sm:$0xff] %vm434_vm6, %v6674_v43  ;;  %v6675_v29 = vadd.f32 %v8187_v60, %v10789_v24 }
 0x666   : > { %6709 = vst.msk [vmem:[%s10800_s13 + $0x78] sm:$0xff] %vm434_vm6, %v6677_v44 }
 0x667   : > { %6707 = vst.msk [vmem:[%s10800_s13 + $0x68] sm:$0xff] %vm434_vm6, %v6675_v29  ;;  %v8140_v62 = vpop.f32.mrb[0].mxu1 }
 0x668   : > { %v8188_v21 = vadd.f32 %v8140_v62, %v10780_v30  ;;  %v6560_v34 = vpop.f32.mrb[1].mxu1 }
 0x669   : > { %v8189_v16 = vadd.f32 %v10780_v30, %v6560_v34  ;;  %v8141_v19 = vpop.f32.mrb[2].mxu1 }
 0x66a   : > { %v6680_v3 = vadd.f32 %v8188_v21, %v10789_v24  ;;  %v8190_v54 = vadd.f32 %v8141_v19, %v10780_v30  ;;  %v6563_v27 = vpop.f32.mrb[3].mxu1 }
 0x66b   : > { %v6678_v50 = vadd.f32 %v8189_v16, %v10789_v24  ;;  %v8191_v23 = vadd.f32 %v10780_v30, %v6563_v27 }
 0x66c   : > { %6712 = vst.msk [vmem:[%s10800_s13 + $0x90] sm:$0xff] %vm434_vm6, %v6680_v3  ;;  %v6681_v58 = vadd.f32 %v8190_v54, %v10789_v24 }
 0x66d   : > { %6710 = vst.msk [vmem:[%s10800_s13 + $0x80] sm:$0xff] %vm434_vm6, %v6678_v50  ;;  %v6679_v57 = vadd.f32 %v8191_v23, %v10789_v24 }
 0x66e   : > { %6713 = vst.msk [vmem:[%s10800_s13 + $0x98] sm:$0xff] %vm434_vm6, %v6681_v58 }
 0x66f   : > { %6711 = vst.msk [vmem:[%s10800_s13 + $0x88] sm:$0xff] %vm434_vm6, %v6679_v57  ;;  %v8144_v28 = vpop.f32.mrb[4].mxu1 }
 0x670   : > { %v8192_v11 = vadd.f32 %v8144_v28, %v10780_v30  ;;  %v6576_v10 = vpop.f32.mrb[5].mxu1 }
 0x671   : > { %v8193_v52 = vadd.f32 %v10780_v30, %v6576_v10  ;;  %v8145_v45 = vpop.f32.mrb[6].mxu1 }
 0x672   : > { %v6684_v42 = vadd.f32 %v8192_v11, %v10789_v24  ;;  %v8194_v46 = vadd.f32 %v8145_v45, %v10780_v30  ;;  %v6579_v31 = vpop.f32.mrb[7].mxu1 }
 0x673   : > { %v6682_v26 = vadd.f32 %v8193_v52, %v10789_v24  ;;  %v8195_v36 = vadd.f32 %v10780_v30, %v6579_v31 }
 0x674   : > { %6716 = vst.msk [vmem:[%s10800_s13 + $0xb0] sm:$0xff] %vm434_vm6, %v6684_v42  ;;  %v6685_v47 = vadd.f32 %v8194_v46, %v10789_v24 }
 0x675   : > { %6714 = vst.msk [vmem:[%s10800_s13 + $0xa0] sm:$0xff] %vm434_vm6, %v6682_v26  ;;  %v6683_v39 = vadd.f32 %v8195_v36, %v10789_v24 }
 0x676   : > { %6717 = vst.msk [vmem:[%s10800_s13 + $0xb8] sm:$0xff] %vm434_vm6, %v6685_v47 }
 0x677   : > { %6715 = vst.msk [vmem:[%s10800_s13 + $0xa8] sm:$0xff] %vm434_vm6, %v6683_v39  ;;  %v8148_v51 = vpop.f32.mrb[8].mxu1 }
 0x678   : > { %v8196_v22 = vadd.f32 %v8148_v51, %v10780_v30  ;;  %v6592_v15 = vpop.f32.mrb[9].mxu1 }
 0x679   : > { %v8197_v12 = vadd.f32 %v10780_v30, %v6592_v15  ;;  %v8149_v14 = vpop.f32.mrb[10].mxu1 }
 0x67a   : > { %v6688_v37 = vadd.f32 %v8196_v22, %v10789_v24  ;;  %v8198_v20 = vadd.f32 %v8149_v14, %v10780_v30  ;;  %v6595_v38 = vpop.f32.mrb[11].mxu1 }
 0x67b   : > { %v6686_v2 = vadd.f32 %v8197_v12, %v10789_v24  ;;  %v8199_v18 = vadd.f32 %v10780_v30, %v6595_v38 }
 0x67c   : > { %6720 = vst.msk [vmem:[%s10800_s13 + $0xd0] sm:$0xff] %vm434_vm6, %v6688_v37  ;;  %v6689_v0 = vadd.f32 %v8198_v20, %v10789_v24 }
 0x67d   : > { %6718 = vst.msk [vmem:[%s10800_s13 + $0xc0] sm:$0xff] %vm434_vm6, %v6686_v2  ;;  %v6687_v5 = vadd.f32 %v8199_v18, %v10789_v24 }
 0x67e   : > { %6721 = vst.msk [vmem:[%s10800_s13 + $0xd8] sm:$0xff] %vm434_vm6, %v6689_v0 }
 0x67f   : > { %6719 = vst.msk [vmem:[%s10800_s13 + $0xc8] sm:$0xff] %vm434_vm6, %v6687_v5  ;;  %v8152_v35 = vpop.f32.mrb[12].mxu1 }
 0x680   : > { %v8200_v4 = vadd.f32 %v8152_v35, %v10780_v30  ;;  %v6608_v33 = vpop.f32.mrb[13].mxu1 }
 0x681   : > { %v8201_v55 = vadd.f32 %v10780_v30, %v6608_v33  ;;  %v8153_v40 = vpop.f32.mrb[14].mxu1 }
 0x682   : > { %v6692_v13 = vadd.f32 %v8200_v4, %v10789_v24  ;;  %v8202_v7 = vadd.f32 %v8153_v40, %v10780_v30  ;;  %v6611_v25 = vpop.f32.mrb[15].mxu1 }
 0x683   : > { %v6690_v9 = vadd.f32 %v8201_v55, %v10789_v24  ;;  %v8203_v32 = vadd.f32 %v10780_v30, %v6611_v25 }
 0x684   : > { %6724 = vst.msk [vmem:[%s10800_s13 + $0xf0] sm:$0xff] %vm434_vm6, %v6692_v13  ;;  %v6693_v56 = vadd.f32 %v8202_v7, %v10789_v24 }
 0x685   : > { %6722 = vst.msk [vmem:[%s10800_s13 + $0xe0] sm:$0xff] %vm434_vm6, %v6690_v9  ;;  %v6691_v8 = vadd.f32 %v8203_v32, %v10789_v24 }
 0x686   : > { %6725 = vst.msk [vmem:[%s10800_s13 + $0xf8] sm:$0xff] %vm434_vm6, %v6693_v56 }
 0x687   : > { %6723 = vst.msk [vmem:[%s10800_s13 + $0xe8] sm:$0xff] %vm434_vm6, %v6691_v8 }
 0x688 PF: > { %s21_s17 = sadd.s32 1, %s8895_s17  }
 0x689   : > { %p18_p4 = scmp.ge.s32.totalorder %s21_s17, 4  }
 0x68b   :  { %20 = sbr.rel (!%p18_p4) target bundleno = 1 (0x1), region = 116 }

</bundles_post_ra>
